<compile_context>
chip_gen: v7x
topology: tpu7x:2x2x1
jax: 0.10.0
libtpu: 0.0.40
codegen_flags: <defaults>
</compile_context>

<pallas_src>
import math
import numpy as np

import jax
import jax.numpy as jnp
from jax.experimental import pallas as pl
from jax.experimental.pallas import tpu as pltpu

# ---- config (BasicBlock index=0, scaled-down dims) ----
EMBED_DIM   = 32                      # dim = embed_dim * 2**0
WINDOW_SIZE = 4
NUM_HEADS   = 4                       # head dim = 8
HEAD_DIM    = EMBED_DIM // NUM_HEADS
SCALE       = HEAD_DIM ** (-0.5)
MLP_RATIO   = 4.0
HIDDEN_DIM  = int(EMBED_DIM * MLP_RATIO)
DEPTH       = 2                       # depths[0]; block 0 unshifted, block 1 shifted
EPS         = 1e-5                    # nn.LayerNorm default
NEG_INF     = -1e9                    # cross-window suppression (exp -> exactly 0 in f32)

# Flip to jnp.bfloat16 on v6e/v7x for MXU-bound (large-dim) deployments; accumulation is
# always f32 and all elementwise/transcendental math stays f32.
MXU_IN_DTYPE = jnp.float32


def _mxu(x):
    return x.astype(MXU_IN_DTYPE)


# ---------------------------------------------------------------------------
# in-kernel helpers
# ---------------------------------------------------------------------------
def _layernorm(x, g, b):
    mu = jnp.mean(x, axis=-1, keepdims=True)
    d = x - mu
    var = jnp.mean(d * d, axis=-1, keepdims=True)
    return d * jax.lax.rsqrt(var + EPS) * g + b


# ---------------------------------------------------------------------------
# the fused Pallas kernel: 2 x SwinTransformerBlock + PatchMerging per image
# ---------------------------------------------------------------------------
def basic_block_kernel(x_ref, bias_ref, g1_ref, b1_ref, wqkv_ref, bqkv_ref,
                       wproj_ref, bproj_ref, g2_ref, b2_ref,
                       w1_ref, bb1_ref, w2_ref, bb2_ref,
                       sel_ref, emb_ref, gm_ref, bm_ref, wm_ref, o_ref):
    x = x_ref[0]                                             # (N, C) tokens of image b
    n_tok = x.shape[0]

    for d in range(DEPTH):                                   # unrolled: block0 (W), block1 (SW)
        # ---- norm1 + (S)W-MSA (dense attention with precomputed additive bias) ----
        xn = _layernorm(x, g1_ref[d], b1_ref[d])
        qkv = jnp.dot(_mxu(xn), wqkv_ref[d],
                      preferred_element_type=jnp.float32) + bqkv_ref[d]      # (N, 3C)

        y = jnp.zeros((n_tok, EMBED_DIM), jnp.float32)
        for h in range(NUM_HEADS):                           # unrolled heads
            q = qkv[:, h * HEAD_DIM:(h + 1) * HEAD_DIM]
            k = qkv[:, EMBED_DIM + h * HEAD_DIM: EMBED_DIM + (h + 1) * HEAD_DIM]
            v = qkv[:, 2 * EMBED_DIM + h * HEAD_DIM: 2 * EMBED_DIM + (h + 1) * HEAD_DIM]
            # scores over all tokens, contracting last dims (no explicit k.T)
            s = jax.lax.dot_general(_mxu(q), _mxu(k), (((1,), (1,)), ((), ())),
                                    preferred_element_type=jnp.float32)      # (N, N)
            a = s * SCALE + bias_ref[d, h]   # rel-pos bias + shift mask + cross-window -1e9
            a = a - jnp.max(a, axis=-1, keepdims=True)
            p = jnp.exp(a)
            p = p / jnp.sum(p, axis=-1, keepdims=True)
            o_h = jnp.dot(_mxu(p), _mxu(v), preferred_element_type=jnp.float32)  # (N, D)
            # fold the output projection per head (no lane concat of heads)
            wproj_d = wproj_ref[d]
            y = y + jnp.dot(_mxu(o_h), _mxu(wproj_d[h * HEAD_DIM:(h + 1) * HEAD_DIM, :]),
                            preferred_element_type=jnp.float32)                  # (N, C)

        x = x + y + bproj_ref[d]                             # residual 1

        # ---- norm2 + MLP ----
        xn2 = _layernorm(x, g2_ref[d], b2_ref[d])
        hdn = jnp.dot(_mxu(xn2), w1_ref[d],
                      preferred_element_type=jnp.float32) + bb1_ref[d]
        hdn = 0.5 * hdn * (1.0 + jax.lax.erf(hdn * (1.0 / math.sqrt(2.0))))  # exact GELU
        x = x + jnp.dot(_mxu(hdn), w2_ref[d],
                        preferred_element_type=jnp.float32) + bb2_ref[d]     # residual 2

    # ---- PatchMerging: 2x2 gather via static one-hot matmuls, LN(4C), Linear(4C->2C) ----
    no = sel_ref.shape[1]
    xm = jnp.zeros((no, 4 * EMBED_DIM), jnp.float32)
    for g in range(4):                                       # x0/x1/x2/x3 channel groups
        grp = jnp.dot(sel_ref[g], _mxu(x), preferred_element_type=jnp.float32)   # (No, C)
        xm = xm + jnp.dot(_mxu(grp), emb_ref[g], preferred_element_type=jnp.float32)
    xm = _layernorm(xm, gm_ref[...], bm_ref[...])
    o_ref[0] = jnp.dot(_mxu(xm), wm_ref[...],
                       preferred_element_type=jnp.float32).astype(o_ref.dtype)


# ---------------------------------------------------------------------------
# pallas_call wrapper
# ---------------------------------------------------------------------------
def basic_block_call(x_tok, p):
    B, N, C = x_tok.shape
    D, NH = p['attn_bias'].shape[:2]
    Hd = p['w1'].shape[2]
    No = p['sel'].shape[1]
    C4, C2 = p['wm'].shape

    def const(shape):
        zeros = (0,) * len(shape)
        return pl.BlockSpec(shape, lambda b: zeros)          # VMEM-resident constants

    in_specs = [
        pl.BlockSpec((1, N, C), lambda b: (b, 0, 0)),        # tokens of image b
        const((D, NH, N, N)),                                # combined attn bias (per block/head)
        const((D, 1, C)), const((D, 1, C)),                  # norm1 gamma / beta
        const((D, C, 3 * C)), const((D, 1, 3 * C)),          # Wqkv / bqkv
        const((D, C, C)), const((D, 1, C)),                  # Wproj / bproj
        const((D, 1, C)), const((D, 1, C)),                  # norm2 gamma / beta
        const((D, C, Hd)), const((D, 1, Hd)),                # fc1 W / b
        const((D, Hd, C)), const((D, 1, C)),                 # fc2 W / b
        const((4, No, N)),                                   # merge token-selection matrices
        const((4, C, C4)),                                   # merge channel-placement matrices
        const((1, C4)), const((1, C4)),                      # merge norm gamma / beta
        const((C4, C2)),                                     # merge reduction W (no bias)
    ]
    return pl.pallas_call(
        basic_block_kernel,
        out_shape=jax.ShapeDtypeStruct((B, No, C2), x_tok.dtype),
        grid_spec=pltpu.PrefetchScalarGridSpec(
            num_scalar_prefetch=0,
            grid=(B,),
            in_specs=in_specs,
            out_specs=pl.BlockSpec((1, No, C2), lambda b: (b, 0, 0)),
        ),
        compiler_params=pltpu.CompilerParams(dimension_semantics=("parallel",)),
    )(x_tok,
      p['attn_bias'],
      p['g1'], p['b1'],
      p['wqkv'].astype(MXU_IN_DTYPE), p['bqkv'],
      p['wproj'].astype(MXU_IN_DTYPE), p['bproj'],
      p['g2'], p['b2'],
      p['w1'].astype(MXU_IN_DTYPE), p['bb1'],
      p['w2'].astype(MXU_IN_DTYPE), p['bb2'],
      p['sel'].astype(MXU_IN_DTYPE), p['emb'].astype(MXU_IN_DTYPE),
      p['gm'], p['bm'],
      p['wm'].astype(MXU_IN_DTYPE))


# ---------------------------------------------------------------------------
# static (numpy) construction of dense attention bias + merge matrices -- hoisted to init
# ---------------------------------------------------------------------------
def build_rel_index(ws):
    coords = np.stack(np.meshgrid(np.arange(ws), np.arange(ws), indexing='ij'))
    cf = coords.reshape(2, -1)
    rel = cf[:, :, None] - cf[:, None, :]
    rel = rel.transpose(1, 2, 0).copy()
    rel[:, :, 0] += ws - 1
    rel[:, :, 1] += ws - 1
    rel[:, :, 0] *= 2 * ws - 1
    return rel.sum(-1)                                       # (L, L) int


REL_INDEX = build_rel_index(WINDOW_SIZE)


def _dense_attn_layout(H, W, ws, shift):
    """For each token pair: same (shifted) window? rel-pos table index? shift-mask value?
    All static; identical semantics to roll + window_partition + create_mask."""
    hh, ww = np.meshgrid(np.arange(H), np.arange(W), indexing='ij')
    hh = hh.reshape(-1)
    ww = ww.reshape(-1)
    a = (hh - shift) % H                                     # rolled coordinates
    b = (ww - shift) % W
    win = (a // ws) * (W // ws) + (b // ws)                  # (shifted-)window id per token
    i = (a % ws) * ws + (b % ws)                             # index inside its window
    same_win = (win[:, None] == win[None, :])
    rel_idx = REL_INDEX[i[:, None], i[None, :]].astype(np.int32)
    if shift > 0:
        def region(c, size):
            r = np.zeros_like(c)
            r = np.where(c >= size - ws, 1, r)
            r = np.where(c >= size - shift, 2, r)
            return r
        grp = region(a, H) * 3 + region(b, W)
        shift_mask = np.where(grp[:, None] == grp[None, :],
                              np.float32(0.0), np.float32(-100.0))
    else:
        shift_mask = np.zeros((H * W, H * W), np.float32)
    return same_win, rel_idx, shift_mask


def build_attn_bias(table, H, W, ws, shift):
    same_win, rel_idx, shift_mask = _dense_attn_layout(H, W, ws, shift)
    rel = table[jnp.asarray(rel_idx)]                        # (N, N, NH)
    rel = jnp.transpose(rel, (2, 0, 1))                      # (NH, N, N)
    bias = rel + jnp.asarray(shift_mask)[None]
    return jnp.where(jnp.asarray(same_win)[None], bias, jnp.float32(NEG_INF))


def build_merge_matrices(H, W, C):
    """PatchMerging 2x2 gather as one-hot matmuls.
    sel[g]  (No, N): picks source token for group g (zero row == zero-padded pixel).
    emb[g]  (C, 4C): places a group's C channels into lanes [g*C, (g+1)*C)."""
    Hp, Wp = H + H % 2, W + W % 2
    Ho, Wo = Hp // 2, Wp // 2
    No, N = Ho * Wo, H * W
    offsets = [(0, 0), (1, 0), (0, 1), (1, 1)]               # x0, x1, x2, x3 (torch order)
    sel = np.zeros((4, No, N), np.float32)
    for g, (dh, dw) in enumerate(offsets):
        for i in range(Ho):
            for j in range(Wo):
                hs, wsrc = 2 * i + dh, 2 * j + dw
                if hs < H and wsrc < W:
                    sel[g, i * Wo + j, hs * W + wsrc] = 1.0
    emb = np.zeros((4, C, 4 * C), np.float32)
    for g in range(4):
        emb[g, np.arange(C), g * C + np.arange(C)] = 1.0
    return jnp.asarray(sel), jnp.asarray(emb)


# ---------------------------------------------------------------------------
# params & forward
# ---------------------------------------------------------------------------
def init_params(key, H, W):
    keys = jax.random.split(key, 5 * DEPTH + 1)

    def nrm(k, shape):
        return jax.random.normal(k, shape, jnp.float32) * 0.02

    blocks = []
    ki = 0
    for d in range(DEPTH):
        shift = 0 if d % 2 == 0 else WINDOW_SIZE // 2
        table = nrm(keys[ki + 2], ((2 * WINDOW_SIZE - 1) ** 2, NUM_HEADS))
        blk = dict(
            g1=jnp.ones((1, EMBED_DIM), jnp.float32),
            b1=jnp.zeros((1, EMBED_DIM), jnp.float32),
            wqkv=nrm(keys[ki + 0], (EMBED_DIM, 3 * EMBED_DIM)),      # stored (in, out)
            bqkv=jnp.zeros((1, 3 * EMBED_DIM), jnp.float32),
            wproj=nrm(keys[ki + 1], (EMBED_DIM, EMBED_DIM)),
            bproj=jnp.zeros((1, EMBED_DIM), jnp.float32),
            g2=jnp.ones((1, EMBED_DIM), jnp.float32),
            b2=jnp.zeros((1, EMBED_DIM), jnp.float32),
            w1=nrm(keys[ki + 3], (EMBED_DIM, HIDDEN_DIM)),
            bb1=jnp.zeros((1, HIDDEN_DIM), jnp.float32),
            w2=nrm(keys[ki + 4], (HIDDEN_DIM, EMBED_DIM)),
            bb2=jnp.zeros((1, EMBED_DIM), jnp.float32),
            # hoisted: rel-pos gather + shift mask + cross-window suppression (static)
            attn_bias=build_attn_bias(table, H, W, WINDOW_SIZE, shift),
        )
        ki += 5
        blocks.append(blk)

    # stack per-block params along a leading DEPTH axis (kept VMEM-resident in the kernel)
    params = {k: jnp.stack([b[k] for b in blocks]) for k in blocks[0]}

    sel, emb = build_merge_matrices(H, W, EMBED_DIM)
    params.update(dict(
        sel=sel, emb=emb,
        gm=jnp.ones((1, 4 * EMBED_DIM), jnp.float32),
        bm=jnp.zeros((1, 4 * EMBED_DIM), jnp.float32),
        wm=nrm(keys[ki], (4 * EMBED_DIM, 2 * EMBED_DIM)),            # bias-free reduction
    ))
    return params


def basic_block_forward(x, params):
    B, H, W, C = x.shape
    # tokens stay in plain row-major order for the whole stage: no window partition,
    # no roll, no window reverse -- the per-block dense attn_bias encodes the windows,
    # and the 2x2 merge gather is folded into the kernel via static selection matmuls.
    x_tok = x.reshape(B, H * W, C)
    out = basic_block_call(x_tok, params)                    # (B, Ho*Wo, 2C)
    Ho, Wo = (H + H % 2) // 2, (W + W % 2) // 2
    return out.reshape(B, Ho, Wo, 2 * C)


if __name__ == "__main__":
    key = jax.random.PRNGKey(0)
    kx, kp = jax.random.split(key)
    B, H, W = 2, 8, 8
    x = jax.random.normal(kx, (B, H, W, EMBED_DIM), jnp.float32)     # (B, H, W, C)
    params = init_params(kp, H, W)

    fwd = jax.jit(basic_block_forward)
    out = jax.block_until_ready(fwd(x, params))

    assert out.shape == (B, H // 2, W // 2, 2 * EMBED_DIM), out.shape
    assert bool(jnp.all(jnp.isfinite(out)))
    print("KERNEL_OK")
</pallas_src>

<mosaic_0001>
module attributes {stable_mosaic.version = 11 : i64} {
  func.func @basic_block_kernel(%arg0: i32, %arg1: memref<1x64x32xf32, #tpu.memory_space<vmem>>, %arg2: memref<2x4x64x64xf32, #tpu.memory_space<vmem>>, %arg3: memref<2x1x32xf32, #tpu.memory_space<vmem>>, %arg4: memref<2x1x32xf32, #tpu.memory_space<vmem>>, %arg5: memref<2x32x96xf32, #tpu.memory_space<vmem>>, %arg6: memref<2x1x96xf32, #tpu.memory_space<vmem>>, %arg7: memref<2x32x32xf32, #tpu.memory_space<vmem>>, %arg8: memref<2x1x32xf32, #tpu.memory_space<vmem>>, %arg9: memref<2x1x32xf32, #tpu.memory_space<vmem>>, %arg10: memref<2x1x32xf32, #tpu.memory_space<vmem>>, %arg11: memref<2x32x128xf32, #tpu.memory_space<vmem>>, %arg12: memref<2x1x128xf32, #tpu.memory_space<vmem>>, %arg13: memref<2x128x32xf32, #tpu.memory_space<vmem>>, %arg14: memref<2x1x32xf32, #tpu.memory_space<vmem>>, %arg15: memref<4x16x64xf32, #tpu.memory_space<vmem>>, %arg16: memref<4x32x128xf32, #tpu.memory_space<vmem>>, %arg17: memref<1x128xf32, #tpu.memory_space<vmem>>, %arg18: memref<1x128xf32, #tpu.memory_space<vmem>>, %arg19: memref<128x64xf32, #tpu.memory_space<vmem>>, %arg20: memref<1x16x64xf32, #tpu.memory_space<vmem>>) attributes {dimension_semantics = [#tpu.dimension_semantics<parallel>], iteration_bounds = array<i64: 2>, scalar_prefetch = 0 : i64, scratch_operands = 0 : i64, tpu.core_type = #tpu.core_type<tc>, window_params = [{transform_indices = @transform_0, window_bounds = array<i64: 1, 64, 32>}, {pipeline_mode = #tpu.pipeline_mode<synchronous>, transform_indices = @transform_1, window_bounds = array<i64: 2, 4, 64, 64>}, {pipeline_mode = #tpu.pipeline_mode<synchronous>, transform_indices = @transform_2, window_bounds = array<i64: 2, 1, 32>}, {pipeline_mode = #tpu.pipeline_mode<synchronous>, transform_indices = @transform_3, window_bounds = array<i64: 2, 1, 32>}, {pipeline_mode = #tpu.pipeline_mode<synchronous>, transform_indices = @transform_4, window_bounds = array<i64: 2, 32, 96>}, {pipeline_mode = #tpu.pipeline_mode<synchronous>, transform_indices = @transform_5, window_bounds = array<i64: 2, 1, 96>}, {pipeline_mode = #tpu.pipeline_mode<synchronous>, transform_indices = @transform_6, window_bounds = array<i64: 2, 32, 32>}, {pipeline_mode = #tpu.pipeline_mode<synchronous>, transform_indices = @transform_7, window_bounds = array<i64: 2, 1, 32>}, {pipeline_mode = #tpu.pipeline_mode<synchronous>, transform_indices = @transform_8, window_bounds = array<i64: 2, 1, 32>}, {pipeline_mode = #tpu.pipeline_mode<synchronous>, transform_indices = @transform_9, window_bounds = array<i64: 2, 1, 32>}, {pipeline_mode = #tpu.pipeline_mode<synchronous>, transform_indices = @transform_10, window_bounds = array<i64: 2, 32, 128>}, {pipeline_mode = #tpu.pipeline_mode<synchronous>, transform_indices = @transform_11, window_bounds = array<i64: 2, 1, 128>}, {pipeline_mode = #tpu.pipeline_mode<synchronous>, transform_indices = @transform_12, window_bounds = array<i64: 2, 128, 32>}, {pipeline_mode = #tpu.pipeline_mode<synchronous>, transform_indices = @transform_13, window_bounds = array<i64: 2, 1, 32>}, {pipeline_mode = #tpu.pipeline_mode<synchronous>, transform_indices = @transform_14, window_bounds = array<i64: 4, 16, 64>}, {pipeline_mode = #tpu.pipeline_mode<synchronous>, transform_indices = @transform_15, window_bounds = array<i64: 4, 32, 128>}, {pipeline_mode = #tpu.pipeline_mode<synchronous>, transform_indices = @transform_16, window_bounds = array<i64: 1, 128>}, {pipeline_mode = #tpu.pipeline_mode<synchronous>, transform_indices = @transform_17, window_bounds = array<i64: 1, 128>}, {pipeline_mode = #tpu.pipeline_mode<synchronous>, transform_indices = @transform_18, window_bounds = array<i64: 128, 64>}, {transform_indices = @transform_19, window_bounds = array<i64: 1, 16, 64>}]} {
    %c0 = arith.constant 0 : index
    %c0_0 = arith.constant 0 : index
    %c0_1 = arith.constant 0 : index
    %0 = vector.load %arg1[%c0, %c0_0, %c0_1] : memref<1x64x32xf32, #tpu.memory_space<vmem>>, vector<1x64x32xf32>
    %1 = vector.shape_cast %0 : vector<1x64x32xf32> to vector<64x32xf32>
    %c0_2 = arith.constant 0 : index
    %c0_3 = arith.constant 0 : index
    %c0_4 = arith.constant 0 : index
    %2 = vector.load %arg3[%c0_2, %c0_3, %c0_4] : memref<2x1x32xf32, #tpu.memory_space<vmem>>, vector<1x1x32xf32>
    %3 = vector.shape_cast %2 : vector<1x1x32xf32> to vector<1x32xf32>
    %c0_5 = arith.constant 0 : index
    %c0_6 = arith.constant 0 : index
    %c0_7 = arith.constant 0 : index
    %4 = vector.load %arg4[%c0_5, %c0_6, %c0_7] : memref<2x1x32xf32, #tpu.memory_space<vmem>>, vector<1x1x32xf32>
    %5 = vector.shape_cast %4 : vector<1x1x32xf32> to vector<1x32xf32>
    %cst = arith.constant dense<0.000000e+00> : vector<64xf32>
    %6 = vector.multi_reduction <add>, %1, %cst [1] : vector<64x32xf32> to vector<64xf32>
    %7 = vector.shape_cast %6 : vector<64xf32> to vector<64x1xf32>
    %cst_8 = arith.constant 3.200000e+01 : f32
    %8 = vector.broadcast %cst_8 : f32 to vector<64x1xf32>
    %9 = arith.divf %7, %8 : vector<64x1xf32>
    %10 = vector.broadcast %9 : vector<64x1xf32> to vector<64x32xf32>
    %11 = arith.subf %1, %10 : vector<64x32xf32>
    %12 = arith.mulf %11, %11 : vector<64x32xf32>
    %cst_9 = arith.constant dense<0.000000e+00> : vector<64xf32>
    %13 = vector.multi_reduction <add>, %12, %cst_9 [1] : vector<64x32xf32> to vector<64xf32>
    %14 = vector.shape_cast %13 : vector<64xf32> to vector<64x1xf32>
    %cst_10 = arith.constant 3.200000e+01 : f32
    %15 = vector.broadcast %cst_10 : f32 to vector<64x1xf32>
    %16 = arith.divf %14, %15 : vector<64x1xf32>
    %cst_11 = arith.constant 9.99999974E-6 : f32
    %17 = vector.broadcast %cst_11 : f32 to vector<64x1xf32>
    %18 = arith.addf %16, %17 : vector<64x1xf32>
    %19 = math.rsqrt %18 : vector<64x1xf32>
    %20 = vector.broadcast %19 : vector<64x1xf32> to vector<64x32xf32>
    %21 = arith.mulf %11, %20 : vector<64x32xf32>
    %22 = vector.broadcast %3 : vector<1x32xf32> to vector<64x32xf32>
    %23 = arith.mulf %21, %22 : vector<64x32xf32>
    %24 = vector.broadcast %5 : vector<1x32xf32> to vector<64x32xf32>
    %25 = arith.addf %23, %24 : vector<64x32xf32>
    %c0_12 = arith.constant 0 : index
    %c0_13 = arith.constant 0 : index
    %c0_14 = arith.constant 0 : index
    %26 = vector.load %arg5[%c0_12, %c0_13, %c0_14] : memref<2x32x96xf32, #tpu.memory_space<vmem>>, vector<1x32x96xf32>
    %27 = vector.shape_cast %26 : vector<1x32x96xf32> to vector<32x96xf32>
    %cst_15 = arith.constant dense<0.000000e+00> : vector<64x96xf32>
    %28 = tpu.matmul %25, %27, %cst_15 {dimension_numbers = #tpu.dot_dimension_numbers<[1], [0], [0], [1], [0, 0, 1, 1], [], []>} : vector<64x32xf32>, vector<32x96xf32>, vector<64x96xf32> -> vector<64x96xf32>
    %c0_16 = arith.constant 0 : index
    %c0_17 = arith.constant 0 : index
    %c0_18 = arith.constant 0 : index
    %29 = vector.load %arg6[%c0_16, %c0_17, %c0_18] : memref<2x1x96xf32, #tpu.memory_space<vmem>>, vector<1x1x96xf32>
    %30 = vector.shape_cast %29 : vector<1x1x96xf32> to vector<1x96xf32>
    %31 = vector.broadcast %30 : vector<1x96xf32> to vector<64x96xf32>
    %32 = arith.addf %28, %31 : vector<64x96xf32>
    %cst_19 = arith.constant 0.000000e+00 : f32
    %33 = vector.broadcast %cst_19 : f32 to vector<64x32xf32>
    %34 = vector.extract_strided_slice %32 {offsets = [0, 0], sizes = [64, 8], strides = [1, 1]} : vector<64x96xf32> to vector<64x8xf32>
    %35 = vector.extract_strided_slice %32 {offsets = [0, 32], sizes = [64, 8], strides = [1, 1]} : vector<64x96xf32> to vector<64x8xf32>
    %36 = vector.extract_strided_slice %32 {offsets = [0, 64], sizes = [64, 8], strides = [1, 1]} : vector<64x96xf32> to vector<64x8xf32>
    %cst_20 = arith.constant dense<0.000000e+00> : vector<64x64xf32>
    %37 = tpu.matmul %34, %35, %cst_20 {dimension_numbers = #tpu.dot_dimension_numbers<[1], [1], [0], [0], [0, 0, 1, 0], [], []>} : vector<64x8xf32>, vector<64x8xf32>, vector<64x64xf32> -> vector<64x64xf32>
    %cst_21 = arith.constant 0.353553385 : f32
    %38 = vector.broadcast %cst_21 : f32 to vector<64x64xf32>
    %39 = arith.mulf %37, %38 : vector<64x64xf32>
    %c0_22 = arith.constant 0 : index
    %c0_23 = arith.constant 0 : index
    %c0_24 = arith.constant 0 : index
    %c0_25 = arith.constant 0 : index
    %40 = vector.load %arg2[%c0_22, %c0_23, %c0_24, %c0_25] : memref<2x4x64x64xf32, #tpu.memory_space<vmem>>, vector<1x1x64x64xf32>
    %41 = vector.shape_cast %40 : vector<1x1x64x64xf32> to vector<64x64xf32>
    %42 = arith.addf %39, %41 : vector<64x64xf32>
    %cst_26 = arith.constant dense<0xFF800000> : vector<64xf32>
    %43 = vector.multi_reduction <maximumf>, %42, %cst_26 [1] : vector<64x64xf32> to vector<64xf32>
    %44 = vector.shape_cast %43 : vector<64xf32> to vector<64x1xf32>
    %45 = vector.broadcast %44 : vector<64x1xf32> to vector<64x64xf32>
    %46 = arith.subf %42, %45 : vector<64x64xf32>
    %47 = math.exp %46 : vector<64x64xf32>
    %cst_27 = arith.constant dense<0.000000e+00> : vector<64xf32>
    %48 = vector.multi_reduction <add>, %47, %cst_27 [1] : vector<64x64xf32> to vector<64xf32>
    %49 = vector.shape_cast %48 : vector<64xf32> to vector<64x1xf32>
    %50 = vector.broadcast %49 : vector<64x1xf32> to vector<64x64xf32>
    %51 = arith.divf %47, %50 : vector<64x64xf32>
    %cst_28 = arith.constant dense<0.000000e+00> : vector<64x8xf32>
    %52 = tpu.matmul %51, %36, %cst_28 {dimension_numbers = #tpu.dot_dimension_numbers<[1], [0], [0], [1], [0, 0, 1, 1], [], []>} : vector<64x64xf32>, vector<64x8xf32>, vector<64x8xf32> -> vector<64x8xf32>
    %c0_29 = arith.constant 0 : index
    %c0_30 = arith.constant 0 : index
    %c0_31 = arith.constant 0 : index
    %53 = vector.load %arg7[%c0_29, %c0_30, %c0_31] : memref<2x32x32xf32, #tpu.memory_space<vmem>>, vector<1x32x32xf32>
    %54 = vector.shape_cast %53 : vector<1x32x32xf32> to vector<32x32xf32>
    %55 = vector.extract_strided_slice %54 {offsets = [0, 0], sizes = [8, 32], strides = [1, 1]} : vector<32x32xf32> to vector<8x32xf32>
    %cst_32 = arith.constant dense<0.000000e+00> : vector<64x32xf32>
    %56 = tpu.matmul %52, %55, %cst_32 {dimension_numbers = #tpu.dot_dimension_numbers<[1], [0], [0], [1], [0, 0, 1, 1], [], []>} : vector<64x8xf32>, vector<8x32xf32>, vector<64x32xf32> -> vector<64x32xf32>
    %57 = arith.addf %33, %56 : vector<64x32xf32>
    %58 = vector.extract_strided_slice %32 {offsets = [0, 8], sizes = [64, 8], strides = [1, 1]} : vector<64x96xf32> to vector<64x8xf32>
    %59 = vector.extract_strided_slice %32 {offsets = [0, 40], sizes = [64, 8], strides = [1, 1]} : vector<64x96xf32> to vector<64x8xf32>
    %60 = vector.extract_strided_slice %32 {offsets = [0, 72], sizes = [64, 8], strides = [1, 1]} : vector<64x96xf32> to vector<64x8xf32>
    %cst_33 = arith.constant dense<0.000000e+00> : vector<64x64xf32>
    %61 = tpu.matmul %58, %59, %cst_33 {dimension_numbers = #tpu.dot_dimension_numbers<[1], [1], [0], [0], [0, 0, 1, 0], [], []>} : vector<64x8xf32>, vector<64x8xf32>, vector<64x64xf32> -> vector<64x64xf32>
    %cst_34 = arith.constant 0.353553385 : f32
    %62 = vector.broadcast %cst_34 : f32 to vector<64x64xf32>
    %63 = arith.mulf %61, %62 : vector<64x64xf32>
    %c0_35 = arith.constant 0 : index
    %c1 = arith.constant 1 : index
    %c0_36 = arith.constant 0 : index
    %c0_37 = arith.constant 0 : index
    %64 = vector.load %arg2[%c0_35, %c1, %c0_36, %c0_37] : memref<2x4x64x64xf32, #tpu.memory_space<vmem>>, vector<1x1x64x64xf32>
    %65 = vector.shape_cast %64 : vector<1x1x64x64xf32> to vector<64x64xf32>
    %66 = arith.addf %63, %65 : vector<64x64xf32>
    %cst_38 = arith.constant dense<0xFF800000> : vector<64xf32>
    %67 = vector.multi_reduction <maximumf>, %66, %cst_38 [1] : vector<64x64xf32> to vector<64xf32>
    %68 = vector.shape_cast %67 : vector<64xf32> to vector<64x1xf32>
    %69 = vector.broadcast %68 : vector<64x1xf32> to vector<64x64xf32>
    %70 = arith.subf %66, %69 : vector<64x64xf32>
    %71 = math.exp %70 : vector<64x64xf32>
    %cst_39 = arith.constant dense<0.000000e+00> : vector<64xf32>
    %72 = vector.multi_reduction <add>, %71, %cst_39 [1] : vector<64x64xf32> to vector<64xf32>
    %73 = vector.shape_cast %72 : vector<64xf32> to vector<64x1xf32>
    %74 = vector.broadcast %73 : vector<64x1xf32> to vector<64x64xf32>
    %75 = arith.divf %71, %74 : vector<64x64xf32>
    %cst_40 = arith.constant dense<0.000000e+00> : vector<64x8xf32>
    %76 = tpu.matmul %75, %60, %cst_40 {dimension_numbers = #tpu.dot_dimension_numbers<[1], [0], [0], [1], [0, 0, 1, 1], [], []>} : vector<64x64xf32>, vector<64x8xf32>, vector<64x8xf32> -> vector<64x8xf32>
    %c0_41 = arith.constant 0 : index
    %c0_42 = arith.constant 0 : index
    %c0_43 = arith.constant 0 : index
    %77 = vector.load %arg7[%c0_41, %c0_42, %c0_43] : memref<2x32x32xf32, #tpu.memory_space<vmem>>, vector<1x32x32xf32>
    %78 = vector.shape_cast %77 : vector<1x32x32xf32> to vector<32x32xf32>
    %79 = vector.extract_strided_slice %78 {offsets = [8, 0], sizes = [8, 32], strides = [1, 1]} : vector<32x32xf32> to vector<8x32xf32>
    %cst_44 = arith.constant dense<0.000000e+00> : vector<64x32xf32>
    %80 = tpu.matmul %76, %79, %cst_44 {dimension_numbers = #tpu.dot_dimension_numbers<[1], [0], [0], [1], [0, 0, 1, 1], [], []>} : vector<64x8xf32>, vector<8x32xf32>, vector<64x32xf32> -> vector<64x32xf32>
    %81 = arith.addf %57, %80 : vector<64x32xf32>
    %82 = vector.extract_strided_slice %32 {offsets = [0, 16], sizes = [64, 8], strides = [1, 1]} : vector<64x96xf32> to vector<64x8xf32>
    %83 = vector.extract_strided_slice %32 {offsets = [0, 48], sizes = [64, 8], strides = [1, 1]} : vector<64x96xf32> to vector<64x8xf32>
    %84 = vector.extract_strided_slice %32 {offsets = [0, 80], sizes = [64, 8], strides = [1, 1]} : vector<64x96xf32> to vector<64x8xf32>
    %cst_45 = arith.constant dense<0.000000e+00> : vector<64x64xf32>
    %85 = tpu.matmul %82, %83, %cst_45 {dimension_numbers = #tpu.dot_dimension_numbers<[1], [1], [0], [0], [0, 0, 1, 0], [], []>} : vector<64x8xf32>, vector<64x8xf32>, vector<64x64xf32> -> vector<64x64xf32>
    %cst_46 = arith.constant 0.353553385 : f32
    %86 = vector.broadcast %cst_46 : f32 to vector<64x64xf32>
    %87 = arith.mulf %85, %86 : vector<64x64xf32>
    %c0_47 = arith.constant 0 : index
    %c2 = arith.constant 2 : index
    %c0_48 = arith.constant 0 : index
    %c0_49 = arith.constant 0 : index
    %88 = vector.load %arg2[%c0_47, %c2, %c0_48, %c0_49] : memref<2x4x64x64xf32, #tpu.memory_space<vmem>>, vector<1x1x64x64xf32>
    %89 = vector.shape_cast %88 : vector<1x1x64x64xf32> to vector<64x64xf32>
    %90 = arith.addf %87, %89 : vector<64x64xf32>
    %cst_50 = arith.constant dense<0xFF800000> : vector<64xf32>
    %91 = vector.multi_reduction <maximumf>, %90, %cst_50 [1] : vector<64x64xf32> to vector<64xf32>
    %92 = vector.shape_cast %91 : vector<64xf32> to vector<64x1xf32>
    %93 = vector.broadcast %92 : vector<64x1xf32> to vector<64x64xf32>
    %94 = arith.subf %90, %93 : vector<64x64xf32>
    %95 = math.exp %94 : vector<64x64xf32>
    %cst_51 = arith.constant dense<0.000000e+00> : vector<64xf32>
    %96 = vector.multi_reduction <add>, %95, %cst_51 [1] : vector<64x64xf32> to vector<64xf32>
    %97 = vector.shape_cast %96 : vector<64xf32> to vector<64x1xf32>
    %98 = vector.broadcast %97 : vector<64x1xf32> to vector<64x64xf32>
    %99 = arith.divf %95, %98 : vector<64x64xf32>
    %cst_52 = arith.constant dense<0.000000e+00> : vector<64x8xf32>
    %100 = tpu.matmul %99, %84, %cst_52 {dimension_numbers = #tpu.dot_dimension_numbers<[1], [0], [0], [1], [0, 0, 1, 1], [], []>} : vector<64x64xf32>, vector<64x8xf32>, vector<64x8xf32> -> vector<64x8xf32>
    %c0_53 = arith.constant 0 : index
    %c0_54 = arith.constant 0 : index
    %c0_55 = arith.constant 0 : index
    %101 = vector.load %arg7[%c0_53, %c0_54, %c0_55] : memref<2x32x32xf32, #tpu.memory_space<vmem>>, vector<1x32x32xf32>
    %102 = vector.shape_cast %101 : vector<1x32x32xf32> to vector<32x32xf32>
    %103 = vector.extract_strided_slice %102 {offsets = [16, 0], sizes = [8, 32], strides = [1, 1]} : vector<32x32xf32> to vector<8x32xf32>
    %cst_56 = arith.constant dense<0.000000e+00> : vector<64x32xf32>
    %104 = tpu.matmul %100, %103, %cst_56 {dimension_numbers = #tpu.dot_dimension_numbers<[1], [0], [0], [1], [0, 0, 1, 1], [], []>} : vector<64x8xf32>, vector<8x32xf32>, vector<64x32xf32> -> vector<64x32xf32>
    %105 = arith.addf %81, %104 : vector<64x32xf32>
    %106 = vector.extract_strided_slice %32 {offsets = [0, 24], sizes = [64, 8], strides = [1, 1]} : vector<64x96xf32> to vector<64x8xf32>
    %107 = vector.extract_strided_slice %32 {offsets = [0, 56], sizes = [64, 8], strides = [1, 1]} : vector<64x96xf32> to vector<64x8xf32>
    %108 = vector.extract_strided_slice %32 {offsets = [0, 88], sizes = [64, 8], strides = [1, 1]} : vector<64x96xf32> to vector<64x8xf32>
    %cst_57 = arith.constant dense<0.000000e+00> : vector<64x64xf32>
    %109 = tpu.matmul %106, %107, %cst_57 {dimension_numbers = #tpu.dot_dimension_numbers<[1], [1], [0], [0], [0, 0, 1, 0], [], []>} : vector<64x8xf32>, vector<64x8xf32>, vector<64x64xf32> -> vector<64x64xf32>
    %cst_58 = arith.constant 0.353553385 : f32
    %110 = vector.broadcast %cst_58 : f32 to vector<64x64xf32>
    %111 = arith.mulf %109, %110 : vector<64x64xf32>
    %c0_59 = arith.constant 0 : index
    %c3 = arith.constant 3 : index
    %c0_60 = arith.constant 0 : index
    %c0_61 = arith.constant 0 : index
    %112 = vector.load %arg2[%c0_59, %c3, %c0_60, %c0_61] : memref<2x4x64x64xf32, #tpu.memory_space<vmem>>, vector<1x1x64x64xf32>
    %113 = vector.shape_cast %112 : vector<1x1x64x64xf32> to vector<64x64xf32>
    %114 = arith.addf %111, %113 : vector<64x64xf32>
    %cst_62 = arith.constant dense<0xFF800000> : vector<64xf32>
    %115 = vector.multi_reduction <maximumf>, %114, %cst_62 [1] : vector<64x64xf32> to vector<64xf32>
    %116 = vector.shape_cast %115 : vector<64xf32> to vector<64x1xf32>
    %117 = vector.broadcast %116 : vector<64x1xf32> to vector<64x64xf32>
    %118 = arith.subf %114, %117 : vector<64x64xf32>
    %119 = math.exp %118 : vector<64x64xf32>
    %cst_63 = arith.constant dense<0.000000e+00> : vector<64xf32>
    %120 = vector.multi_reduction <add>, %119, %cst_63 [1] : vector<64x64xf32> to vector<64xf32>
    %121 = vector.shape_cast %120 : vector<64xf32> to vector<64x1xf32>
    %122 = vector.broadcast %121 : vector<64x1xf32> to vector<64x64xf32>
    %123 = arith.divf %119, %122 : vector<64x64xf32>
    %cst_64 = arith.constant dense<0.000000e+00> : vector<64x8xf32>
    %124 = tpu.matmul %123, %108, %cst_64 {dimension_numbers = #tpu.dot_dimension_numbers<[1], [0], [0], [1], [0, 0, 1, 1], [], []>} : vector<64x64xf32>, vector<64x8xf32>, vector<64x8xf32> -> vector<64x8xf32>
    %c0_65 = arith.constant 0 : index
    %c0_66 = arith.constant 0 : index
    %c0_67 = arith.constant 0 : index
    %125 = vector.load %arg7[%c0_65, %c0_66, %c0_67] : memref<2x32x32xf32, #tpu.memory_space<vmem>>, vector<1x32x32xf32>
    %126 = vector.shape_cast %125 : vector<1x32x32xf32> to vector<32x32xf32>
    %127 = vector.extract_strided_slice %126 {offsets = [24, 0], sizes = [8, 32], strides = [1, 1]} : vector<32x32xf32> to vector<8x32xf32>
    %cst_68 = arith.constant dense<0.000000e+00> : vector<64x32xf32>
    %128 = tpu.matmul %124, %127, %cst_68 {dimension_numbers = #tpu.dot_dimension_numbers<[1], [0], [0], [1], [0, 0, 1, 1], [], []>} : vector<64x8xf32>, vector<8x32xf32>, vector<64x32xf32> -> vector<64x32xf32>
    %129 = arith.addf %105, %128 : vector<64x32xf32>
    %130 = arith.addf %1, %129 : vector<64x32xf32>
    %c0_69 = arith.constant 0 : index
    %c0_70 = arith.constant 0 : index
    %c0_71 = arith.constant 0 : index
    %131 = vector.load %arg8[%c0_69, %c0_70, %c0_71] : memref<2x1x32xf32, #tpu.memory_space<vmem>>, vector<1x1x32xf32>
    %132 = vector.shape_cast %131 : vector<1x1x32xf32> to vector<1x32xf32>
    %133 = vector.broadcast %132 : vector<1x32xf32> to vector<64x32xf32>
    %134 = arith.addf %130, %133 : vector<64x32xf32>
    %c0_72 = arith.constant 0 : index
    %c0_73 = arith.constant 0 : index
    %c0_74 = arith.constant 0 : index
    %135 = vector.load %arg9[%c0_72, %c0_73, %c0_74] : memref<2x1x32xf32, #tpu.memory_space<vmem>>, vector<1x1x32xf32>
    %136 = vector.shape_cast %135 : vector<1x1x32xf32> to vector<1x32xf32>
    %c0_75 = arith.constant 0 : index
    %c0_76 = arith.constant 0 : index
    %c0_77 = arith.constant 0 : index
    %137 = vector.load %arg10[%c0_75, %c0_76, %c0_77] : memref<2x1x32xf32, #tpu.memory_space<vmem>>, vector<1x1x32xf32>
    %138 = vector.shape_cast %137 : vector<1x1x32xf32> to vector<1x32xf32>
    %cst_78 = arith.constant dense<0.000000e+00> : vector<64xf32>
    %139 = vector.multi_reduction <add>, %134, %cst_78 [1] : vector<64x32xf32> to vector<64xf32>
    %140 = vector.shape_cast %139 : vector<64xf32> to vector<64x1xf32>
    %cst_79 = arith.constant 3.200000e+01 : f32
    %141 = vector.broadcast %cst_79 : f32 to vector<64x1xf32>
    %142 = arith.divf %140, %141 : vector<64x1xf32>
    %143 = vector.broadcast %142 : vector<64x1xf32> to vector<64x32xf32>
    %144 = arith.subf %134, %143 : vector<64x32xf32>
    %145 = arith.mulf %144, %144 : vector<64x32xf32>
    %cst_80 = arith.constant dense<0.000000e+00> : vector<64xf32>
    %146 = vector.multi_reduction <add>, %145, %cst_80 [1] : vector<64x32xf32> to vector<64xf32>
    %147 = vector.shape_cast %146 : vector<64xf32> to vector<64x1xf32>
    %cst_81 = arith.constant 3.200000e+01 : f32
    %148 = vector.broadcast %cst_81 : f32 to vector<64x1xf32>
    %149 = arith.divf %147, %148 : vector<64x1xf32>
    %cst_82 = arith.constant 9.99999974E-6 : f32
    %150 = vector.broadcast %cst_82 : f32 to vector<64x1xf32>
    %151 = arith.addf %149, %150 : vector<64x1xf32>
    %152 = math.rsqrt %151 : vector<64x1xf32>
    %153 = vector.broadcast %152 : vector<64x1xf32> to vector<64x32xf32>
    %154 = arith.mulf %144, %153 : vector<64x32xf32>
    %155 = vector.broadcast %136 : vector<1x32xf32> to vector<64x32xf32>
    %156 = arith.mulf %154, %155 : vector<64x32xf32>
    %157 = vector.broadcast %138 : vector<1x32xf32> to vector<64x32xf32>
    %158 = arith.addf %156, %157 : vector<64x32xf32>
    %c0_83 = arith.constant 0 : index
    %c0_84 = arith.constant 0 : index
    %c0_85 = arith.constant 0 : index
    %159 = vector.load %arg11[%c0_83, %c0_84, %c0_85] : memref<2x32x128xf32, #tpu.memory_space<vmem>>, vector<1x32x128xf32>
    %160 = vector.shape_cast %159 : vector<1x32x128xf32> to vector<32x128xf32>
    %cst_86 = arith.constant dense<0.000000e+00> : vector<64x128xf32>
    %161 = tpu.matmul %158, %160, %cst_86 {dimension_numbers = #tpu.dot_dimension_numbers<[1], [0], [0], [1], [0, 0, 1, 1], [], []>} : vector<64x32xf32>, vector<32x128xf32>, vector<64x128xf32> -> vector<64x128xf32>
    %c0_87 = arith.constant 0 : index
    %c0_88 = arith.constant 0 : index
    %c0_89 = arith.constant 0 : index
    %162 = vector.load %arg12[%c0_87, %c0_88, %c0_89] : memref<2x1x128xf32, #tpu.memory_space<vmem>>, vector<1x1x128xf32>
    %163 = vector.shape_cast %162 : vector<1x1x128xf32> to vector<1x128xf32>
    %164 = vector.broadcast %163 : vector<1x128xf32> to vector<64x128xf32>
    %165 = arith.addf %161, %164 : vector<64x128xf32>
    %cst_90 = arith.constant 5.000000e-01 : f32
    %166 = vector.broadcast %cst_90 : f32 to vector<64x128xf32>
    %167 = arith.mulf %166, %165 : vector<64x128xf32>
    %cst_91 = arith.constant 0.707106769 : f32
    %168 = vector.broadcast %cst_91 : f32 to vector<64x128xf32>
    %169 = arith.mulf %165, %168 : vector<64x128xf32>
    %170 = math.erf %169 : vector<64x128xf32>
    %cst_92 = arith.constant 1.000000e+00 : f32
    %171 = vector.broadcast %cst_92 : f32 to vector<64x128xf32>
    %172 = arith.addf %171, %170 : vector<64x128xf32>
    %173 = arith.mulf %167, %172 : vector<64x128xf32>
    %c0_93 = arith.constant 0 : index
    %c0_94 = arith.constant 0 : index
    %c0_95 = arith.constant 0 : index
    %174 = vector.load %arg13[%c0_93, %c0_94, %c0_95] : memref<2x128x32xf32, #tpu.memory_space<vmem>>, vector<1x128x32xf32>
    %175 = vector.shape_cast %174 : vector<1x128x32xf32> to vector<128x32xf32>
    %cst_96 = arith.constant dense<0.000000e+00> : vector<64x32xf32>
    %176 = tpu.matmul %173, %175, %cst_96 {dimension_numbers = #tpu.dot_dimension_numbers<[1], [0], [0], [1], [0, 0, 1, 1], [], []>} : vector<64x128xf32>, vector<128x32xf32>, vector<64x32xf32> -> vector<64x32xf32>
    %177 = arith.addf %134, %176 : vector<64x32xf32>
    %c0_97 = arith.constant 0 : index
    %c0_98 = arith.constant 0 : index
    %c0_99 = arith.constant 0 : index
    %178 = vector.load %arg14[%c0_97, %c0_98, %c0_99] : memref<2x1x32xf32, #tpu.memory_space<vmem>>, vector<1x1x32xf32>
    %179 = vector.shape_cast %178 : vector<1x1x32xf32> to vector<1x32xf32>
    %180 = vector.broadcast %179 : vector<1x32xf32> to vector<64x32xf32>
    %181 = arith.addf %177, %180 : vector<64x32xf32>
    %c1_100 = arith.constant 1 : index
    %c0_101 = arith.constant 0 : index
    %c0_102 = arith.constant 0 : index
    %182 = vector.load %arg3[%c1_100, %c0_101, %c0_102] : memref<2x1x32xf32, #tpu.memory_space<vmem>>, vector<1x1x32xf32>
    %183 = vector.shape_cast %182 : vector<1x1x32xf32> to vector<1x32xf32>
    %c1_103 = arith.constant 1 : index
    %c0_104 = arith.constant 0 : index
    %c0_105 = arith.constant 0 : index
    %184 = vector.load %arg4[%c1_103, %c0_104, %c0_105] : memref<2x1x32xf32, #tpu.memory_space<vmem>>, vector<1x1x32xf32>
    %185 = vector.shape_cast %184 : vector<1x1x32xf32> to vector<1x32xf32>
    %cst_106 = arith.constant dense<0.000000e+00> : vector<64xf32>
    %186 = vector.multi_reduction <add>, %181, %cst_106 [1] : vector<64x32xf32> to vector<64xf32>
    %187 = vector.shape_cast %186 : vector<64xf32> to vector<64x1xf32>
    %cst_107 = arith.constant 3.200000e+01 : f32
    %188 = vector.broadcast %cst_107 : f32 to vector<64x1xf32>
    %189 = arith.divf %187, %188 : vector<64x1xf32>
    %190 = vector.broadcast %189 : vector<64x1xf32> to vector<64x32xf32>
    %191 = arith.subf %181, %190 : vector<64x32xf32>
    %192 = arith.mulf %191, %191 : vector<64x32xf32>
    %cst_108 = arith.constant dense<0.000000e+00> : vector<64xf32>
    %193 = vector.multi_reduction <add>, %192, %cst_108 [1] : vector<64x32xf32> to vector<64xf32>
    %194 = vector.shape_cast %193 : vector<64xf32> to vector<64x1xf32>
    %cst_109 = arith.constant 3.200000e+01 : f32
    %195 = vector.broadcast %cst_109 : f32 to vector<64x1xf32>
    %196 = arith.divf %194, %195 : vector<64x1xf32>
    %cst_110 = arith.constant 9.99999974E-6 : f32
    %197 = vector.broadcast %cst_110 : f32 to vector<64x1xf32>
    %198 = arith.addf %196, %197 : vector<64x1xf32>
    %199 = math.rsqrt %198 : vector<64x1xf32>
    %200 = vector.broadcast %199 : vector<64x1xf32> to vector<64x32xf32>
    %201 = arith.mulf %191, %200 : vector<64x32xf32>
    %202 = vector.broadcast %183 : vector<1x32xf32> to vector<64x32xf32>
    %203 = arith.mulf %201, %202 : vector<64x32xf32>
    %204 = vector.broadcast %185 : vector<1x32xf32> to vector<64x32xf32>
    %205 = arith.addf %203, %204 : vector<64x32xf32>
    %c1_111 = arith.constant 1 : index
    %c0_112 = arith.constant 0 : index
    %c0_113 = arith.constant 0 : index
    %206 = vector.load %arg5[%c1_111, %c0_112, %c0_113] : memref<2x32x96xf32, #tpu.memory_space<vmem>>, vector<1x32x96xf32>
    %207 = vector.shape_cast %206 : vector<1x32x96xf32> to vector<32x96xf32>
    %cst_114 = arith.constant dense<0.000000e+00> : vector<64x96xf32>
    %208 = tpu.matmul %205, %207, %cst_114 {dimension_numbers = #tpu.dot_dimension_numbers<[1], [0], [0], [1], [0, 0, 1, 1], [], []>} : vector<64x32xf32>, vector<32x96xf32>, vector<64x96xf32> -> vector<64x96xf32>
    %c1_115 = arith.constant 1 : index
    %c0_116 = arith.constant 0 : index
    %c0_117 = arith.constant 0 : index
    %209 = vector.load %arg6[%c1_115, %c0_116, %c0_117] : memref<2x1x96xf32, #tpu.memory_space<vmem>>, vector<1x1x96xf32>
    %210 = vector.shape_cast %209 : vector<1x1x96xf32> to vector<1x96xf32>
    %211 = vector.broadcast %210 : vector<1x96xf32> to vector<64x96xf32>
    %212 = arith.addf %208, %211 : vector<64x96xf32>
    %cst_118 = arith.constant 0.000000e+00 : f32
    %213 = vector.broadcast %cst_118 : f32 to vector<64x32xf32>
    %214 = vector.extract_strided_slice %212 {offsets = [0, 0], sizes = [64, 8], strides = [1, 1]} : vector<64x96xf32> to vector<64x8xf32>
    %215 = vector.extract_strided_slice %212 {offsets = [0, 32], sizes = [64, 8], strides = [1, 1]} : vector<64x96xf32> to vector<64x8xf32>
    %216 = vector.extract_strided_slice %212 {offsets = [0, 64], sizes = [64, 8], strides = [1, 1]} : vector<64x96xf32> to vector<64x8xf32>
    %cst_119 = arith.constant dense<0.000000e+00> : vector<64x64xf32>
    %217 = tpu.matmul %214, %215, %cst_119 {dimension_numbers = #tpu.dot_dimension_numbers<[1], [1], [0], [0], [0, 0, 1, 0], [], []>} : vector<64x8xf32>, vector<64x8xf32>, vector<64x64xf32> -> vector<64x64xf32>
    %cst_120 = arith.constant 0.353553385 : f32
    %218 = vector.broadcast %cst_120 : f32 to vector<64x64xf32>
    %219 = arith.mulf %217, %218 : vector<64x64xf32>
    %c1_121 = arith.constant 1 : index
    %c0_122 = arith.constant 0 : index
    %c0_123 = arith.constant 0 : index
    %c0_124 = arith.constant 0 : index
    %220 = vector.load %arg2[%c1_121, %c0_122, %c0_123, %c0_124] : memref<2x4x64x64xf32, #tpu.memory_space<vmem>>, vector<1x1x64x64xf32>
    %221 = vector.shape_cast %220 : vector<1x1x64x64xf32> to vector<64x64xf32>
    %222 = arith.addf %219, %221 : vector<64x64xf32>
    %cst_125 = arith.constant dense<0xFF800000> : vector<64xf32>
    %223 = vector.multi_reduction <maximumf>, %222, %cst_125 [1] : vector<64x64xf32> to vector<64xf32>
    %224 = vector.shape_cast %223 : vector<64xf32> to vector<64x1xf32>
    %225 = vector.broadcast %224 : vector<64x1xf32> to vector<64x64xf32>
    %226 = arith.subf %222, %225 : vector<64x64xf32>
    %227 = math.exp %226 : vector<64x64xf32>
    %cst_126 = arith.constant dense<0.000000e+00> : vector<64xf32>
    %228 = vector.multi_reduction <add>, %227, %cst_126 [1] : vector<64x64xf32> to vector<64xf32>
    %229 = vector.shape_cast %228 : vector<64xf32> to vector<64x1xf32>
    %230 = vector.broadcast %229 : vector<64x1xf32> to vector<64x64xf32>
    %231 = arith.divf %227, %230 : vector<64x64xf32>
    %cst_127 = arith.constant dense<0.000000e+00> : vector<64x8xf32>
    %232 = tpu.matmul %231, %216, %cst_127 {dimension_numbers = #tpu.dot_dimension_numbers<[1], [0], [0], [1], [0, 0, 1, 1], [], []>} : vector<64x64xf32>, vector<64x8xf32>, vector<64x8xf32> -> vector<64x8xf32>
    %c1_128 = arith.constant 1 : index
    %c0_129 = arith.constant 0 : index
    %c0_130 = arith.constant 0 : index
    %233 = vector.load %arg7[%c1_128, %c0_129, %c0_130] : memref<2x32x32xf32, #tpu.memory_space<vmem>>, vector<1x32x32xf32>
    %234 = vector.shape_cast %233 : vector<1x32x32xf32> to vector<32x32xf32>
    %235 = vector.extract_strided_slice %234 {offsets = [0, 0], sizes = [8, 32], strides = [1, 1]} : vector<32x32xf32> to vector<8x32xf32>
    %cst_131 = arith.constant dense<0.000000e+00> : vector<64x32xf32>
    %236 = tpu.matmul %232, %235, %cst_131 {dimension_numbers = #tpu.dot_dimension_numbers<[1], [0], [0], [1], [0, 0, 1, 1], [], []>} : vector<64x8xf32>, vector<8x32xf32>, vector<64x32xf32> -> vector<64x32xf32>
    %237 = arith.addf %213, %236 : vector<64x32xf32>
    %238 = vector.extract_strided_slice %212 {offsets = [0, 8], sizes = [64, 8], strides = [1, 1]} : vector<64x96xf32> to vector<64x8xf32>
    %239 = vector.extract_strided_slice %212 {offsets = [0, 40], sizes = [64, 8], strides = [1, 1]} : vector<64x96xf32> to vector<64x8xf32>
    %240 = vector.extract_strided_slice %212 {offsets = [0, 72], sizes = [64, 8], strides = [1, 1]} : vector<64x96xf32> to vector<64x8xf32>
    %cst_132 = arith.constant dense<0.000000e+00> : vector<64x64xf32>
    %241 = tpu.matmul %238, %239, %cst_132 {dimension_numbers = #tpu.dot_dimension_numbers<[1], [1], [0], [0], [0, 0, 1, 0], [], []>} : vector<64x8xf32>, vector<64x8xf32>, vector<64x64xf32> -> vector<64x64xf32>
    %cst_133 = arith.constant 0.353553385 : f32
    %242 = vector.broadcast %cst_133 : f32 to vector<64x64xf32>
    %243 = arith.mulf %241, %242 : vector<64x64xf32>
    %c1_134 = arith.constant 1 : index
    %c1_135 = arith.constant 1 : index
    %c0_136 = arith.constant 0 : index
    %c0_137 = arith.constant 0 : index
    %244 = vector.load %arg2[%c1_134, %c1_135, %c0_136, %c0_137] : memref<2x4x64x64xf32, #tpu.memory_space<vmem>>, vector<1x1x64x64xf32>
    %245 = vector.shape_cast %244 : vector<1x1x64x64xf32> to vector<64x64xf32>
    %246 = arith.addf %243, %245 : vector<64x64xf32>
    %cst_138 = arith.constant dense<0xFF800000> : vector<64xf32>
    %247 = vector.multi_reduction <maximumf>, %246, %cst_138 [1] : vector<64x64xf32> to vector<64xf32>
    %248 = vector.shape_cast %247 : vector<64xf32> to vector<64x1xf32>
    %249 = vector.broadcast %248 : vector<64x1xf32> to vector<64x64xf32>
    %250 = arith.subf %246, %249 : vector<64x64xf32>
    %251 = math.exp %250 : vector<64x64xf32>
    %cst_139 = arith.constant dense<0.000000e+00> : vector<64xf32>
    %252 = vector.multi_reduction <add>, %251, %cst_139 [1] : vector<64x64xf32> to vector<64xf32>
    %253 = vector.shape_cast %252 : vector<64xf32> to vector<64x1xf32>
    %254 = vector.broadcast %253 : vector<64x1xf32> to vector<64x64xf32>
    %255 = arith.divf %251, %254 : vector<64x64xf32>
    %cst_140 = arith.constant dense<0.000000e+00> : vector<64x8xf32>
    %256 = tpu.matmul %255, %240, %cst_140 {dimension_numbers = #tpu.dot_dimension_numbers<[1], [0], [0], [1], [0, 0, 1, 1], [], []>} : vector<64x64xf32>, vector<64x8xf32>, vector<64x8xf32> -> vector<64x8xf32>
    %c1_141 = arith.constant 1 : index
    %c0_142 = arith.constant 0 : index
    %c0_143 = arith.constant 0 : index
    %257 = vector.load %arg7[%c1_141, %c0_142, %c0_143] : memref<2x32x32xf32, #tpu.memory_space<vmem>>, vector<1x32x32xf32>
    %258 = vector.shape_cast %257 : vector<1x32x32xf32> to vector<32x32xf32>
    %259 = vector.extract_strided_slice %258 {offsets = [8, 0], sizes = [8, 32], strides = [1, 1]} : vector<32x32xf32> to vector<8x32xf32>
    %cst_144 = arith.constant dense<0.000000e+00> : vector<64x32xf32>
    %260 = tpu.matmul %256, %259, %cst_144 {dimension_numbers = #tpu.dot_dimension_numbers<[1], [0], [0], [1], [0, 0, 1, 1], [], []>} : vector<64x8xf32>, vector<8x32xf32>, vector<64x32xf32> -> vector<64x32xf32>
    %261 = arith.addf %237, %260 : vector<64x32xf32>
    %262 = vector.extract_strided_slice %212 {offsets = [0, 16], sizes = [64, 8], strides = [1, 1]} : vector<64x96xf32> to vector<64x8xf32>
    %263 = vector.extract_strided_slice %212 {offsets = [0, 48], sizes = [64, 8], strides = [1, 1]} : vector<64x96xf32> to vector<64x8xf32>
    %264 = vector.extract_strided_slice %212 {offsets = [0, 80], sizes = [64, 8], strides = [1, 1]} : vector<64x96xf32> to vector<64x8xf32>
    %cst_145 = arith.constant dense<0.000000e+00> : vector<64x64xf32>
    %265 = tpu.matmul %262, %263, %cst_145 {dimension_numbers = #tpu.dot_dimension_numbers<[1], [1], [0], [0], [0, 0, 1, 0], [], []>} : vector<64x8xf32>, vector<64x8xf32>, vector<64x64xf32> -> vector<64x64xf32>
    %cst_146 = arith.constant 0.353553385 : f32
    %266 = vector.broadcast %cst_146 : f32 to vector<64x64xf32>
    %267 = arith.mulf %265, %266 : vector<64x64xf32>
    %c1_147 = arith.constant 1 : index
    %c2_148 = arith.constant 2 : index
    %c0_149 = arith.constant 0 : index
    %c0_150 = arith.constant 0 : index
    %268 = vector.load %arg2[%c1_147, %c2_148, %c0_149, %c0_150] : memref<2x4x64x64xf32, #tpu.memory_space<vmem>>, vector<1x1x64x64xf32>
    %269 = vector.shape_cast %268 : vector<1x1x64x64xf32> to vector<64x64xf32>
    %270 = arith.addf %267, %269 : vector<64x64xf32>
    %cst_151 = arith.constant dense<0xFF800000> : vector<64xf32>
    %271 = vector.multi_reduction <maximumf>, %270, %cst_151 [1] : vector<64x64xf32> to vector<64xf32>
    %272 = vector.shape_cast %271 : vector<64xf32> to vector<64x1xf32>
    %273 = vector.broadcast %272 : vector<64x1xf32> to vector<64x64xf32>
    %274 = arith.subf %270, %273 : vector<64x64xf32>
    %275 = math.exp %274 : vector<64x64xf32>
    %cst_152 = arith.constant dense<0.000000e+00> : vector<64xf32>
    %276 = vector.multi_reduction <add>, %275, %cst_152 [1] : vector<64x64xf32> to vector<64xf32>
    %277 = vector.shape_cast %276 : vector<64xf32> to vector<64x1xf32>
    %278 = vector.broadcast %277 : vector<64x1xf32> to vector<64x64xf32>
    %279 = arith.divf %275, %278 : vector<64x64xf32>
    %cst_153 = arith.constant dense<0.000000e+00> : vector<64x8xf32>
    %280 = tpu.matmul %279, %264, %cst_153 {dimension_numbers = #tpu.dot_dimension_numbers<[1], [0], [0], [1], [0, 0, 1, 1], [], []>} : vector<64x64xf32>, vector<64x8xf32>, vector<64x8xf32> -> vector<64x8xf32>
    %c1_154 = arith.constant 1 : index
    %c0_155 = arith.constant 0 : index
    %c0_156 = arith.constant 0 : index
    %281 = vector.load %arg7[%c1_154, %c0_155, %c0_156] : memref<2x32x32xf32, #tpu.memory_space<vmem>>, vector<1x32x32xf32>
    %282 = vector.shape_cast %281 : vector<1x32x32xf32> to vector<32x32xf32>
    %283 = vector.extract_strided_slice %282 {offsets = [16, 0], sizes = [8, 32], strides = [1, 1]} : vector<32x32xf32> to vector<8x32xf32>
    %cst_157 = arith.constant dense<0.000000e+00> : vector<64x32xf32>
    %284 = tpu.matmul %280, %283, %cst_157 {dimension_numbers = #tpu.dot_dimension_numbers<[1], [0], [0], [1], [0, 0, 1, 1], [], []>} : vector<64x8xf32>, vector<8x32xf32>, vector<64x32xf32> -> vector<64x32xf32>
    %285 = arith.addf %261, %284 : vector<64x32xf32>
    %286 = vector.extract_strided_slice %212 {offsets = [0, 24], sizes = [64, 8], strides = [1, 1]} : vector<64x96xf32> to vector<64x8xf32>
    %287 = vector.extract_strided_slice %212 {offsets = [0, 56], sizes = [64, 8], strides = [1, 1]} : vector<64x96xf32> to vector<64x8xf32>
    %288 = vector.extract_strided_slice %212 {offsets = [0, 88], sizes = [64, 8], strides = [1, 1]} : vector<64x96xf32> to vector<64x8xf32>
    %cst_158 = arith.constant dense<0.000000e+00> : vector<64x64xf32>
    %289 = tpu.matmul %286, %287, %cst_158 {dimension_numbers = #tpu.dot_dimension_numbers<[1], [1], [0], [0], [0, 0, 1, 0], [], []>} : vector<64x8xf32>, vector<64x8xf32>, vector<64x64xf32> -> vector<64x64xf32>
    %cst_159 = arith.constant 0.353553385 : f32
    %290 = vector.broadcast %cst_159 : f32 to vector<64x64xf32>
    %291 = arith.mulf %289, %290 : vector<64x64xf32>
    %c1_160 = arith.constant 1 : index
    %c3_161 = arith.constant 3 : index
    %c0_162 = arith.constant 0 : index
    %c0_163 = arith.constant 0 : index
    %292 = vector.load %arg2[%c1_160, %c3_161, %c0_162, %c0_163] : memref<2x4x64x64xf32, #tpu.memory_space<vmem>>, vector<1x1x64x64xf32>
    %293 = vector.shape_cast %292 : vector<1x1x64x64xf32> to vector<64x64xf32>
    %294 = arith.addf %291, %293 : vector<64x64xf32>
    %cst_164 = arith.constant dense<0xFF800000> : vector<64xf32>
    %295 = vector.multi_reduction <maximumf>, %294, %cst_164 [1] : vector<64x64xf32> to vector<64xf32>
    %296 = vector.shape_cast %295 : vector<64xf32> to vector<64x1xf32>
    %297 = vector.broadcast %296 : vector<64x1xf32> to vector<64x64xf32>
    %298 = arith.subf %294, %297 : vector<64x64xf32>
    %299 = math.exp %298 : vector<64x64xf32>
    %cst_165 = arith.constant dense<0.000000e+00> : vector<64xf32>
    %300 = vector.multi_reduction <add>, %299, %cst_165 [1] : vector<64x64xf32> to vector<64xf32>
    %301 = vector.shape_cast %300 : vector<64xf32> to vector<64x1xf32>
    %302 = vector.broadcast %301 : vector<64x1xf32> to vector<64x64xf32>
    %303 = arith.divf %299, %302 : vector<64x64xf32>
    %cst_166 = arith.constant dense<0.000000e+00> : vector<64x8xf32>
    %304 = tpu.matmul %303, %288, %cst_166 {dimension_numbers = #tpu.dot_dimension_numbers<[1], [0], [0], [1], [0, 0, 1, 1], [], []>} : vector<64x64xf32>, vector<64x8xf32>, vector<64x8xf32> -> vector<64x8xf32>
    %c1_167 = arith.constant 1 : index
    %c0_168 = arith.constant 0 : index
    %c0_169 = arith.constant 0 : index
    %305 = vector.load %arg7[%c1_167, %c0_168, %c0_169] : memref<2x32x32xf32, #tpu.memory_space<vmem>>, vector<1x32x32xf32>
    %306 = vector.shape_cast %305 : vector<1x32x32xf32> to vector<32x32xf32>
    %307 = vector.extract_strided_slice %306 {offsets = [24, 0], sizes = [8, 32], strides = [1, 1]} : vector<32x32xf32> to vector<8x32xf32>
    %cst_170 = arith.constant dense<0.000000e+00> : vector<64x32xf32>
    %308 = tpu.matmul %304, %307, %cst_170 {dimension_numbers = #tpu.dot_dimension_numbers<[1], [0], [0], [1], [0, 0, 1, 1], [], []>} : vector<64x8xf32>, vector<8x32xf32>, vector<64x32xf32> -> vector<64x32xf32>
    %309 = arith.addf %285, %308 : vector<64x32xf32>
    %310 = arith.addf %181, %309 : vector<64x32xf32>
    %c1_171 = arith.constant 1 : index
    %c0_172 = arith.constant 0 : index
    %c0_173 = arith.constant 0 : index
    %311 = vector.load %arg8[%c1_171, %c0_172, %c0_173] : memref<2x1x32xf32, #tpu.memory_space<vmem>>, vector<1x1x32xf32>
    %312 = vector.shape_cast %311 : vector<1x1x32xf32> to vector<1x32xf32>
    %313 = vector.broadcast %312 : vector<1x32xf32> to vector<64x32xf32>
    %314 = arith.addf %310, %313 : vector<64x32xf32>
    %c1_174 = arith.constant 1 : index
    %c0_175 = arith.constant 0 : index
    %c0_176 = arith.constant 0 : index
    %315 = vector.load %arg9[%c1_174, %c0_175, %c0_176] : memref<2x1x32xf32, #tpu.memory_space<vmem>>, vector<1x1x32xf32>
    %316 = vector.shape_cast %315 : vector<1x1x32xf32> to vector<1x32xf32>
    %c1_177 = arith.constant 1 : index
    %c0_178 = arith.constant 0 : index
    %c0_179 = arith.constant 0 : index
    %317 = vector.load %arg10[%c1_177, %c0_178, %c0_179] : memref<2x1x32xf32, #tpu.memory_space<vmem>>, vector<1x1x32xf32>
    %318 = vector.shape_cast %317 : vector<1x1x32xf32> to vector<1x32xf32>
    %cst_180 = arith.constant dense<0.000000e+00> : vector<64xf32>
    %319 = vector.multi_reduction <add>, %314, %cst_180 [1] : vector<64x32xf32> to vector<64xf32>
    %320 = vector.shape_cast %319 : vector<64xf32> to vector<64x1xf32>
    %cst_181 = arith.constant 3.200000e+01 : f32
    %321 = vector.broadcast %cst_181 : f32 to vector<64x1xf32>
    %322 = arith.divf %320, %321 : vector<64x1xf32>
    %323 = vector.broadcast %322 : vector<64x1xf32> to vector<64x32xf32>
    %324 = arith.subf %314, %323 : vector<64x32xf32>
    %325 = arith.mulf %324, %324 : vector<64x32xf32>
    %cst_182 = arith.constant dense<0.000000e+00> : vector<64xf32>
    %326 = vector.multi_reduction <add>, %325, %cst_182 [1] : vector<64x32xf32> to vector<64xf32>
    %327 = vector.shape_cast %326 : vector<64xf32> to vector<64x1xf32>
    %cst_183 = arith.constant 3.200000e+01 : f32
    %328 = vector.broadcast %cst_183 : f32 to vector<64x1xf32>
    %329 = arith.divf %327, %328 : vector<64x1xf32>
    %cst_184 = arith.constant 9.99999974E-6 : f32
    %330 = vector.broadcast %cst_184 : f32 to vector<64x1xf32>
    %331 = arith.addf %329, %330 : vector<64x1xf32>
    %332 = math.rsqrt %331 : vector<64x1xf32>
    %333 = vector.broadcast %332 : vector<64x1xf32> to vector<64x32xf32>
    %334 = arith.mulf %324, %333 : vector<64x32xf32>
    %335 = vector.broadcast %316 : vector<1x32xf32> to vector<64x32xf32>
    %336 = arith.mulf %334, %335 : vector<64x32xf32>
    %337 = vector.broadcast %318 : vector<1x32xf32> to vector<64x32xf32>
    %338 = arith.addf %336, %337 : vector<64x32xf32>
    %c1_185 = arith.constant 1 : index
    %c0_186 = arith.constant 0 : index
    %c0_187 = arith.constant 0 : index
    %339 = vector.load %arg11[%c1_185, %c0_186, %c0_187] : memref<2x32x128xf32, #tpu.memory_space<vmem>>, vector<1x32x128xf32>
    %340 = vector.shape_cast %339 : vector<1x32x128xf32> to vector<32x128xf32>
    %cst_188 = arith.constant dense<0.000000e+00> : vector<64x128xf32>
    %341 = tpu.matmul %338, %340, %cst_188 {dimension_numbers = #tpu.dot_dimension_numbers<[1], [0], [0], [1], [0, 0, 1, 1], [], []>} : vector<64x32xf32>, vector<32x128xf32>, vector<64x128xf32> -> vector<64x128xf32>
    %c1_189 = arith.constant 1 : index
    %c0_190 = arith.constant 0 : index
    %c0_191 = arith.constant 0 : index
    %342 = vector.load %arg12[%c1_189, %c0_190, %c0_191] : memref<2x1x128xf32, #tpu.memory_space<vmem>>, vector<1x1x128xf32>
    %343 = vector.shape_cast %342 : vector<1x1x128xf32> to vector<1x128xf32>
    %344 = vector.broadcast %343 : vector<1x128xf32> to vector<64x128xf32>
    %345 = arith.addf %341, %344 : vector<64x128xf32>
    %cst_192 = arith.constant 5.000000e-01 : f32
    %346 = vector.broadcast %cst_192 : f32 to vector<64x128xf32>
    %347 = arith.mulf %346, %345 : vector<64x128xf32>
    %cst_193 = arith.constant 0.707106769 : f32
    %348 = vector.broadcast %cst_193 : f32 to vector<64x128xf32>
    %349 = arith.mulf %345, %348 : vector<64x128xf32>
    %350 = math.erf %349 : vector<64x128xf32>
    %cst_194 = arith.constant 1.000000e+00 : f32
    %351 = vector.broadcast %cst_194 : f32 to vector<64x128xf32>
    %352 = arith.addf %351, %350 : vector<64x128xf32>
    %353 = arith.mulf %347, %352 : vector<64x128xf32>
    %c1_195 = arith.constant 1 : index
    %c0_196 = arith.constant 0 : index
    %c0_197 = arith.constant 0 : index
    %354 = vector.load %arg13[%c1_195, %c0_196, %c0_197] : memref<2x128x32xf32, #tpu.memory_space<vmem>>, vector<1x128x32xf32>
    %355 = vector.shape_cast %354 : vector<1x128x32xf32> to vector<128x32xf32>
    %cst_198 = arith.constant dense<0.000000e+00> : vector<64x32xf32>
    %356 = tpu.matmul %353, %355, %cst_198 {dimension_numbers = #tpu.dot_dimension_numbers<[1], [0], [0], [1], [0, 0, 1, 1], [], []>} : vector<64x128xf32>, vector<128x32xf32>, vector<64x32xf32> -> vector<64x32xf32>
    %357 = arith.addf %314, %356 : vector<64x32xf32>
    %c1_199 = arith.constant 1 : index
    %c0_200 = arith.constant 0 : index
    %c0_201 = arith.constant 0 : index
    %358 = vector.load %arg14[%c1_199, %c0_200, %c0_201] : memref<2x1x32xf32, #tpu.memory_space<vmem>>, vector<1x1x32xf32>
    %359 = vector.shape_cast %358 : vector<1x1x32xf32> to vector<1x32xf32>
    %360 = vector.broadcast %359 : vector<1x32xf32> to vector<64x32xf32>
    %361 = arith.addf %357, %360 : vector<64x32xf32>
    %cst_202 = arith.constant 0.000000e+00 : f32
    %362 = vector.broadcast %cst_202 : f32 to vector<16x128xf32>
    %c0_203 = arith.constant 0 : index
    %c0_204 = arith.constant 0 : index
    %c0_205 = arith.constant 0 : index
    %363 = vector.load %arg15[%c0_203, %c0_204, %c0_205] : memref<4x16x64xf32, #tpu.memory_space<vmem>>, vector<1x16x64xf32>
    %364 = vector.shape_cast %363 : vector<1x16x64xf32> to vector<16x64xf32>
    %cst_206 = arith.constant dense<0.000000e+00> : vector<16x32xf32>
    %365 = tpu.matmul %364, %361, %cst_206 {dimension_numbers = #tpu.dot_dimension_numbers<[1], [0], [0], [1], [0, 0, 1, 1], [], []>} : vector<16x64xf32>, vector<64x32xf32>, vector<16x32xf32> -> vector<16x32xf32>
    %c0_207 = arith.constant 0 : index
    %c0_208 = arith.constant 0 : index
    %c0_209 = arith.constant 0 : index
    %366 = vector.load %arg16[%c0_207, %c0_208, %c0_209] : memref<4x32x128xf32, #tpu.memory_space<vmem>>, vector<1x32x128xf32>
    %367 = vector.shape_cast %366 : vector<1x32x128xf32> to vector<32x128xf32>
    %cst_210 = arith.constant dense<0.000000e+00> : vector<16x128xf32>
    %368 = tpu.matmul %365, %367, %cst_210 {dimension_numbers = #tpu.dot_dimension_numbers<[1], [0], [0], [1], [0, 0, 1, 1], [], []>} : vector<16x32xf32>, vector<32x128xf32>, vector<16x128xf32> -> vector<16x128xf32>
    %369 = arith.addf %362, %368 : vector<16x128xf32>
    %c1_211 = arith.constant 1 : index
    %c0_212 = arith.constant 0 : index
    %c0_213 = arith.constant 0 : index
    %370 = vector.load %arg15[%c1_211, %c0_212, %c0_213] : memref<4x16x64xf32, #tpu.memory_space<vmem>>, vector<1x16x64xf32>
    %371 = vector.shape_cast %370 : vector<1x16x64xf32> to vector<16x64xf32>
    %cst_214 = arith.constant dense<0.000000e+00> : vector<16x32xf32>
    %372 = tpu.matmul %371, %361, %cst_214 {dimension_numbers = #tpu.dot_dimension_numbers<[1], [0], [0], [1], [0, 0, 1, 1], [], []>} : vector<16x64xf32>, vector<64x32xf32>, vector<16x32xf32> -> vector<16x32xf32>
    %c1_215 = arith.constant 1 : index
    %c0_216 = arith.constant 0 : index
    %c0_217 = arith.constant 0 : index
    %373 = vector.load %arg16[%c1_215, %c0_216, %c0_217] : memref<4x32x128xf32, #tpu.memory_space<vmem>>, vector<1x32x128xf32>
    %374 = vector.shape_cast %373 : vector<1x32x128xf32> to vector<32x128xf32>
    %cst_218 = arith.constant dense<0.000000e+00> : vector<16x128xf32>
    %375 = tpu.matmul %372, %374, %cst_218 {dimension_numbers = #tpu.dot_dimension_numbers<[1], [0], [0], [1], [0, 0, 1, 1], [], []>} : vector<16x32xf32>, vector<32x128xf32>, vector<16x128xf32> -> vector<16x128xf32>
    %376 = arith.addf %369, %375 : vector<16x128xf32>
    %c2_219 = arith.constant 2 : index
    %c0_220 = arith.constant 0 : index
    %c0_221 = arith.constant 0 : index
    %377 = vector.load %arg15[%c2_219, %c0_220, %c0_221] : memref<4x16x64xf32, #tpu.memory_space<vmem>>, vector<1x16x64xf32>
    %378 = vector.shape_cast %377 : vector<1x16x64xf32> to vector<16x64xf32>
    %cst_222 = arith.constant dense<0.000000e+00> : vector<16x32xf32>
    %379 = tpu.matmul %378, %361, %cst_222 {dimension_numbers = #tpu.dot_dimension_numbers<[1], [0], [0], [1], [0, 0, 1, 1], [], []>} : vector<16x64xf32>, vector<64x32xf32>, vector<16x32xf32> -> vector<16x32xf32>
    %c2_223 = arith.constant 2 : index
    %c0_224 = arith.constant 0 : index
    %c0_225 = arith.constant 0 : index
    %380 = vector.load %arg16[%c2_223, %c0_224, %c0_225] : memref<4x32x128xf32, #tpu.memory_space<vmem>>, vector<1x32x128xf32>
    %381 = vector.shape_cast %380 : vector<1x32x128xf32> to vector<32x128xf32>
    %cst_226 = arith.constant dense<0.000000e+00> : vector<16x128xf32>
    %382 = tpu.matmul %379, %381, %cst_226 {dimension_numbers = #tpu.dot_dimension_numbers<[1], [0], [0], [1], [0, 0, 1, 1], [], []>} : vector<16x32xf32>, vector<32x128xf32>, vector<16x128xf32> -> vector<16x128xf32>
    %383 = arith.addf %376, %382 : vector<16x128xf32>
    %c3_227 = arith.constant 3 : index
    %c0_228 = arith.constant 0 : index
    %c0_229 = arith.constant 0 : index
    %384 = vector.load %arg15[%c3_227, %c0_228, %c0_229] : memref<4x16x64xf32, #tpu.memory_space<vmem>>, vector<1x16x64xf32>
    %385 = vector.shape_cast %384 : vector<1x16x64xf32> to vector<16x64xf32>
    %cst_230 = arith.constant dense<0.000000e+00> : vector<16x32xf32>
    %386 = tpu.matmul %385, %361, %cst_230 {dimension_numbers = #tpu.dot_dimension_numbers<[1], [0], [0], [1], [0, 0, 1, 1], [], []>} : vector<16x64xf32>, vector<64x32xf32>, vector<16x32xf32> -> vector<16x32xf32>
    %c3_231 = arith.constant 3 : index
    %c0_232 = arith.constant 0 : index
    %c0_233 = arith.constant 0 : index
    %387 = vector.load %arg16[%c3_231, %c0_232, %c0_233] : memref<4x32x128xf32, #tpu.memory_space<vmem>>, vector<1x32x128xf32>
    %388 = vector.shape_cast %387 : vector<1x32x128xf32> to vector<32x128xf32>
    %cst_234 = arith.constant dense<0.000000e+00> : vector<16x128xf32>
    %389 = tpu.matmul %386, %388, %cst_234 {dimension_numbers = #tpu.dot_dimension_numbers<[1], [0], [0], [1], [0, 0, 1, 1], [], []>} : vector<16x32xf32>, vector<32x128xf32>, vector<16x128xf32> -> vector<16x128xf32>
    %390 = arith.addf %383, %389 : vector<16x128xf32>
    %c0_235 = arith.constant 0 : index
    %c0_236 = arith.constant 0 : index
    %391 = vector.load %arg17[%c0_235, %c0_236] : memref<1x128xf32, #tpu.memory_space<vmem>>, vector<1x128xf32>
    %c0_237 = arith.constant 0 : index
    %c0_238 = arith.constant 0 : index
    %392 = vector.load %arg18[%c0_237, %c0_238] : memref<1x128xf32, #tpu.memory_space<vmem>>, vector<1x128xf32>
    %cst_239 = arith.constant dense<0.000000e+00> : vector<16xf32>
    %393 = vector.multi_reduction <add>, %390, %cst_239 [1] : vector<16x128xf32> to vector<16xf32>
    %394 = vector.shape_cast %393 : vector<16xf32> to vector<16x1xf32>
    %cst_240 = arith.constant 1.280000e+02 : f32
    %395 = vector.broadcast %cst_240 : f32 to vector<16x1xf32>
    %396 = arith.divf %394, %395 : vector<16x1xf32>
    %397 = vector.broadcast %396 : vector<16x1xf32> to vector<16x128xf32>
    %398 = arith.subf %390, %397 : vector<16x128xf32>
    %399 = arith.mulf %398, %398 : vector<16x128xf32>
    %cst_241 = arith.constant dense<0.000000e+00> : vector<16xf32>
    %400 = vector.multi_reduction <add>, %399, %cst_241 [1] : vector<16x128xf32> to vector<16xf32>
    %401 = vector.shape_cast %400 : vector<16xf32> to vector<16x1xf32>
    %cst_242 = arith.constant 1.280000e+02 : f32
    %402 = vector.broadcast %cst_242 : f32 to vector<16x1xf32>
    %403 = arith.divf %401, %402 : vector<16x1xf32>
    %cst_243 = arith.constant 9.99999974E-6 : f32
    %404 = vector.broadcast %cst_243 : f32 to vector<16x1xf32>
    %405 = arith.addf %403, %404 : vector<16x1xf32>
    %406 = math.rsqrt %405 : vector<16x1xf32>
    %407 = vector.broadcast %406 : vector<16x1xf32> to vector<16x128xf32>
    %408 = arith.mulf %398, %407 : vector<16x128xf32>
    %409 = vector.broadcast %391 : vector<1x128xf32> to vector<16x128xf32>
    %410 = arith.mulf %408, %409 : vector<16x128xf32>
    %411 = vector.broadcast %392 : vector<1x128xf32> to vector<16x128xf32>
    %412 = arith.addf %410, %411 : vector<16x128xf32>
    %c0_244 = arith.constant 0 : index
    %c0_245 = arith.constant 0 : index
    %413 = vector.load %arg19[%c0_244, %c0_245] : memref<128x64xf32, #tpu.memory_space<vmem>>, vector<128x64xf32>
    %cst_246 = arith.constant dense<0.000000e+00> : vector<16x64xf32>
    %414 = tpu.matmul %412, %413, %cst_246 {dimension_numbers = #tpu.dot_dimension_numbers<[1], [0], [0], [1], [0, 0, 1, 1], [], []>} : vector<16x128xf32>, vector<128x64xf32>, vector<16x64xf32> -> vector<16x64xf32>
    %c0_247 = arith.constant 0 : index
    %c0_248 = arith.constant 0 : index
    %c0_249 = arith.constant 0 : index
    %415 = vector.load %arg20[%c0_247, %c0_248, %c0_249] : memref<1x16x64xf32, #tpu.memory_space<vmem>>, vector<1x16x64xf32>
    %416 = vector.shape_cast %415 : vector<1x16x64xf32> to vector<16x64xf32>
    %417 = vector.shape_cast %414 : vector<16x64xf32> to vector<1x16x64xf32>
    tpu.vector_store %arg20[%c0_247, %c0_248, %c0_249], %417 {strides = array<i32>} : memref<1x16x64xf32, #tpu.memory_space<vmem>>, vector<1x16x64xf32>,
    return
  }
  func.func @transform_0(%arg0: i32) -> (i32, i32, i32) {
    %c0_i32 = arith.constant 0 : i32
    %c0_i32_0 = arith.constant 0 : i32
    %c0_i32_1 = arith.constant 0 : i32
    return %arg0, %c0_i32, %c0_i32_0 : i32, i32, i32
  }
  func.func @transform_1(%arg0: i32) -> (i32, i32, i32, i32) {
    %c0_i32 = arith.constant 0 : i32
    %c0_i32_0 = arith.constant 0 : i32
    %c0_i32_1 = arith.constant 0 : i32
    %c0_i32_2 = arith.constant 0 : i32
    %c0_i32_3 = arith.constant 0 : i32
    return %c0_i32, %c0_i32_0, %c0_i32_1, %c0_i32_2 : i32, i32, i32, i32
  }
  func.func @transform_2(%arg0: i32) -> (i32, i32, i32) {
    %c0_i32 = arith.constant 0 : i32
    %c0_i32_0 = arith.constant 0 : i32
    %c0_i32_1 = arith.constant 0 : i32
    %c0_i32_2 = arith.constant 0 : i32
    return %c0_i32, %c0_i32_0, %c0_i32_1 : i32, i32, i32
  }
  func.func @transform_3(%arg0: i32) -> (i32, i32, i32) {
    %c0_i32 = arith.constant 0 : i32
    %c0_i32_0 = arith.constant 0 : i32
    %c0_i32_1 = arith.constant 0 : i32
    %c0_i32_2 = arith.constant 0 : i32
    return %c0_i32, %c0_i32_0, %c0_i32_1 : i32, i32, i32
  }
  func.func @transform_4(%arg0: i32) -> (i32, i32, i32) {
    %c0_i32 = arith.constant 0 : i32
    %c0_i32_0 = arith.constant 0 : i32
    %c0_i32_1 = arith.constant 0 : i32
    %c0_i32_2 = arith.constant 0 : i32
    return %c0_i32, %c0_i32_0, %c0_i32_1 : i32, i32, i32
  }
  func.func @transform_5(%arg0: i32) -> (i32, i32, i32) {
    %c0_i32 = arith.constant 0 : i32
    %c0_i32_0 = arith.constant 0 : i32
    %c0_i32_1 = arith.constant 0 : i32
    %c0_i32_2 = arith.constant 0 : i32
    return %c0_i32, %c0_i32_0, %c0_i32_1 : i32, i32, i32
  }
  func.func @transform_6(%arg0: i32) -> (i32, i32, i32) {
    %c0_i32 = arith.constant 0 : i32
    %c0_i32_0 = arith.constant 0 : i32
    %c0_i32_1 = arith.constant 0 : i32
    %c0_i32_2 = arith.constant 0 : i32
    return %c0_i32, %c0_i32_0, %c0_i32_1 : i32, i32, i32
  }
  func.func @transform_7(%arg0: i32) -> (i32, i32, i32) {
    %c0_i32 = arith.constant 0 : i32
    %c0_i32_0 = arith.constant 0 : i32
    %c0_i32_1 = arith.constant 0 : i32
    %c0_i32_2 = arith.constant 0 : i32
    return %c0_i32, %c0_i32_0, %c0_i32_1 : i32, i32, i32
  }
  func.func @transform_8(%arg0: i32) -> (i32, i32, i32) {
    %c0_i32 = arith.constant 0 : i32
    %c0_i32_0 = arith.constant 0 : i32
    %c0_i32_1 = arith.constant 0 : i32
    %c0_i32_2 = arith.constant 0 : i32
    return %c0_i32, %c0_i32_0, %c0_i32_1 : i32, i32, i32
  }
  func.func @transform_9(%arg0: i32) -> (i32, i32, i32) {
    %c0_i32 = arith.constant 0 : i32
    %c0_i32_0 = arith.constant 0 : i32
    %c0_i32_1 = arith.constant 0 : i32
    %c0_i32_2 = arith.constant 0 : i32
    return %c0_i32, %c0_i32_0, %c0_i32_1 : i32, i32, i32
  }
  func.func @transform_10(%arg0: i32) -> (i32, i32, i32) {
    %c0_i32 = arith.constant 0 : i32
    %c0_i32_0 = arith.constant 0 : i32
    %c0_i32_1 = arith.constant 0 : i32
    %c0_i32_2 = arith.constant 0 : i32
    return %c0_i32, %c0_i32_0, %c0_i32_1 : i32, i32, i32
  }
  func.func @transform_11(%arg0: i32) -> (i32, i32, i32) {
    %c0_i32 = arith.constant 0 : i32
    %c0_i32_0 = arith.constant 0 : i32
    %c0_i32_1 = arith.constant 0 : i32
    %c0_i32_2 = arith.constant 0 : i32
    return %c0_i32, %c0_i32_0, %c0_i32_1 : i32, i32, i32
  }
  func.func @transform_12(%arg0: i32) -> (i32, i32, i32) {
    %c0_i32 = arith.constant 0 : i32
    %c0_i32_0 = arith.constant 0 : i32
    %c0_i32_1 = arith.constant 0 : i32
    %c0_i32_2 = arith.constant 0 : i32
    return %c0_i32, %c0_i32_0, %c0_i32_1 : i32, i32, i32
  }
  func.func @transform_13(%arg0: i32) -> (i32, i32, i32) {
    %c0_i32 = arith.constant 0 : i32
    %c0_i32_0 = arith.constant 0 : i32
    %c0_i32_1 = arith.constant 0 : i32
    %c0_i32_2 = arith.constant 0 : i32
    return %c0_i32, %c0_i32_0, %c0_i32_1 : i32, i32, i32
  }
  func.func @transform_14(%arg0: i32) -> (i32, i32, i32) {
    %c0_i32 = arith.constant 0 : i32
    %c0_i32_0 = arith.constant 0 : i32
    %c0_i32_1 = arith.constant 0 : i32
    %c0_i32_2 = arith.constant 0 : i32
    return %c0_i32, %c0_i32_0, %c0_i32_1 : i32, i32, i32
  }
  func.func @transform_15(%arg0: i32) -> (i32, i32, i32) {
    %c0_i32 = arith.constant 0 : i32
    %c0_i32_0 = arith.constant 0 : i32
    %c0_i32_1 = arith.constant 0 : i32
    %c0_i32_2 = arith.constant 0 : i32
    return %c0_i32, %c0_i32_0, %c0_i32_1 : i32, i32, i32
  }
  func.func @transform_16(%arg0: i32) -> (i32, i32) {
    %c0_i32 = arith.constant 0 : i32
    %c0_i32_0 = arith.constant 0 : i32
    %c0_i32_1 = arith.constant 0 : i32
    return %c0_i32, %c0_i32_0 : i32, i32
  }
  func.func @transform_17(%arg0: i32) -> (i32, i32) {
    %c0_i32 = arith.constant 0 : i32
    %c0_i32_0 = arith.constant 0 : i32
    %c0_i32_1 = arith.constant 0 : i32
    return %c0_i32, %c0_i32_0 : i32, i32
  }
  func.func @transform_18(%arg0: i32) -> (i32, i32) {
    %c0_i32 = arith.constant 0 : i32
    %c0_i32_0 = arith.constant 0 : i32
    %c0_i32_1 = arith.constant 0 : i32
    return %c0_i32, %c0_i32_0 : i32, i32
  }
  func.func @transform_19(%arg0: i32) -> (i32, i32, i32) {
    %c0_i32 = arith.constant 0 : i32
    %c0_i32_0 = arith.constant 0 : i32
    %c0_i32_1 = arith.constant 0 : i32
    return %arg0, %c0_i32, %c0_i32_0 : i32, i32, i32
  }
}

</mosaic_0001>

<bundles_post_ra>
// kernel: basic_block_forward.1
= control target key start
LH: loop header
LB: loop body
LE: loop exit
PB: predicated region body
PF: predicated region fallthrough
CT: control target
= control target key end

     0   :  { %s14580_s0 = inlined_call_operand.hbm [shape: f32[2,64,32], index: 0, kind: input, shape index: {}]   ;;  %s14581_s1 = inlined_call_operand.vmem [shape: f32[2,4,64,64], index: 1, kind: input, shape index: {}]   ;;  %s14582_s2 = inlined_call_operand.hbm [shape: f32[2,1,32], index: 2, kind: input, shape index: {}]   ;;  %s14583_s3 = inlined_call_operand.hbm [shape: f32[2,1,32], index: 3, kind: input, shape index: {}]   ;;  %s14584_s4 = inlined_call_operand.hbm [shape: f32[2,32,96], index: 4, kind: input, shape index: {}]   ;;  %s14585_s5 = inlined_call_operand.hbm [shape: f32[2,1,96], index: 5, kind: input, shape index: {}]   ;;  %s14586_s6 = inlined_call_operand.hbm [shape: f32[2,32,32], index: 6, kind: input, shape index: {}]   ;;  %s14587_s7 = inlined_call_operand.hbm [shape: f32[2,1,32], index: 7, kind: input, shape index: {}]   ;;  %s14588_s8 = inlined_call_operand.hbm [shape: f32[2,1,32], index: 8, kind: input, shape index: {}]   ;;  %s14589_s9 = inlined_call_operand.hbm [shape: f32[2,1,32], index: 9, kind: input, shape index: {}]   ;;  %s14590_s10 = inlined_call_operand.hbm [shape: f32[2,32,128], index: 10, kind: input, shape index: {}]   ;;  %s14591_s11 = inlined_call_operand.hbm [shape: f32[2,1,128], index: 11, kind: input, shape index: {}]   ;;  %s14592_s12 = inlined_call_operand.vmem [shape: f32[2,128,32], index: 12, kind: input, shape index: {}]   ;;  %s14593_s13 = inlined_call_operand.hbm [shape: f32[2,1,32], index: 13, kind: input, shape index: {}]   ;;  %s14594_s14 = inlined_call_operand.hbm [shape: f32[4,16,64], index: 14, kind: input, shape index: {}]   ;;  %s14595_s15 = inlined_call_operand.hbm [shape: f32[4,32,128], index: 15, kind: input, shape index: {}]   ;;  %s14596_s16 = inlined_call_operand.hbm [shape: f32[1,128], index: 16, kind: input, shape index: {}]   ;;  %s14597_s17 = inlined_call_operand.hbm [shape: f32[1,128], index: 17, kind: input, shape index: {}]   ;;  %s14598_s18 = inlined_call_operand.vmem [shape: f32[128,64], index: 18, kind: input, shape index: {}]   ;;  %s14599_s19 = inlined_call_operand.hbm [shape: f32[2,16,64], index: 19, kind: output, shape index: {}]  }
   0x1   :  { %14640 = sst [smem:[#allocation44_spill]] %s14580_s0 }
   0x2   :  { %14641 = sst [smem:[#allocation45_spill]] %s14581_s1 }
   0x3   :  { %14642 = sst [smem:[#allocation46_spill]] %s14582_s2 }
   0x4   :  { %14643 = sst [smem:[#allocation47_spill]] %s14583_s3 }
   0x5   :  { %14644 = sst [smem:[#allocation48_spill]] %s14584_s4 }
   0x6   :  { %14645 = sst [smem:[#allocation49_spill]] %s14585_s5 }
   0x7   :  { %14646 = sst [smem:[#allocation50_spill]] %s14586_s6 }
   0x8   :  { %14647 = sst [smem:[#allocation51_spill]] %s14588_s8 }
   0x9   :  { %14648 = sst [smem:[#allocation52_spill]] %s14592_s12 }
   0xa   :  { %14649 = sst [smem:[#allocation53_spill]] %s14598_s18 }
   0xb   :  { %14650 = sst [smem:[#allocation54_spill]] %s14599_s19 }
   0xc   :  { %24 = vsyncpa [#allocation3], 0 }
   0xd   :  { %26 = vsyncpa [#allocation3 + $0x1], 0 }
   0xe   :  { %27 = vsyncpa [#allocation6], 0 }
   0xf   :  { %28 = vsyncpa [#allocation9], 0 }
  0x10   :  { %29 = vsyncpa [#allocation12], 0 }
  0x11   :  { %30 = vsyncpa [#allocation15], 0 }
  0x12   :  { %31 = vsyncpa [#allocation18], 0 }
  0x13   :  { %32 = vsyncpa [#allocation21], 0 }
  0x14   :  { %33 = vsyncpa [#allocation24], 0 }
  0x15   :  { %34 = vsyncpa [#allocation27], 0 }
  0x16   :  { %35 = vsyncpa [#allocation4], 0 }
  0x17   :  { %37 = vsyncpa [#allocation4 + $0x1], 0  ;;  %s11959_s0 = smov 0   ;;  %s11961_s30 = smov 0  }
  0x18   :  { %s11963_s20 = smov 0   ;;  %s11965_s21 = smov 0  }
  0x19 LB: > { %14651 = sst [smem:[#allocation39_spill]] %s11811_s0  ;;  %s11825_s1 = smov [#allocation5]   ;;  %s11823_s21 = sphi %s11965_s21, %s14718_s21   ;;  %s11819_s20 = sphi %s11963_s20, %s12344_s20   ;;  %s11815_s30 = sphi %s11961_s30, %s14717_s30   ;;  %s11811_s0 = sphi %s11959_s0, %s14716_s0  }
  0x1a   : > { %14652 = sst [smem:[#allocation40_spill]] %s11815_s30  ;;  %s493_s22 = sshll.u32 %s11825_s1, 4  ;;  %s11985_s22 = int_to_ptr.vmem [resolvable:$true] %s493_s22 }
  0x1b   : > { %14653 = sst [smem:[#allocation41_spill]] %s11819_s20  ;;  %s11980_s2 = sadd.s32 4294967295, %s11823_s21  }
  0x1c   : > { %14654 = sst [smem:[#allocation42_spill]] %s11980_s2  ;;  %p7951_p0 = scmp.ge.s32.totalorder %s11823_s21, 1 }
  0x1d   : > { %p14615_p1 = scmp.eq.s32.totalorder %s11980_s2, 0  ;;  %p478_p2 = scmp.lt.s32.totalorder %s11823_s21, 3 }
  0x1e   : > { %s11826_s24 = smov [#allocation8]   ;;  %s11827_s26 = smov [#allocation11]  }
  0x1f   : > { %p11987_p3 = pnand %p7951_p0, %p478_p2  ;;  %s519_s25 = sshll.u32 %s11826_s24, 4  ;;  %s12000_s25 = int_to_ptr.vmem [resolvable:$true] %s519_s25 }
  0x20   : > { %s12002_s27 = sshll.u32 %s11827_s26, 4  ;;  %s14658_s1 = sld [smem:[#allocation46_spill]]  ;;  %s546_s27 = int_to_ptr.vmem [resolvable:$true] %s12002_s27 }
  0x21   : > { %s14655_s23 = scalar_select %p11987_p3, 1, 0 }
  0x22   : > { %p10441_p5 = pneg %p11987_p3 }
  0x23   : > { %14656 = sst [smem:[#allocation43_spill]] %s14655_s23 }
  0x24   : > { %p11996_p6 = pnand %p10441_p5, %p14615_p1 }
  0x26   : > { %s11275_s19 = scalar_lea.hbm %s14658_s1, 32  ;;  %p12012_p8 = pneg %p11996_p6 }
  0x27   : > { %p11276_p7 = scmp.ne.s32.totalorder %s14658_s1, %s11275_s19  ;;  %p11282_p11 = scmp.lt.u32.totalorder %s11275_s19, %s14658_s1 }
  0x29   : > { %p11278_p9 = pnand %p12012_p8, %p11276_p7 }
  0x2b   : > { %p11279_p10 = pneg %p11278_p9 }
  0x2d   : > { %p11284_p12 = pnand %p11282_p11, %p11279_p10 }
  0x2f   : > { %11287 = shalt.err (!%p11284_p12)
}
  0x30   : > { %s11288_s12 = scalar_lea.vmem %s11985_s22, 32  ;;  %p11296_p5 = scmp.lt.s32.totalorder %s11985_s22, %s11985_s22 }
  0x31   : > { %p11289_p13 = scmp.ne.s32.totalorder %s11985_s22, %s11288_s12  ;;  %p11297_p4 = scmp.lt.s32.totalorder %s11288_s12, %s11288_s12 }
  0x33   : > { %p11291_p0 = pnand %p11289_p13, %p12012_p8  ;;  %p11298_p7 = por %p11297_p4, %p11296_p5 }
  0x35   : > { %p11292_p2 = pneg %p11291_p0 }
  0x37   : > { %p11299_p9 = pnand %p11298_p7, %p11292_p2 }
  0x39   : > { %11302 = shalt.err (!%p11299_p9)
}
  0x3a   : > { %s14613_s18 = smov 16   ;;  %s14617_s19 = smov 1  }
  0x3b   : > { %10444 = dma.hbm_to_vmem [thread:$0]  (!%p11996_p6), %s14658_s1, 32, %s11985_s22, [#allocation6], %s14613_s18, %s14613_s18, %s14617_s19  }
  0x3c   : > { %s14660_s4 = sld [smem:[#allocation48_spill]] }
  0x42   : > { %s11303_s12 = scalar_lea.hbm %s14660_s4, 1024 }
  0x43   : > { %p11304_p4 = scmp.ne.s32.totalorder %s14660_s4, %s11303_s12  ;;  %p11310_p12 = scmp.lt.u32.totalorder %s11303_s12, %s14660_s4 }
  0x45   : > { %p11306_p10 = pnand %p11304_p4, %p12012_p8 }
  0x47   : > { %p11307_p11 = pneg %p11306_p10 }
  0x49   : > { %p11312_p13 = pnand %p11310_p12, %p11307_p11 }
  0x4b   : > { %11315 = shalt.err (!%p11312_p13)
}
  0x4c   : > { %s11316_s22 = scalar_lea.vmem %s12000_s25, 1024  ;;  %p11324_p7 = scmp.lt.s32.totalorder %s12000_s25, %s12000_s25 }
  0x4d   : > { %p11317_p0 = scmp.ne.s32.totalorder %s12000_s25, %s11316_s22  ;;  %p11325_p9 = scmp.lt.s32.totalorder %s11316_s22, %s11316_s22 }
  0x4f   : > { %p11319_p2 = pnand %p11317_p0, %p12012_p8  ;;  %p11326_p4 = por %p11325_p9, %p11324_p7 }
  0x51   : > { %p11320_p5 = pneg %p11319_p2 }
  0x53   : > { %p11327_p10 = pnand %p11326_p4, %p11320_p5 }
  0x55   : > { %11330 = shalt.err (!%p11327_p10)
}
  0x56   : > { %s11830_s0 = smov 128   ;;  %s11831_s30 = smov 8  }
  0x57   : > { %10450 = dma.hbm_to_vmem [thread:$0]  (!%p11996_p6), %s14660_s4, 1024, %s12000_s25, [#allocation9], %s11830_s0, %s11830_s0, %s11831_s30  }
  0x58   : > { %s14661_s6 = sld [smem:[#allocation50_spill]] }
  0x5e   : > { %s11331_s29 = scalar_lea.hbm %s14661_s6, 1024 }
  0x5f   : > { %p11332_p11 = scmp.ne.s32.totalorder %s14661_s6, %s11331_s29  ;;  %p11338_p0 = scmp.lt.u32.totalorder %s11331_s29, %s14661_s6 }
  0x61   : > { %p11334_p12 = pnand %p11332_p11, %p12012_p8 }
  0x63   : > { %p11335_p13 = pneg %p11334_p12 }
  0x65   : > { %p11340_p2 = pnand %p11338_p0, %p11335_p13 }
  0x67   : > { %11343 = shalt.err (!%p11340_p2)
}
  0x68   : > { %s11344_s20 = scalar_lea.vmem %s546_s27, 1024  ;;  %p11352_p4 = scmp.lt.s32.totalorder %s546_s27, %s546_s27 }
  0x69   : > { %p11345_p5 = scmp.ne.s32.totalorder %s546_s27, %s11344_s20  ;;  %p11353_p10 = scmp.lt.s32.totalorder %s11344_s20, %s11344_s20 }
  0x6b   : > { %p11347_p7 = pnand %p11345_p5, %p12012_p8  ;;  %p11354_p1 = por %p11353_p10, %p11352_p4 }
  0x6d   : > { %p11348_p9 = pneg %p11347_p7 }
  0x6f   : > { %p11355_p3 = pnand %p11354_p1, %p11348_p9 }
  0x71   : > { %11358 = shalt.err (!%p11355_p3)
}
  0x72   : > { %10456 = dma.hbm_to_vmem [thread:$0]  (!%p11996_p6), %s14661_s6, 1024, %s546_s27, [#allocation12], %s11830_s0, %s11830_s0, %s11831_s30  }
  0x73   : > { %s11832_s2 = smov [#allocation14]   ;;  %s11833_s28 = smov [#allocation17]  }
  0x74   : > { %s571_s23 = sshll.u32 %s11832_s2, 4  ;;  %s597_s29 = sshll.u32 %s11833_s28, 4  ;;  %s572_s23 = int_to_ptr.vmem [resolvable:$true] %s571_s23  ;;  %s598_s29 = int_to_ptr.vmem [resolvable:$true] %s597_s29 }
  0x75   : > { %s14662_s8 = sld [smem:[#allocation51_spill]] }
  0x7b   : > { %s11359_s22 = scalar_lea.hbm %s14662_s8, 32 }
  0x7c   : > { %p11360_p1 = scmp.ne.s32.totalorder %s14662_s8, %s11359_s22  ;;  %p11366_p12 = scmp.lt.u32.totalorder %s11359_s22, %s14662_s8 }
  0x7e   : > { %p11362_p3 = pnand %p11360_p1, %p12012_p8 }
  0x80   : > { %p11363_p11 = pneg %p11362_p3 }
  0x82   : > { %p11368_p13 = pnand %p11366_p12, %p11363_p11 }
  0x84   : > { %11371 = shalt.err (!%p11368_p13)
}
  0x85   : > { %s11372_s27 = scalar_lea.vmem %s572_s23, 32  ;;  %p11380_p7 = scmp.lt.s32.totalorder %s572_s23, %s572_s23 }
  0x86   : > { %p11373_p0 = scmp.ne.s32.totalorder %s572_s23, %s11372_s27  ;;  %p11381_p9 = scmp.lt.s32.totalorder %s11372_s27, %s11372_s27 }
  0x88   : > { %p11375_p2 = pnand %p11373_p0, %p12012_p8  ;;  %p11382_p4 = por %p11381_p9, %p11380_p7 }
  0x8a   : > { %p11376_p5 = pneg %p11375_p2 }
  0x8c   : > { %p11383_p10 = pnand %p11382_p4, %p11376_p5 }
  0x8e   : > { %11386 = shalt.err (!%p11383_p10)
}
  0x8f   : > { %s14663_s19 = smov 1   ;;  %s14664_s18 = smov 16  }
  0x90   : > { %10462 = dma.hbm_to_vmem [thread:$0]  (!%p11996_p6), %s14662_s8, 32, %s572_s23, [#allocation15], %s14664_s18, %s14664_s18, %s14663_s19  }
  0x91   : > { %s11387_s12 = scalar_lea.hbm %s14590_s10, 1024 }
  0x92   : > { %p11388_p1 = scmp.ne.s32.totalorder %s14590_s10, %s11387_s12  ;;  %p11394_p12 = scmp.lt.u32.totalorder %s11387_s12, %s14590_s10 }
  0x94   : > { %p11390_p3 = pnand %p11388_p1, %p12012_p8 }
  0x96   : > { %p11391_p11 = pneg %p11390_p3 }
  0x98   : > { %p11396_p13 = pnand %p11394_p12, %p11391_p11 }
  0x9a   : > { %11399 = shalt.err (!%p11396_p13)
}
  0x9b   : > { %s11400_s1 = scalar_lea.vmem %s598_s29, 1024  ;;  %p11408_p7 = scmp.lt.s32.totalorder %s598_s29, %s598_s29 }
  0x9c   : > { %p11401_p0 = scmp.ne.s32.totalorder %s598_s29, %s11400_s1  ;;  %p11409_p9 = scmp.lt.s32.totalorder %s11400_s1, %s11400_s1 }
  0x9e   : > { %p11403_p2 = pnand %p11401_p0, %p12012_p8  ;;  %p11410_p4 = por %p11409_p9, %p11408_p7 }
  0xa0   : > { %p11404_p5 = pneg %p11403_p2 }
  0xa2   : > { %p11411_p10 = pnand %p11410_p4, %p11404_p5 }
  0xa4   : > { %11414 = shalt.err (!%p11411_p10)
}
  0xa5   : > { %10468 = dma.hbm_to_vmem [thread:$0]  (!%p11996_p6), %s14590_s10, 1024, %s598_s29, [#allocation18], %s11830_s0, %s11830_s0, %s11831_s30  }
  0xa6   : > { %s11834_s28 = smov [#allocation20]   ;;  %s11835_s12 = smov [#allocation23]  }
  0xa7   : > { %s626_s26 = sshll.u32 %s11834_s28, 4  ;;  %s652_s22 = sshll.u32 %s11835_s12, 4  ;;  %s627_s26 = int_to_ptr.vmem [resolvable:$true] %s626_s26  ;;  %s653_s22 = int_to_ptr.vmem [resolvable:$true] %s652_s22 }
  0xa8   : > { %s11415_s27 = scalar_lea.hbm %s14593_s13, 32 }
  0xa9   : > { %p11416_p1 = scmp.ne.s32.totalorder %s14593_s13, %s11415_s27  ;;  %p11422_p12 = scmp.lt.u32.totalorder %s11415_s27, %s14593_s13 }
  0xab   : > { %p11418_p3 = pnand %p11416_p1, %p12012_p8 }
  0xad   : > { %p11419_p11 = pneg %p11418_p3 }
  0xaf   : > { %p11424_p13 = pnand %p11422_p12, %p11419_p11 }
  0xb1   : > { %11427 = shalt.err (!%p11424_p13)
}
  0xb2   : > { %s11428_s29 = scalar_lea.vmem %s627_s26, 32  ;;  %p11436_p7 = scmp.lt.s32.totalorder %s627_s26, %s627_s26 }
  0xb3   : > { %p11429_p0 = scmp.ne.s32.totalorder %s627_s26, %s11428_s29  ;;  %p11437_p9 = scmp.lt.s32.totalorder %s11428_s29, %s11428_s29 }
  0xb5   : > { %p11431_p2 = pnand %p11429_p0, %p12012_p8  ;;  %p11438_p4 = por %p11437_p9, %p11436_p7 }
  0xb7   : > { %p11432_p5 = pneg %p11431_p2 }
  0xb9   : > { %p11439_p10 = pnand %p11438_p4, %p11432_p5 }
  0xbb   : > { %11442 = shalt.err (!%p11439_p10)
}
  0xbc   : > { %10474 = dma.hbm_to_vmem [thread:$0]  (!%p11996_p6), %s14593_s13, 32, %s627_s26, [#allocation21], %s14664_s18, %s14664_s18, %s14663_s19  }
  0xbd   : > { %s11443_s12 = scalar_lea.hbm %s14595_s15, 2048 }
  0xbe   : > { %p11444_p1 = scmp.ne.s32.totalorder %s14595_s15, %s11443_s12  ;;  %p11450_p12 = scmp.lt.u32.totalorder %s11443_s12, %s14595_s15 }
  0xc0   : > { %p11446_p3 = pnand %p11444_p1, %p12012_p8 }
  0xc2   : > { %p11447_p11 = pneg %p11446_p3 }
  0xc4   : > { %p11452_p13 = pnand %p11450_p12, %p11447_p11 }
  0xc6   : > { %11455 = shalt.err (!%p11452_p13)
}
  0xc7   : > { %s11456_s23 = scalar_lea.vmem %s653_s22, 2048  ;;  %p11464_p7 = scmp.lt.s32.totalorder %s653_s22, %s653_s22 }
  0xc8   : > { %p11457_p0 = scmp.ne.s32.totalorder %s653_s22, %s11456_s23  ;;  %p11465_p9 = scmp.lt.s32.totalorder %s11456_s23, %s11456_s23 }
  0xca   : > { %p11459_p2 = pnand %p11457_p0, %p12012_p8  ;;  %p11466_p4 = por %p11465_p9, %p11464_p7 }
  0xcc   : > { %p11460_p5 = pneg %p11459_p2 }
  0xce   : > { %p11467_p10 = pnand %p11466_p4, %p11460_p5 }
  0xd0   : > { %11470 = shalt.err (!%p11467_p10)
}
  0xd1   : > { %10480 = dma.hbm_to_vmem [thread:$0]  (!%p11996_p6), %s14595_s15, 2048, %s653_s22, [#allocation24], %s11830_s0, %s11830_s0, %s11831_s30  }
  0xd2   : > { %s11836_s4 = smov [#allocation7]   ;;  %s11837_s2 = smov [#allocation10]  }
  0xd3   : > { %s506_s6 = sshll.u32 %s11836_s4, 4  ;;  %s532_s28 = sshll.u32 %s11837_s2, 4  ;;  %s507_s6 = int_to_ptr.vmem [resolvable:$true] %s506_s6  ;;  %s533_s28 = int_to_ptr.vmem [resolvable:$true] %s532_s28 }
  0xd4   : > { %s14665_s25 = sld [smem:[#allocation47_spill]] }
  0xda   : > { %s11471_s27 = scalar_lea.hbm %s14665_s25, 32 }
  0xdb   : > { %p11472_p1 = scmp.ne.s32.totalorder %s14665_s25, %s11471_s27  ;;  %p11478_p12 = scmp.lt.u32.totalorder %s11471_s27, %s14665_s25 }
  0xdd   : > { %p11474_p3 = pnand %p11472_p1, %p12012_p8 }
  0xdf   : > { %p11475_p11 = pneg %p11474_p3 }
  0xe1   : > { %p11480_p13 = pnand %p11478_p12, %p11475_p11 }
  0xe3   : > { %11483 = shalt.err (!%p11480_p13)
}
  0xe4   : > { %s11484_s22 = scalar_lea.vmem %s507_s6, 32  ;;  %p11492_p7 = scmp.lt.s32.totalorder %s507_s6, %s507_s6 }
  0xe5   : > { %p11485_p0 = scmp.ne.s32.totalorder %s507_s6, %s11484_s22  ;;  %p11493_p9 = scmp.lt.s32.totalorder %s11484_s22, %s11484_s22 }
  0xe7   : > { %p11487_p2 = pnand %p11485_p0, %p12012_p8  ;;  %p11494_p4 = por %p11493_p9, %p11492_p7 }
  0xe9   : > { %p11488_p5 = pneg %p11487_p2 }
  0xeb   : > { %p11495_p10 = pnand %p11494_p4, %p11488_p5 }
  0xed   : > { %11498 = shalt.err (!%p11495_p10)
}
  0xee   : > { %10447 = dma.hbm_to_vmem [thread:$0]  (!%p11996_p6), %s14665_s25, 32, %s507_s6, [#allocation6], %s14664_s18, %s14664_s18, %s14663_s19  }
  0xef   : > { %s14666_s5 = sld [smem:[#allocation49_spill]] }
  0xf5   : > { %s11499_s12 = scalar_lea.hbm %s14666_s5, 32 }
  0xf6   : > { %p11500_p1 = scmp.ne.s32.totalorder %s14666_s5, %s11499_s12  ;;  %p11506_p12 = scmp.lt.u32.totalorder %s11499_s12, %s14666_s5 }
  0xf8   : > { %p11502_p3 = pnand %p11500_p1, %p12012_p8 }
  0xfa   : > { %p11503_p11 = pneg %p11502_p3 }
  0xfc   : > { %p11508_p13 = pnand %p11506_p12, %p11503_p11 }
  0xfe   : > { %11511 = shalt.err (!%p11508_p13)
}
  0xff   : > { %s11512_s26 = scalar_lea.vmem %s533_s28, 32  ;;  %p11520_p7 = scmp.lt.s32.totalorder %s533_s28, %s533_s28 }
 0x100   : > { %p11513_p0 = scmp.ne.s32.totalorder %s533_s28, %s11512_s26  ;;  %p11521_p9 = scmp.lt.s32.totalorder %s11512_s26, %s11512_s26 }
 0x102   : > { %p11515_p2 = pnand %p11513_p0, %p12012_p8  ;;  %p11522_p4 = por %p11521_p9, %p11520_p7 }
 0x104   : > { %p11516_p5 = pneg %p11515_p2 }
 0x106   : > { %p11523_p10 = pnand %p11522_p4, %p11516_p5 }
 0x108   : > { %11526 = shalt.err (!%p11523_p10)
}
 0x109   : > { %10453 = dma.hbm_to_vmem [thread:$0]  (!%p11996_p6), %s14666_s5, 32, %s533_s28, [#allocation9], %s14664_s18, %s14664_s18, %s14663_s19  }
 0x10a   : > { %s11838_s8 = smov [#allocation13]   ;;  %s11839_s4 = smov [#allocation16]  }
 0x10b   : > { %s558_s29 = sshll.u32 %s11838_s8, 4  ;;  %s584_s2 = sshll.u32 %s11839_s4, 4  ;;  %s559_s29 = int_to_ptr.vmem [resolvable:$true] %s558_s29  ;;  %s585_s2 = int_to_ptr.vmem [resolvable:$true] %s584_s2 }
 0x10c   : > { %s11527_s27 = scalar_lea.hbm %s14587_s7, 32 }
 0x10d   : > { %p11528_p1 = scmp.ne.s32.totalorder %s14587_s7, %s11527_s27  ;;  %p11534_p12 = scmp.lt.u32.totalorder %s11527_s27, %s14587_s7 }
 0x10f   : > { %p11530_p3 = pnand %p11528_p1, %p12012_p8 }
 0x111   : > { %p11531_p11 = pneg %p11530_p3 }
 0x113   : > { %p11536_p13 = pnand %p11534_p12, %p11531_p11 }
 0x115   : > { %11539 = shalt.err (!%p11536_p13)
}
 0x116   : > { %s11540_s28 = scalar_lea.vmem %s559_s29, 32  ;;  %p11548_p7 = scmp.lt.s32.totalorder %s559_s29, %s559_s29 }
 0x117   : > { %p11541_p0 = scmp.ne.s32.totalorder %s559_s29, %s11540_s28  ;;  %p11549_p9 = scmp.lt.s32.totalorder %s11540_s28, %s11540_s28 }
 0x119   : > { %p11543_p2 = pnand %p11541_p0, %p12012_p8  ;;  %p11550_p4 = por %p11549_p9, %p11548_p7 }
 0x11b   : > { %p11544_p5 = pneg %p11543_p2 }
 0x11d   : > { %p11551_p10 = pnand %p11550_p4, %p11544_p5 }
 0x11f   : > { %11554 = shalt.err (!%p11551_p10)
}
 0x120   : > { %10459 = dma.hbm_to_vmem [thread:$0]  (!%p11996_p6), %s14587_s7, 32, %s559_s29, [#allocation12], %s14664_s18, %s14664_s18, %s14663_s19  }
 0x121   : > { %s11555_s20 = scalar_lea.hbm %s14589_s9, 32 }
 0x122   : > { %p11556_p1 = scmp.ne.s32.totalorder %s14589_s9, %s11555_s20  ;;  %p11562_p12 = scmp.lt.u32.totalorder %s11555_s20, %s14589_s9 }
 0x124   : > { %p11558_p3 = pnand %p11556_p1, %p12012_p8 }
 0x126   : > { %p11559_p11 = pneg %p11558_p3 }
 0x128   : > { %p11564_p13 = pnand %p11562_p12, %p11559_p11 }
 0x12a   : > { %11567 = shalt.err (!%p11564_p13)
}
 0x12b   : > { %s11568_s6 = scalar_lea.vmem %s585_s2, 32  ;;  %p11576_p7 = scmp.lt.s32.totalorder %s585_s2, %s585_s2 }
 0x12c   : > { %p11569_p0 = scmp.ne.s32.totalorder %s585_s2, %s11568_s6  ;;  %p11577_p9 = scmp.lt.s32.totalorder %s11568_s6, %s11568_s6 }
 0x12e   : > { %p11571_p2 = pnand %p11569_p0, %p12012_p8  ;;  %p11578_p4 = por %p11577_p9, %p11576_p7 }
 0x130   : > { %p11572_p5 = pneg %p11571_p2 }
 0x132   : > { %p11579_p10 = pnand %p11578_p4, %p11572_p5 }
 0x134   : > { %11582 = shalt.err (!%p11579_p10)
}
 0x135   : > { %10465 = dma.hbm_to_vmem [thread:$0]  (!%p11996_p6), %s14589_s9, 32, %s585_s2, [#allocation15], %s14664_s18, %s14664_s18, %s14663_s19  }
 0x136   : > { %s11840_s22 = smov [#allocation19]   ;;  %s11841_s4 = smov [#allocation22]  }
 0x137   : > { %s610_s8 = sshll.u32 %s11840_s22, 4  ;;  %s639_s12 = sshll.u32 %s11841_s4, 4  ;;  %s611_s8 = int_to_ptr.vmem [resolvable:$true] %s610_s8  ;;  %s640_s12 = int_to_ptr.vmem [resolvable:$true] %s639_s12 }
 0x138   : > { %s11583_s1 = scalar_lea.hbm %s14591_s11, 32 }
 0x139   : > { %p11584_p1 = scmp.ne.s32.totalorder %s14591_s11, %s11583_s1  ;;  %p11590_p12 = scmp.lt.u32.totalorder %s11583_s1, %s14591_s11 }
 0x13b   : > { %p11586_p3 = pnand %p11584_p1, %p12012_p8 }
 0x13d   : > { %p11587_p11 = pneg %p11586_p3 }
 0x13f   : > { %p11592_p13 = pnand %p11590_p12, %p11587_p11 }
 0x141   : > { %11595 = shalt.err (!%p11592_p13)
}
 0x142   : > { %s11596_s2 = scalar_lea.vmem %s611_s8, 32  ;;  %p11604_p7 = scmp.lt.s32.totalorder %s611_s8, %s611_s8 }
 0x143   : > { %p11597_p0 = scmp.ne.s32.totalorder %s611_s8, %s11596_s2  ;;  %p11605_p9 = scmp.lt.s32.totalorder %s11596_s2, %s11596_s2 }
 0x145   : > { %p11599_p2 = pnand %p11597_p0, %p12012_p8  ;;  %p11606_p4 = por %p11605_p9, %p11604_p7 }
 0x147   : > { %p11600_p5 = pneg %p11599_p2 }
 0x149   : > { %p11607_p10 = pnand %p11606_p4, %p11600_p5 }
 0x14b   : > { %11610 = shalt.err (!%p11607_p10)
}
 0x14c   : > { %10471 = dma.hbm_to_vmem [thread:$0]  (!%p11996_p6), %s14591_s11, 32, %s611_s8, [#allocation18], %s14664_s18, %s14664_s18, %s14663_s19  }
 0x14d   : > { %s11611_s27 = scalar_lea.hbm %s14594_s14, 1024 }
 0x14e   : > { %p11612_p1 = scmp.ne.s32.totalorder %s14594_s14, %s11611_s27  ;;  %p11618_p12 = scmp.lt.u32.totalorder %s11611_s27, %s14594_s14 }
 0x150   : > { %p11614_p3 = pnand %p11612_p1, %p12012_p8 }
 0x152   : > { %p11615_p11 = pneg %p11614_p3 }
 0x154   : > { %p11620_p13 = pnand %p11618_p12, %p11615_p11 }
 0x156   : > { %11623 = shalt.err (!%p11620_p13)
}
 0x157   : > { %s11624_s29 = scalar_lea.vmem %s640_s12, 1024  ;;  %p11632_p7 = scmp.lt.s32.totalorder %s640_s12, %s640_s12 }
 0x158   : > { %p11625_p0 = scmp.ne.s32.totalorder %s640_s12, %s11624_s29  ;;  %p11633_p9 = scmp.lt.s32.totalorder %s11624_s29, %s11624_s29 }
 0x15a   : > { %p11627_p2 = pnand %p11625_p0, %p12012_p8  ;;  %p11634_p4 = por %p11633_p9, %p11632_p7 }
 0x15c   : > { %p11628_p5 = pneg %p11627_p2 }
 0x15e   : > { %p11635_p10 = pnand %p11634_p4, %p11628_p5 }
 0x160   : > { %11638 = shalt.err (!%p11635_p10)
}
 0x161   : > { %10477 = dma.hbm_to_vmem [thread:$0]  (!%p11996_p6), %s14594_s14, 1024, %s640_s12, [#allocation21], %s11830_s0, %s11830_s0, %s11831_s30  }
 0x162   : > { %s11842_s8 = smov [#allocation25]   ;;  %s11843_s28 = smov [#allocation26]  }
 0x163   : > { %s666_s2 = sshll.u32 %s11842_s8, 4  ;;  %s677_s22 = sshll.u32 %s11843_s28, 4  ;;  %s667_s2 = int_to_ptr.vmem [resolvable:$true] %s666_s2  ;;  %s678_s22 = int_to_ptr.vmem [resolvable:$true] %s677_s22 }
 0x164   : > { %s11639_s27 = scalar_lea.hbm %s14596_s16, 16 }
 0x165   : > { %p11640_p1 = scmp.ne.s32.totalorder %s14596_s16, %s11639_s27  ;;  %p11646_p12 = scmp.lt.u32.totalorder %s11639_s27, %s14596_s16 }
 0x167   : > { %p11642_p3 = pnand %p11640_p1, %p12012_p8 }
 0x169   : > { %p11643_p11 = pneg %p11642_p3 }
 0x16b   : > { %p11648_p13 = pnand %p11646_p12, %p11643_p11 }
 0x16d   : > { %11651 = shalt.err (!%p11648_p13)
}
 0x16e   : > { %s11652_s12 = scalar_lea.vmem %s667_s2, 16  ;;  %s11659_s29 = scalar_lea.vmem %s667_s2, 32 }
 0x16f   : > { %p11653_p0 = scmp.ne.s32.totalorder %s667_s2, %s11652_s12  ;;  %p11660_p7 = scmp.lt.s32.totalorder %s667_s2, %s667_s2 }
 0x170   : > { %p11661_p9 = scmp.lt.s32.totalorder %s11659_s29, %s11652_s12 }
 0x171   : > { %p11655_p2 = pnand %p11653_p0, %p12012_p8 }
 0x172   : > { %p11662_p4 = por %p11661_p9, %p11660_p7 }
 0x173   : > { %p11656_p5 = pneg %p11655_p2 }
 0x175   : > { %p11663_p10 = pnand %p11662_p4, %p11656_p5 }
 0x177   : > { %11666 = shalt.err (!%p11663_p10)
}
 0x178   : > { %10483 = dma.hbm_to_vmem [thread:$0]  (!%p11996_p6), %s14596_s16, 16, %s667_s2, [#allocation24]  }
 0x179   : > { %s11667_s4 = scalar_lea.hbm %s14597_s17, 16 }
 0x17a   : > { %p11668_p1 = scmp.ne.s32.totalorder %s14597_s17, %s11667_s4  ;;  %p11674_p12 = scmp.lt.u32.totalorder %s11667_s4, %s14597_s17 }
 0x17c   : > { %p11670_p3 = pnand %p11668_p1, %p12012_p8 }
 0x17e   : > { %p11671_p11 = pneg %p11670_p3 }
 0x180   : > { %p11676_p13 = pnand %p11674_p12, %p11671_p11 }
 0x182   : > { %11679 = shalt.err (!%p11676_p13)
}
 0x183   : > { %s11680_s26 = scalar_lea.vmem %s678_s22, 16  ;;  %s11687_s2 = scalar_lea.vmem %s678_s22, 32 }
 0x184   : > { %p11681_p0 = scmp.ne.s32.totalorder %s678_s22, %s11680_s26  ;;  %p11688_p7 = scmp.lt.s32.totalorder %s678_s22, %s678_s22 }
 0x185   : > { %p11689_p9 = scmp.lt.s32.totalorder %s11687_s2, %s11680_s26 }
 0x186   : > { %p11683_p2 = pnand %p11681_p0, %p12012_p8 }
 0x187   : > { %p11690_p4 = por %p11689_p9, %p11688_p7 }
 0x188   : > { %p11684_p5 = pneg %p11683_p2 }
 0x18a   : > { %p11691_p10 = pnand %p11690_p4, %p11684_p5 }
 0x18c   : > { %11694 = shalt.err (!%p11691_p10)
}
 0x18d   : > { %s14667_s29 = sld [smem:[#allocation41_spill]]  ;;  %s14668_s19 = sld [smem:[#allocation40_spill]] }
 0x18e   : > { %s14669_s24 = sld [smem:[#allocation39_spill]]  ;;  %s14670_s18 = sld [smem:[#allocation42_spill]] }
 0x18f   : > { %10486 = dma.hbm_to_vmem [thread:$0]  (!%p11996_p6), %s14597_s17, 16, %s678_s22, [#allocation27]  }
 0x190   : > { %s7950_s8 = sadd.s32 4294967294, %s11823_s21   ;;  %s12332_s3 = sadd.s32 1, %s11823_s21  }
 0x191   : > { %s47_s4 = ssub.s32 %s11823_s21, %s12332_s3  ;;  %p58_p3 = scmp.eq.s32.totalorder %s11823_s21, 0 }
 0x192   : > { %p48_p1 = scmp.eq.s32.totalorder %s47_s4, 0  ;;  %p471_p5 = scmp.eq.s32.totalorder %s7950_s8, 1 }
 0x193   : > { %s50_s28 = sadd.s32 1, %s14667_s29  ;;  %p57_p8 = scmp.ne.s32.totalorder %s14667_s29, %s14668_s19 }
 0x194   : > { %p63_p11 = scmp.ne.s32.totalorder %s14668_s19, %s14669_s24  ;;  %p465_p12 = scmp.eq.s32.totalorder %s14670_s18, 1 }
 0x195   : > { %s12344_s20 = scalar_select %p48_p1, %s14667_s29, %s50_s28  }
 0x196   : > { %p59_p13 = por %p58_p3, %p57_p8  ;;  %p14671_p0 = scmp.eq.s32.totalorder %s14670_s18, 0 }
 0x197   : > { %p12352_p6 = por %p465_p12, %p57_p8  ;;  %p10510_p7 = scmp.lt.s32.totalorder %s11823_s21, 2 }
 0x198   : > { %p12348_p2 = por %p14671_p0, %p63_p11  ;;  %s691_s1 = sand.u32 1, %s14667_s29  }
 0x199   : > { %s14673_s22 = scalar_select %p12352_p6, 1, 0 }
 0x19a   : > { %p12358_p9 = por %p471_p5, %p63_p11  ;;  %s7968_s26 = sshll.u32 %s691_s1, 6 }
 0x19b   : > { %s8388_s2 = sshll.u32 %s11823_s21, 10  ;;  %s14675_s19 = sld [smem:[#allocation44_spill]] }
 0x19c   : > { %s14674_s23 = scalar_select %p12358_p9, 1, 0 }
 0x19d   : > { %s695_s18 = scalar_lea.vmem [#allocation2], %s7968_s26  ;;  %p12368_p4 = pnand %p10510_p7, %p59_p13 }
 0x19e   : > { %s702_s28 = sshll.u32 %s695_s18, 4  ;;  %s12374_s29 = scalar_lea.sflag [#allocation3], %s691_s1  ;;  %s12372_s28 = int_to_ptr.vmem [resolvable:$true] %s702_s28 }
 0x19f   : > { %p11697_p8 = pneg %p12368_p4 }
 0x1a1   : > { %s12366_s24 = scalar_lea.hbm %s14675_s19, %s8388_s2  ;;  %s11700_s6 = scalar_lea.hbm %s14675_s19, 2048 }
 0x1a2   : > { %s11695_s4 = scalar_lea.hbm %s12366_s24, 1024  ;;  %p11701_p11 = scmp.lt.u32.totalorder %s12366_s24, %s14675_s19 }
 0x1a3   : > { %p11696_p10 = scmp.ne.s32.totalorder %s12366_s24, %s11695_s4  ;;  %p11702_p12 = scmp.lt.u32.totalorder %s11700_s6, %s11695_s4 }
 0x1a4   : > { %p11704_p0 = scmp.lt.u32.totalorder %s11695_s4, %s12366_s24 }
 0x1a5   : > { %p11698_p1 = pnand %p11697_p8, %p11696_p10  ;;  %p11703_p13 = por %p11702_p12, %p11701_p11 }
 0x1a7   : > { %p11699_p3 = pneg %p11698_p1  ;;  %p11705_p5 = por %p11704_p0, %p11703_p13 }
 0x1a9   : > { %p11706_p7 = pnand %p11705_p5, %p11699_p3 }
 0x1ab   : > { %11709 = shalt.err (!%p11706_p7)
}
 0x1ac   : > { %s11710_s1 = scalar_lea.vmem %s12372_s28, 1024  ;;  %s11844_s26 = smov [#allocation2]  }
 0x1ad   : > { %p11711_p10 = scmp.ne.s32.totalorder %s12372_s28, %s11710_s1  ;;  %s11715_s2 = sshll.u32 %s11844_s26, 4  ;;  %s11716_s2 = int_to_ptr.vmem [resolvable:$false] %s11715_s2 }
 0x1ae   : > { %s11717_s12 = scalar_lea.vmem %s11716_s2, 2048  ;;  %p11718_p6 = scmp.lt.s32.totalorder %s12372_s28, %s11716_s2 }
 0x1af   : > { %p11713_p1 = pnand %p11711_p10, %p11697_p8  ;;  %p11719_p11 = scmp.lt.s32.totalorder %s11717_s12, %s11710_s1 }
 0x1b1   : > { %p11714_p9 = pneg %p11713_p1  ;;  %p11720_p12 = por %p11719_p11, %p11718_p6 }
 0x1b3   : > { %p11721_p13 = pnand %p11720_p12, %p11714_p9 }
 0x1b5   : > { %11724 = shalt.err (!%p11721_p13)
}
 0x1b6   : > { %10490 = dma.hbm_to_vmem [thread:$0]  (!%p12368_p4), %s12366_s24, 1024, %s12372_s28, %s12374_s29, %s11830_s0, %s11830_s0, %s11831_s30  }
 0x1b7   : > { %s14677_s4 = sld [smem:[#allocation43_spill]] }
 0x1bd   : > { %p14678_p8 = scmp.ne.s32.totalorder %s14677_s4, 0 }
 0x1be   : > { %s14679_s6 = sld [smem:[#allocation40_spill]] (!%p14678_p8) }
 0x1bf   : > { %714 = sbr.rel (%p14678_p8) target bundleno = 8208 (0x2010), region = 96 }
 0x1c4   : > { %s12408_s18 = sand.u32 (!%p14678_p8), 1, %s14679_s6  }
 0x1c5   : > { %s7972_s1 = sshll.u32 (!%p14678_p8), %s12408_s18, 6  ;;  %s717_s26 = scalar_lea.sflag (!%p14678_p8), [#allocation3], %s12408_s18 }
 0x1c6   : > { %s12412_s2 = scalar_lea.vmem [#allocation2], %s7972_s1 }
 0x1c7   : > { %11770 = dma.done.wait (%p12348_p2), %s717_s26, 1024  }
 0x1c8   : > { %11772 = vsyncadd (%p12348_p2), %s717_s26, 4294966272  ;;  %s14680_s8 = sld [smem:[#allocation42_spill]] }
 0x1ce   : > { %p14681_p6 = scmp.eq.s32.totalorder %s14680_s8, 0 }
 0x1d0   : > { %11774 = dma.done.wait (%p14681_p6), [#allocation6], 64   ;;  %p14682_p9 = pmov %p14681_p6 }
 0x1d1   : > { %p14683_p4 = pmov %p14681_p6 }
 0x1d2   : > { %11776 = vsyncadd (%p14682_p9), [#allocation6], 4294967232 }
 0x1d3   : > { %11778 = dma.done.wait (%p14683_p4), [#allocation9], 1056   ;;  %p14684_p3 = pmov %p14683_p4 }
 0x1d5   : > { %11780 = vsyncadd (%p14684_p3), [#allocation9], 4294966240  ;;  %p14685_p0 = pmov %p14684_p3 }
 0x1d7   : > { %11782 = dma.done.wait (%p14685_p0), [#allocation12], 1056   ;;  %p14686_p5 = pmov %p14685_p0 }
 0x1d8   : > { %p14687_p2 = pmov %p14685_p0 }
 0x1d9   : > { %11784 = vsyncadd (%p14686_p5), [#allocation12], 4294966240 }
 0x1da   : > { %11786 = dma.done.wait (%p14687_p2), [#allocation15], 64   ;;  %p14688_p7 = pmov %p14685_p0 }
 0x1db   : > { %p14689_p10 = pmov %p14685_p0 }
 0x1dc   : > { %11788 = vsyncadd (%p14688_p7), [#allocation15], 4294967232 }
 0x1dd   : > { %11790 = dma.done.wait (%p14689_p10), [#allocation18], 1056   ;;  %p14690_p1 = pmov %p14685_p0 }
 0x1de   : > { %p14691_p11 = pmov %p14685_p0 }
 0x1df   : > { %11792 = vsyncadd (%p14690_p1), [#allocation18], 4294966240 }
 0x1e0   : > { %11794 = dma.done.wait (%p14691_p11), [#allocation21], 1056   ;;  %p14692_p12 = pmov %p14685_p0 }
 0x1e1   : > { %p14693_p13 = pmov %p14685_p0 }
 0x1e2   : > { %11796 = vsyncadd (%p14692_p12), [#allocation21], 4294966240 }
 0x1e3   : > { %11798 = dma.done.wait (%p14693_p13), [#allocation24], 2064   ;;  %p14694_p8 = pmov %p14685_p0 }
 0x1e4   : > { %p14695_p6 = pmov %p14685_p0 }
 0x1e5   : > { %11800 = vsyncadd (%p14694_p8), [#allocation24], 4294965232 }
 0x1e6   : > { %11802 = dma.done.wait (%p14695_p6), [#allocation27], 16   ;;  %p14696_p9 = pmov %p14685_p0 }
 0x1e7   : > { %vm845_vm0 = vcmask 261120   ;;  %v835_v0 = vld [vmem:[%s12412_s2] sm:$0xff]  ;;  %v837_v1 = vld [vmem:[%s12412_s2 + $0x10] sm:$0xff]  ;;  %v836_v2 = vld [vmem:[%s12412_s2 + $0x8] sm:$0xff]  ;;  %vm1143_vm1 = vcmask 64512   ;;  %s11845_s0 = smov 96  }
 0x1e8   : > { %11804 = vsyncadd (%p14696_p9), [#allocation27], 4294967280  ;;  %v846_v3 = vsel %vm845_vm0, %v835_v0, 0.0  ;;  %v852_v4 = vsel %vm845_vm0, %v837_v1, 0.0  ;;  %v838_v5 = vld [vmem:[%s12412_s2 + $0x18] sm:$0xff]  ;;  %v849_v6 = vsel %vm845_vm0, %v836_v2, 0.0 }
 0x1e9   : > { %847 = vadd.xlane.f32.xlu0 %v846_v3  ;;  %853 = vadd.xlane.f32.xlu1 %v852_v4  ;;  %v855_v7 = vsel %vm845_vm0, %v838_v5, 0.0  ;;  %v839_v8 = vld [vmem:[%s12412_s2 + $0x20] sm:$0xff]  ;;  %v840_v9 = vld [vmem:[%s12412_s2 + $0x28] sm:$0xff]  ;;  %v841_v12 = vld [vmem:[%s12412_s2 + $0x30] sm:$0xff]  ;;  %s14637_s30 = smov 88   ;;  %s14625_s27 = smov 120  }
 0x1ea   : > { %v858_v10 = vsel %vm845_vm0, %v839_v8, 0.0  ;;  %v861_v11 = vsel %vm845_vm0, %v840_v9, 0.0  ;;  %v842_v13 = vld [vmem:[%s12412_s2 + $0x38] sm:$0xff]  ;;  %v864_v14 = vsel %vm845_vm0, %v841_v12, 0.0  ;;  %v979_v56 = vld [vmem:[#allocation8] sm:$0xff]  ;;  %v980_v57 = vld [vmem:[#allocation8 + $0x8] sm:$0xff] }
 0x1eb   : > { %v867_v15 = vsel %vm845_vm0, %v842_v13, 0.0  ;;  %v9779_v58 = vpack.c.bf16 %v980_v57, %v979_v56  ;;  %v981_v59 = vld [vmem:[#allocation8 + $0x10] sm:$0xff]  ;;  %v982_v60 = vld [vmem:[#allocation8 + $0x18] sm:$0xff]  ;;  %s14623_s24 = smov 80   ;;  %s14621_s28 = smov 112   ;;  %vm12620_vm2 = vmpackc.low %vm1143_vm1, %vm1143_vm1  ;;  %vm1305_vm3 = vcmask 523264  }
 0x1ec   : > { %v9783_v61 = vpack.c.bf16 %v982_v60, %v981_v59  ;;  %s11850_s29 = smov 64   ;;  %s14699_s6 = sld [smem:[#allocation45_spill]] }
 0x1ed   : > { %850 = vadd.xlane.f32.xlu0 %v849_v6  ;;  %856 = vadd.xlane.f32.xlu1 %v855_v7  ;;  %s14633_s26 = smov 72   ;;  %s14627_s12 = smov 104  }
 0x1ee   : > { %9780 = vmatprep.subr.bf16.mxu0 %v9779_v58  ;;  %s14700_s1 = sld [smem:[#allocation52_spill]]  ;;  %s14708_s4 = smov 48  }
 0x1ef   : > { %9782 = vmatpush3.bf16.msra.mxu0 %v9779_v58  ;;  %p14712_p3 = scmp.ne.s32.totalorder %s14673_s22, 0 }
 0x1f0   : > { %9784 = vmatprep.subr.bf16.mxu0 %v9783_v61 }
 0x1f1   : > { %859 = vadd.xlane.f32.xlu0 %v858_v10  ;;  %862 = vadd.xlane.f32.xlu1 %v861_v11 }
 0x1f3   : > { %9786 = vmatpush3.bf16.msra.mxu0 %v9783_v61 }
 0x1f5   : > { %865 = vadd.xlane.f32.xlu0 %v864_v14  ;;  %868 = vadd.xlane.f32.xlu1 %v867_v15 }
 0x276   : > { %v848_v16 = vpop.xlane.xlu0 %847  ;;  %v854_v17 = vpop.xlane.xlu1 %853 }
 0x277   : > { %v871_v18 = vmul.f32 0.03125, %v848_v16  ;;  %v873_v19 = vmul.f32 0.03125, %v854_v17 }
 0x279   : > { %v12466_v20 = vsub.f32 %v835_v0, %v871_v18  ;;  %v12468_v21 = vsub.f32 %v837_v1, %v873_v19 }
 0x27a   : > { %v851_v22 = vpop.xlane.xlu0 %850  ;;  %v857_v23 = vpop.xlane.xlu1 %856 }
 0x27b   : > { %v872_v24 = vmul.f32 0.03125, %v851_v22  ;;  %v874_v25 = vmul.f32 0.03125, %v857_v23  ;;  %v887_v26 = vmul.f32 %v12466_v20, %v12466_v20  ;;  %v889_v27 = vmul.f32 %v12468_v21, %v12468_v21  ;;  %v7989_v22 = vld [vmem:[#allocation5] ss:$0 sm:$0xff] }
 0x27d   : > { %v12474_v28 = vsub.f32 %v836_v2, %v872_v24  ;;  %v12476_v29 = vsub.f32 %v838_v5, %v874_v25  ;;  %v895_v30 = vsel %vm845_vm0, %v887_v26, 0.0  ;;  %v901_v33 = vsel %vm845_vm0, %v889_v27, 0.0  ;;  %v7990_v26 = vld [vmem:[#allocation7] ss:$0 sm:$0xff] }
 0x27e   : > { %896 = vadd.xlane.f32.xlu0 %v895_v30  ;;  %v860_v31 = vpop.xlane.xlu0 %859  ;;  %v863_v32 = vpop.xlane.xlu1 %862 }
 0x27f   : > { %v875_v34 = vmul.f32 0.03125, %v860_v31  ;;  %v876_v35 = vmul.f32 0.03125, %v863_v32  ;;  %v888_v36 = vmul.f32 %v12474_v28, %v12474_v28  ;;  %v890_v37 = vmul.f32 %v12476_v29, %v12476_v29 }
 0x281   : > { %v12484_v38 = vsub.f32 %v839_v8, %v875_v34  ;;  %v12486_v39 = vsub.f32 %v840_v9, %v876_v35  ;;  %v898_v40 = vsel %vm845_vm0, %v888_v36, 0.0  ;;  %v904_v43 = vsel %vm845_vm0, %v890_v37, 0.0 }
 0x282   : > { %902 = vadd.xlane.f32.xlu0 %v901_v33  ;;  %899 = vadd.xlane.f32.xlu1 %v898_v40  ;;  %v866_v41 = vpop.xlane.xlu0 %865  ;;  %v869_v42 = vpop.xlane.xlu1 %868 }
 0x283   : > { %v877_v44 = vmul.f32 0.03125, %v866_v41  ;;  %v878_v45 = vmul.f32 0.03125, %v869_v42  ;;  %v891_v46 = vmul.f32 %v12484_v38, %v12484_v38  ;;  %v892_v47 = vmul.f32 %v12486_v39, %v12486_v39 }
 0x285   : > { %v12494_v48 = vsub.f32 %v841_v12, %v877_v44  ;;  %v12496_v49 = vsub.f32 %v842_v13, %v878_v45  ;;  %v907_v50 = vsel %vm845_vm0, %v891_v46, 0.0  ;;  %v910_v51 = vsel %vm845_vm0, %v892_v47, 0.0 }
 0x286   : > { %905 = vadd.xlane.f32.xlu1 %v904_v43  ;;  %908 = vadd.xlane.f32.xlu0 %v907_v50 }
 0x287   : > { %v893_v52 = vmul.f32 %v12494_v48, %v12494_v48  ;;  %v894_v53 = vmul.f32 %v12496_v49, %v12496_v49 }
 0x289   : > { %v913_v54 = vsel %vm845_vm0, %v893_v52, 0.0  ;;  %v916_v55 = vsel %vm845_vm0, %v894_v53, 0.0 }
 0x28a   : > { %911 = vadd.xlane.f32.xlu1 %v910_v51  ;;  %914 = vadd.xlane.f32.xlu0 %v913_v54 }
 0x28e   : > { %917 = vadd.xlane.f32.xlu1 %v916_v55 }
 0x30b   : > { %v897_v62 = vpop.xlane.xlu0 %896 }
 0x30c   : > { %v919_v63 = vmul.f32 0.03125, %v897_v62 }
 0x30e   : > { %v927_v0 = vadd.f32 1e-05, %v919_v63 }
 0x30f   : > { %v900_v1 = vpop.xlane.xlu1 %899  ;;  %v903_v2 = vpop.xlane.xlu0 %902 }
 0x310   : > { %10911 = vrsqrt.f32 %v927_v0  ;;  %v920_v3 = vmul.f32 0.03125, %v900_v1  ;;  %v921_v4 = vmul.f32 0.03125, %v903_v2 }
 0x312   : > { %v928_v5 = vadd.f32 1e-05, %v920_v3  ;;  %v929_v6 = vadd.f32 1e-05, %v921_v4 }
 0x313   : > { %v906_v7 = vpop.xlane.xlu1 %905  ;;  %v909_v8 = vpop.xlane.xlu0 %908 }
 0x314   : > { %10913 = vrsqrt.f32 %v928_v5  ;;  %v922_v9 = vmul.f32 0.03125, %v906_v7  ;;  %v923_v10 = vmul.f32 0.03125, %v909_v8 }
 0x315   : > { %10915 = vrsqrt.f32 %v929_v6 }
 0x316   : > { %v930_v11 = vadd.f32 1e-05, %v922_v9  ;;  %v931_v12 = vadd.f32 1e-05, %v923_v10 }
 0x317   : > { %v912_v13 = vpop.xlane.xlu1 %911  ;;  %v915_v14 = vpop.xlane.xlu0 %914 }
 0x318   : > { %10917 = vrsqrt.f32 %v930_v11  ;;  %v924_v15 = vmul.f32 0.03125, %v912_v13  ;;  %v925_v16 = vmul.f32 0.03125, %v915_v14 }
 0x319   : > { %10919 = vrsqrt.f32 %v931_v12 }
 0x31a   : > { %v10912_v17 = vpop.eup %10911  ;;  %v932_v18 = vadd.f32 1e-05, %v924_v15  ;;  %v933_v19 = vadd.f32 1e-05, %v925_v16 }
 0x31b   : > { %v918_v23 = vpop.xlane.xlu1 %917  ;;  %v943_v24 = vmul.f32 %v10912_v17, %v12466_v20 }
 0x31c   : > { %10921 = vrsqrt.f32 %v932_v18  ;;  %v926_v25 = vmul.f32 0.03125, %v918_v23 }
 0x31d   : > { %10923 = vrsqrt.f32 %v933_v19  ;;  %v957_v27 = vmul.f32 %v7989_v22, %v943_v24 }
 0x31e   : > { %v10914_v30 = vpop.eup %10913  ;;  %v934_v31 = vadd.f32 1e-05, %v926_v25 }
 0x31f   : > { %v10916_v32 = vpop.eup %10915  ;;  %v971_v33 = vadd.f32 %v7990_v26, %v957_v27  ;;  %v944_v34 = vmul.f32 %v10914_v30, %v12474_v28 }
 0x320   : > { %10925 = vrsqrt.f32 %v934_v31  ;;  %v945_v35 = vmul.f32 %v10916_v32, %v12468_v21 }
 0x321   : > { %8904 = vmatprep.mubr.msk.f32.mxu0 %vm845_vm0, %v971_v33  ;;  %v958_v36 = vmul.f32 %v7989_v22, %v944_v34 }
 0x322   : > { %v10918_v37 = vpop.eup %10917  ;;  %v959_v40 = vmul.f32 %v7989_v22, %v945_v35 }
 0x323   : > { %v10920_v20 = vpop.eup %10919  ;;  %v972_v41 = vadd.f32 %v7990_v26, %v958_v36  ;;  %v946_v42 = vmul.f32 %v10918_v37, %v12476_v29 }
 0x324   : > { %v973_v43 = vadd.f32 %v7990_v26, %v959_v40  ;;  %v947_v44 = vmul.f32 %v10920_v20, %v12484_v38 }
 0x325   : > { %8905 = vmatmul.mubr.msk.f32.vlgmr.msra.gmra.mrb[0].mxu0 %vm845_vm0, %v972_v41  ;;  %v960_v45 = vmul.f32 %v7989_v22, %v946_v42 }
 0x326   : > { %v10922_v46 = vpop.eup %10921  ;;  %8907 = vmatprep.mubr.msk.f32.mxu0 %vm845_vm0, %v973_v43  ;;  %v961_v28 = vmul.f32 %v7989_v22, %v947_v44 }
 0x327   : > { %v10924_v21 = vpop.eup %10923  ;;  %v974_v47 = vadd.f32 %v7990_v26, %v960_v45  ;;  %v948_v50 = vmul.f32 %v10922_v46, %v12486_v39 }
 0x328   : > { %v975_v51 = vadd.f32 %v7990_v26, %v961_v28  ;;  %v949_v52 = vmul.f32 %v10924_v21, %v12494_v48  ;;  %v7991_v48 = vld [vmem:[#allocation10] ss:$0 sm:$0xff] }
 0x329   : > { %8908 = vmatmul.mubr.msk.f32.gmra.mrb[2].mxu0 %vm845_vm0, %v974_v47  ;;  %v962_v29 = vmul.f32 %v7989_v22, %v948_v50 }
 0x32a   : > { %v10926_v53 = vpop.eup %10925  ;;  %8910 = vmatprep.mubr.msk.f32.mxu0 %vm845_vm0, %v975_v51  ;;  %v963_v38 = vmul.f32 %v7989_v22, %v949_v52 }
 0x32b   : > { %v976_v54 = vadd.f32 %v7990_v26, %v962_v29  ;;  %v950_v55 = vmul.f32 %v10926_v53, %v12496_v49 }
 0x32c   : > { %v977_v56 = vadd.f32 %v7990_v26, %v963_v38 }
 0x32d   : > { %8911 = vmatmul.mubr.msk.f32.gmra.mrb[4].mxu0 %vm845_vm0, %v976_v54  ;;  %v964_v57 = vmul.f32 %v7989_v22, %v950_v55 }
 0x32e   : > { %8913 = vmatprep.mubr.msk.f32.mxu0 %vm845_vm0, %v977_v56 }
 0x32f   : > { %v978_v39 = vadd.f32 %v7990_v26, %v964_v57 }
 0x331   : > { %8914 = vmatmul.mubr.msk.f32.gmra.mrb[6].mxu0 %vm845_vm0, %v978_v39 }
 0x3f8   : > { %v8906_v58 = vpop.f32.mrb[0].mxu0 }
 0x3f9   : > { %v12522_v59 = vadd.f32 %v8906_v58, %v7991_v48  ;;  %v1080_v60 = vpop.f32.mrb[1].mxu0 }
 0x3fa   : > { %v12524_v61 = vadd.f32 %v7991_v48, %v1080_v60 }
 0x3fc   : > { %v8909_v62 = vpop.f32.mrb[2].mxu0  ;;  %8932 = vmatprep.mubr.msk.f32.mxu1 %vm1143_vm1, %v12524_v61  ;;  %v12530_v49 = vpack.i.bf16 %v12522_v59, %v12524_v61 }
 0x3fd   : > { %v12532_v63 = vadd.f32 %v8909_v62, %v7991_v48  ;;  %v1090_v0 = vpop.f32.mrb[3].mxu0 }
 0x3fe   : > { %v12534_v1 = vadd.f32 %v7991_v48, %v1090_v0  ;;  %10592 = vrot.lane.b32.xlu0 %v12530_v49, %s11845_s0 }
 0x400   : > { %v8912_v2 = vpop.f32.mrb[4].mxu0  ;;  %v12540_v3 = vpack.i.bf16 %v12532_v63, %v12534_v1 }
 0x401   : > { %v12542_v4 = vadd.f32 %v8912_v2, %v7991_v48  ;;  %v1100_v5 = vpop.f32.mrb[5].mxu0 }
 0x402   : > { %v12544_v6 = vadd.f32 %v7991_v48, %v1100_v5  ;;  %10597 = vrot.lane.b32.xlu1 %v12540_v3, %s11845_s0 }
 0x404   : > { %v8915_v7 = vpop.f32.mrb[6].mxu0  ;;  %v12550_v8 = vpack.i.bf16 %v12542_v4, %v12544_v6 }
 0x405   : > { %v12552_v9 = vadd.f32 %v8915_v7, %v7991_v48  ;;  %v1110_v10 = vpop.f32.mrb[7].mxu0 }
 0x406   : > { %v12554_v11 = vadd.f32 %v7991_v48, %v1110_v10  ;;  %10602 = vrot.lane.b32.xlu1 %v12550_v8, %s11845_s0 }
 0x408   : > { %v12560_v12 = vpack.i.bf16 %v12552_v9, %v12554_v11 }
 0x40a   : > { %10607 = vrot.lane.b32.xlu1 %v12530_v49, %s14637_s30  ;;  %10612 = vrot.lane.b32.xlu0 %v12560_v12, %s11845_s0 }
 0x40e   : > { %10617 = vrot.lane.b32.xlu1 %v12540_v3, %s14637_s30  ;;  %10622 = vrot.lane.b32.xlu0 %v12550_v8, %s14637_s30 }
 0x412   : > { %10627 = vrot.lane.b32.xlu1 %v12560_v12, %s14637_s30  ;;  %1551 = vrot.lane.b32.xlu0 %v12524_v61, %s14625_s27  ;;  %s14709_s30 = smov 40  }
 0x416   : > { %1553 = vrot.lane.b32.xlu1 %v12522_v59, %s14625_s27  ;;  %1555 = vrot.lane.b32.xlu0 %v12534_v1, %s14625_s27 }
 0x41a   : > { %1557 = vrot.lane.b32.xlu1 %v12532_v63, %s14625_s27  ;;  %1559 = vrot.lane.b32.xlu0 %v12544_v6, %s14625_s27 }
 0x41e   : > { %1561 = vrot.lane.b32.xlu1 %v12542_v4, %s14625_s27  ;;  %1563 = vrot.lane.b32.xlu0 %v12554_v11, %s14625_s27 }
 0x422   : > { %1565 = vrot.lane.b32.xlu1 %v12552_v9, %s14625_s27  ;;  %10632 = vrot.lane.b32.xlu0 %v12530_v49, %s14623_s24  ;;  %s14631_s27 = smov 48  }
 0x426   : > { %10637 = vrot.lane.b32.xlu1 %v12540_v3, %s14623_s24  ;;  %10642 = vrot.lane.b32.xlu0 %v12550_v8, %s14623_s24 }
 0x42a   : > { %2246 = vrot.lane.b32.xlu1 %v12522_v59, %s14621_s28  ;;  %2244 = vrot.lane.b32.xlu0 %v12524_v61, %s14621_s28 }
 0x42e   : > { %2250 = vrot.lane.b32.xlu1 %v12532_v63, %s14621_s28  ;;  %2248 = vrot.lane.b32.xlu0 %v12534_v1, %s14621_s28 }
 0x432   : > { %2254 = vrot.lane.b32.xlu1 %v12542_v4, %s14621_s28  ;;  %2252 = vrot.lane.b32.xlu0 %v12544_v6, %s14621_s28 }
 0x436   : > { %2258 = vrot.lane.b32.xlu1 %v12552_v9, %s14621_s28  ;;  %10647 = vrot.lane.b32.xlu0 %v12530_v49, %s11850_s29 }
 0x43a   : > { %10652 = vrot.lane.b32.xlu1 %v12540_v3, %s11850_s29  ;;  %10657 = vrot.lane.b32.xlu0 %v12550_v8, %s11850_s29 }
 0x43e   : > { %10662 = vrot.lane.b32.xlu1 %v12560_v12, %s14623_s24  ;;  %2256 = vrot.lane.b32.xlu0 %v12554_v11, %s14621_s28  ;;  %s14635_s24 = smov 56  }
 0x470   : > { %v10593_v13 = vpop.permute.xlu0 %10592 }
 0x471   : > { %v10595_v14 = vunpack.i.h.bf16 %v10593_v13  ;;  %v10594_v15 = vunpack.i.l.bf16 %v10593_v13 }
 0x473   : > { %v9787_v17 = vpack.c.bf16 %v10595_v14, %v10594_v15 }
 0x474   : > { %v10598_v18 = vpop.permute.xlu1 %10597 }
 0x475   : > { %v10600_v19 = vunpack.i.h.bf16 %v10598_v18  ;;  %v10599_v22 = vunpack.i.l.bf16 %v10598_v18  ;;  %9789 = vmatprep.subr.msk.bf16.mxu1 %vm12620_vm2, %v9787_v17 }
 0x476   : > { %9792 = vmatpush3.bf16.xpose.msk.msra.mxu1 %vm12620_vm2, %v9787_v17 }
 0x477   : > { %v9793_v23 = vpack.c.bf16 %v10600_v19, %v10599_v22 }
 0x478   : > { %v10603_v24 = vpop.permute.xlu1 %10602 }
 0x479   : > { %v10605_v25 = vunpack.i.h.bf16 %v10603_v24  ;;  %v10604_v26 = vunpack.i.l.bf16 %v10603_v24  ;;  %9795 = vmatprep.subr.msk.bf16.mxu1 %vm12620_vm2, %v9793_v23 }
 0x47b   : > { %v9799_v31 = vpack.c.bf16 %v10605_v25, %v10604_v26 }
 0x47c   : > { %v10608_v27 = vpop.permute.xlu1 %10607  ;;  %v10613_v30 = vpop.permute.xlu0 %10612 }
 0x47d   : > { %v10610_v32 = vunpack.i.h.bf16 %v10608_v27  ;;  %v10609_v33 = vunpack.i.l.bf16 %v10608_v27  ;;  %v10615_v37 = vunpack.i.h.bf16 %v10613_v30  ;;  %v10614_v40 = vunpack.i.l.bf16 %v10613_v30 }
 0x47e   : > { %9798 = vmatpush3.bf16.xpose.msk.msra.mxu1 %vm12620_vm2, %v9793_v23 }
 0x47f   : > { %v9827_v34 = vpack.c.bf16 %v10610_v32, %v10609_v33  ;;  %9801 = vmatprep.subr.msk.bf16.mxu1 %vm12620_vm2, %v9799_v31  ;;  %v9805_v45 = vpack.c.bf16 %v10615_v37, %v10614_v40 }
 0x480   : > { %v10618_v35 = vpop.permute.xlu1 %10617  ;;  %v10623_v36 = vpop.permute.xlu0 %10622 }
 0x481   : > { %v10620_v20 = vunpack.i.h.bf16 %v10618_v35  ;;  %v10619_v41 = vunpack.i.l.bf16 %v10618_v35  ;;  %9829 = vmatprep.subr.msk.bf16.mxu0 %vm12620_vm2, %v9827_v34  ;;  %v10625_v46 = vunpack.i.h.bf16 %v10623_v36  ;;  %v10624_v28 = vunpack.i.l.bf16 %v10623_v36 }
 0x482   : > { %9832 = vmatpush3.bf16.xpose.msk.msra.mxu0 %vm12620_vm2, %v9827_v34 }
 0x483   : > { %v9833_v42 = vpack.c.bf16 %v10620_v20, %v10619_v41  ;;  %v9839_v50 = vpack.c.bf16 %v10625_v46, %v10624_v28 }
 0x484   : > { %v10628_v43 = vpop.permute.xlu1 %10627  ;;  %v1552_v44 = vpop.permute.xlu0 %1551 }
 0x485   : > { %9835 = vmatprep.subr.msk.bf16.mxu0 %vm12620_vm2, %v9833_v42  ;;  %8988 = vmatprep.mubr.msk.f32.mxu0 %vm1143_vm1, %v1552_v44  ;;  %v10630_v29 = vunpack.i.h.bf16 %v10628_v43  ;;  %v10629_v53 = vunpack.i.l.bf16 %v10628_v43 }
 0x486   : > { %9804 = vmatpush3.bf16.xpose.msk.msra.mxu1 %vm12620_vm2, %v9799_v31 }
 0x487   : > { %9807 = vmatprep.subr.msk.bf16.mxu1 %vm12620_vm2, %v9805_v45  ;;  %v9845_v55 = vpack.c.bf16 %v10630_v29, %v10629_v53 }
 0x488   : > { %v1554_v21 = vpop.permute.xlu1 %1553  ;;  %v1556_v47 = vpop.permute.xlu0 %1555 }
 0x48a   : > { %9838 = vmatpush3.bf16.xpose.msk.msra.mxu0 %vm12620_vm2, %v9833_v42 }
 0x48b   : > { %9841 = vmatprep.subr.msk.bf16.mxu0 %vm12620_vm2, %v9839_v50 }
 0x48c   : > { %v1558_v51 = vpop.permute.xlu1 %1557  ;;  %v1560_v52 = vpop.permute.xlu0 %1559 }
 0x48e   : > { %9810 = vmatpush3.bf16.xpose.msk.msra.mxu1 %vm12620_vm2, %v9805_v45  ;;  %v1290_v45 = vld [vmem:[%s14699_s6 + $0x8] sm:$0xff] }
 0x490   : > { %v1562_v38 = vpop.permute.xlu1 %1561  ;;  %v1564_v54 = vpop.permute.xlu0 %1563 }
 0x492   : > { %9844 = vmatpush3.bf16.xpose.msk.msra.mxu0 %vm12620_vm2, %v9839_v50 }
 0x493   : > { %9847 = vmatprep.subr.msk.bf16.mxu0 %vm12620_vm2, %v9845_v55 }
 0x494   : > { %v1566_v56 = vpop.permute.xlu1 %1565  ;;  %v10633_v57 = vpop.permute.xlu0 %10632 }
 0x495   : > { %v10635_v39 = vunpack.i.h.bf16 %v10633_v57  ;;  %v10634_v48 = vunpack.i.l.bf16 %v10633_v57  ;;  %8933 = vmatmul.mubr.msk.f32.vlgmr.msra.gmra.mrb[0].mxu1 %vm1143_vm1, %v12522_v59 }
 0x496   : > { %8935 = vmatprep.mubr.msk.f32.mxu1 %vm1143_vm1, %v12534_v1 }
 0x497   : > { %v9867_v62 = vpack.c.bf16 %v10635_v39, %v10634_v48  ;;  %v8041_v39 = vld [vmem:[%s14699_s6 + $0x48] sm:$0xff] }
 0x498   : > { %v10638_v58 = vpop.permute.xlu1 %10637  ;;  %v10643_v60 = vpop.permute.xlu0 %10642 }
 0x499   : > { %8936 = vmatmul.mubr.msk.f32.gmra.mrb[2].mxu1 %vm1143_vm1, %v12532_v63  ;;  %v10640_v5 = vunpack.i.h.bf16 %v10638_v58  ;;  %v10639_v7 = vunpack.i.l.bf16 %v10638_v58  ;;  %v10645_v18 = vunpack.i.h.bf16 %v10643_v60  ;;  %v10644_v19 = vunpack.i.l.bf16 %v10643_v60 }
 0x49a   : > { %8938 = vmatprep.mubr.msk.f32.mxu1 %vm1143_vm1, %v12544_v6  ;;  %9850 = vmatpush3.bf16.xpose.msk.msra.mxu0 %vm12620_vm2, %v9845_v55 }
 0x49b   : > { %9869 = vmatprep.subr.msk.bf16.mxu0 %vm12620_vm2, %v9867_v62  ;;  %v9873_v14 = vpack.c.bf16 %v10640_v5, %v10639_v7  ;;  %v9879_v24 = vpack.c.bf16 %v10645_v18, %v10644_v19  ;;  %v1292_v7 = vld [vmem:[%s14699_s6 + $0x18] sm:$0xff] }
 0x49c   : > { %v2247_v0 = vpop.permute.xlu1 %2246  ;;  %v2245_v2 = vpop.permute.xlu0 %2244 }
 0x49d   : > { %8939 = vmatmul.mubr.msk.f32.gmra.mrb[4].mxu1 %vm1143_vm1, %v12542_v4 }
 0x49e   : > { %8941 = vmatprep.mubr.msk.f32.mxu1 %vm1143_vm1, %v12554_v11 }
 0x4a0   : > { %v2251_v10 = vpop.permute.xlu1 %2250  ;;  %v2249_v13 = vpop.permute.xlu0 %2248 }
 0x4a1   : > { %8942 = vmatmul.mubr.msk.f32.gmra.mrb[6].mxu1 %vm1143_vm1, %v12552_v9  ;;  %8989 = vmatmul.mubr.msk.f32.vlgmr.msra.gmra.mrb[8].mxu0 %vm1143_vm1, %v1554_v21  ;;  %v1289_v21 = vld [vmem:[%s14699_s6] sm:$0xff] }
 0x4a2   : > { %8991 = vmatprep.mubr.msk.f32.mxu0 %vm1143_vm1, %v1556_v47  ;;  %9872 = vmatpush3.bf16.xpose.msk.msra.mxu0 %vm12620_vm2, %v9867_v62  ;;  %v8040_v62 = vld [vmem:[%s14699_s6 + $0x40] sm:$0xff] }
 0x4a3   : > { %9875 = vmatprep.subr.msk.bf16.mxu0 %vm12620_vm2, %v9873_v14 }
 0x4a4   : > { %v2255_v15 = vpop.permute.xlu1 %2254  ;;  %v2253_v17 = vpop.permute.xlu0 %2252 }
 0x4a5   : > { %8992 = vmatmul.mubr.msk.f32.gmra.mrb[10].mxu0 %vm1143_vm1, %v1558_v51 }
 0x4a6   : > { %8994 = vmatprep.mubr.msk.f32.mxu0 %vm1143_vm1, %v1560_v52 }
 0x4a8   : > { %v2259_v22 = vpop.permute.xlu1 %2258  ;;  %v10648_v23 = vpop.permute.xlu0 %10647 }
 0x4a9   : > { %v10650_v25 = vunpack.i.h.bf16 %v10648_v23  ;;  %v10649_v26 = vunpack.i.l.bf16 %v10648_v23  ;;  %8995 = vmatmul.mubr.msk.f32.gmra.mrb[12].mxu0 %vm1143_vm1, %v1562_v38 }
 0x4aa   : > { %8997 = vmatprep.mubr.msk.f32.mxu0 %vm1143_vm1, %v1564_v54  ;;  %9878 = vmatpush3.bf16.xpose.msk.msra.mxu0 %vm12620_vm2, %v9873_v14  ;;  %v8043_v14 = vld [vmem:[%s14699_s6 + $0x58] sm:$0xff] }
 0x4ab   : > { %9881 = vmatprep.subr.msk.bf16.mxu0 %vm12620_vm2, %v9879_v24  ;;  %v9811_v27 = vpack.c.bf16 %v10650_v25, %v10649_v26  ;;  %v1294_v25 = vld [vmem:[%s14699_s6 + $0x28] sm:$0xff] }
 0x4ac   : > { %v10653_v30 = vpop.permute.xlu1 %10652  ;;  %v10658_v31 = vpop.permute.xlu0 %10657 }
 0x4ad   : > { %v10655_v32 = vunpack.i.h.bf16 %v10653_v30  ;;  %v10654_v33 = vunpack.i.l.bf16 %v10653_v30  ;;  %v10660_v34 = vunpack.i.h.bf16 %v10658_v31  ;;  %v10659_v35 = vunpack.i.l.bf16 %v10658_v31  ;;  %9812 = vmatprep.subr.bf16.mxu1 %v9811_v27  ;;  %8998 = vmatmul.mubr.msk.f32.gmra.mrb[14].mxu0 %vm1143_vm1, %v1566_v56 }
 0x4ae   : > { %9814 = vmatpush3.bf16.msra.mxu1 %v9811_v27  ;;  %9072 = vmatprep.mubr.msk.f32.mxu0 %vm1143_vm1, %v2245_v2  ;;  %v1291_v27 = vld [vmem:[%s14699_s6 + $0x10] sm:$0xff] }
 0x4af   : > { %v9815_v36 = vpack.c.bf16 %v10655_v32, %v10654_v33  ;;  %v9819_v41 = vpack.c.bf16 %v10660_v34, %v10659_v35 }
 0x4b0   : > { %v10663_v37 = vpop.permute.xlu1 %10662  ;;  %v2257_v43 = vpop.permute.xlu0 %2256 }
 0x4b1   : > { %v10665_v40 = vunpack.i.h.bf16 %v10663_v37  ;;  %v10664_v20 = vunpack.i.l.bf16 %v10663_v37  ;;  %9816 = vmatprep.subr.bf16.mxu1 %v9815_v36 }
 0x4b2   : > { %9818 = vmatpush3.bf16.msra.mxu1 %v9815_v36  ;;  %9884 = vmatpush3.bf16.xpose.msk.msra.mxu0 %vm12620_vm2, %v9879_v24 }
 0x4b3   : > { %v9885_v42 = vpack.c.bf16 %v10665_v40, %v10664_v20  ;;  %9820 = vmatprep.subr.bf16.mxu1 %v9819_v41  ;;  %v8045_v40 = vld [vmem:[%s14699_s6 + $0x68] sm:$0xff]  ;;  %v8042_v20 = vld [vmem:[%s14699_s6 + $0x50] sm:$0xff] }
 0x4b5   : > { %9887 = vmatprep.subr.msk.bf16.mxu0 %vm12620_vm2, %v9885_v42 }
 0x4b6   : > { %9822 = vmatpush3.bf16.msra.mxu1 %v9819_v41 }
 0x4ba   : > { %9890 = vmatpush3.bf16.xpose.msk.msra.mxu0 %vm12620_vm2, %v9885_v42 }
 0x4c1   : > { %9073 = vmatmul.mubr.msk.f32.vlgmr.msra.gmra.mrb[16].mxu0 %vm1143_vm1, %v2247_v0 }
 0x4c2   : > { %9075 = vmatprep.mubr.msk.f32.mxu0 %vm1143_vm1, %v2249_v13 }
 0x4c5   : > { %9076 = vmatmul.mubr.msk.f32.gmra.mrb[18].mxu0 %vm1143_vm1, %v2251_v10 }
 0x4c6   : > { %9078 = vmatprep.mubr.msk.f32.mxu0 %vm1143_vm1, %v2253_v17 }
 0x4c9   : > { %9079 = vmatmul.mubr.msk.f32.gmra.mrb[20].mxu0 %vm1143_vm1, %v2255_v15 }
 0x4ca   : > { %9081 = vmatprep.mubr.msk.f32.mxu0 %vm1143_vm1, %v2257_v43 }
 0x4cd   : > { %9082 = vmatmul.mubr.msk.f32.gmra.mrb[22].mxu0 %vm1143_vm1, %v2259_v22 }
 0x568   : > { %v8934_v44 = vpop.f32.mrb[0].mxu1 }
 0x569   : > { %v1282_v46 = vmul.f32 0.35355338, %v8934_v44  ;;  %v1242_v28 = vpop.f32.mrb[1].mxu1 }
 0x56a   : > { %v1281_v47 = vmul.f32 0.35355338, %v1242_v28 }
 0x56b   : > { %v12708_v50 = vadd.f32 %v1290_v45, %v1282_v46 }
 0x56c   : > { %v8937_v51 = vpop.f32.mrb[2].mxu1  ;;  %v12710_v52 = vadd.f32 %v1289_v21, %v1281_v47  ;;  %v1296_v47 = vld [vmem:[%s14699_s6 + $0x38] sm:$0xff] }
 0x56d   : > { %v1252_v29 = vpop.f32.mrb[3].mxu1  ;;  %v1309_v53 = vsel %vm1305_vm3, %v12708_v50, -inf  ;;  %v1284_v0 = vmul.f32 0.35355338, %v8937_v51  ;;  %v1293_v51 = vld [vmem:[%s14699_s6 + $0x20] sm:$0xff] }
 0x56e   : > { %1310 = vmax.xlane.f32.xlu1 %v1309_v53  ;;  %v1306_v38 = vsel %vm1305_vm3, %v12710_v52, -inf  ;;  %v1283_v22 = vmul.f32 0.35355338, %v1252_v29 }
 0x56f   : > { %1307 = vmax.xlane.f32.xlu0 %v1306_v38  ;;  %v12736_v24 = vadd.f32 %v1292_v7, %v1284_v0  ;;  %v1295_v7 = vld [vmem:[%s14699_s6 + $0x30] sm:$0xff] }
 0x570   : > { %v8940_v54 = vpop.f32.mrb[4].mxu1  ;;  %v12752_v37 = vadd.f32 %v1291_v27, %v1283_v22 }
 0x571   : > { %v1262_v55 = vpop.f32.mrb[5].mxu1  ;;  %v1286_v15 = vmul.f32 0.35355338, %v8940_v54  ;;  %v1315_v36 = vsel %vm1305_vm3, %v12736_v24, -inf }
 0x572   : > { %v1285_v46 = vmul.f32 0.35355338, %v1262_v55  ;;  %v1312_v28 = vsel %vm1305_vm3, %v12752_v37, -inf }
 0x573   : > { %v12748_v34 = vadd.f32 %v1294_v25, %v1286_v15 }
 0x574   : > { %v8943_v56 = vpop.f32.mrb[6].mxu1  ;;  %v8990_v57 = vpop.f32.mrb[8].mxu0 }
 0x575   : > { %v1721_v48 = vmul.f32 0.35355338, %v8990_v57  ;;  %v1272_v58 = vpop.f32.mrb[7].mxu1  ;;  %v1681_v60 = vpop.f32.mrb[9].mxu0  ;;  %v1288_v42 = vmul.f32 0.35355338, %v8943_v56  ;;  %v12780_v56 = vadd.f32 %v1293_v51, %v1285_v46 }
 0x576   : > { %v1720_v2 = vmul.f32 0.35355338, %v1681_v60  ;;  %v1321_v44 = vsel %vm1305_vm3, %v12748_v34, -inf  ;;  %v8047_v57 = vld [vmem:[%s14699_s6 + $0x78] sm:$0xff] }
 0x577   : > { %v12722_v5 = vadd.f32 %v8041_v39, %v1721_v48  ;;  %v12776_v38 = vadd.f32 %v1296_v47, %v1288_v42  ;;  %v8044_v39 = vld [vmem:[%s14699_s6 + $0x60] sm:$0xff]  ;;  %v1318_v0 = vsel %vm1305_vm3, %v12780_v56, -inf }
 0x578   : > { %v8993_v10 = vpop.f32.mrb[10].mxu0  ;;  %v12727_v13 = vadd.f32 %v8040_v62, %v1720_v2  ;;  %v1287_v62 = vmul.f32 0.35355338, %v1272_v58 }
 0x579   : > { %v1723_v17 = vmul.f32 0.35355338, %v8993_v10  ;;  %v1691_v18 = vpop.f32.mrb[11].mxu0  ;;  %v1748_v19 = vsel %vm1305_vm3, %v12722_v5, -inf  ;;  %v1327_v48 = vsel %vm1305_vm3, %v12776_v38, -inf }
 0x57a   : > { %1749 = vmax.xlane.f32.xlu1 %v1748_v19  ;;  %v1745_v23 = vsel %vm1305_vm3, %v12727_v13, -inf  ;;  %v1722_v35 = vmul.f32 0.35355338, %v1691_v18  ;;  %v12803_v15 = vadd.f32 %v1295_v7, %v1287_v62 }
 0x57b   : > { %1746 = vmax.xlane.f32.xlu0 %v1745_v23  ;;  %v12741_v26 = vadd.f32 %v8043_v14, %v1723_v17 }
 0x57c   : > { %v8996_v30 = vpop.f32.mrb[12].mxu0  ;;  %v12766_v21 = vadd.f32 %v8042_v20, %v1722_v35  ;;  %v1324_v58 = vsel %vm1305_vm3, %v12803_v15, -inf }
 0x57d   : > { %v1725_v31 = vmul.f32 0.35355338, %v8996_v30  ;;  %v1701_v32 = vpop.f32.mrb[13].mxu0  ;;  %v1754_v33 = vsel %vm1305_vm3, %v12741_v26, -inf }
 0x57e   : > { %1755 = vmax.xlane.f32.xlu1 %v1754_v33  ;;  %v1724_v54 = vmul.f32 0.35355338, %v1701_v32  ;;  %v1751_v55 = vsel %vm1305_vm3, %v12766_v21, -inf  ;;  %v8046_v32 = vld [vmem:[%s14699_s6 + $0x70] sm:$0xff] }
 0x57f   : > { %1316 = vmax.xlane.f32.xlu0 %v1315_v36  ;;  %v12762_v45 = vadd.f32 %v8045_v40, %v1725_v31 }
 0x580   : > { %v8999_v41 = vpop.f32.mrb[14].mxu0  ;;  %v12794_v2 = vadd.f32 %v8044_v39, %v1724_v54 }
 0x581   : > { %v1711_v43 = vpop.f32.mrb[15].mxu0  ;;  %v1727_v29 = vmul.f32 0.35355338, %v8999_v41  ;;  %v1760_v53 = vsel %vm1305_vm3, %v12762_v45, -inf }
 0x582   : > { %1322 = vmax.xlane.f32.xlu1 %v1321_v44  ;;  %v1757_v14 = vsel %vm1305_vm3, %v12794_v2, -inf  ;;  %v1726_v31 = vmul.f32 0.35355338, %v1711_v43 }
 0x583   : > { %1313 = vmax.xlane.f32.xlu0 %v1312_v28  ;;  %v12790_v60 = vadd.f32 %v8047_v57, %v1727_v29 }
 0x584   : > { %v12830_v33 = vadd.f32 %v8046_v32, %v1726_v31 }
 0x585   : > { %v1766_v10 = vsel %vm1305_vm3, %v12790_v60, -inf }
 0x586   : > { %1761 = vmax.xlane.f32.xlu1 %v1760_v53  ;;  %v1763_v35 = vsel %vm1305_vm3, %v12830_v33, -inf }
 0x587   : > { %1752 = vmax.xlane.f32.xlu0 %v1751_v55 }
 0x58a   : > { %1328 = vmax.xlane.f32.xlu1 %v1327_v48 }
 0x58b   : > { %1319 = vmax.xlane.f32.xlu0 %v1318_v0 }
 0x58e   : > { %1767 = vmax.xlane.f32.xlu1 %v1766_v10 }
 0x58f   : > { %1758 = vmax.xlane.f32.xlu0 %v1757_v14 }
 0x593   : > { %1325 = vmax.xlane.f32.xlu0 %v1324_v58 }
 0x594   : > { %v12807_v17 = vpop.f32.mrb[16].mxu0 }
 0x595   : > { %v12809_v18 = vpop.f32.mrb[17].mxu0 }
 0x598   : > { %v12811_v19 = vpop.f32.mrb[18].mxu0 }
 0x599   : > { %v12813_v22 = vpop.f32.mrb[19].mxu0 }
 0x59c   : > { %v12815_v23 = vpop.f32.mrb[20].mxu0 }
 0x59d   : > { %v12817_v25 = vpop.f32.mrb[21].mxu0 }
 0x59f   : > { %10667 = vrot.lane.b32.xlu1 %v12560_v12, %s11850_s29 }
 0x5a0   : > { %v12821_v27 = vpop.f32.mrb[22].mxu0 }
 0x5a1   : > { %v12823_v30 = vpop.f32.mrb[23].mxu0 }
 0x5a9   : > { %10672 = vrot.lane.b32.xlu0 %v12530_v49, %s14635_s24 }
 0x5c8   : > { %1764 = vmax.xlane.f32.xlu0 %v1763_v35 }
 0x5de   : > { %10677 = vrot.lane.b32.xlu0 %v12540_v3, %s14635_s24 }
 0x5fb   : > { %v1311_v36 = vpop.xlane.xlu1 %1310 }
 0x5fc   : > { %v1331_v40 = vsub.f32 %v12708_v50, %v1311_v36  ;;  %v1308_v20 = vpop.xlane.xlu0 %1307 }
 0x5fd   : > { %v1330_v41 = vsub.f32 %v12710_v52, %v1308_v20 }
 0x5fe   : > { %v1340_v42 = vmul.f32 1.442695, %v1331_v40 }
 0x5ff   : > { %v1338_v43 = vmul.f32 1.442695, %v1330_v41 }
 0x600   : > { %10927 = vpow2.f32 %v1340_v42 }
 0x601   : > { %10929 = vpow2.f32 %v1338_v43 }
 0x607   : > { %v1750_v44 = vpop.xlane.xlu1 %1749 }
 0x608   : > { %v1770_v46 = vsub.f32 %v12722_v5, %v1750_v44  ;;  %v1747_v28 = vpop.xlane.xlu0 %1746 }
 0x609   : > { %v1769_v47 = vsub.f32 %v12727_v13, %v1747_v28 }
 0x60a   : > { %v12840_v51 = vpop.eup %10927  ;;  %v1779_v29 = vmul.f32 1.442695, %v1770_v46 }
 0x60b   : > { %v12842_v53 = vpop.eup %10929  ;;  %v1777_v54 = vmul.f32 1.442695, %v1769_v47  ;;  %v1756_v50 = vpop.xlane.xlu1 %1755  ;;  %v1357_v52 = vsel %vm1305_vm3, %v12840_v51, 0.0 }
 0x60c   : > { %10931 = vpow2.f32 %v1779_v29  ;;  %v1772_v55 = vsub.f32 %v12741_v26, %v1756_v50  ;;  %v1317_v57 = vpop.xlane.xlu0 %1316  ;;  %1358 = vadd.xlane.f32.xlu1 %v1357_v52  ;;  %v1354_v5 = vsel %vm1305_vm3, %v12842_v53, 0.0 }
 0x60d   : > { %10933 = vpow2.f32 %v1777_v54  ;;  %v1333_v13 = vsub.f32 %v12736_v24, %v1317_v57  ;;  %1355 = vadd.xlane.f32.xlu0 %v1354_v5 }
 0x60e   : > { %v1783_v39 = vmul.f32 1.442695, %v1772_v55 }
 0x60f   : > { %v1344_v48 = vmul.f32 1.442695, %v1333_v13  ;;  %v1323_v62 = vpop.xlane.xlu1 %1322 }
 0x610   : > { %v1314_v0 = vpop.xlane.xlu0 %1313  ;;  %v1335_v10 = vsub.f32 %v12748_v34, %v1323_v62 }
 0x611   : > { %10935 = vpow2.f32 %v1344_v48  ;;  %v1332_v7 = vsub.f32 %v12752_v37, %v1314_v0 }
 0x612   : > { %10937 = vpow2.f32 %v1783_v39  ;;  %v1348_v35 = vmul.f32 1.442695, %v1335_v10 }
 0x613   : > { %v1342_v26 = vmul.f32 1.442695, %v1332_v7  ;;  %v1762_v14 = vpop.xlane.xlu1 %1761 }
 0x614   : > { %v1753_v58 = vpop.xlane.xlu0 %1752  ;;  %v1774_v36 = vsub.f32 %v12762_v45, %v1762_v14 }
 0x615   : > { %10939 = vpow2.f32 %v1342_v26  ;;  %v1771_v31 = vsub.f32 %v12766_v21, %v1753_v58 }
 0x616   : > { %v12853_v32 = vpop.eup %10931  ;;  %v1787_v43 = vmul.f32 1.442695, %v1774_v36 }
 0x617   : > { %v12855_v24 = vpop.eup %10933  ;;  %v1781_v40 = vmul.f32 1.442695, %v1771_v31  ;;  %v1329_v20 = vpop.xlane.xlu1 %1328  ;;  %v1796_v37 = vsel %vm1305_vm3, %v12853_v32, 0.0 }
 0x618   : > { %v1320_v41 = vpop.xlane.xlu0 %1319  ;;  %1797 = vadd.xlane.f32.xlu1 %v1796_v37  ;;  %v1793_v34 = vsel %vm1305_vm3, %v12855_v24, 0.0  ;;  %v1337_v45 = vsub.f32 %v12776_v38, %v1329_v20 }
 0x619   : > { %10941 = vpow2.f32 %v1781_v40  ;;  %v1334_v21 = vsub.f32 %v12780_v56, %v1320_v41  ;;  %1794 = vadd.xlane.f32.xlu0 %v1793_v34 }
 0x61a   : > { %10943 = vpow2.f32 %v1348_v35  ;;  %v1352_v50 = vmul.f32 1.442695, %v1337_v45 }
 0x61b   : > { %v12863_v42 = vpop.eup %10935  ;;  %v1346_v44 = vmul.f32 1.442695, %v1334_v21  ;;  %v1768_v46 = vpop.xlane.xlu1 %1767 }
 0x61c   : > { %v1759_v28 = vpop.xlane.xlu0 %1758  ;;  %v1363_v47 = vsel %vm1305_vm3, %v12863_v42, 0.0  ;;  %v12868_v29 = vpop.eup %10937  ;;  %v1776_v52 = vsub.f32 %v12790_v60, %v1768_v46 }
 0x61d   : > { %10945 = vpow2.f32 %v1346_v44  ;;  %v1773_v54 = vsub.f32 %v12794_v2, %v1759_v28  ;;  %1364 = vadd.xlane.f32.xlu1 %v1363_v47  ;;  %v1802_v39 = vsel %vm1305_vm3, %v12868_v29, 0.0 }
 0x61e   : > { %10947 = vpow2.f32 %v1787_v43  ;;  %v1791_v0 = vmul.f32 1.442695, %v1776_v52 }
 0x61f   : > { %v12871_v56 = vpop.eup %10939  ;;  %v1785_v55 = vmul.f32 1.442695, %v1773_v54  ;;  %v10668_v38 = vpop.permute.xlu1 %10667 }
 0x620   : > { %v10670_v57 = vunpack.i.h.bf16 %v10668_v38  ;;  %v10669_v5 = vunpack.i.l.bf16 %v10668_v38  ;;  %v1326_v13 = vpop.xlane.xlu0 %1325  ;;  %v1360_v48 = vsel %vm1305_vm3, %v12871_v56, 0.0 }
 0x621   : > { %10949 = vpow2.f32 %v1785_v55  ;;  %1803 = vadd.xlane.f32.xlu1 %v1802_v39  ;;  %1361 = vadd.xlane.f32.xlu0 %v1360_v48  ;;  %v1336_v60 = vsub.f32 %v12803_v15, %v1326_v13  ;;  %v2417_v13 = vmul.f32 0.35355338, %v12817_v25  ;;  %v8092_v39 = vld [vmem:[%s14699_s6 + $0xa0] sm:$0xff]  ;;  %v8094_v25 = vld [vmem:[%s14699_s6 + $0xb0] sm:$0xff] }
 0x622   : > { %v9823_v2 = vpack.c.bf16 %v10670_v57, %v10669_v5  ;;  %10951 = vpow2.f32 %v1352_v50 }
 0x623   : > { %v12878_v62 = vpop.eup %10941  ;;  %10953 = vpow2.f32 %v1791_v0  ;;  %v1350_v35 = vmul.f32 1.442695, %v1336_v60  ;;  %v12969_v48 = vadd.f32 %v8092_v39, %v2417_v13 }
 0x624   : > { %9824 = vmatprep.subr.bf16.mxu1 %v9823_v2  ;;  %v10673_v7 = vpop.permute.xlu0 %10672  ;;  %v1799_v10 = vsel %vm1305_vm3, %v12878_v62, 0.0  ;;  %v12883_v26 = vpop.eup %10943 }
 0x625   : > { %v10675_v14 = vunpack.i.h.bf16 %v10673_v7  ;;  %v10674_v58 = vunpack.i.l.bf16 %v10673_v7  ;;  %1800 = vadd.xlane.f32.xlu1 %v1799_v10  ;;  %9826 = vmatpush3.bf16.msra.mxu1 %v9823_v2  ;;  %v1369_v15 = vsel %vm1305_vm3, %v12883_v26, 0.0  ;;  %10955 = vpow2.f32 %v1350_v35 }
 0x626   : > { %v2419_v2 = vmul.f32 0.35355338, %v12823_v30 }
 0x627   : > { %v12885_v31 = vpop.eup %10945  ;;  %v12887_v36 = vpack.c.bf16 %v10675_v14, %v10674_v58 }
 0x628   : > { %v1366_v40 = vsel %vm1305_vm3, %v12885_v31, 0.0  ;;  %v12893_v20 = vpop.eup %10947  ;;  %v12979_v0 = vadd.f32 %v8094_v25, %v2419_v2 }
 0x629   : > { %1370 = vadd.xlane.f32.xlu1 %v1369_v15  ;;  %1367 = vadd.xlane.f32.xlu0 %v1366_v40  ;;  %v1808_v41 = vsel %vm1305_vm3, %v12893_v20, 0.0 }
 0x62a   : > { %9852 = vmatprep.subr.bf16.mxu1 %v12887_v36  ;;  %v2456_v30 = vsel %vm1305_vm3, %v12979_v0, -inf }
 0x62b   : > { %v12896_v37 = vpop.eup %10949 }
 0x62c   : > { %v1805_v34 = vsel %vm1305_vm3, %v12896_v37, 0.0  ;;  %v12902_v21 = vpop.eup %10951 }
 0x62d   : > { %1809 = vadd.xlane.f32.xlu1 %v1808_v41  ;;  %1806 = vadd.xlane.f32.xlu0 %v1805_v34  ;;  %v1375_v43 = vsel %vm1305_vm3, %v12902_v21, 0.0  ;;  %v12906_v45 = vpop.eup %10953  ;;  %v8089_v41 = vld [vmem:[%s14699_s6 + $0x88] sm:$0xff] }
 0x62e   : > { %v1814_v44 = vsel %vm1305_vm3, %v12906_v45, 0.0 }
 0x62f   : > { %v12910_v46 = vpop.eup %10955 }
 0x630   : > { %v1372_v28 = vsel %vm1305_vm3, %v12910_v46, 0.0 }
 0x631   : > { %1376 = vadd.xlane.f32.xlu1 %v1375_v43 }
 0x635   : > { %1815 = vadd.xlane.f32.xlu1 %v1814_v44 }
 0x639   : > { %1373 = vadd.xlane.f32.xlu1 %v1372_v28  ;;  %v2418_v28 = vmul.f32 0.35355338, %v12815_v23 }
 0x643   : > { %10687 = vrot.lane.b32.xlu0 %v12560_v12, %s14635_s24 }
 0x647   : > { %10692 = vrot.lane.b32.xlu0 %v12530_v49, %s14633_s26 }
 0x64b   : > { %10697 = vrot.lane.b32.xlu0 %v12540_v3, %s14633_s26 }
 0x64f   : > { %10702 = vrot.lane.b32.xlu0 %v12550_v8, %s14633_s26 }
 0x653   : > { %2816 = vrot.lane.b32.xlu0 %v12524_v61, %s14627_s12  ;;  %v2413_v61 = vmul.f32 0.35355338, %v12809_v18  ;;  %v2416_v18 = vmul.f32 0.35355338, %v12811_v19 }
 0x655   : > { %v1765_v47 = vpop.xlane.xlu0 %1764 }
 0x656   : > { %v1775_v54 = vsub.f32 %v12830_v33, %v1765_v47 }
 0x657   : > { %2820 = vrot.lane.b32.xlu0 %v12534_v1, %s14627_s12  ;;  %v8088_v1 = vld [vmem:[%s14699_s6 + $0x80] sm:$0xff] }
 0x658   : > { %v1789_v50 = vmul.f32 1.442695, %v1775_v54  ;;  %v12942_v33 = vadd.f32 %v8088_v1, %v2413_v61 }
 0x659   : > { %v10678_v60 = vpop.permute.xlu0 %10677 }
 0x65a   : > { %10957 = vpow2.f32 %v1789_v50  ;;  %v2438_v38 = vsel %vm1305_vm3, %v12942_v33, -inf  ;;  %v10680_v58 = vunpack.i.h.bf16 %v10678_v60  ;;  %v10679_v35 = vunpack.i.l.bf16 %v10678_v60 }
 0x65b   : > { %2824 = vrot.lane.b32.xlu0 %v12544_v6, %s14627_s12  ;;  %v2415_v6 = vmul.f32 0.35355338, %v12813_v22  ;;  %v8091_v22 = vld [vmem:[%s14699_s6 + $0x98] sm:$0xff] }
 0x65c   : > { %v12959_v5 = vadd.f32 %v8091_v22, %v2416_v18  ;;  %v9855_v43 = vpack.c.bf16 %v10680_v58, %v10679_v35 }
 0x65f   : > { %2828 = vrot.lane.b32.xlu0 %v12554_v11, %s14627_s12  ;;  %v8090_v11 = vld [vmem:[%s14699_s6 + $0x90] sm:$0xff] }
 0x660   : > { %v12952_v57 = vadd.f32 %v8090_v11, %v2415_v6 }
 0x662   : > { %v2444_v19 = vsel %vm1305_vm3, %v12952_v57, -inf }
 0x664   : > { %v12931_v52 = vpop.eup %10957 }
 0x665   : > { %v1811_v55 = vsel %vm1305_vm3, %v12931_v52, 0.0 }
 0x666   : > { %1812 = vadd.xlane.f32.xlu1 %v1811_v55 }
 0x677   : > { %10682 = vrot.lane.b32.xlu1 %v12550_v8, %s14635_s24  ;;  %s14711_s24 = sld [smem:[#allocation54_spill]] }
 0x67b   : > { %10707 = vrot.lane.b32.xlu1 %v12560_v12, %s14633_s26  ;;  %s8389_s26 = sshll.u32 %s14680_s8, 8  ;;  %s11856_s8 = smov [#allocation28]  }
 0x67e   : > { %2439 = vmax.xlane.f32.xlu0 %v2438_v38 }
 0x67f   : > { %2818 = vrot.lane.b32.xlu1 %v12522_v59, %s14627_s12  ;;  %v2447_v59 = vsel %vm1305_vm3, %v12959_v5, -inf }
 0x682   : > { %2445 = vmax.xlane.f32.xlu0 %v2444_v19 }
 0x683   : > { %2822 = vrot.lane.b32.xlu1 %v12532_v63, %s14627_s12  ;;  %v2450_v63 = vsel %vm1305_vm3, %v12969_v48, -inf }
 0x686   : > { %2448 = vmax.xlane.f32.xlu0 %v2447_v59 }
 0x687   : > { %2826 = vrot.lane.b32.xlu1 %v12542_v4, %s14627_s12 }
 0x68a   : > { %2451 = vmax.xlane.f32.xlu0 %v2450_v63 }
 0x68b   : > { %2830 = vrot.lane.b32.xlu1 %v12552_v9, %s14627_s12  ;;  %v2414_v9 = vmul.f32 0.35355338, %v12807_v17  ;;  %s14629_s12 = smov 40  }
 0x68d   : > { %v12999_v44 = vadd.f32 %v8089_v41, %v2414_v9 }
 0x68e   : > { %2457 = vmax.xlane.f32.xlu0 %v2456_v30 }
 0x68f   : > { %v2441_v23 = vsel %vm1305_vm3, %v12999_v44, -inf }
 0x699   : > { %v1359_v7 = vpop.xlane.xlu1 %1358 }
 0x69a   : > { %10959 = vrcp.f32 %v1359_v7  ;;  %v1356_v10 = vpop.xlane.xlu0 %1355 }
 0x69b   : > { %10961 = vrcp.f32 %v1356_v10 }
 0x6a4   : > { %v10960_v14 = vpop.eup %10959  ;;  %10712 = vrot.lane.b32.xlu0 %v12530_v49, %s14631_s27 }
 0x6a5   : > { %v10962_v4 = vpop.eup %10961  ;;  %v12989_v15 = vpop.xlane.xlu1 %1797  ;;  %v1381_v34 = vmul.f32 %v10960_v14, %v12840_v51  ;;  %v2420_v51 = vmul.f32 0.35355338, %v12821_v27 }
 0x6a6   : > { %v1379_v40 = vmul.f32 %v10962_v4, %v12842_v53  ;;  %v1795_v47 = vpop.xlane.xlu0 %1794  ;;  %v8093_v53 = vld [vmem:[%s14699_s6 + $0xa8] sm:$0xff] }
 0x6a7   : > { %v13006_v54 = vadd.f32 %v8093_v53, %v2418_v28 }
 0x6a8   : > { %8960 = vmatprep.mubr.msk.f32.mxu1 %vm1305_vm3, %v1379_v40 }
 0x6a9   : > { %8961 = vmatmul.mubr.msk.f32.vlgmr.msra.gmra.mrb[8].mxu1 %vm1305_vm3, %v1381_v34  ;;  %v2453_v27 = vsel %vm1305_vm3, %v13006_v54, -inf }
 0x6aa   : > { %9854 = vmatpush3.bf16.msra.mxu1 %v12887_v36  ;;  %v1365_v17 = vpop.xlane.xlu1 %1364  ;;  %v8095_v36 = vld [vmem:[%s14699_s6 + $0xb8] sm:$0xff] }
 0x6ab   : > { %9856 = vmatprep.subr.bf16.mxu1 %v9855_v43  ;;  %10963 = vrcp.f32 %v1365_v17  ;;  %v13016_v61 = vadd.f32 %v8095_v36, %v2420_v51 }
 0x6ad   : > { %v2459_v18 = vsel %vm1305_vm3, %v13016_v61, -inf }
 0x6ae   : > { %9858 = vmatpush3.bf16.msra.mxu1 %v9855_v43  ;;  %v13009_v50 = vpop.xlane.xlu1 %1803  ;;  %v1362_v55 = vpop.xlane.xlu0 %1361 }
 0x6af   : > { %2442 = vmax.xlane.f32.xlu1 %v2441_v23  ;;  %10965 = vrcp.f32 %v1362_v55 }
 0x6b2   : > { %v1801_v1 = vpop.xlane.xlu1 %1800 }
 0x6b3   : > { %2454 = vmax.xlane.f32.xlu1 %v2453_v27 }
 0x6b5   : > { %v10964_v38 = vpop.eup %10963 }
 0x6b6   : > { %v1371_v6 = vpop.xlane.xlu1 %1370  ;;  %v1368_v11 = vpop.xlane.xlu0 %1367  ;;  %v1385_v2 = vmul.f32 %v10964_v38, %v12863_v42 }
 0x6b7   : > { %10967 = vrcp.f32 %v1371_v6  ;;  %2460 = vmax.xlane.f32.xlu1 %v2459_v18 }
 0x6b8   : > { %10969 = vrcp.f32 %v1368_v11 }
 0x6b9   : > { %v10966_v22 = vpop.eup %10965  ;;  %10971 = vrcp.f32 %v1795_v47 }
 0x6ba   : > { %v13022_v13 = vpop.xlane.xlu1 %1809  ;;  %v1807_v19 = vpop.xlane.xlu0 %1806  ;;  %v1383_v39 = vmul.f32 %v10966_v22, %v12871_v56 }
 0x6bc   : > { %8963 = vmatprep.mubr.msk.f32.mxu1 %vm1305_vm3, %v1383_v39 }
 0x6bd   : > { %8964 = vmatmul.mubr.msk.f32.gmra.mrb[10].mxu1 %vm1305_vm3, %v1385_v2 }
 0x6be   : > { %v1377_v59 = vpop.xlane.xlu1 %1376  ;;  %v10688_v25 = vpop.permute.xlu0 %10687 }
 0x6bf   : > { %10973 = vrcp.f32 %v1377_v59  ;;  %v10690_v6 = vunpack.i.h.bf16 %v10688_v25 }
 0x6c1   : > { %v10968_v63 = vpop.eup %10967 }
 0x6c2   : > { %v10970_v30 = vpop.eup %10969  ;;  %v13028_v60 = vpop.xlane.xlu1 %1815  ;;  %v1389_v10 = vmul.f32 %v10968_v63, %v12883_v26 }
 0x6c3   : > { %v10693_v7 = vpop.permute.xlu0 %10692  ;;  %v1387_v58 = vmul.f32 %v10970_v30, %v12885_v31  ;;  %v10972_v28 = vpop.eup %10971 }
 0x6c4   : > { %v10695_v14 = vunpack.i.h.bf16 %v10693_v7  ;;  %v10694_v4 = vunpack.i.l.bf16 %v10693_v7  ;;  %v1818_v23 = vmul.f32 %v10972_v28, %v12855_v24 }
 0x6c5   : > { %8966 = vmatprep.mubr.msk.f32.mxu1 %vm1305_vm3, %v1387_v58 }
 0x6c6   : > { %v9907_v56 = vpack.c.bf16 %v10695_v14, %v10694_v4  ;;  %8967 = vmatmul.mubr.msk.f32.gmra.mrb[12].mxu1 %vm1305_vm3, %v1389_v10  ;;  %v1374_v42 = vpop.xlane.xlu1 %1373 }
 0x6c7   : > { %v10698_v35 = vpop.permute.xlu0 %10697  ;;  %10975 = vrcp.f32 %v1374_v42 }
 0x6c8   : > { %v10700_v9 = vunpack.i.h.bf16 %v10698_v35  ;;  %v10699_v40 = vunpack.i.l.bf16 %v10698_v35  ;;  %9909 = vmatprep.subr.msk.bf16.mxu0 %vm12620_vm2, %v9907_v56  ;;  %10717 = vrot.lane.b32.xlu1 %v12540_v3, %s14631_s27  ;;  %10977 = vrcp.f32 %v12989_v15 }
 0x6c9   : > { %9912 = vmatpush3.bf16.xpose.msk.msra.mxu0 %vm12620_vm2, %v9907_v56  ;;  %v10974_v17 = vpop.eup %10973  ;;  %10979 = vrcp.f32 %v1801_v1 }
 0x6ca   : > { %v9913_v26 = vpack.c.bf16 %v10700_v9, %v10699_v40  ;;  %v1393_v55 = vmul.f32 %v10974_v17, %v12902_v21  ;;  %10981 = vrcp.f32 %v13009_v50 }
 0x6cb   : > { %v10703_v31 = vpop.permute.xlu0 %10702  ;;  %10983 = vrcp.f32 %v1807_v19 }
 0x6cc   : > { %v10705_v41 = vunpack.i.h.bf16 %v10703_v31  ;;  %v10704_v34 = vunpack.i.l.bf16 %v10703_v31  ;;  %9915 = vmatprep.subr.msk.bf16.mxu0 %vm12620_vm2, %v9913_v26  ;;  %10985 = vrcp.f32 %v13022_v13 }
 0x6ce   : > { %v9919_v47 = vpack.c.bf16 %v10705_v41, %v10704_v34 }
 0x6cf   : > { %v2817_v43 = vpop.permute.xlu0 %2816 }
 0x6d0   : > { %9142 = vmatprep.mubr.msk.f32.mxu0 %vm1143_vm1, %v2817_v43 }
 0x6d1   : > { %9918 = vmatpush3.bf16.xpose.msk.msra.mxu0 %vm12620_vm2, %v9913_v26  ;;  %v10976_v53 = vpop.eup %10975 }
 0x6d2   : > { %9921 = vmatprep.subr.msk.bf16.mxu0 %vm12620_vm2, %v9919_v47  ;;  %v1391_v51 = vmul.f32 %v10976_v53, %v12910_v46  ;;  %v10689_v46 = vunpack.i.l.bf16 %v10688_v25  ;;  %v10978_v1 = vpop.eup %10977 }
 0x6d3   : > { %v2821_v18 = vpop.permute.xlu0 %2820  ;;  %v10980_v59 = vpop.eup %10979  ;;  %v1820_v25 = vmul.f32 %v10978_v1, %v12853_v32 }
 0x6d4   : > { %8969 = vmatprep.mubr.msk.f32.mxu1 %vm1305_vm3, %v1391_v51  ;;  %v9863_v2 = vpack.c.bf16 %v10690_v6, %v10689_v46  ;;  %v10982_v13 = vpop.eup %10981  ;;  %v1822_v63 = vmul.f32 %v10980_v59, %v12878_v62  ;;  %v1547_v59 = vld [vmem:[#allocation11] sm:$0xff] }
 0x6d5   : > { %8970 = vmatmul.mubr.msk.f32.gmra.mrb[14].mxu1 %vm1305_vm3, %v1393_v55  ;;  %v10984_v30 = vpop.eup %10983  ;;  %v1824_v7 = vmul.f32 %v10982_v13, %v12868_v29 }
 0x6d6   : > { %9016 = vmatprep.mubr.msk.f32.mxu1 %vm1305_vm3, %v1818_v23  ;;  %v10986_v10 = vpop.eup %10985  ;;  %v1826_v4 = vmul.f32 %v10984_v30, %v12896_v37 }
 0x6d7   : > { %v2825_v50 = vpop.permute.xlu0 %2824  ;;  %v1828_v32 = vmul.f32 %v10986_v10, %v12893_v20 }
 0x6d9   : > { %9924 = vmatpush3.bf16.xpose.msk.msra.mxu0 %vm12620_vm2, %v9919_v47 }
 0x6f3   : > { %v1813_v36 = vpop.xlane.xlu1 %1812 }
 0x6f4   : > { %10987 = vrcp.f32 %v1813_v36 }
 0x6f5   : > { %10989 = vrcp.f32 %v13028_v60  ;;  %v2829_v60 = vpop.permute.xlu0 %2828 }
 0x6f7   : > { %v10683_v27 = vpop.permute.xlu1 %10682 }
 0x6f8   : > { %v10685_v11 = vunpack.i.h.bf16 %v10683_v27  ;;  %v10684_v21 = vunpack.i.l.bf16 %v10683_v27 }
 0x6fa   : > { %v9859_v24 = vpack.c.bf16 %v10685_v11, %v10684_v21 }
 0x6fb   : > { %v10708_v38 = vpop.permute.xlu1 %10707 }
 0x6fc   : > { %v10710_v22 = vunpack.i.h.bf16 %v10708_v38  ;;  %v10709_v39 = vunpack.i.l.bf16 %v10708_v38  ;;  %9860 = vmatprep.subr.bf16.mxu1 %v9859_v24 }
 0x6fd   : > { %9862 = vmatpush3.bf16.msra.mxu1 %v9859_v24 }
 0x6fe   : > { %v9925_v15 = vpack.c.bf16 %v10710_v22, %v10709_v39  ;;  %9864 = vmatprep.subr.bf16.mxu1 %v9863_v2  ;;  %v10988_v58 = vpop.eup %10987 }
 0x6ff   : > { %v2819_v19 = vpop.permute.xlu1 %2818  ;;  %v10990_v62 = vpop.eup %10989  ;;  %v1830_v29 = vmul.f32 %v10988_v58, %v12931_v52 }
 0x700   : > { %9927 = vmatprep.subr.msk.bf16.mxu0 %vm12620_vm2, %v9925_v15  ;;  %v1832_v9 = vmul.f32 %v10990_v62, %v12906_v45 }
 0x701   : > { %9866 = vmatpush3.bf16.msra.mxu1 %v9863_v2  ;;  %9930 = vmatpush3.bf16.xpose.msk.msra.mxu0 %vm12620_vm2, %v9925_v15  ;;  %v1548_v2 = vld [vmem:[#allocation11 + $0x8] sm:$0xff] }
 0x702   : > { %9028 = vmatprep.subr.mxu1 %v1548_v2 }
 0x703   : > { %v2823_v14 = vpop.permute.xlu1 %2822 }
 0x704   : > { %9017 = vmatmul.mubr.msk.f32.vlgmr.msra.gmra.mrb[16].mxu1 %vm1305_vm3, %v1820_v25 }
 0x705   : > { %9019 = vmatprep.mubr.msk.f32.mxu1 %vm1305_vm3, %v1822_v63  ;;  %9029 = vmatpush3.msra.mxu1 %v1548_v2 }
 0x706   : > { %9042 = vmatprep.subr.mxu1 %v1547_v59 }
 0x707   : > { %v2827_v37 = vpop.permute.xlu1 %2826 }
 0x708   : > { %9020 = vmatmul.mubr.msk.f32.gmra.mrb[18].mxu1 %vm1305_vm3, %v1824_v7  ;;  %9143 = vmatmul.mubr.msk.f32.vlgmr.msra.gmra.mrb[24].mxu0 %vm1143_vm1, %v2819_v19 }
 0x709   : > { %9022 = vmatprep.mubr.msk.f32.mxu1 %vm1305_vm3, %v1826_v4  ;;  %9145 = vmatprep.mubr.msk.f32.mxu0 %vm1143_vm1, %v2821_v18 }
 0x70b   : > { %v2440_v56 = vpop.xlane.xlu0 %2439 }
 0x70c   : > { %v2462_v42 = vsub.f32 %v12942_v33, %v2440_v56  ;;  %9023 = vmatmul.mubr.msk.f32.gmra.mrb[20].mxu1 %vm1305_vm3, %v1828_v32  ;;  %9146 = vmatmul.mubr.msk.f32.gmra.mrb[26].mxu0 %vm1143_vm1, %v2823_v14  ;;  %v2831_v33 = vpop.permute.xlu1 %2830 }
 0x70d   : > { %9025 = vmatprep.mubr.msk.f32.mxu1 %vm1305_vm3, %v1830_v29  ;;  %9148 = vmatprep.mubr.msk.f32.mxu0 %vm1143_vm1, %v2825_v50 }
 0x70e   : > { %v2470_v35 = vmul.f32 1.442695, %v2462_v42 }
 0x70f   : > { %v2446_v40 = vpop.xlane.xlu0 %2445 }
 0x710   : > { %10991 = vpow2.f32 %v2470_v35  ;;  %v2464_v20 = vsub.f32 %v12952_v57, %v2446_v40  ;;  %9026 = vmatmul.mubr.msk.f32.gmra.mrb[22].mxu1 %vm1305_vm3, %v1832_v9  ;;  %9149 = vmatmul.mubr.msk.f32.gmra.mrb[28].mxu0 %vm1143_vm1, %v2827_v37  ;;  %v8129_v40 = vld [vmem:[%s14699_s6 + $0xc8] sm:$0xff] }
 0x711   : > { %9151 = vmatprep.mubr.msk.f32.mxu0 %vm1143_vm1, %v2829_v60 }
 0x712   : > { %v2474_v52 = vmul.f32 1.442695, %v2464_v20 }
 0x713   : > { %v2449_v26 = vpop.xlane.xlu0 %2448 }
 0x714   : > { %10993 = vpow2.f32 %v2474_v52  ;;  %9152 = vmatmul.mubr.msk.f32.gmra.mrb[30].mxu0 %vm1143_vm1, %v2831_v33 }
 0x717   : > { %v2452_v31 = vpop.xlane.xlu0 %2451 }
 0x718   : > { %v2466_v41 = vsub.f32 %v12969_v48, %v2452_v31  ;;  %v2465_v48 = vsub.f32 %v12959_v5, %v2449_v26  ;;  %v8128_v26 = vld [vmem:[%s14699_s6 + $0xc0] sm:$0xff] }
 0x71a   : > { %v13087_v45 = vpop.eup %10991  ;;  %v2478_v34 = vmul.f32 1.442695, %v2466_v41  ;;  %v2476_v55 = vmul.f32 1.442695, %v2465_v48 }
 0x71b   : > { %v2486_v57 = vsel %vm1305_vm3, %v13087_v45, 0.0  ;;  %v2458_v46 = vpop.xlane.xlu0 %2457 }
 0x71c   : > { %10995 = vpow2.f32 %v2478_v34  ;;  %2487 = vadd.xlane.f32.xlu0 %v2486_v57  ;;  %v2468_v5 = vsub.f32 %v12979_v0, %v2458_v46 }
 0x71e   : > { %v13091_v43 = vpop.eup %10993  ;;  %v2482_v18 = vmul.f32 1.442695, %v2468_v5 }
 0x71f   : > { %v2492_v28 = vsel %vm1305_vm3, %v13091_v43, 0.0  ;;  %v10713_v14 = vpop.permute.xlu0 %10712 }
 0x720   : > { %2493 = vadd.xlane.f32.xlu0 %v2492_v28  ;;  %v10715_v4 = vunpack.i.h.bf16 %v10713_v14  ;;  %v10714_v58 = vunpack.i.l.bf16 %v10713_v14 }
 0x722   : > { %v13150_v37 = vpack.c.bf16 %v10715_v4, %v10714_v58 }
 0x726   : > { %v13095_v47 = vpop.eup %10995 }
 0x727   : > { %v2498_v17 = vsel %vm1305_vm3, %v13095_v47, 0.0 }
 0x728   : > { %2499 = vadd.xlane.f32.xlu0 %v2498_v17 }
 0x73c   : > { %v2443_v53 = vpop.xlane.xlu1 %2442 }
 0x73d   : > { %v2463_v51 = vsub.f32 %v12999_v44, %v2443_v53 }
 0x73e   : > { %10722 = vrot.lane.b32.xlu0 %v12550_v8, %s14631_s27 }
 0x73f   : > { %v2472_v23 = vmul.f32 1.442695, %v2463_v51 }
 0x740   : > { %v2455_v36 = vpop.xlane.xlu1 %2454 }
 0x741   : > { %10997 = vpow2.f32 %v2472_v23  ;;  %v2467_v27 = vsub.f32 %v13006_v54, %v2455_v36 }
 0x742   : > { %10999 = vpow2.f32 %v2476_v55  ;;  %v8130_v55 = vld [vmem:[%s14699_s6 + $0xd0] sm:$0xff] }
 0x743   : > { %v2480_v6 = vmul.f32 1.442695, %v2467_v27 }
 0x744   : > { %v2461_v11 = vpop.xlane.xlu1 %2460 }
 0x745   : > { %v2469_v21 = vsub.f32 %v13016_v61, %v2461_v11  ;;  %11001 = vpow2.f32 %v2480_v6  ;;  %v8131_v11 = vld [vmem:[%s14699_s6 + $0xd8] sm:$0xff] }
 0x747   : > { %v2484_v24 = vmul.f32 1.442695, %v2469_v21 }
 0x748   : > { %v13144_v32 = vpop.permute.xlu1 %10717 }
 0x749   : > { %11003 = vpow2.f32 %v2484_v24  ;;  %v10720_v14 = vunpack.i.h.bf16 %v13144_v32  ;;  %v10719_v4 = vunpack.i.l.bf16 %v13144_v32 }
 0x74a   : > { %11005 = vpow2.f32 %v2482_v18 }
 0x74b   : > { %v13106_v44 = vpop.eup %10997 }
 0x74c   : > { %v2489_v38 = vsel %vm1305_vm3, %v13106_v44, 0.0  ;;  %v13110_v22 = vpop.eup %10999 }
 0x74d   : > { %2490 = vadd.xlane.f32.xlu1 %v2489_v38  ;;  %v2495_v54 = vsel %vm1305_vm3, %v13110_v22, 0.0  ;;  %v8133_v38 = vld [vmem:[%s14699_s6 + $0xe8] sm:$0xff] }
 0x74f   : > { %v13114_v39 = vpop.eup %11001 }
 0x750   : > { %v2501_v0 = vsel %vm1305_vm3, %v13114_v39, 0.0 }
 0x751   : > { %2496 = vadd.xlane.f32.xlu1 %v2495_v54 }
 0x753   : > { %v13118_v61 = vpop.eup %11003 }
 0x754   : > { %v2507_v15 = vsel %vm1305_vm3, %v13118_v61, 0.0  ;;  %v13122_v1 = vpop.eup %11005 }
 0x755   : > { %2502 = vadd.xlane.f32.xlu1 %v2501_v0  ;;  %v2504_v50 = vsel %vm1305_vm3, %v13122_v1, 0.0 }
 0x759   : > { %2508 = vadd.xlane.f32.xlu1 %v2507_v15 }
 0x75d   : > { %2505 = vadd.xlane.f32.xlu1 %v2504_v50 }
 0x76e   : > { %10727 = vrot.lane.b32.xlu1 %v12560_v12, %s14631_s27  ;;  %s14534_s27 = scalar_lea.hbm %s14711_s24, %s8389_s26 }
 0x77c   : > { %v13128_v19 = vpop.f32.mrb[8].mxu1 }
 0x77d   : > { %v13130_v25 = vpop.f32.mrb[9].mxu1 }
 0x790   : > { %v13132_v13 = vpop.f32.mrb[10].mxu1 }
 0x791   : > { %v13134_v63 = vpop.f32.mrb[11].mxu1 }
 0x799   : > { %v13136_v30 = vpop.f32.mrb[12].mxu1 }
 0x79a   : > { %v13138_v7 = vpop.f32.mrb[13].mxu1 }
 0x7a8   : > { %v13140_v10 = vpop.f32.mrb[14].mxu1 }
 0x7a9   : > { %v13142_v60 = vpop.f32.mrb[15].mxu1  ;;  %v2488_v62 = vpop.xlane.xlu0 %2487 }
 0x7aa   : > { %11007 = vrcp.f32 %v2488_v62  ;;  %v8134_v62 = vld [vmem:[%s14699_s6 + $0xf0] sm:$0xff] }
 0x7ad   : > { %v13159_v31 = vpop.xlane.xlu0 %2493 }
 0x7b5   : > { %v13174_v36 = vpop.xlane.xlu0 %2499 }
 0x7d7   : > { %v9018_v56 = vpop.f32.mrb[16].mxu1 }
 0x7d8   : > { %v1947_v29 = vpop.f32.mrb[17].mxu1 }
 0x7d9   : > { %9030 = vmatprep.mubr.msk.f32.mxu1 %vm1143_vm1, %v1947_v29 }
 0x7da   : > { %v13147_v42 = vpop.xlane.xlu1 %2490  ;;  %9031 = vmatmul.mubr.msk.f32.vlgmr.msra.gmra.mrb[24].mxu1 %vm1143_vm1, %v9018_v56  ;;  %v8132_v56 = vld [vmem:[%s14699_s6 + $0xe0] sm:$0xff] }
 0x7db   : > { %9043 = vmatpush3.msra.mxu1 %v1547_v59  ;;  %v9021_v35 = vpop.f32.mrb[18].mxu1  ;;  %v9144_v9 = vpop.f32.mrb[24].mxu0  ;;  %11009 = vrcp.f32 %v13147_v42 }
 0x7dc   : > { %9892 = vmatprep.subr.bf16.mxu1 %v13150_v37  ;;  %v2986_v20 = vmul.f32 0.35355338, %v9144_v9  ;;  %v1957_v52 = vpop.f32.mrb[19].mxu1  ;;  %v2946_v33 = vpop.f32.mrb[25].mxu0  ;;  %11011 = vrcp.f32 %v13159_v31 }
 0x7dd   : > { %v2985_v41 = vmul.f32 0.35355338, %v2946_v33  ;;  %9033 = vmatprep.mubr.msk.f32.mxu1 %vm1143_vm1, %v1957_v52 }
 0x7de   : > { %v13162_v34 = vadd.f32 %v8129_v40, %v2986_v20  ;;  %v13164_v57 = vpop.xlane.xlu1 %2496  ;;  %9034 = vmatmul.mubr.msk.f32.gmra.mrb[26].mxu1 %vm1143_vm1, %v9021_v35  ;;  %v10723_v35 = vpop.permute.xlu0 %10722  ;;  %v8135_v40 = vld [vmem:[%s14699_s6 + $0xf8] sm:$0xff] }
 0x7df   : > { %v13167_v28 = vadd.f32 %v8128_v26, %v2985_v41  ;;  %v9024_v17 = vpop.f32.mrb[20].mxu1  ;;  %v9147_v48 = vpop.f32.mrb[26].mxu0  ;;  %11013 = vrcp.f32 %v13164_v57 }
 0x7e0   : > { %v1967_v53 = vpop.f32.mrb[21].mxu1  ;;  %v2956_v51 = vpop.f32.mrb[27].mxu0  ;;  %v3013_v23 = vsel %vm1305_vm3, %v13162_v34, -inf  ;;  %v2988_v27 = vmul.f32 0.35355338, %v9147_v48  ;;  %11015 = vrcp.f32 %v13174_v36 }
 0x7e1   : > { %v2987_v6 = vmul.f32 0.35355338, %v2956_v51  ;;  %3014 = vmax.xlane.f32.xlu1 %v3013_v23  ;;  %9036 = vmatprep.mubr.msk.f32.mxu1 %vm1143_vm1, %v1967_v53  ;;  %v3010_v46 = vsel %vm1305_vm3, %v13167_v28, -inf  ;;  %v9895_v51 = vpack.c.bf16 %v10720_v14, %v10719_v4 }
 0x7e2   : > { %v13182_v21 = vpop.xlane.xlu1 %2502  ;;  %3011 = vmax.xlane.f32.xlu0 %v3010_v46  ;;  %9037 = vmatmul.mubr.msk.f32.gmra.mrb[28].mxu1 %vm1143_vm1, %v9024_v17  ;;  %v13190_v15 = vadd.f32 %v8131_v11, %v2988_v27  ;;  %v10725_v17 = vunpack.i.h.bf16 %v10723_v35  ;;  %v11008_v46 = vpop.eup %11007 }
 0x7e3   : > { %v13185_v5 = vadd.f32 %v8130_v55, %v2987_v6  ;;  %v9027_v24 = vpop.f32.mrb[22].mxu1  ;;  %v9150_v18 = vpop.f32.mrb[28].mxu0  ;;  %11017 = vrcp.f32 %v13182_v21 }
 0x7e4   : > { %v2990_v54 = vmul.f32 0.35355338, %v9150_v18  ;;  %v1977_v0 = vpop.f32.mrb[23].mxu1  ;;  %v2966_v2 = vpop.f32.mrb[29].mxu0  ;;  %v3019_v41 = vsel %vm1305_vm3, %v13190_v15, -inf }
 0x7e5   : > { %v2989_v59 = vmul.f32 0.35355338, %v2966_v2  ;;  %9039 = vmatprep.mubr.msk.f32.mxu1 %vm1143_vm1, %v1977_v0  ;;  %v3016_v50 = vsel %vm1305_vm3, %v13185_v5, -inf }
 0x7e6   : > { %v13197_v58 = vadd.f32 %v8133_v38, %v2990_v54  ;;  %v2509_v29 = vpop.xlane.xlu1 %2508  ;;  %3017 = vmax.xlane.f32.xlu0 %v3016_v50  ;;  %9040 = vmatmul.mubr.msk.f32.gmra.mrb[30].mxu1 %vm1143_vm1, %v9027_v24 }
 0x7e7   : > { %9044 = vmatprep.mubr.msk.f32.mxu1 %vm1143_vm1, %v13130_v25  ;;  %v9153_v9 = vpop.f32.mrb[30].mxu0  ;;  %v13210_v33 = vadd.f32 %v8132_v56, %v2989_v59  ;;  %v10724_v25 = vunpack.i.l.bf16 %v10723_v35 }
 0x7e8   : > { %v2992_v32 = vmul.f32 0.35355338, %v9153_v9  ;;  %v2976_v20 = vpop.f32.mrb[31].mxu0  ;;  %v3025_v52 = vsel %vm1305_vm3, %v13197_v58, -inf }
 0x7e9   : > { %v2991_v26 = vmul.f32 0.35355338, %v2976_v20  ;;  %3026 = vmax.xlane.f32.xlu1 %v3025_v52  ;;  %v9899_v42 = vpack.c.bf16 %v10725_v17, %v10724_v25 }
 0x7ea   : > { %v13214_v48 = vadd.f32 %v8135_v40, %v2992_v32  ;;  %v2506_v53 = vpop.xlane.xlu1 %2505  ;;  %3020 = vmax.xlane.f32.xlu0 %v3019_v41  ;;  %9045 = vmatmul.mubr.msk.f32.vlgmr.msra.gmra.mrb[24].mxu1 %vm1143_vm1, %v13128_v19  ;;  %v3022_v19 = vsel %vm1305_vm3, %v13210_v33, -inf }
 0x7eb   : > { %9894 = vmatpush3.bf16.msra.mxu1 %v13150_v37  ;;  %9047 = vmatprep.mubr.msk.f32.mxu1 %vm1143_vm1, %v13134_v63  ;;  %v13228_v23 = vadd.f32 %v8134_v62, %v2991_v26  ;;  %11019 = vrcp.f32 %v2506_v53 }
 0x7ec   : > { %9896 = vmatprep.subr.bf16.mxu1 %v9895_v51  ;;  %v3031_v55 = vsel %vm1305_vm3, %v13214_v48, -inf  ;;  %11021 = vrcp.f32 %v2509_v29 }
 0x7ed   : > { %3032 = vmax.xlane.f32.xlu1 %v3031_v55  ;;  %v3028_v31 = vsel %vm1305_vm3, %v13228_v23, -inf }
 0x7ee   : > { %v10728_v27 = vpop.permute.xlu1 %10727  ;;  %3023 = vmax.xlane.f32.xlu0 %v3022_v19  ;;  %9048 = vmatmul.mubr.msk.f32.gmra.mrb[26].mxu1 %vm1143_vm1, %v13132_v13  ;;  %v11010_v13 = vpop.eup %11009 }
 0x7ef   : > { %v10730_v63 = vunpack.i.h.bf16 %v10728_v27  ;;  %v10729_v37 = vunpack.i.l.bf16 %v10728_v27  ;;  %9898 = vmatpush3.bf16.msra.mxu1 %v9895_v51  ;;  %9050 = vmatprep.mubr.msk.f32.mxu1 %vm1143_vm1, %v13138_v7  ;;  %v2511_v7 = vmul.f32 %v11008_v46, %v13087_v45  ;;  %v11012_v57 = vpop.eup %11011 }
 0x7f0   : > { %9900 = vmatprep.subr.bf16.mxu1 %v9899_v42  ;;  %v11014_v36 = vpop.eup %11013  ;;  %v2515_v11 = vmul.f32 %v11012_v57, %v13091_v43 }
 0x7f1   : > { %v9903_v6 = vpack.c.bf16 %v10730_v63, %v10729_v37  ;;  %v11016_v21 = vpop.eup %11015  ;;  %v2517_v45 = vmul.f32 %v11014_v36, %v13110_v22  ;;  %v1549_v22 = vld [vmem:[#allocation11 + $0x10] sm:$0xff] }
 0x7f2   : > { %3029 = vmax.xlane.f32.xlu0 %v3028_v31  ;;  %9051 = vmatmul.mubr.msk.f32.gmra.mrb[28].mxu1 %vm1143_vm1, %v13136_v30  ;;  %v2513_v30 = vmul.f32 %v11010_v13, %v13106_v44  ;;  %v2519_v24 = vmul.f32 %v11016_v21, %v13095_v47 }
 0x7f3   : > { %9902 = vmatpush3.bf16.msra.mxu1 %v9899_v42  ;;  %9053 = vmatprep.mubr.msk.f32.mxu1 %vm1143_vm1, %v13142_v60  ;;  %v11018_v60 = vpop.eup %11017 }
 0x7f4   : > { %9904 = vmatprep.subr.bf16.mxu1 %v9903_v6  ;;  %v2521_v43 = vmul.f32 %v11018_v60, %v13114_v39 }
 0x7f6   : > { %9054 = vmatmul.mubr.msk.f32.gmra.mrb[30].mxu1 %vm1143_vm1, %v13140_v10  ;;  %v11020_v10 = vpop.eup %11019 }
 0x7f7   : > { %9906 = vmatpush3.bf16.msra.mxu1 %v9903_v6  ;;  %9100 = vmatprep.mubr.msk.f32.mxu1 %vm1305_vm3, %v2511_v7  ;;  %v11022_v44 = vpop.eup %11021  ;;  %v2523_v18 = vmul.f32 %v11020_v10, %v13122_v1 }
 0x7f8   : > { %v2525_v47 = vmul.f32 %v11022_v44, %v13118_v61  ;;  %9112 = vmatprep.subr.mxu1 %v1549_v22 }
 0x7fa   : > { %9101 = vmatmul.mubr.msk.f32.vlgmr.msra.gmra.mrb[32].mxu1 %vm1305_vm3, %v2513_v30 }
 0x7fb   : > { %9103 = vmatprep.mubr.msk.f32.mxu1 %vm1305_vm3, %v2515_v11  ;;  %9113 = vmatpush3.msra.mxu1 %v1549_v22 }
 0x7fe   : > { %10737 = vrot.lane.b32.xlu1 %v12540_v3, %s14629_s12  ;;  %9104 = vmatmul.mubr.msk.f32.gmra.mrb[34].mxu1 %vm1305_vm3, %v2517_v45 }
 0x7ff   : > { %9106 = vmatprep.mubr.msk.f32.mxu1 %vm1305_vm3, %v2519_v24 }
 0x802   : > { %9107 = vmatmul.mubr.msk.f32.gmra.mrb[36].mxu1 %vm1305_vm3, %v2521_v43 }
 0x803   : > { %9109 = vmatprep.mubr.msk.f32.mxu1 %vm1305_vm3, %v2523_v18 }
 0x806   : > { %9110 = vmatmul.mubr.msk.f32.gmra.mrb[38].mxu1 %vm1305_vm3, %v2525_v47 }
 0x808   : > { %10732 = vrot.lane.b32.xlu0 %v12530_v49, %s14629_s12 }
 0x86e   : > { %v3015_v3 = vpop.xlane.xlu1 %3014 }
 0x86f   : > { %v3035_v39 = vsub.f32 %v13162_v34, %v3015_v3  ;;  %v3012_v38 = vpop.xlane.xlu0 %3011 }
 0x870   : > { %v3034_v1 = vsub.f32 %v13167_v28, %v3012_v38 }
 0x871   : > { %v3044_v54 = vmul.f32 1.442695, %v3035_v39 }
 0x872   : > { %v3042_v0 = vmul.f32 1.442695, %v3034_v1 }
 0x873   : > { %11023 = vpow2.f32 %v3044_v54  ;;  %v3018_v2 = vpop.xlane.xlu0 %3017 }
 0x874   : > { %11025 = vpow2.f32 %v3042_v0  ;;  %v3036_v61 = vsub.f32 %v13185_v5, %v3018_v2 }
 0x876   : > { %v3046_v59 = vmul.f32 1.442695, %v3036_v61  ;;  %v3027_v50 = vpop.xlane.xlu1 %3026 }
 0x877   : > { %v3039_v14 = vsub.f32 %v13197_v58, %v3027_v50  ;;  %v3021_v4 = vpop.xlane.xlu0 %3020 }
 0x878   : > { %11027 = vpow2.f32 %v3046_v59  ;;  %v3037_v49 = vsub.f32 %v13190_v15, %v3021_v4 }
 0x879   : > { %v3052_v56 = vmul.f32 1.442695, %v3039_v14 }
 0x87a   : > { %v3048_v34 = vmul.f32 1.442695, %v3037_v49  ;;  %v3033_v19 = vpop.xlane.xlu1 %3032 }
 0x87b   : > { %11029 = vpow2.f32 %v3052_v56  ;;  %v3024_v29 = vpop.xlane.xlu0 %3023  ;;  %v3041_v27 = vsub.f32 %v13214_v48, %v3033_v19  ;;  %v8152_v19 = vld [vmem:[#allocation13] ss:$0 sm:$0xff] }
 0x87c   : > { %11031 = vpow2.f32 %v3048_v34  ;;  %v3038_v28 = vsub.f32 %v13210_v33, %v3024_v29 }
 0x87d   : > { %v13273_v35 = vpop.eup %11023  ;;  %v3056_v42 = vmul.f32 1.442695, %v3041_v27  ;;  %v11267_v27 = vld [vmem:[%s12412_s2 + $0x8] sm:$0xff] }
 0x87e   : > { %v13275_v9 = vpop.eup %11025  ;;  %v3050_v5 = vmul.f32 1.442695, %v3038_v28  ;;  %v3061_v40 = vsel %vm1305_vm3, %v13273_v35, 0.0 }
 0x87f   : > { %3062 = vadd.xlane.f32.xlu1 %v3061_v40  ;;  %v3030_v58 = vpop.xlane.xlu0 %3029  ;;  %v3058_v15 = vsel %vm1305_vm3, %v13275_v9, 0.0 }
 0x880   : > { %11033 = vpow2.f32 %v3050_v5  ;;  %3059 = vadd.xlane.f32.xlu0 %v3058_v15  ;;  %v3040_v63 = vsub.f32 %v13228_v23, %v3030_v58 }
 0x881   : > { %11035 = vpow2.f32 %v3056_v42 }
 0x882   : > { %v13281_v32 = vpop.eup %11027  ;;  %v3054_v37 = vmul.f32 1.442695, %v3040_v63 }
 0x883   : > { %v10733_v20 = vpop.permute.xlu0 %10732  ;;  %v3064_v52 = vsel %vm1305_vm3, %v13281_v32, 0.0 }
 0x884   : > { %v10735_v33 = vunpack.i.h.bf16 %v10733_v20  ;;  %v10734_v26 = vunpack.i.l.bf16 %v10733_v20  ;;  %3065 = vadd.xlane.f32.xlu0 %v3064_v52  ;;  %11037 = vpow2.f32 %v3054_v37  ;;  %v1550_v52 = vld [vmem:[#allocation11 + $0x18] sm:$0xff] }
 0x885   : > { %v13285_v41 = vpop.eup %11029  ;;  %v11268_v37 = vld [vmem:[%s12412_s2] sm:$0xff] }
 0x886   : > { %v13287_v17 = vpop.eup %11031  ;;  %v3073_v25 = vsel %vm1305_vm3, %v13285_v41, 0.0  ;;  %v9931_v62 = vpack.c.bf16 %v10735_v33, %v10734_v26 }
 0x887   : > { %v3067_v53 = vsel %vm1305_vm3, %v13287_v17, 0.0 }
 0x888   : > { %3068 = vadd.xlane.f32.xlu1 %v3067_v53  ;;  %3074 = vadd.xlane.f32.xlu0 %v3073_v25 }
 0x889   : > { %9932 = vmatprep.subr.bf16.mxu1 %v9931_v62 }
 0x88a   : > { %v13293_v51 = vpop.eup %11033 }
 0x88b   : > { %v3070_v55 = vsel %vm1305_vm3, %v13293_v51, 0.0  ;;  %v13303_v31 = vpop.eup %11035 }
 0x88c   : > { %3071 = vadd.xlane.f32.xlu1 %v3070_v55  ;;  %v3079_v6 = vsel %vm1305_vm3, %v13303_v31, 0.0 }
 0x88e   : > { %v13307_v46 = vpop.eup %11037 }
 0x89d   : > { %10747 = vrot.lane.b32.xlu1 %v12560_v12, %s14629_s12  ;;  %v10738_v12 = vpop.permute.xlu1 %10737 }
 0x89e   : > { %10742 = vrot.lane.b32.xlu0 %v12550_v8, %s14629_s12  ;;  %v3076_v8 = vsel %vm1305_vm3, %v13307_v46, 0.0  ;;  %v10740_v48 = vunpack.i.h.bf16 %v10738_v12  ;;  %v10739_v13 = vunpack.i.l.bf16 %v10738_v12  ;;  %v11269_v12 = vld [vmem:[%s12412_s2 + $0x18] sm:$0xff]  ;;  %s14701_s12 = smov 88  }
 0x8a0   : > { %v9935_v57 = vpack.c.bf16 %v10740_v48, %v10739_v13 }
 0x8bd   : > { %3080 = vadd.xlane.f32.xlu0 %v3079_v6 }
 0x8c1   : > { %3077 = vadd.xlane.f32.xlu1 %v3076_v8 }
 0x8cd   : > { %v9102_v7 = vpop.f32.mrb[32].mxu1 }
 0x8ce   : > { %v2640_v23 = vpop.f32.mrb[33].mxu1 }
 0x8cf   : > { %9114 = vmatprep.mubr.msk.f32.mxu1 %vm1143_vm1, %v2640_v23  ;;  %v11270_v23 = vld [vmem:[%s12412_s2 + $0x10] sm:$0xff] }
 0x8d0   : > { %9115 = vmatmul.mubr.msk.f32.vlgmr.msra.gmra.mrb[24].mxu1 %vm1143_vm1, %v9102_v7 }
 0x8d1   : > { %9934 = vmatpush3.bf16.msra.mxu1 %v9931_v62  ;;  %v9105_v30 = vpop.f32.mrb[34].mxu1 }
 0x8d2   : > { %9936 = vmatprep.subr.bf16.mxu1 %v9935_v57  ;;  %v2650_v36 = vpop.f32.mrb[35].mxu1 }
 0x8d3   : > { %9117 = vmatprep.mubr.msk.f32.mxu1 %vm1143_vm1, %v2650_v36 }
 0x8d4   : > { %9118 = vmatmul.mubr.msk.f32.gmra.mrb[26].mxu1 %vm1143_vm1, %v9105_v30 }
 0x8d5   : > { %9938 = vmatpush3.bf16.msra.mxu1 %v9935_v57  ;;  %v9108_v11 = vpop.f32.mrb[36].mxu1 }
 0x8d6   : > { %v2660_v21 = vpop.f32.mrb[37].mxu1 }
 0x8d7   : > { %9120 = vmatprep.mubr.msk.f32.mxu1 %vm1143_vm1, %v2660_v21 }
 0x8d8   : > { %9121 = vmatmul.mubr.msk.f32.gmra.mrb[28].mxu1 %vm1143_vm1, %v9108_v11 }
 0x8d9   : > { %v9111_v45 = vpop.f32.mrb[38].mxu1 }
 0x8da   : > { %v2670_v60 = vpop.f32.mrb[39].mxu1 }
 0x8db   : > { %9123 = vmatprep.mubr.msk.f32.mxu1 %vm1143_vm1, %v2670_v60 }
 0x8dc   : > { %9124 = vmatmul.mubr.msk.f32.gmra.mrb[30].mxu1 %vm1143_vm1, %v9111_v45  ;;  %v11271_v45 = vld [vmem:[%s12412_s2 + $0x28] sm:$0xff] }
 0x90c   : > { %v3063_v10 = vpop.xlane.xlu1 %3062 }
 0x90d   : > { %v3060_v24 = vpop.xlane.xlu0 %3059 }
 0x90e   : > { %11039 = vrcp.f32 %v3060_v24 }
 0x90f   : > { %11041 = vrcp.f32 %v3063_v10 }
 0x911   : > { %v3066_v43 = vpop.xlane.xlu0 %3065 }
 0x912   : > { %11043 = vrcp.f32 %v3066_v43  ;;  %v11272_v43 = vld [vmem:[%s12412_s2 + $0x20] sm:$0xff] }
 0x915   : > { %v3069_v44 = vpop.xlane.xlu1 %3068  ;;  %v3075_v18 = vpop.xlane.xlu0 %3074 }
 0x916   : > { %11045 = vrcp.f32 %v3069_v44 }
 0x918   : > { %v11040_v47 = vpop.eup %11039 }
 0x919   : > { %v3072_v22 = vpop.xlane.xlu1 %3071  ;;  %v10743_v3 = vpop.permute.xlu0 %10742  ;;  %v3083_v39 = vmul.f32 %v11040_v47, %v13275_v9 }
 0x91a   : > { %v10745_v38 = vunpack.i.h.bf16 %v10743_v3  ;;  %v10744_v1 = vunpack.i.l.bf16 %v10743_v3  ;;  %11047 = vrcp.f32 %v3072_v22  ;;  %v11042_v50 = vpop.eup %11041 }
 0x91b   : > { %9170 = vmatprep.mubr.msk.f32.mxu1 %vm1305_vm3, %v3083_v39  ;;  %11049 = vrcp.f32 %v3075_v18  ;;  %v3085_v4 = vmul.f32 %v11042_v50, %v13273_v35 }
 0x91c   : > { %v9939_v54 = vpack.c.bf16 %v10745_v38, %v10744_v1  ;;  %v11044_v14 = vpop.eup %11043  ;;  %v11273_v1 = vld [vmem:[%s12412_s2 + $0x38] sm:$0xff] }
 0x91d   : > { %v10748_v0 = vpop.permute.xlu1 %10747  ;;  %v3087_v56 = vmul.f32 %v11044_v14, %v13281_v32 }
 0x91e   : > { %v10750_v2 = vunpack.i.h.bf16 %v10748_v0  ;;  %v10749_v61 = vunpack.i.l.bf16 %v10748_v0  ;;  %9940 = vmatprep.subr.bf16.mxu1 %v9939_v54 }
 0x91f   : > { %9942 = vmatpush3.bf16.msra.mxu1 %v9939_v54 }
 0x920   : > { %v9943_v59 = vpack.c.bf16 %v10750_v2, %v10749_v61  ;;  %v11046_v49 = vpop.eup %11045  ;;  %v11274_v2 = vld [vmem:[%s12412_s2 + $0x30] sm:$0xff]  ;;  %s14703_s2 = smov 80  }
 0x921   : > { %v3089_v29 = vmul.f32 %v11046_v49, %v13287_v17 }
 0x922   : > { %9944 = vmatprep.subr.bf16.mxu1 %v9943_v59 }
 0x923   : > { %9946 = vmatpush3.bf16.msra.mxu1 %v9943_v59 }
 0x924   : > { %v11048_v34 = vpop.eup %11047  ;;  %9182 = vmatprep.subr.mxu1 %v1550_v52 }
 0x925   : > { %v11050_v28 = vpop.eup %11049  ;;  %v3091_v9 = vmul.f32 %v11048_v34, %v13293_v51 }
 0x926   : > { %9171 = vmatmul.mubr.msk.f32.vlgmr.msra.gmra.mrb[40].mxu1 %vm1305_vm3, %v3085_v4  ;;  %v3093_v5 = vmul.f32 %v11050_v28, %v13285_v41 }
 0x927   : > { %9173 = vmatprep.mubr.msk.f32.mxu1 %vm1305_vm3, %v3087_v56  ;;  %9183 = vmatpush3.msra.mxu1 %v1550_v52 }
 0x92a   : > { %9174 = vmatmul.mubr.msk.f32.gmra.mrb[42].mxu1 %vm1305_vm3, %v3089_v29 }
 0x92b   : > { %9176 = vmatprep.mubr.msk.f32.mxu1 %vm1305_vm3, %v3091_v9 }
 0x92e   : > { %9177 = vmatmul.mubr.msk.f32.gmra.mrb[44].mxu1 %vm1305_vm3, %v3093_v5 }
 0x94a   : > { %v3081_v35 = vpop.xlane.xlu0 %3080 }
 0x94b   : > { %11051 = vrcp.f32 %v3081_v35 }
 0x94e   : > { %v3078_v40 = vpop.xlane.xlu1 %3077 }
 0x94f   : > { %11053 = vrcp.f32 %v3078_v40 }
 0x955   : > { %v11052_v58 = vpop.eup %11051 }
 0x956   : > { %v3097_v20 = vmul.f32 %v11052_v58, %v13303_v31 }
 0x959   : > { %v11054_v15 = vpop.eup %11053 }
 0x95a   : > { %v3095_v32 = vmul.f32 %v11054_v15, %v13307_v46 }
 0x95c   : > { %9179 = vmatprep.mubr.msk.f32.mxu1 %vm1305_vm3, %v3095_v32 }
 0x95d   : > { %9180 = vmatmul.mubr.msk.f32.gmra.mrb[46].mxu1 %vm1305_vm3, %v3097_v20 }
 0x9f9   : > { %v9172_v33 = vpop.f32.mrb[40].mxu1 }
 0x9fa   : > { %v3212_v26 = vpop.f32.mrb[41].mxu1 }
 0x9fb   : > { %9184 = vmatprep.mubr.msk.f32.mxu1 %vm1143_vm1, %v3212_v26 }
 0x9fc   : > { %9185 = vmatmul.mubr.msk.f32.vlgmr.msra.gmra.mrb[24].mxu1 %vm1143_vm1, %v9172_v33 }
 0x9fd   : > { %v9175_v41 = vpop.f32.mrb[42].mxu1 }
 0x9fe   : > { %v3222_v17 = vpop.f32.mrb[43].mxu1 }
 0x9ff   : > { %9187 = vmatprep.mubr.msk.f32.mxu1 %vm1143_vm1, %v3222_v17 }
 0xa00   : > { %9188 = vmatmul.mubr.msk.f32.gmra.mrb[26].mxu1 %vm1143_vm1, %v9175_v41 }
 0xa01   : > { %v9178_v25 = vpop.f32.mrb[44].mxu1 }
 0xa02   : > { %v3232_v62 = vpop.f32.mrb[45].mxu1 }
 0xa03   : > { %9190 = vmatprep.mubr.msk.f32.mxu1 %vm1143_vm1, %v3232_v62 }
 0xa04   : > { %9191 = vmatmul.mubr.msk.f32.gmra.mrb[28].mxu1 %vm1143_vm1, %v9178_v25 }
 0xa30   : > { %v9181_v53 = vpop.f32.mrb[46].mxu1 }
 0xa31   : > { %v3242_v51 = vpop.f32.mrb[47].mxu1 }
 0xa32   : > { %9193 = vmatprep.mubr.msk.f32.mxu1 %vm1143_vm1, %v3242_v51 }
 0xa33   : > { %9194 = vmatmul.mubr.msk.f32.gmra.mrb[30].mxu1 %vm1143_vm1, %v9181_v53 }
 0xacf   : > { %v9186_v55 = vpop.f32.mrb[24].mxu1 }
 0xad0   : > { %v3389_v42 = vadd.f32 %v11267_v27, %v9186_v55  ;;  %v3341_v63 = vpop.f32.mrb[25].mxu1 }
 0xad1   : > { %v3388_v31 = vadd.f32 %v11268_v37, %v3341_v63 }
 0xad2   : > { %v13345_v6 = vadd.f32 %v8152_v19, %v3389_v42 }
 0xad3   : > { %v13347_v46 = vadd.f32 %v8152_v19, %v3388_v31  ;;  %v9189_v8 = vpop.f32.mrb[26].mxu1 }
 0xad4   : > { %v3391_v48 = vadd.f32 %v11269_v12, %v9189_v8  ;;  %v3351_v13 = vpop.f32.mrb[27].mxu1  ;;  %v3416_v7 = vsel %vm845_vm0, %v13345_v6, 0.0  ;;  %v3545_v12 = vld [vmem:[#allocation17] sm:$0xff] }
 0xad5   : > { %v3390_v57 = vadd.f32 %v11270_v23, %v3351_v13  ;;  %3417 = vadd.xlane.f32.xlu1 %v3416_v7  ;;  %v3413_v30 = vsel %vm845_vm0, %v13347_v46, 0.0  ;;  %v3547_v7 = vld [vmem:[#allocation17 + $0x10] sm:$0xff]  ;;  %v3548_v23 = vld [vmem:[#allocation17 + $0x18] sm:$0xff] }
 0xad6   : > { %v13355_v36 = vadd.f32 %v8152_v19, %v3391_v48  ;;  %3414 = vadd.xlane.f32.xlu0 %v3413_v30  ;;  %v3546_v48 = vld [vmem:[#allocation17 + $0x8] sm:$0xff] }
 0xad7   : > { %v13357_v11 = vadd.f32 %v8152_v19, %v3390_v57  ;;  %v9192_v21 = vpop.f32.mrb[28].mxu1  ;;  %v9947_v13 = vpack.c.bf16 %v3546_v48, %v3545_v12  ;;  %v9951_v57 = vpack.c.bf16 %v3548_v23, %v3547_v7 }
 0xad8   : > { %v3393_v60 = vadd.f32 %v11271_v45, %v9192_v21  ;;  %v3361_v24 = vpop.f32.mrb[29].mxu1  ;;  %v3422_v10 = vsel %vm845_vm0, %v13355_v36, 0.0 }
 0xad9   : > { %v3392_v44 = vadd.f32 %v11272_v43, %v3361_v24  ;;  %3423 = vadd.xlane.f32.xlu1 %v3422_v10  ;;  %v3419_v18 = vsel %vm845_vm0, %v13357_v11, 0.0  ;;  %9948 = vmatprep.subr.bf16.mxu0 %v9947_v13 }
 0xada   : > { %v13365_v47 = vadd.f32 %v8152_v19, %v3393_v60  ;;  %3420 = vadd.xlane.f32.xlu0 %v3419_v18  ;;  %9950 = vmatpush3.bf16.msra.mxu0 %v9947_v13 }
 0xadb   : > { %v13367_v22 = vadd.f32 %v8152_v19, %v3392_v44  ;;  %9952 = vmatprep.subr.bf16.mxu0 %v9951_v57 }
 0xadc   : > { %v3428_v3 = vsel %vm845_vm0, %v13365_v47, 0.0 }
 0xadd   : > { %3429 = vadd.xlane.f32.xlu1 %v3428_v3  ;;  %v3425_v39 = vsel %vm845_vm0, %v13367_v22, 0.0 }
 0xade   : > { %3426 = vadd.xlane.f32.xlu0 %v3425_v39  ;;  %9954 = vmatpush3.bf16.msra.mxu0 %v9951_v57  ;;  %v3725_v39 = vld [vmem:[%s14700_s1] sm:$0xff] }
 0xb06   : > { %v9195_v38 = vpop.f32.mrb[30].mxu1 }
 0xb07   : > { %v3395_v54 = vadd.f32 %v11273_v1, %v9195_v38  ;;  %v3371_v0 = vpop.f32.mrb[31].mxu1  ;;  %v3726_v38 = vld [vmem:[%s14700_s1 + $0x8] sm:$0xff] }
 0xb08   : > { %v3394_v61 = vadd.f32 %v11274_v2, %v3371_v0  ;;  %v9955_v1 = vpack.c.bf16 %v3726_v38, %v3725_v39 }
 0xb09   : > { %v13375_v59 = vadd.f32 %v8152_v19, %v3395_v54 }
 0xb0a   : > { %v13377_v50 = vadd.f32 %v8152_v19, %v3394_v61  ;;  %9956 = vmatprep.subr.bf16.mxu0 %v9955_v1 }
 0xb0b   : > { %v3434_v14 = vsel %vm845_vm0, %v13375_v59, 0.0 }
 0xb0c   : > { %3435 = vadd.xlane.f32.xlu1 %v3434_v14  ;;  %v3431_v4 = vsel %vm845_vm0, %v13377_v50, 0.0 }
 0xb0d   : > { %3432 = vadd.xlane.f32.xlu0 %v3431_v4 }
 0xb62   : > { %v3418_v49 = vpop.xlane.xlu1 %3417 }
 0xb63   : > { %v3438_v56 = vmul.f32 0.03125, %v3418_v49  ;;  %v3415_v34 = vpop.xlane.xlu0 %3414 }
 0xb64   : > { %v3437_v29 = vmul.f32 0.03125, %v3415_v34 }
 0xb65   : > { %v13384_v28 = vsub.f32 %v13345_v6, %v3438_v56 }
 0xb66   : > { %v13387_v9 = vsub.f32 %v13347_v46, %v3437_v29  ;;  %v3424_v5 = vpop.xlane.xlu1 %3423 }
 0xb67   : > { %v3440_v35 = vmul.f32 0.03125, %v3424_v5  ;;  %v3421_v40 = vpop.xlane.xlu0 %3420  ;;  %v3454_v58 = vmul.f32 %v13384_v28, %v13384_v28 }
 0xb68   : > { %v3439_v15 = vmul.f32 0.03125, %v3421_v40  ;;  %v3453_v32 = vmul.f32 %v13387_v9, %v13387_v9 }
 0xb69   : > { %v13394_v20 = vsub.f32 %v13355_v36, %v3440_v35  ;;  %v3464_v52 = vsel %vm845_vm0, %v3454_v58, 0.0 }
 0xb6a   : > { %v13398_v33 = vsub.f32 %v13357_v11, %v3439_v15  ;;  %v3430_v26 = vpop.xlane.xlu1 %3429  ;;  %3465 = vadd.xlane.f32.xlu1 %v3464_v52  ;;  %v3461_v41 = vsel %vm845_vm0, %v3453_v32, 0.0 }
 0xb6b   : > { %v3442_v17 = vmul.f32 0.03125, %v3430_v26  ;;  %v3427_v25 = vpop.xlane.xlu0 %3426  ;;  %3462 = vadd.xlane.f32.xlu0 %v3461_v41  ;;  %v3456_v62 = vmul.f32 %v13394_v20, %v13394_v20 }
 0xb6c   : > { %v3441_v53 = vmul.f32 0.03125, %v3427_v25  ;;  %v3455_v51 = vmul.f32 %v13398_v33, %v13398_v33 }
 0xb6d   : > { %v13406_v55 = vsub.f32 %v13365_v47, %v3442_v17  ;;  %v3470_v19 = vsel %vm845_vm0, %v3456_v62, 0.0  ;;  %v8153_v17 = vld [vmem:[#allocation14] ss:$0 sm:$0xff] }
 0xb6e   : > { %v13410_v27 = vsub.f32 %v13367_v22, %v3441_v53  ;;  %3471 = vadd.xlane.f32.xlu1 %v3470_v19  ;;  %v3467_v42 = vsel %vm845_vm0, %v3455_v51, 0.0  ;;  %v8154_v19 = vld [vmem:[#allocation16] ss:$0 sm:$0xff] }
 0xb6f   : > { %3468 = vadd.xlane.f32.xlu0 %v3467_v42  ;;  %v3458_v63 = vmul.f32 %v13406_v55, %v13406_v55 }
 0xb70   : > { %v3457_v37 = vmul.f32 %v13410_v27, %v13410_v27 }
 0xb71   : > { %v3476_v31 = vsel %vm845_vm0, %v3458_v63, 0.0 }
 0xb72   : > { %3477 = vadd.xlane.f32.xlu1 %v3476_v31  ;;  %v3473_v8 = vsel %vm845_vm0, %v3457_v37, 0.0  ;;  %v3727_v37 = vld [vmem:[%s14700_s1 + $0x10] sm:$0xff]  ;;  %v3728_v31 = vld [vmem:[%s14700_s1 + $0x18] sm:$0xff] }
 0xb73   : > { %3474 = vadd.xlane.f32.xlu0 %v3473_v8  ;;  %v9959_v7 = vpack.c.bf16 %v3728_v31, %v3727_v37 }
 0xb99   : > { %v3436_v30 = vpop.xlane.xlu1 %3435 }
 0xb9a   : > { %v3444_v21 = vmul.f32 0.03125, %v3436_v30  ;;  %v3433_v45 = vpop.xlane.xlu0 %3432  ;;  %v3729_v30 = vld [vmem:[%s14700_s1 + $0x20] sm:$0xff] }
 0xb9b   : > { %v3443_v60 = vmul.f32 0.03125, %v3433_v45 }
 0xb9c   : > { %v13420_v24 = vsub.f32 %v13375_v59, %v3444_v21  ;;  %v3730_v21 = vld [vmem:[%s14700_s1 + $0x28] sm:$0xff] }
 0xb9d   : > { %v13423_v10 = vsub.f32 %v13377_v50, %v3443_v60 }
 0xb9e   : > { %v3460_v43 = vmul.f32 %v13420_v24, %v13420_v24 }
 0xb9f   : > { %v3459_v44 = vmul.f32 %v13423_v10, %v13423_v10 }
 0xba0   : > { %v3482_v18 = vsel %vm845_vm0, %v3460_v43, 0.0 }
 0xba1   : > { %3483 = vadd.xlane.f32.xlu1 %v3482_v18  ;;  %v3479_v3 = vsel %vm845_vm0, %v3459_v44, 0.0  ;;  %v9963_v18 = vpack.c.bf16 %v3730_v21, %v3729_v30 }
 0xba2   : > { %3480 = vadd.xlane.f32.xlu0 %v3479_v3 }
 0xbf7   : > { %v3466_v54 = vpop.xlane.xlu1 %3465 }
 0xbf8   : > { %v3486_v0 = vmul.f32 0.03125, %v3466_v54  ;;  %v3463_v2 = vpop.xlane.xlu0 %3462 }
 0xbf9   : > { %v3485_v61 = vmul.f32 0.03125, %v3463_v2 }
 0xbfa   : > { %v3494_v14 = vadd.f32 1e-05, %v3486_v0 }
 0xbfb   : > { %v3493_v4 = vadd.f32 1e-05, %v3485_v61  ;;  %v3472_v49 = vpop.xlane.xlu1 %3471 }
 0xbfc   : > { %11055 = vrsqrt.f32 %v3494_v14  ;;  %v3488_v56 = vmul.f32 0.03125, %v3472_v49  ;;  %v3469_v34 = vpop.xlane.xlu0 %3468 }
 0xbfd   : > { %11057 = vrsqrt.f32 %v3493_v4  ;;  %v3487_v29 = vmul.f32 0.03125, %v3469_v34 }
 0xbfe   : > { %v3496_v5 = vadd.f32 1e-05, %v3488_v56 }
 0xbff   : > { %v3495_v35 = vadd.f32 1e-05, %v3487_v29  ;;  %v3478_v40 = vpop.xlane.xlu1 %3477 }
 0xc00   : > { %11059 = vrsqrt.f32 %v3496_v5  ;;  %v3490_v58 = vmul.f32 0.03125, %v3478_v40  ;;  %v3475_v15 = vpop.xlane.xlu0 %3474  ;;  %v3732_v40 = vld [vmem:[%s14700_s1 + $0x38] sm:$0xff] }
 0xc01   : > { %11061 = vrsqrt.f32 %v3495_v35  ;;  %v3489_v32 = vmul.f32 0.03125, %v3475_v15  ;;  %v3731_v35 = vld [vmem:[%s14700_s1 + $0x30] sm:$0xff] }
 0xc02   : > { %v3498_v52 = vadd.f32 1e-05, %v3490_v58  ;;  %v9967_v58 = vpack.c.bf16 %v3732_v40, %v3731_v35 }
 0xc03   : > { %v3497_v26 = vadd.f32 1e-05, %v3489_v32  ;;  %v3735_v32 = vld [vmem:[%s14700_s1 + $0x50] sm:$0xff] }
 0xc04   : > { %11063 = vrsqrt.f32 %v3498_v52  ;;  %v3736_v52 = vld [vmem:[%s14700_s1 + $0x58] sm:$0xff] }
 0xc05   : > { %11065 = vrsqrt.f32 %v3497_v26  ;;  %v9975_v26 = vpack.c.bf16 %v3736_v52, %v3735_v32 }
 0xc06   : > { %v11056_v41 = vpop.eup %11055 }
 0xc07   : > { %v11058_v25 = vpop.eup %11057  ;;  %v3510_v62 = vmul.f32 %v11056_v41, %v13384_v28  ;;  %v3737_v41 = vld [vmem:[%s14700_s1 + $0x60] sm:$0xff] }
 0xc08   : > { %v3509_v53 = vmul.f32 %v11058_v25, %v13387_v9 }
 0xc09   : > { %v3524_v51 = vmul.f32 %v8153_v17, %v3510_v62  ;;  %v3739_v62 = vld [vmem:[%s14700_s1 + $0x70] sm:$0xff] }
 0xc0a   : > { %v11060_v42 = vpop.eup %11059  ;;  %v3523_v63 = vmul.f32 %v8153_v17, %v3509_v53  ;;  %v3740_v53 = vld [vmem:[%s14700_s1 + $0x78] sm:$0xff] }
 0xc0b   : > { %v11062_v8 = vpop.eup %11061  ;;  %v3512_v12 = vmul.f32 %v11060_v42, %v13394_v20  ;;  %v3538_v13 = vadd.f32 %v8154_v19, %v3524_v51  ;;  %v9983_v51 = vpack.c.bf16 %v3740_v53, %v3739_v62 }
 0xc0c   : > { %v3537_v48 = vadd.f32 %v8154_v19, %v3523_v63  ;;  %v3511_v28 = vmul.f32 %v11062_v8, %v13398_v33 }
 0xc0d   : > { %v3526_v9 = vmul.f32 %v8153_v17, %v3512_v12 }
 0xc0e   : > { %v11064_v23 = vpop.eup %11063  ;;  %9204 = vmatprep.mubr.msk.f32.mxu0 %vm845_vm0, %v3537_v48  ;;  %v3525_v57 = vmul.f32 %v8153_v17, %v3511_v28 }
 0xc0f   : > { %v11066_v45 = vpop.eup %11065  ;;  %9205 = vmatmul.mubr.msk.f32.vlgmr.msra.gmra.mrb[32].mxu0 %vm845_vm0, %v3538_v13  ;;  %v3514_v20 = vmul.f32 %v11064_v23, %v13406_v55  ;;  %v3540_v43 = vadd.f32 %v8154_v19, %v3526_v9 }
 0xc10   : > { %v3539_v33 = vadd.f32 %v8154_v19, %v3525_v57  ;;  %v3513_v60 = vmul.f32 %v11066_v45, %v13410_v27  ;;  %9958 = vmatpush3.bf16.msra.mxu0 %v9955_v1 }
 0xc11   : > { %v3528_v44 = vmul.f32 %v8153_v17, %v3514_v20  ;;  %9960 = vmatprep.subr.bf16.mxu0 %v9959_v7 }
 0xc12   : > { %9207 = vmatprep.mubr.msk.f32.mxu0 %vm845_vm0, %v3539_v33  ;;  %v3527_v3 = vmul.f32 %v8153_v17, %v3513_v60 }
 0xc13   : > { %9208 = vmatmul.mubr.msk.f32.gmra.mrb[34].mxu0 %vm845_vm0, %v3540_v43  ;;  %v3542_v38 = vadd.f32 %v8154_v19, %v3528_v44 }
 0xc14   : > { %v3541_v39 = vadd.f32 %v8154_v19, %v3527_v3  ;;  %9962 = vmatpush3.bf16.msra.mxu0 %v9959_v7 }
 0xc15   : > { %9964 = vmatprep.subr.bf16.mxu0 %v9963_v18 }
 0xc16   : > { %9210 = vmatprep.mubr.msk.f32.mxu0 %vm845_vm0, %v3541_v39 }
 0xc17   : > { %9211 = vmatmul.mubr.msk.f32.gmra.mrb[36].mxu0 %vm845_vm0, %v3542_v38 }
 0xc18   : > { %9966 = vmatpush3.bf16.msra.mxu0 %v9963_v18 }
 0xc19   : > { %9968 = vmatprep.subr.bf16.mxu0 %v9967_v58 }
 0xc1c   : > { %9970 = vmatpush3.bf16.msra.mxu0 %v9967_v58 }
 0xc2e   : > { %v3484_v55 = vpop.xlane.xlu1 %3483 }
 0xc2f   : > { %v3492_v27 = vmul.f32 0.03125, %v3484_v55  ;;  %v3481_v1 = vpop.xlane.xlu0 %3480 }
 0xc30   : > { %v3491_v54 = vmul.f32 0.03125, %v3481_v1 }
 0xc31   : > { %v3500_v0 = vadd.f32 1e-05, %v3492_v27 }
 0xc32   : > { %v3499_v2 = vadd.f32 1e-05, %v3491_v54 }
 0xc33   : > { %11067 = vrsqrt.f32 %v3500_v0 }
 0xc34   : > { %11069 = vrsqrt.f32 %v3499_v2 }
 0xc3d   : > { %v11068_v61 = vpop.eup %11067 }
 0xc3e   : > { %v11070_v14 = vpop.eup %11069  ;;  %v3516_v4 = vmul.f32 %v11068_v61, %v13420_v24  ;;  %v3733_v24 = vld [vmem:[%s14700_s1 + $0x40] sm:$0xff] }
 0xc3f   : > { %v3515_v49 = vmul.f32 %v11070_v14, %v13423_v10  ;;  %v3734_v10 = vld [vmem:[%s14700_s1 + $0x48] sm:$0xff] }
 0xc40   : > { %v3530_v56 = vmul.f32 %v8153_v17, %v3516_v4  ;;  %v9971_v15 = vpack.c.bf16 %v3734_v10, %v3733_v24 }
 0xc41   : > { %v3529_v34 = vmul.f32 %v8153_v17, %v3515_v49  ;;  %v3738_v17 = vld [vmem:[%s14700_s1 + $0x68] sm:$0xff] }
 0xc42   : > { %v3544_v5 = vadd.f32 %v8154_v19, %v3530_v56  ;;  %9972 = vmatprep.subr.bf16.mxu0 %v9971_v15  ;;  %v9979_v25 = vpack.c.bf16 %v3738_v17, %v3737_v41 }
 0xc43   : > { %v3543_v29 = vadd.f32 %v8154_v19, %v3529_v34  ;;  %9974 = vmatpush3.bf16.msra.mxu0 %v9971_v15  ;;  %v8155_v19 = vld [vmem:[#allocation19] ss:$0 sm:$0xff] }
 0xc44   : > { %9976 = vmatprep.subr.bf16.mxu0 %v9975_v26 }
 0xc45   : > { %9213 = vmatprep.mubr.msk.f32.mxu0 %vm845_vm0, %v3543_v29 }
 0xc46   : > { %9214 = vmatmul.mubr.msk.f32.gmra.mrb[38].mxu0 %vm845_vm0, %v3544_v5 }
 0xc47   : > { %9978 = vmatpush3.bf16.msra.mxu0 %v9975_v26 }
 0xc48   : > { %9980 = vmatprep.subr.bf16.mxu0 %v9979_v25 }
 0xc4b   : > { %9982 = vmatpush3.bf16.msra.mxu0 %v9979_v25 }
 0xc4c   : > { %9984 = vmatprep.subr.bf16.mxu0 %v9983_v51 }
 0xc4f   : > { %9986 = vmatpush3.bf16.msra.mxu0 %v9983_v51 }
 0xce2   : > { %v9206_v42 = vpop.f32.mrb[32].mxu0 }
 0xce3   : > { %v3652_v63 = vadd.f32 %v9206_v42, %v8155_v19  ;;  %v3646_v37 = vpop.f32.mrb[33].mxu0 }
 0xce4   : > { %v3647_v31 = vadd.f32 %v8155_v19, %v3646_v37 }
 0xce5   : > { %v3694_v8 = vmul.f32 0.70710677, %v3652_v63  ;;  %v3686_v39 = vmul.f32 0.5, %v3652_v63 }
 0xce6   : > { %v3693_v12 = vmul.f32 0.70710677, %v3647_v31  ;;  %v9209_v48 = vpop.f32.mrb[34].mxu0  ;;  %v3685_v18 = vmul.f32 0.5, %v3647_v31  ;;  %v8164_v31 = vld [vmem:[#allocation20] ss:$0 sm:$0xff] }
 0xce7   : > { %11071 = verf.f32 %v3694_v8  ;;  %v3662_v28 = vadd.f32 %v9209_v48, %v8155_v19  ;;  %v3656_v13 = vpop.f32.mrb[35].mxu0 }
 0xce8   : > { %11073 = verf.f32 %v3693_v12  ;;  %v3657_v9 = vadd.f32 %v8155_v19, %v3656_v13 }
 0xce9   : > { %v3696_v7 = vmul.f32 0.70710677, %v3662_v28  ;;  %v3688_v61 = vmul.f32 0.5, %v3662_v28 }
 0xcea   : > { %v3695_v23 = vmul.f32 0.70710677, %v3657_v9  ;;  %v9212_v57 = vpop.f32.mrb[36].mxu0  ;;  %v3687_v0 = vmul.f32 0.5, %v3657_v9 }
 0xceb   : > { %11075 = verf.f32 %v3696_v7  ;;  %v3672_v30 = vadd.f32 %v9212_v57, %v8155_v19  ;;  %v3666_v21 = vpop.f32.mrb[37].mxu0 }
 0xcec   : > { %11077 = verf.f32 %v3695_v23  ;;  %v3667_v45 = vadd.f32 %v8155_v19, %v3666_v21 }
 0xced   : > { %v3698_v20 = vmul.f32 0.70710677, %v3672_v30  ;;  %v3690_v35 = vmul.f32 0.5, %v3672_v30 }
 0xcee   : > { %v3697_v33 = vmul.f32 0.70710677, %v3667_v45  ;;  %v3689_v29 = vmul.f32 0.5, %v3667_v45 }
 0xcef   : > { %11079 = verf.f32 %v3698_v20 }
 0xcf0   : > { %11081 = verf.f32 %v3697_v33 }
 0xcf1   : > { %v11072_v60 = vpop.eup %11071 }
 0xcf2   : > { %v11074_v43 = vpop.eup %11073  ;;  %v3710_v44 = vadd.f32 1.0, %v11072_v60 }
 0xcf3   : > { %v3709_v3 = vadd.f32 1.0, %v11074_v43 }
 0xcf4   : > { %v3718_v1 = vmul.f32 %v3710_v44, %v3686_v39 }
 0xcf5   : > { %v11076_v38 = vpop.eup %11075  ;;  %v3717_v55 = vmul.f32 %v3709_v3, %v3685_v18 }
 0xcf6   : > { %v11078_v27 = vpop.eup %11077  ;;  %v3712_v54 = vadd.f32 1.0, %v11076_v38 }
 0xcf7   : > { %v3711_v2 = vadd.f32 1.0, %v11078_v27  ;;  %9248 = vmatprep.mubr.f32.mxu0 %v3717_v55 }
 0xcf8   : > { %9249 = vmatmul.mubr.f32.vlgmr.msra.gmra.mrb[40].mxu0 %v3718_v1  ;;  %v3720_v34 = vmul.f32 %v3712_v54, %v3688_v61 }
 0xcf9   : > { %v11080_v14 = vpop.eup %11079  ;;  %v3719_v4 = vmul.f32 %v3711_v2, %v3687_v0 }
 0xcfa   : > { %v11082_v49 = vpop.eup %11081  ;;  %v3714_v56 = vadd.f32 1.0, %v11080_v14 }
 0xcfb   : > { %v3713_v5 = vadd.f32 1.0, %v11082_v49  ;;  %9251 = vmatprep.mubr.f32.mxu0 %v3719_v4 }
 0xcfc   : > { %9252 = vmatmul.mubr.f32.gmra.mrb[42].mxu0 %v3720_v34  ;;  %v3722_v58 = vmul.f32 %v3714_v56, %v3690_v35 }
 0xcfd   : > { %v3721_v40 = vmul.f32 %v3713_v5, %v3689_v29 }
 0xcff   : > { %9254 = vmatprep.mubr.f32.mxu0 %v3721_v40 }
 0xd00   : > { %9255 = vmatmul.mubr.f32.gmra.mrb[44].mxu0 %v3722_v58 }
 0xd19   : > { %v9215_v24 = vpop.f32.mrb[38].mxu0 }
 0xd1a   : > { %v3682_v10 = vadd.f32 %v9215_v24, %v8155_v19  ;;  %v3676_v15 = vpop.f32.mrb[39].mxu0 }
 0xd1b   : > { %v3677_v32 = vadd.f32 %v8155_v19, %v3676_v15 }
 0xd1c   : > { %v3700_v52 = vmul.f32 0.70710677, %v3682_v10  ;;  %v3692_v51 = vmul.f32 0.5, %v3682_v10 }
 0xd1d   : > { %v3699_v26 = vmul.f32 0.70710677, %v3677_v32  ;;  %v3691_v62 = vmul.f32 0.5, %v3677_v32 }
 0xd1e   : > { %11083 = verf.f32 %v3700_v52 }
 0xd1f   : > { %11085 = verf.f32 %v3699_v26 }
 0xd28   : > { %v11084_v41 = vpop.eup %11083 }
 0xd29   : > { %v11086_v17 = vpop.eup %11085  ;;  %v3716_v25 = vadd.f32 1.0, %v11084_v41 }
 0xd2a   : > { %v3715_v53 = vadd.f32 1.0, %v11086_v17 }
 0xd2b   : > { %v3724_v63 = vmul.f32 %v3716_v25, %v3692_v51 }
 0xd2c   : > { %v3723_v42 = vmul.f32 %v3715_v53, %v3691_v62 }
 0xd2e   : > { %9257 = vmatprep.mubr.f32.mxu0 %v3723_v42 }
 0xd2f   : > { %9258 = vmatmul.mubr.f32.gmra.mrb[46].mxu0 %v3724_v63 }
 0xdcb   : > { %v9250_v37 = vpop.f32.mrb[40].mxu0 }
 0xdcc   : > { %v3847_v8 = vadd.f32 %v9250_v37, %v13345_v6  ;;  %v3807_v12 = vpop.f32.mrb[41].mxu0  ;;  %v4006_v37 = vld [vmem:[#allocation8 + $0x20] sm:$0xff] }
 0xdcd   : > { %v3846_v19 = vadd.f32 %v3807_v12, %v13347_v46  ;;  %v4008_v12 = vld [vmem:[#allocation8 + $0x30] sm:$0xff] }
 0xdce   : > { %v13497_v48 = vadd.f32 %v8164_v31, %v3847_v8 }
 0xdcf   : > { %v13499_v28 = vadd.f32 %v8164_v31, %v3846_v19  ;;  %v9253_v13 = vpop.f32.mrb[42].mxu0  ;;  %v4009_v19 = vld [vmem:[#allocation8 + $0x38] sm:$0xff] }
 0xdd0   : > { %v3849_v9 = vadd.f32 %v9253_v13, %v13355_v36  ;;  %v3817_v7 = vpop.f32.mrb[43].mxu0  ;;  %v3876_v23 = vsel %vm845_vm0, %v13497_v48, 0.0  ;;  %v9991_v13 = vpack.c.bf16 %v4009_v19, %v4008_v12 }
 0xdd1   : > { %v3848_v57 = vadd.f32 %v3817_v7, %v13357_v11  ;;  %3877 = vadd.xlane.f32.xlu1 %v3876_v23  ;;  %v3873_v6 = vsel %vm845_vm0, %v13499_v28, 0.0 }
 0xdd2   : > { %v13507_v30 = vadd.f32 %v8164_v31, %v3849_v9  ;;  %3874 = vadd.xlane.f32.xlu0 %v3873_v6 }
 0xdd3   : > { %v13509_v46 = vadd.f32 %v8164_v31, %v3848_v57  ;;  %v9256_v21 = vpop.f32.mrb[44].mxu0 }
 0xdd4   : > { %v3851_v45 = vadd.f32 %v9256_v21, %v13365_v47  ;;  %v3827_v20 = vpop.f32.mrb[45].mxu0  ;;  %v3882_v36 = vsel %vm845_vm0, %v13507_v30, 0.0 }
 0xdd5   : > { %v3850_v33 = vadd.f32 %v3827_v20, %v13367_v22  ;;  %3883 = vadd.xlane.f32.xlu1 %v3882_v36  ;;  %v3879_v11 = vsel %vm845_vm0, %v13509_v46, 0.0 }
 0xdd6   : > { %v13517_v60 = vadd.f32 %v8164_v31, %v3851_v45  ;;  %3880 = vadd.xlane.f32.xlu0 %v3879_v11 }
 0xdd7   : > { %v13519_v43 = vadd.f32 %v8164_v31, %v3850_v33 }
 0xdd8   : > { %v3888_v44 = vsel %vm845_vm0, %v13517_v60, 0.0 }
 0xdd9   : > { %3889 = vadd.xlane.f32.xlu1 %v3888_v44  ;;  %v3885_v47 = vsel %vm845_vm0, %v13519_v43, 0.0 }
 0xdda   : > { %3886 = vadd.xlane.f32.xlu0 %v3885_v47 }
 0xe02   : > { %v9259_v18 = vpop.f32.mrb[46].mxu0 }
 0xe03   : > { %v3853_v22 = vadd.f32 %v9259_v18, %v13375_v59  ;;  %v3837_v3 = vpop.f32.mrb[47].mxu0 }
 0xe04   : > { %v3852_v39 = vadd.f32 %v3837_v3, %v13377_v50 }
 0xe05   : > { %v13527_v38 = vadd.f32 %v8164_v31, %v3853_v22 }
 0xe06   : > { %v13529_v55 = vadd.f32 %v8164_v31, %v3852_v39  ;;  %v4007_v31 = vld [vmem:[#allocation8 + $0x28] sm:$0xff] }
 0xe07   : > { %v3894_v27 = vsel %vm845_vm0, %v13527_v38, 0.0  ;;  %v9987_v8 = vpack.c.bf16 %v4007_v31, %v4006_v37 }
 0xe08   : > { %3895 = vadd.xlane.f32.xlu1 %v3894_v27  ;;  %v3891_v1 = vsel %vm845_vm0, %v13529_v55, 0.0 }
 0xe09   : > { %3892 = vadd.xlane.f32.xlu0 %v3891_v1  ;;  %9988 = vmatprep.subr.bf16.mxu1 %v9987_v8 }
 0xe0a   : > { %9990 = vmatpush3.bf16.msra.mxu1 %v9987_v8 }
 0xe0b   : > { %9992 = vmatprep.subr.bf16.mxu1 %v9991_v13 }
 0xe0e   : > { %9994 = vmatpush3.bf16.msra.mxu1 %v9991_v13 }
 0xe5e   : > { %v3878_v54 = vpop.xlane.xlu1 %3877 }
 0xe5f   : > { %v3898_v0 = vmul.f32 0.03125, %v3878_v54  ;;  %v3875_v2 = vpop.xlane.xlu0 %3874 }
 0xe60   : > { %v3897_v61 = vmul.f32 0.03125, %v3875_v2 }
 0xe61   : > { %v13536_v59 = vsub.f32 %v13497_v48, %v3898_v0 }
 0xe62   : > { %v13539_v50 = vsub.f32 %v13499_v28, %v3897_v61  ;;  %v3884_v14 = vpop.xlane.xlu1 %3883 }
 0xe63   : > { %v3900_v4 = vmul.f32 0.03125, %v3884_v14  ;;  %v3881_v49 = vpop.xlane.xlu0 %3880  ;;  %v3914_v56 = vmul.f32 %v13536_v59, %v13536_v59 }
 0xe64   : > { %v3899_v34 = vmul.f32 0.03125, %v3881_v49  ;;  %v3913_v29 = vmul.f32 %v13539_v50, %v13539_v50 }
 0xe65   : > { %v13546_v5 = vsub.f32 %v13507_v30, %v3900_v4  ;;  %v3924_v35 = vsel %vm845_vm0, %v3914_v56, 0.0 }
 0xe66   : > { %v13550_v40 = vsub.f32 %v13509_v46, %v3899_v34  ;;  %v3890_v58 = vpop.xlane.xlu1 %3889  ;;  %3925 = vadd.xlane.f32.xlu1 %v3924_v35  ;;  %v3921_v24 = vsel %vm845_vm0, %v3913_v29, 0.0  ;;  %v8165_v35 = vld [vmem:[#allocation5 + $0x1] ss:$0 sm:$0xff] }
 0xe67   : > { %v3902_v10 = vmul.f32 0.03125, %v3890_v58  ;;  %v3887_v15 = vpop.xlane.xlu0 %3886  ;;  %3922 = vadd.xlane.f32.xlu0 %v3921_v24  ;;  %v3916_v32 = vmul.f32 %v13546_v5, %v13546_v5 }
 0xe68   : > { %v3901_v52 = vmul.f32 0.03125, %v3887_v15  ;;  %v3915_v26 = vmul.f32 %v13550_v40, %v13550_v40 }
 0xe69   : > { %v13558_v41 = vsub.f32 %v13517_v60, %v3902_v10  ;;  %v3930_v17 = vsel %vm845_vm0, %v3916_v32, 0.0  ;;  %v8166_v32 = vld [vmem:[#allocation7 + $0x1] ss:$0 sm:$0xff] }
 0xe6a   : > { %v13562_v25 = vsub.f32 %v13519_v43, %v3901_v52  ;;  %3931 = vadd.xlane.f32.xlu1 %v3930_v17  ;;  %v3927_v62 = vsel %vm845_vm0, %v3915_v26, 0.0 }
 0xe6b   : > { %3928 = vadd.xlane.f32.xlu0 %v3927_v62  ;;  %v3918_v53 = vmul.f32 %v13558_v41, %v13558_v41 }
 0xe6c   : > { %v3917_v51 = vmul.f32 %v13562_v25, %v13562_v25 }
 0xe6d   : > { %v3936_v42 = vsel %vm845_vm0, %v3918_v53, 0.0 }
 0xe6e   : > { %3937 = vadd.xlane.f32.xlu1 %v3936_v42  ;;  %v3933_v63 = vsel %vm845_vm0, %v3917_v51, 0.0 }
 0xe6f   : > { %3934 = vadd.xlane.f32.xlu0 %v3933_v63 }
 0xe95   : > { %v3896_v9 = vpop.xlane.xlu1 %3895 }
 0xe96   : > { %v3904_v7 = vmul.f32 0.03125, %v3896_v9  ;;  %v3893_v23 = vpop.xlane.xlu0 %3892 }
 0xe97   : > { %v3903_v57 = vmul.f32 0.03125, %v3893_v23 }
 0xe98   : > { %v13572_v6 = vsub.f32 %v13527_v38, %v3904_v7 }
 0xe99   : > { %v13575_v21 = vsub.f32 %v13529_v55, %v3903_v57 }
 0xe9a   : > { %v3920_v45 = vmul.f32 %v13572_v6, %v13572_v6 }
 0xe9b   : > { %v3919_v20 = vmul.f32 %v13575_v21, %v13575_v21 }
 0xe9c   : > { %v3942_v36 = vsel %vm845_vm0, %v3920_v45, 0.0 }
 0xe9d   : > { %3943 = vadd.xlane.f32.xlu1 %v3942_v36  ;;  %v3939_v33 = vsel %vm845_vm0, %v3919_v20, 0.0 }
 0xe9e   : > { %3940 = vadd.xlane.f32.xlu0 %v3939_v33 }
 0xef3   : > { %v3926_v11 = vpop.xlane.xlu1 %3925 }
 0xef4   : > { %v3946_v44 = vmul.f32 0.03125, %v3926_v11  ;;  %v3923_v47 = vpop.xlane.xlu0 %3922 }
 0xef5   : > { %v3945_v18 = vmul.f32 0.03125, %v3923_v47 }
 0xef6   : > { %v3954_v22 = vadd.f32 1e-05, %v3946_v44 }
 0xef7   : > { %v3953_v3 = vadd.f32 1e-05, %v3945_v18  ;;  %v3932_v39 = vpop.xlane.xlu1 %3931 }
 0xef8   : > { %11087 = vrsqrt.f32 %v3954_v22  ;;  %v3948_v27 = vmul.f32 0.03125, %v3932_v39  ;;  %v3929_v1 = vpop.xlane.xlu0 %3928 }
 0xef9   : > { %11089 = vrsqrt.f32 %v3953_v3  ;;  %v3947_v54 = vmul.f32 0.03125, %v3929_v1  ;;  %v8167_v3 = vld [vmem:[#allocation10 + $0x1] ss:$0 sm:$0xff] }
 0xefa   : > { %v3956_v0 = vadd.f32 1e-05, %v3948_v27 }
 0xefb   : > { %v3955_v2 = vadd.f32 1e-05, %v3947_v54  ;;  %v3938_v61 = vpop.xlane.xlu1 %3937 }
 0xefc   : > { %11091 = vrsqrt.f32 %v3956_v0  ;;  %v3950_v14 = vmul.f32 0.03125, %v3938_v61  ;;  %v3935_v4 = vpop.xlane.xlu0 %3934 }
 0xefd   : > { %11093 = vrsqrt.f32 %v3955_v2  ;;  %v3949_v49 = vmul.f32 0.03125, %v3935_v4 }
 0xefe   : > { %v3958_v56 = vadd.f32 1e-05, %v3950_v14 }
 0xeff   : > { %v3957_v34 = vadd.f32 1e-05, %v3949_v49 }
 0xf00   : > { %11095 = vrsqrt.f32 %v3958_v56 }
 0xf01   : > { %11097 = vrsqrt.f32 %v3957_v34 }
 0xf02   : > { %v11088_v29 = vpop.eup %11087 }
 0xf03   : > { %v11090_v58 = vpop.eup %11089  ;;  %v3970_v24 = vmul.f32 %v11088_v29, %v13536_v59 }
 0xf04   : > { %v3969_v10 = vmul.f32 %v11090_v58, %v13539_v50 }
 0xf05   : > { %v3984_v15 = vmul.f32 %v8165_v35, %v3970_v24 }
 0xf06   : > { %v11092_v52 = vpop.eup %11091  ;;  %v3983_v26 = vmul.f32 %v8165_v35, %v3969_v10 }
 0xf07   : > { %v11094_v17 = vpop.eup %11093  ;;  %v3972_v62 = vmul.f32 %v11092_v52, %v13546_v5  ;;  %v3998_v42 = vadd.f32 %v8166_v32, %v3984_v15 }
 0xf08   : > { %v3997_v53 = vadd.f32 %v8166_v32, %v3983_v26  ;;  %v3971_v51 = vmul.f32 %v11094_v17, %v13550_v40 }
 0xf09   : > { %v3986_v63 = vmul.f32 %v8165_v35, %v3972_v62 }
 0xf0a   : > { %v11096_v37 = vpop.eup %11095  ;;  %9268 = vmatprep.mubr.msk.f32.mxu1 %vm845_vm0, %v3997_v53  ;;  %v3985_v31 = vmul.f32 %v8165_v35, %v3971_v51 }
 0xf0b   : > { %v11098_v8 = vpop.eup %11097  ;;  %9269 = vmatmul.mubr.msk.f32.vlgmr.msra.gmra.mrb[48].mxu1 %vm845_vm0, %v3998_v42  ;;  %v3974_v59 = vmul.f32 %v11096_v37, %v13558_v41  ;;  %v4000_v19 = vadd.f32 %v8166_v32, %v3986_v63 }
 0xf0c   : > { %v3999_v50 = vadd.f32 %v8166_v32, %v3985_v31  ;;  %v3973_v12 = vmul.f32 %v11098_v8, %v13562_v25 }
 0xf0d   : > { %v3988_v13 = vmul.f32 %v8165_v35, %v3974_v59 }
 0xf0e   : > { %9271 = vmatprep.mubr.msk.f32.mxu1 %vm845_vm0, %v3999_v50  ;;  %v3987_v5 = vmul.f32 %v8165_v35, %v3973_v12 }
 0xf0f   : > { %9272 = vmatmul.mubr.msk.f32.gmra.mrb[50].mxu1 %vm845_vm0, %v4000_v19  ;;  %v4002_v9 = vadd.f32 %v8166_v32, %v3988_v13 }
 0xf10   : > { %v4001_v40 = vadd.f32 %v8166_v32, %v3987_v5  ;;  %v8193_v5 = vld [vmem:[%s14699_s6 + $0x108] sm:$0xff] }
 0xf12   : > { %9274 = vmatprep.mubr.msk.f32.mxu1 %vm845_vm0, %v4001_v40 }
 0xf13   : > { %9275 = vmatmul.mubr.msk.f32.gmra.mrb[52].mxu1 %vm845_vm0, %v4002_v9 }
 0xf2a   : > { %v3944_v7 = vpop.xlane.xlu1 %3943 }
 0xf2b   : > { %v3952_v23 = vmul.f32 0.03125, %v3944_v7  ;;  %v3941_v57 = vpop.xlane.xlu0 %3940  ;;  %v8192_v7 = vld [vmem:[%s14699_s6 + $0x100] sm:$0xff] }
 0xf2c   : > { %v3951_v41 = vmul.f32 0.03125, %v3941_v57 }
 0xf2d   : > { %v3960_v45 = vadd.f32 1e-05, %v3952_v23 }
 0xf2e   : > { %v3959_v20 = vadd.f32 1e-05, %v3951_v41 }
 0xf2f   : > { %11099 = vrsqrt.f32 %v3960_v45 }
 0xf30   : > { %11101 = vrsqrt.f32 %v3959_v20  ;;  %v8195_v20 = vld [vmem:[%s14699_s6 + $0x118] sm:$0xff] }
 0xf39   : > { %v11100_v25 = vpop.eup %11099 }
 0xf3a   : > { %v11102_v36 = vpop.eup %11101  ;;  %v3976_v33 = vmul.f32 %v11100_v25, %v13572_v6 }
 0xf3b   : > { %v3975_v11 = vmul.f32 %v11102_v36, %v13575_v21 }
 0xf3c   : > { %v3990_v44 = vmul.f32 %v8165_v35, %v3976_v33 }
 0xf3d   : > { %v3989_v47 = vmul.f32 %v8165_v35, %v3975_v11 }
 0xf3e   : > { %v4004_v22 = vadd.f32 %v8166_v32, %v3990_v44 }
 0xf3f   : > { %v4003_v18 = vadd.f32 %v8166_v32, %v3989_v47 }
 0xf41   : > { %9277 = vmatprep.mubr.msk.f32.mxu1 %vm845_vm0, %v4003_v18  ;;  %v8194_v18 = vld [vmem:[%s14699_s6 + $0x110] sm:$0xff] }
 0xf42   : > { %9278 = vmatmul.mubr.msk.f32.gmra.mrb[54].mxu1 %vm845_vm0, %v4004_v22 }
 0xfde   : > { %v9270_v39 = vpop.f32.mrb[48].mxu1 }
 0xfdf   : > { %v13599_v27 = vadd.f32 %v9270_v39, %v8167_v3  ;;  %v4108_v1 = vpop.f32.mrb[49].mxu1 }
 0xfe0   : > { %v13601_v54 = vadd.f32 %v8167_v3, %v4108_v1 }
 0xfe2   : > { %v9273_v0 = vpop.f32.mrb[50].mxu1  ;;  %9296 = vmatprep.mubr.msk.f32.mxu1 %vm1143_vm1, %v13601_v54  ;;  %v13607_v6 = vpack.i.bf16 %v13599_v27, %v13601_v54 }
 0xfe3   : > { %v13609_v21 = vadd.f32 %v9273_v0, %v8167_v3  ;;  %v4118_v2 = vpop.f32.mrb[51].mxu1 }
 0xfe4   : > { %v13611_v61 = vadd.f32 %v8167_v3, %v4118_v2  ;;  %10752 = vrot.lane.b32.xlu0 %v13607_v6, %s11845_s0 }
 0xfe6   : > { %v9276_v14 = vpop.f32.mrb[52].mxu1  ;;  %v13617_v4 = vpack.i.bf16 %v13609_v21, %v13611_v61 }
 0xfe7   : > { %v13619_v49 = vadd.f32 %v9276_v14, %v8167_v3  ;;  %v4128_v56 = vpop.f32.mrb[53].mxu1 }
 0xfe8   : > { %v13621_v34 = vadd.f32 %v8167_v3, %v4128_v56  ;;  %10757 = vrot.lane.b32.xlu1 %v13617_v4, %s11845_s0 }
 0xfea   : > { %v13627_v29 = vpack.i.bf16 %v13619_v49, %v13621_v34 }
 0xfec   : > { %10762 = vrot.lane.b32.xlu1 %v13627_v29, %s11845_s0 }
0x1015   : > { %v9279_v35 = vpop.f32.mrb[54].mxu1 }
0x1016   : > { %v13631_v58 = vadd.f32 %v9279_v35, %v8167_v3  ;;  %v4138_v24 = vpop.f32.mrb[55].mxu1  ;;  %v8196_v35 = vld [vmem:[%s14699_s6 + $0x120] sm:$0xff] }
0x1017   : > { %v13633_v10 = vadd.f32 %v8167_v3, %v4138_v24  ;;  %v8197_v3 = vld [vmem:[%s14699_s6 + $0x128] sm:$0xff] }
0x1019   : > { %v13637_v15 = vpack.i.bf16 %v13631_v58, %v13633_v10 }
0x101b   : > { %10767 = vrot.lane.b32.xlu1 %v13637_v15, %s11845_s0  ;;  %s14704_s0 = smov 112  }
0x1056   : > { %v10753_v32 = vpop.permute.xlu0 %10752 }
0x1057   : > { %v10755_v52 = vunpack.i.h.bf16 %v10753_v32  ;;  %v10754_v26 = vunpack.i.l.bf16 %v10753_v32  ;;  %v8199_v32 = vld [vmem:[%s14699_s6 + $0x138] sm:$0xff] }
0x1059   : > { %v9995_v17 = vpack.c.bf16 %v10755_v52, %v10754_v26 }
0x105a   : > { %v10758_v62 = vpop.permute.xlu1 %10757 }
0x105b   : > { %v10760_v53 = vunpack.i.h.bf16 %v10758_v62  ;;  %v10759_v51 = vunpack.i.l.bf16 %v10758_v62  ;;  %9997 = vmatprep.subr.msk.bf16.mxu1 %vm12620_vm2, %v9995_v17 }
0x105c   : > { %10000 = vmatpush3.bf16.xpose.msk.msra.mxu1 %vm12620_vm2, %v9995_v17 }
0x105d   : > { %v10001_v42 = vpack.c.bf16 %v10760_v53, %v10759_v51 }
0x105e   : > { %v10763_v63 = vpop.permute.xlu1 %10762 }
0x105f   : > { %v10765_v37 = vunpack.i.h.bf16 %v10763_v63  ;;  %v10764_v31 = vunpack.i.l.bf16 %v10763_v63  ;;  %10003 = vmatprep.subr.msk.bf16.mxu1 %vm12620_vm2, %v10001_v42  ;;  %v8198_v63 = vld [vmem:[%s14699_s6 + $0x130] sm:$0xff] }
0x1061   : > { %v10007_v8 = vpack.c.bf16 %v10765_v37, %v10764_v31 }
0x1064   : > { %10006 = vmatpush3.bf16.xpose.msk.msra.mxu1 %vm12620_vm2, %v10001_v42 }
0x1065   : > { %10009 = vmatprep.subr.msk.bf16.mxu1 %vm12620_vm2, %v10007_v8 }
0x106c   : > { %10012 = vmatpush3.bf16.xpose.msk.msra.mxu1 %vm12620_vm2, %v10007_v8 }
0x108d   : > { %v10768_v59 = vpop.permute.xlu1 %10767 }
0x108e   : > { %v10770_v50 = vunpack.i.h.bf16 %v10768_v59  ;;  %v10769_v12 = vunpack.i.l.bf16 %v10768_v59 }
0x1090   : > { %v10013_v19 = vpack.c.bf16 %v10770_v50, %v10769_v12 }
0x1092   : > { %10015 = vmatprep.subr.msk.bf16.mxu1 %vm12620_vm2, %v10013_v19 }
0x1093   : > { %10018 = vmatpush3.bf16.xpose.msk.msra.mxu1 %vm12620_vm2, %v10013_v19 }
0x109a   : > { %9297 = vmatmul.mubr.msk.f32.vlgmr.msra.gmra.mrb[56].mxu1 %vm1143_vm1, %v13599_v27 }
0x109b   : > { %9299 = vmatprep.mubr.msk.f32.mxu1 %vm1143_vm1, %v13611_v61 }
0x109e   : > { %9300 = vmatmul.mubr.msk.f32.gmra.mrb[58].mxu1 %vm1143_vm1, %v13609_v21 }
0x109f   : > { %9302 = vmatprep.mubr.msk.f32.mxu1 %vm1143_vm1, %v13621_v34 }
0x10a2   : > { %9303 = vmatmul.mubr.msk.f32.gmra.mrb[60].mxu1 %vm1143_vm1, %v13619_v49 }
0x10a3   : > { %9305 = vmatprep.mubr.msk.f32.mxu1 %vm1143_vm1, %v13633_v10 }
0x10a6   : > { %9306 = vmatmul.mubr.msk.f32.gmra.mrb[62].mxu1 %vm1143_vm1, %v13631_v58 }
0x116d   : > { %v9298_v13 = vpop.f32.mrb[56].mxu1 }
0x116e   : > { %v4309_v40 = vmul.f32 0.35355338, %v9298_v13  ;;  %v4269_v9 = vpop.f32.mrb[57].mxu1 }
0x116f   : > { %v4308_v23 = vmul.f32 0.35355338, %v4269_v9 }
0x1170   : > { %v4326_v57 = vadd.f32 %v8193_v5, %v4309_v40 }
0x1171   : > { %v4325_v41 = vadd.f32 %v8192_v7, %v4308_v23  ;;  %v9301_v45 = vpop.f32.mrb[58].mxu1 }
0x1172   : > { %v4311_v25 = vmul.f32 0.35355338, %v9301_v45  ;;  %v4279_v36 = vpop.f32.mrb[59].mxu1  ;;  %v4336_v33 = vsel %vm1305_vm3, %v4326_v57, -inf }
0x1173   : > { %v4310_v11 = vmul.f32 0.35355338, %v4279_v36  ;;  %4337 = vmax.xlane.f32.xlu1 %v4336_v33  ;;  %v4333_v44 = vsel %vm1305_vm3, %v4325_v41, -inf }
0x1174   : > { %v4328_v47 = vadd.f32 %v8195_v20, %v4311_v25  ;;  %4334 = vmax.xlane.f32.xlu0 %v4333_v44 }
0x1175   : > { %v9304_v22 = vpop.f32.mrb[60].mxu1  ;;  %v4327_v2 = vadd.f32 %v8194_v18, %v4310_v11 }
0x1176   : > { %v4313_v39 = vmul.f32 0.35355338, %v9304_v22  ;;  %v4289_v1 = vpop.f32.mrb[61].mxu1  ;;  %v4342_v0 = vsel %vm1305_vm3, %v4328_v47, -inf }
0x1177   : > { %v4312_v14 = vmul.f32 0.35355338, %v4289_v1  ;;  %v4339_v51 = vsel %vm1305_vm3, %v4327_v2, -inf }
0x1178   : > { %v4330_v56 = vadd.f32 %v8197_v3, %v4313_v39  ;;  %4343 = vmax.xlane.f32.xlu0 %v4342_v0 }
0x1179   : > { %v9307_v24 = vpop.f32.mrb[62].mxu1  ;;  %v4329_v62 = vadd.f32 %v8196_v35, %v4312_v14 }
0x117a   : > { %v4315_v52 = vmul.f32 0.35355338, %v9307_v24  ;;  %v4299_v26 = vpop.f32.mrb[63].mxu1  ;;  %v4348_v17 = vsel %vm1305_vm3, %v4330_v56, -inf }
0x117b   : > { %v4314_v53 = vmul.f32 0.35355338, %v4299_v26  ;;  %4349 = vmax.xlane.f32.xlu1 %v4348_v17  ;;  %v4345_v8 = vsel %vm1305_vm3, %v4329_v62, -inf }
0x117c   : > { %v13697_v42 = vadd.f32 %v8199_v32, %v4315_v52  ;;  %4340 = vmax.xlane.f32.xlu0 %v4339_v51 }
0x117d   : > { %v13704_v31 = vadd.f32 %v8198_v63, %v4314_v53 }
0x117e   : > { %v4354_v37 = vsel %vm1305_vm3, %v13697_v42, -inf }
0x117f   : > { %4355 = vmax.xlane.f32.xlu1 %v4354_v37  ;;  %v4351_v59 = vsel %vm1305_vm3, %v13704_v31, -inf }
0x1180   : > { %4346 = vmax.xlane.f32.xlu0 %v4345_v8 }
0x1184   : > { %4352 = vmax.xlane.f32.xlu0 %v4351_v59 }
0x1190   : > { %10777 = vrot.lane.b32.xlu1 %v13617_v4, %s11850_s29 }
0x1194   : > { %10782 = vrot.lane.b32.xlu1 %v13627_v29, %s11850_s29 }
0x1198   : > { %10787 = vrot.lane.b32.xlu1 %v13637_v15, %s11850_s29 }
0x119a   : > { %10772 = vrot.lane.b32.xlu0 %v13607_v6, %s11850_s29  ;;  %s14702_s29 = smov 120  }
0x119c   : > { %10797 = vrot.lane.b32.xlu1 %v13617_v4, %s14701_s12 }
0x119e   : > { %10792 = vrot.lane.b32.xlu0 %v13607_v6, %s14701_s12 }
0x1200   : > { %v4338_v50 = vpop.xlane.xlu1 %4337 }
0x1201   : > { %v4358_v12 = vsub.f32 %v4326_v57, %v4338_v50  ;;  %v4335_v19 = vpop.xlane.xlu0 %4334 }
0x1202   : > { %v4357_v13 = vsub.f32 %v4325_v41, %v4335_v19 }
0x1203   : > { %v4367_v5 = vmul.f32 1.442695, %v4358_v12 }
0x1204   : > { %v4365_v40 = vmul.f32 1.442695, %v4357_v13 }
0x1205   : > { %11103 = vpow2.f32 %v4367_v5  ;;  %v4344_v9 = vpop.xlane.xlu0 %4343 }
0x1206   : > { %11105 = vpow2.f32 %v4365_v40  ;;  %v4360_v7 = vsub.f32 %v4328_v47, %v4344_v9 }
0x1208   : > { %v4371_v23 = vmul.f32 1.442695, %v4360_v7  ;;  %v4350_v45 = vpop.xlane.xlu1 %4349 }
0x1209   : > { %v4362_v20 = vsub.f32 %v4330_v56, %v4350_v45  ;;  %v4341_v25 = vpop.xlane.xlu0 %4340 }
0x120a   : > { %11107 = vpow2.f32 %v4371_v23  ;;  %v4359_v36 = vsub.f32 %v4327_v2, %v4341_v25 }
0x120b   : > { %v4375_v33 = vmul.f32 1.442695, %v4362_v20 }
0x120c   : > { %v4369_v11 = vmul.f32 1.442695, %v4359_v36  ;;  %v4356_v44 = vpop.xlane.xlu1 %4355 }
0x120d   : > { %v4347_v18 = vpop.xlane.xlu0 %4346  ;;  %v4364_v25 = vsub.f32 %v13697_v42, %v4356_v44 }
0x120e   : > { %11109 = vpow2.f32 %v4369_v11  ;;  %v4361_v57 = vsub.f32 %v4329_v62, %v4347_v18 }
0x120f   : > { %v13721_v22 = vpop.eup %11103  ;;  %11111 = vpow2.f32 %v4375_v33  ;;  %v4379_v36 = vmul.f32 1.442695, %v4364_v25 }
0x1210   : > { %v13723_v41 = vpop.eup %11105  ;;  %v4373_v3 = vmul.f32 1.442695, %v4361_v57  ;;  %v10778_v39 = vpop.permute.xlu1 %10777  ;;  %v4384_v47 = vsel %vm1305_vm3, %v13721_v22, 0.0 }
0x1211   : > { %4385 = vadd.xlane.f32.xlu1 %v4384_v47  ;;  %v4353_v1 = vpop.xlane.xlu0 %4352  ;;  %v4381_v0 = vsel %vm1305_vm3, %v13723_v41, 0.0  ;;  %v10780_v24 = vunpack.i.h.bf16 %v10778_v39  ;;  %v10779_v32 = vunpack.i.l.bf16 %v10778_v39 }
0x1212   : > { %4382 = vadd.xlane.f32.xlu0 %v4381_v0  ;;  %11113 = vpow2.f32 %v4373_v3  ;;  %v4363_v33 = vsub.f32 %v13704_v31, %v4353_v1 }
0x1213   : > { %v10023_v8 = vpack.c.bf16 %v10780_v24, %v10779_v32  ;;  %11115 = vpow2.f32 %v4379_v36 }
0x1214   : > { %v13729_v2 = vpop.eup %11107  ;;  %v10783_v14 = vpop.permute.xlu1 %10782  ;;  %v4377_v11 = vmul.f32 1.442695, %v4363_v33 }
0x1215   : > { %v10773_v56 = vpop.permute.xlu0 %10772  ;;  %v4390_v35 = vsel %vm1305_vm3, %v13729_v2, 0.0  ;;  %v10785_v63 = vunpack.i.h.bf16 %v10783_v14  ;;  %v10784_v37 = vunpack.i.l.bf16 %v10783_v14 }
0x1216   : > { %v10775_v52 = vunpack.i.h.bf16 %v10773_v56  ;;  %v10774_v26 = vunpack.i.l.bf16 %v10773_v56  ;;  %4391 = vadd.xlane.f32.xlu1 %v4390_v35  ;;  %11117 = vpow2.f32 %v4377_v11 }
0x1217   : > { %v10027_v5 = vpack.c.bf16 %v10785_v63, %v10784_v37 }
0x1218   : > { %v13733_v17 = vpop.eup %11109  ;;  %v10019_v62 = vpack.c.bf16 %v10775_v52, %v10774_v26  ;;  %v10788_v59 = vpop.permute.xlu1 %10787 }
0x1219   : > { %v4387_v53 = vsel %vm1305_vm3, %v13733_v17, 0.0  ;;  %v13737_v51 = vpop.eup %11111  ;;  %v10790_v19 = vunpack.i.h.bf16 %v10788_v59  ;;  %v10789_v13 = vunpack.i.l.bf16 %v10788_v59  ;;  %v10793_v40 = vpop.permute.xlu0 %10792 }
0x121a   : > { %4388 = vadd.xlane.f32.xlu0 %v4387_v53  ;;  %10020 = vmatprep.subr.bf16.mxu0 %v10019_v62  ;;  %v4396_v50 = vsel %vm1305_vm3, %v13737_v51, 0.0  ;;  %v10795_v7 = vunpack.i.h.bf16 %v10793_v40  ;;  %v10794_v23 = vunpack.i.l.bf16 %v10793_v40 }
0x121b   : > { %10022 = vmatpush3.bf16.msra.mxu0 %v10019_v62  ;;  %v10031_v45 = vpack.c.bf16 %v10790_v19, %v10789_v13 }
0x121c   : > { %10024 = vmatprep.subr.bf16.mxu0 %v10023_v8  ;;  %v13741_v12 = vpop.eup %11113  ;;  %v10035_v20 = vpack.c.bf16 %v10795_v7, %v10794_v23  ;;  %v10798_v57 = vpop.permute.xlu1 %10797 }
0x121d   : > { %v4393_v9 = vsel %vm1305_vm3, %v13741_v12, 0.0  ;;  %v13763_v18 = vpop.eup %11115  ;;  %v10800_v56 = vunpack.i.h.bf16 %v10798_v57  ;;  %v10799_v35 = vunpack.i.l.bf16 %v10798_v57 }
0x121e   : > { %4397 = vadd.xlane.f32.xlu0 %v4396_v50  ;;  %v4402_v42 = vsel %vm1305_vm3, %v13763_v18, 0.0 }
0x121f   : > { %10026 = vmatpush3.bf16.msra.mxu0 %v10023_v8  ;;  %v10041_v26 = vpack.c.bf16 %v10800_v56, %v10799_v35 }
0x1220   : > { %10028 = vmatprep.subr.bf16.mxu0 %v10027_v5  ;;  %v13769_v31 = vpop.eup %11117 }
0x1221   : > { %v4399_v44 = vsel %vm1305_vm3, %v13769_v31, 0.0 }
0x1222   : > { %4394 = vadd.xlane.f32.xlu0 %v4393_v9 }
0x1223   : > { %10030 = vmatpush3.bf16.msra.mxu0 %v10027_v5 }
0x1224   : > { %10032 = vmatprep.subr.bf16.mxu0 %v10031_v45 }
0x1227   : > { %10807 = vrot.lane.b32.xlu1 %v13637_v15, %s14701_s12  ;;  %10034 = vmatpush3.bf16.msra.mxu0 %v10031_v45 }
0x1228   : > { %10037 = vmatprep.subr.msk.bf16.mxu0 %vm12620_vm2, %v10035_v20 }
0x122b   : > { %4581 = vrot.lane.b32.xlu1 %v13599_v27, %s14702_s29 }
0x1238   : > { %10802 = vrot.lane.b32.xlu0 %v13627_v29, %s14701_s12  ;;  %s14705_s12 = smov 56  }
0x123c   : > { %4579 = vrot.lane.b32.xlu0 %v13601_v54, %s14702_s29 }
0x1240   : > { %4583 = vrot.lane.b32.xlu0 %v13611_v61, %s14702_s29 }
0x1244   : > { %4587 = vrot.lane.b32.xlu0 %v13621_v34, %s14702_s29 }
0x1248   : > { %4591 = vrot.lane.b32.xlu0 %v13633_v10, %s14702_s29 }
0x124c   : > { %10812 = vrot.lane.b32.xlu0 %v13607_v6, %s14703_s2 }
0x124f   : > { %4403 = vadd.xlane.f32.xlu1 %v4402_v42 }
0x1250   : > { %10822 = vrot.lane.b32.xlu0 %v13627_v29, %s14703_s2 }
0x1253   : > { %4400 = vadd.xlane.f32.xlu1 %v4399_v44 }
0x1254   : > { %5272 = vrot.lane.b32.xlu0 %v13601_v54, %s14704_s0 }
0x1258   : > { %5276 = vrot.lane.b32.xlu0 %v13611_v61, %s14704_s0 }
0x125c   : > { %5280 = vrot.lane.b32.xlu0 %v13621_v34, %s14704_s0 }
0x1260   : > { %5284 = vrot.lane.b32.xlu0 %v13633_v10, %s14704_s0 }
0x1264   : > { %4585 = vrot.lane.b32.xlu1 %v13609_v21, %s14702_s29 }
0x1268   : > { %4589 = vrot.lane.b32.xlu1 %v13619_v49, %s14702_s29 }
0x126c   : > { %4593 = vrot.lane.b32.xlu1 %v13631_v58, %s14702_s29  ;;  %s14706_s29 = smov 72  }
0x1270   : > { %10817 = vrot.lane.b32.xlu1 %v13617_v4, %s14703_s2 }
0x1274   : > { %10827 = vrot.lane.b32.xlu1 %v13637_v15, %s14703_s2  ;;  %s14707_s2 = smov 104  }
0x1278   : > { %5274 = vrot.lane.b32.xlu1 %v13599_v27, %s14704_s0 }
0x127c   : > { %5278 = vrot.lane.b32.xlu1 %v13609_v21, %s14704_s0 }
0x1280   : > { %5282 = vrot.lane.b32.xlu1 %v13619_v49, %s14704_s0 }
0x1284   : > { %5286 = vrot.lane.b32.xlu1 %v13631_v58, %s14704_s0 }
0x129e   : > { %v4386_v3 = vpop.xlane.xlu1 %4385 }
0x129f   : > { %11119 = vrcp.f32 %v4386_v3  ;;  %v4383_v39 = vpop.xlane.xlu0 %4382 }
0x12a0   : > { %11121 = vrcp.f32 %v4383_v39 }
0x12a3   : > { %v4392_v47 = vpop.xlane.xlu1 %4391 }
0x12a4   : > { %11123 = vrcp.f32 %v4392_v47 }
0x12a7   : > { %v4389_v1 = vpop.xlane.xlu0 %4388  ;;  %v10808_v19 = vpop.permute.xlu1 %10807 }
0x12a8   : > { %11125 = vrcp.f32 %v4389_v1  ;;  %v10809_v9 = vunpack.i.l.bf16 %v10808_v19 }
0x12a9   : > { %v11120_v0 = vpop.eup %11119 }
0x12aa   : > { %v11122_v14 = vpop.eup %11121  ;;  %v4408_v52 = vmul.f32 %v11120_v0, %v13721_v22 }
0x12ab   : > { %v4398_v24 = vpop.xlane.xlu0 %4397  ;;  %v4406_v32 = vmul.f32 %v11122_v14, %v13723_v41  ;;  %v4582_v11 = vpop.permute.xlu1 %4581 }
0x12ac   : > { %11127 = vrcp.f32 %v4398_v24 }
0x12ad   : > { %9324 = vmatprep.mubr.msk.f32.mxu0 %vm1305_vm3, %v4406_v32 }
0x12ae   : > { %9325 = vmatmul.mubr.msk.f32.vlgmr.msra.gmra.mrb[48].mxu0 %vm1305_vm3, %v4408_v52  ;;  %v11124_v53 = vpop.eup %11123 }
0x12af   : > { %10040 = vmatpush3.bf16.xpose.msk.msra.mxu0 %vm12620_vm2, %v10035_v20  ;;  %v4395_v62 = vpop.xlane.xlu0 %4394  ;;  %v4412_v59 = vmul.f32 %v11124_v53, %v13729_v2 }
0x12b0   : > { %11129 = vrcp.f32 %v4395_v62  ;;  %10043 = vmatprep.subr.msk.bf16.mxu0 %vm12620_vm2, %v10041_v26 }
0x12b2   : > { %v11126_v63 = vpop.eup %11125 }
0x12b3   : > { %v10803_v37 = vpop.permute.xlu0 %10802  ;;  %v4410_v41 = vmul.f32 %v11126_v63, %v13733_v17  ;;  %v10810_v17 = vunpack.i.h.bf16 %v10808_v19 }
0x12b4   : > { %v10805_v22 = vunpack.i.h.bf16 %v10803_v37  ;;  %v10804_v8 = vunpack.i.l.bf16 %v10803_v37 }
0x12b5   : > { %9327 = vmatprep.mubr.msk.f32.mxu0 %vm1305_vm3, %v4410_v41  ;;  %v10053_v45 = vpack.c.bf16 %v10810_v17, %v10809_v9 }
0x12b6   : > { %v10047_v50 = vpack.c.bf16 %v10805_v22, %v10804_v8  ;;  %9328 = vmatmul.mubr.msk.f32.gmra.mrb[50].mxu0 %vm1305_vm3, %v4412_v59  ;;  %v11128_v5 = vpop.eup %11127 }
0x12b7   : > { %10046 = vmatpush3.bf16.xpose.msk.msra.mxu0 %vm12620_vm2, %v10041_v26  ;;  %v4580_v13 = vpop.permute.xlu0 %4579  ;;  %v4416_v23 = vmul.f32 %v11128_v5, %v13737_v51 }
0x12b8   : > { %10049 = vmatprep.subr.msk.bf16.mxu0 %vm12620_vm2, %v10047_v50 }
0x12ba   : > { %v11130_v40 = vpop.eup %11129 }
0x12bb   : > { %v4584_v7 = vpop.permute.xlu0 %4583  ;;  %v4414_v2 = vmul.f32 %v11130_v40, %v13741_v12 }
0x12bd   : > { %9330 = vmatprep.mubr.msk.f32.mxu0 %vm1305_vm3, %v4414_v2 }
0x12be   : > { %9331 = vmatmul.mubr.msk.f32.gmra.mrb[52].mxu0 %vm1305_vm3, %v4416_v23 }
0x12bf   : > { %10052 = vmatpush3.bf16.xpose.msk.msra.mxu0 %vm12620_vm2, %v10047_v50  ;;  %v4588_v20 = vpop.permute.xlu0 %4587 }
0x12c0   : > { %10055 = vmatprep.subr.msk.bf16.mxu0 %vm12620_vm2, %v10053_v45 }
0x12c3   : > { %v4592_v25 = vpop.permute.xlu0 %4591 }
0x12c7   : > { %10058 = vmatpush3.bf16.xpose.msk.msra.mxu0 %vm12620_vm2, %v10053_v45  ;;  %v10813_v36 = vpop.permute.xlu0 %10812 }
0x12c8   : > { %v10815_v12 = vunpack.i.h.bf16 %v10813_v36  ;;  %v10814_v33 = vunpack.i.l.bf16 %v10813_v36  ;;  %v8225_v36 = vld [vmem:[%s14699_s6 + $0x148] sm:$0xff] }
0x12ca   : > { %v10075_v51 = vpack.c.bf16 %v10815_v12, %v10814_v33 }
0x12cb   : > { %v10823_v52 = vpop.permute.xlu0 %10822 }
0x12cc   : > { %10077 = vmatprep.subr.msk.bf16.mxu0 %vm12620_vm2, %v10075_v51 }
0x12cf   : > { %v5273_v53 = vpop.permute.xlu0 %5272 }
0x12d3   : > { %v5277_v8 = vpop.permute.xlu0 %5276 }
0x12d7   : > { %v5281_v50 = vpop.permute.xlu0 %5280 }
0x12dc   : > { %v4404_v42 = vpop.xlane.xlu1 %4403 }
0x12dd   : > { %11131 = vrcp.f32 %v4404_v42 }
0x12e0   : > { %v4401_v44 = vpop.xlane.xlu1 %4400 }
0x12e1   : > { %11133 = vrcp.f32 %v4401_v44 }
0x12e4   : > { %v4586_v57 = vpop.permute.xlu1 %4585 }
0x12e7   : > { %v11132_v39 = vpop.eup %11131 }
0x12e8   : > { %v4590_v3 = vpop.permute.xlu1 %4589  ;;  %v4420_v14 = vmul.f32 %v11132_v39, %v13763_v18  ;;  %v10825_v18 = vunpack.i.h.bf16 %v10823_v52 }
0x12eb   : > { %v11134_v47 = vpop.eup %11133 }
0x12ec   : > { %v4594_v1 = vpop.permute.xlu1 %4593  ;;  %v4418_v0 = vmul.f32 %v11134_v47, %v13769_v31  ;;  %v10824_v31 = vunpack.i.l.bf16 %v10823_v52 }
0x12ee   : > { %9333 = vmatprep.mubr.msk.f32.mxu0 %vm1305_vm3, %v4418_v0  ;;  %v10087_v26 = vpack.c.bf16 %v10825_v18, %v10824_v31 }
0x12ef   : > { %9334 = vmatmul.mubr.msk.f32.gmra.mrb[54].mxu0 %vm1305_vm3, %v4420_v14 }
0x12f0   : > { %v10818_v56 = vpop.permute.xlu1 %10817  ;;  %9352 = vmatprep.mubr.msk.f32.mxu0 %vm1143_vm1, %v4580_v13  ;;  %v5285_v13 = vpop.permute.xlu0 %5284 }
0x12f1   : > { %v10820_v35 = vunpack.i.h.bf16 %v10818_v56  ;;  %v10819_v24 = vunpack.i.l.bf16 %v10818_v56 }
0x12f3   : > { %v10081_v32 = vpack.c.bf16 %v10820_v35, %v10819_v24  ;;  %9353 = vmatmul.mubr.msk.f32.vlgmr.msra.gmra.mrb[56].mxu0 %vm1143_vm1, %v4582_v11  ;;  %v8226_v35 = vld [vmem:[%s14699_s6 + $0x150] sm:$0xff] }
0x12f4   : > { %10080 = vmatpush3.bf16.xpose.msk.msra.mxu0 %vm12620_vm2, %v10075_v51  ;;  %9355 = vmatprep.mubr.msk.f32.mxu0 %vm1143_vm1, %v4584_v7  ;;  %v10828_v62 = vpop.permute.xlu1 %10827  ;;  %v8224_v51 = vld [vmem:[%s14699_s6 + $0x140] sm:$0xff] }
0x12f5   : > { %10083 = vmatprep.subr.msk.bf16.mxu0 %vm12620_vm2, %v10081_v32  ;;  %v10830_v63 = vunpack.i.h.bf16 %v10828_v62  ;;  %v10829_v37 = vunpack.i.l.bf16 %v10828_v62 }
0x12f7   : > { %9356 = vmatmul.mubr.msk.f32.gmra.mrb[58].mxu0 %vm1143_vm1, %v4586_v57  ;;  %v10093_v41 = vpack.c.bf16 %v10830_v63, %v10829_v37  ;;  %v8228_v63 = vld [vmem:[%s14699_s6 + $0x160] sm:$0xff] }
0x12f8   : > { %9358 = vmatprep.mubr.msk.f32.mxu0 %vm1143_vm1, %v4588_v20  ;;  %v5275_v22 = vpop.permute.xlu1 %5274 }
0x12fb   : > { %9359 = vmatmul.mubr.msk.f32.gmra.mrb[60].mxu0 %vm1143_vm1, %v4590_v3  ;;  %v8227_v3 = vld [vmem:[%s14699_s6 + $0x158] sm:$0xff] }
0x12fc   : > { %10086 = vmatpush3.bf16.xpose.msk.msra.mxu0 %vm12620_vm2, %v10081_v32  ;;  %9361 = vmatprep.mubr.msk.f32.mxu0 %vm1143_vm1, %v4592_v25  ;;  %v5279_v59 = vpop.permute.xlu1 %5278  ;;  %v8229_v32 = vld [vmem:[%s14699_s6 + $0x168] sm:$0xff] }
0x12fd   : > { %10089 = vmatprep.subr.msk.bf16.mxu0 %vm12620_vm2, %v10087_v26 }
0x12ff   : > { %9362 = vmatmul.mubr.msk.f32.gmra.mrb[62].mxu0 %vm1143_vm1, %v4594_v1 }
0x1300   : > { %9436 = vmatprep.mubr.msk.f32.mxu0 %vm1143_vm1, %v5273_v53  ;;  %v5283_v19 = vpop.permute.xlu1 %5282 }
0x1304   : > { %10092 = vmatpush3.bf16.xpose.msk.msra.mxu0 %vm12620_vm2, %v10087_v26  ;;  %v5287_v5 = vpop.permute.xlu1 %5286 }
0x1305   : > { %10095 = vmatprep.subr.msk.bf16.mxu0 %vm12620_vm2, %v10093_v41 }
0x130c   : > { %10098 = vmatpush3.bf16.xpose.msk.msra.mxu0 %vm12620_vm2, %v10093_v41  ;;  %v8231_v41 = vld [vmem:[%s14699_s6 + $0x178] sm:$0xff] }
0x1313   : > { %9437 = vmatmul.mubr.msk.f32.vlgmr.msra.gmra.mrb[64].mxu0 %vm1143_vm1, %v5275_v22 }
0x1314   : > { %9439 = vmatprep.mubr.msk.f32.mxu0 %vm1143_vm1, %v5277_v8 }
0x1317   : > { %9440 = vmatmul.mubr.msk.f32.gmra.mrb[66].mxu0 %vm1143_vm1, %v5279_v59 }
0x1318   : > { %9442 = vmatprep.mubr.msk.f32.mxu0 %vm1143_vm1, %v5281_v50 }
0x131b   : > { %9443 = vmatmul.mubr.msk.f32.gmra.mrb[68].mxu0 %vm1143_vm1, %v5283_v19 }
0x131c   : > { %9445 = vmatprep.mubr.msk.f32.mxu0 %vm1143_vm1, %v5285_v13 }
0x131f   : > { %9446 = vmatmul.mubr.msk.f32.gmra.mrb[70].mxu0 %vm1143_vm1, %v5287_v5 }
0x1381   : > { %v13863_v40 = vpop.f32.mrb[48].mxu0 }
0x1382   : > { %v13865_v17 = vpop.f32.mrb[49].mxu0 }
0x1389   : > { %v13867_v9 = vpop.f32.mrb[50].mxu0 }
0x138a   : > { %v13869_v7 = vpop.f32.mrb[51].mxu0 }
0x1391   : > { %v13871_v2 = vpop.f32.mrb[52].mxu0 }
0x1392   : > { %v13873_v23 = vpop.f32.mrb[53].mxu0 }
0x13c2   : > { %v13875_v45 = vpop.f32.mrb[54].mxu0 }
0x13c3   : > { %v13877_v20 = vpop.f32.mrb[55].mxu0 }
0x13c6   : > { %v9354_v25 = vpop.f32.mrb[56].mxu0 }
0x13c7   : > { %v4749_v12 = vmul.f32 0.35355338, %v9354_v25  ;;  %v4709_v33 = vpop.f32.mrb[57].mxu0  ;;  %v8230_v25 = vld [vmem:[%s14699_s6 + $0x170] sm:$0xff] }
0x13c8   : > { %v4748_v11 = vmul.f32 0.35355338, %v4709_v33 }
0x13c9   : > { %v4766_v42 = vadd.f32 %v8225_v36, %v4749_v12 }
0x13ca   : > { %v4765_v44 = vadd.f32 %v8224_v51, %v4748_v11  ;;  %v9357_v57 = vpop.f32.mrb[58].mxu0 }
0x13cb   : > { %v4751_v39 = vmul.f32 0.35355338, %v9357_v57  ;;  %v4719_v47 = vpop.f32.mrb[59].mxu0  ;;  %v4776_v1 = vsel %vm1305_vm3, %v4766_v42, -inf }
0x13cc   : > { %v4750_v0 = vmul.f32 0.35355338, %v4719_v47  ;;  %4777 = vmax.xlane.f32.xlu1 %v4776_v1  ;;  %v4773_v14 = vsel %vm1305_vm3, %v4765_v44, -inf }
0x13cd   : > { %v4768_v56 = vadd.f32 %v8227_v3, %v4751_v39  ;;  %4774 = vmax.xlane.f32.xlu0 %v4773_v14 }
0x13ce   : > { %v9360_v24 = vpop.f32.mrb[60].mxu0  ;;  %v4767_v26 = vadd.f32 %v8226_v35, %v4750_v0 }
0x13cf   : > { %v4753_v52 = vmul.f32 0.35355338, %v9360_v24  ;;  %v4729_v18 = vpop.f32.mrb[61].mxu0  ;;  %v4782_v31 = vsel %vm1305_vm3, %v4768_v56, -inf }
0x13d0   : > { %v4752_v62 = vmul.f32 0.35355338, %v4729_v18  ;;  %v4779_v13 = vsel %vm1305_vm3, %v4767_v26, -inf }
0x13d1   : > { %v4770_v53 = vadd.f32 %v8229_v32, %v4753_v52  ;;  %4783 = vmax.xlane.f32.xlu0 %v4782_v31 }
0x13d2   : > { %v9363_v37 = vpop.f32.mrb[62].mxu0  ;;  %v4769_v50 = vadd.f32 %v8228_v63, %v4752_v62 }
0x13d3   : > { %v4755_v22 = vmul.f32 0.35355338, %v9363_v37  ;;  %v4739_v8 = vpop.f32.mrb[63].mxu0  ;;  %v4788_v59 = vsel %vm1305_vm3, %v4770_v53, -inf }
0x13d4   : > { %v4754_v19 = vmul.f32 0.35355338, %v4739_v8  ;;  %4789 = vmax.xlane.f32.xlu1 %v4788_v59  ;;  %v4785_v33 = vsel %vm1305_vm3, %v4769_v50, -inf }
0x13d5   : > { %v4772_v5 = vadd.f32 %v8231_v41, %v4755_v22  ;;  %4780 = vmax.xlane.f32.xlu0 %v4779_v13 }
0x13d6   : > { %v4771_v12 = vadd.f32 %v8230_v25, %v4754_v19 }
0x13d7   : > { %v4794_v36 = vsel %vm1305_vm3, %v4772_v5, -inf }
0x13d8   : > { %4795 = vmax.xlane.f32.xlu1 %v4794_v36  ;;  %v4791_v51 = vsel %vm1305_vm3, %v4771_v12, -inf }
0x13d9   : > { %4786 = vmax.xlane.f32.xlu0 %v4785_v33 }
0x13dd   : > { %4792 = vmax.xlane.f32.xlu0 %v4791_v51 }
0x13e6   : > { %v13911_v11 = vpop.f32.mrb[64].mxu0 }
0x13e7   : > { %v13913_v57 = vpop.f32.mrb[65].mxu0 }
0x13e9   : > { %10837 = vrot.lane.b32.xlu1 %v13617_v4, %s14705_s12 }
0x13ea   : > { %v13917_v3 = vpop.f32.mrb[66].mxu0 }
0x13eb   : > { %v13919_v39 = vpop.f32.mrb[67].mxu0 }
0x13ee   : > { %v13921_v47 = vpop.f32.mrb[68].mxu0 }
0x13ef   : > { %v13923_v1 = vpop.f32.mrb[69].mxu0 }
0x13f2   : > { %v13925_v0 = vpop.f32.mrb[70].mxu0 }
0x13f3   : > { %v13927_v14 = vpop.f32.mrb[71].mxu0  ;;  %10832 = vrot.lane.b32.xlu0 %v13607_v6, %s14705_s12 }
0x1459   : > { %v4778_v35 = vpop.xlane.xlu1 %4777 }
0x145a   : > { %v4798_v24 = vsub.f32 %v4766_v42, %v4778_v35  ;;  %v4775_v32 = vpop.xlane.xlu0 %4774 }
0x145b   : > { %v4797_v52 = vsub.f32 %v4765_v44, %v4775_v32 }
0x145c   : > { %v4807_v18 = vmul.f32 1.442695, %v4798_v24 }
0x145d   : > { %v4805_v31 = vmul.f32 1.442695, %v4797_v52 }
0x145e   : > { %11135 = vpow2.f32 %v4807_v18  ;;  %v4784_v62 = vpop.xlane.xlu0 %4783 }
0x145f   : > { %11137 = vpow2.f32 %v4805_v31  ;;  %v4800_v63 = vsub.f32 %v4768_v56, %v4784_v62 }
0x1461   : > { %v4811_v37 = vmul.f32 1.442695, %v4800_v63  ;;  %v4790_v41 = vpop.xlane.xlu1 %4789 }
0x1462   : > { %v4802_v22 = vsub.f32 %v4770_v53, %v4790_v41  ;;  %v4781_v8 = vpop.xlane.xlu0 %4780 }
0x1463   : > { %11139 = vpow2.f32 %v4811_v37  ;;  %v4799_v59 = vsub.f32 %v4767_v26, %v4781_v8 }
0x1464   : > { %v4815_v19 = vmul.f32 1.442695, %v4802_v22 }
0x1465   : > { %v4809_v13 = vmul.f32 1.442695, %v4799_v59  ;;  %v4796_v25 = vpop.xlane.xlu1 %4795 }
0x1466   : > { %11141 = vpow2.f32 %v4815_v19  ;;  %v4804_v36 = vsub.f32 %v4772_v5, %v4796_v25  ;;  %v4787_v42 = vpop.xlane.xlu0 %4786 }
0x1467   : > { %11143 = vpow2.f32 %v4809_v13  ;;  %v4801_v44 = vsub.f32 %v4769_v50, %v4787_v42 }
0x1468   : > { %v13931_v33 = vpop.eup %11135  ;;  %v4819_v51 = vmul.f32 1.442695, %v4804_v36 }
0x1469   : > { %v13933_v35 = vpop.eup %11137  ;;  %v4813_v56 = vmul.f32 1.442695, %v4801_v44  ;;  %v4824_v53 = vsel %vm1305_vm3, %v13931_v33, 0.0  ;;  %v10838_v50 = vpop.permute.xlu1 %10837 }
0x146a   : > { %11145 = vpow2.f32 %v4819_v51  ;;  %4825 = vadd.xlane.f32.xlu1 %v4824_v53  ;;  %v4793_v26 = vpop.xlane.xlu0 %4792  ;;  %v4821_v24 = vsel %vm1305_vm3, %v13933_v35, 0.0  ;;  %v10840_v41 = vunpack.i.h.bf16 %v10838_v50  ;;  %v10839_v22 = vunpack.i.l.bf16 %v10838_v50 }
0x146b   : > { %11147 = vpow2.f32 %v4813_v56  ;;  %v4803_v5 = vsub.f32 %v4771_v12, %v4793_v26  ;;  %4822 = vadd.xlane.f32.xlu0 %v4821_v24  ;;  %v5446_v26 = vmul.f32 0.35355338, %v13921_v47 }
0x146c   : > { %v10063_v25 = vpack.c.bf16 %v10840_v41, %v10839_v22 }
0x146d   : > { %v13939_v32 = vpop.eup %11139  ;;  %v4817_v52 = vmul.f32 1.442695, %v4803_v5 }
0x146e   : > { %v10833_v18 = vpop.permute.xlu0 %10832  ;;  %v4830_v31 = vsel %vm1305_vm3, %v13939_v32, 0.0 }
0x146f   : > { %11149 = vpow2.f32 %v4817_v52  ;;  %v10835_v62 = vunpack.i.h.bf16 %v10833_v18  ;;  %v10834_v63 = vunpack.i.l.bf16 %v10833_v18  ;;  %4831 = vadd.xlane.f32.xlu1 %v4830_v31  ;;  %v5445_v52 = vmul.f32 0.35355338, %v13923_v1  ;;  %v8276_v31 = vld [vmem:[%s14699_s6 + $0x1a0] sm:$0xff] }
0x1470   : > { %v13943_v37 = vpop.eup %11141  ;;  %v5448_v18 = vmul.f32 0.35355338, %v13925_v0  ;;  %v5447_v0 = vmul.f32 0.35355338, %v13927_v14 }
0x1471   : > { %v13945_v8 = vpop.eup %11143  ;;  %v10059_v12 = vpack.c.bf16 %v10835_v62, %v10834_v63  ;;  %v4836_v59 = vsel %vm1305_vm3, %v13943_v37, 0.0  ;;  %v8279_v62 = vld [vmem:[%s14699_s6 + $0x1b8] sm:$0xff]  ;;  %v14037_v41 = vadd.f32 %v8276_v31, %v5445_v52 }
0x1472   : > { %v4827_v19 = vsel %vm1305_vm3, %v13945_v8, 0.0  ;;  %v14039_v1 = vadd.f32 %v8279_v62, %v5448_v18 }
0x1473   : > { %4837 = vadd.xlane.f32.xlu1 %v4836_v59  ;;  %4828 = vadd.xlane.f32.xlu0 %v4827_v19  ;;  %v5478_v19 = vsel %vm1305_vm3, %v14037_v41, -inf }
0x1474   : > { %v13951_v13 = vpop.eup %11145  ;;  %10060 = vmatprep.subr.bf16.mxu1 %v10059_v12 }
0x1475   : > { %v13953_v36 = vpop.eup %11147  ;;  %10062 = vmatpush3.bf16.msra.mxu1 %v10059_v12  ;;  %v4842_v42 = vsel %vm1305_vm3, %v13951_v13, 0.0  ;;  %v8278_v12 = vld [vmem:[%s14699_s6 + $0x1b0] sm:$0xff] }
0x1476   : > { %10064 = vmatprep.subr.bf16.mxu1 %v10063_v25  ;;  %v4833_v44 = vsel %vm1305_vm3, %v13953_v36, 0.0  ;;  %v14047_v59 = vadd.f32 %v8278_v12, %v5447_v0 }
0x1477   : > { %4843 = vadd.xlane.f32.xlu1 %v4842_v42  ;;  %4834 = vadd.xlane.f32.xlu0 %v4833_v44 }
0x1478   : > { %v5484_v14 = vsel %vm1305_vm3, %v14047_v59, -inf }
0x1479   : > { %v13959_v51 = vpop.eup %11149  ;;  %10066 = vmatpush3.bf16.msra.mxu1 %v10063_v25  ;;  %v5487_v25 = vsel %vm1305_vm3, %v14039_v1, -inf }
0x147a   : > { %v4839_v56 = vsel %vm1305_vm3, %v13959_v51, 0.0 }
0x147b   : > { %4840 = vadd.xlane.f32.xlu1 %v4839_v56 }
0x148c   : > { %10847 = vrot.lane.b32.xlu1 %v13637_v15, %s14705_s12 }
0x148d   : > { %10842 = vrot.lane.b32.xlu0 %v13627_v29, %s14705_s12 }
0x1490   : > { %10857 = vrot.lane.b32.xlu1 %v13617_v4, %s14706_s29 }
0x1491   : > { %10852 = vrot.lane.b32.xlu0 %v13607_v6, %s14706_s29 }
0x1494   : > { %10867 = vrot.lane.b32.xlu1 %v13637_v15, %s14706_s29 }
0x1495   : > { %10862 = vrot.lane.b32.xlu0 %v13627_v29, %s14706_s29  ;;  %s14710_s29 = sld [smem:[#allocation53_spill]] }
0x1498   : > { %5846 = vrot.lane.b32.xlu1 %v13599_v27, %s14707_s2  ;;  %v5441_v27 = vmul.f32 0.35355338, %v13913_v57  ;;  %v5444_v57 = vmul.f32 0.35355338, %v13917_v3 }
0x1499   : > { %5844 = vrot.lane.b32.xlu0 %v13601_v54, %s14707_s2  ;;  %v8272_v54 = vld [vmem:[%s14699_s6 + $0x180] sm:$0xff] }
0x149c   : > { %5850 = vrot.lane.b32.xlu1 %v13609_v21, %s14707_s2  ;;  %v5442_v21 = vmul.f32 0.35355338, %v13911_v11  ;;  %v8275_v11 = vld [vmem:[%s14699_s6 + $0x198] sm:$0xff] }
0x149d   : > { %5848 = vrot.lane.b32.xlu0 %v13611_v61, %s14707_s2  ;;  %v8273_v61 = vld [vmem:[%s14699_s6 + $0x188] sm:$0xff]  ;;  %v14019_v5 = vadd.f32 %v8275_v11, %v5444_v57 }
0x149f   : > { %v5475_v63 = vsel %vm1305_vm3, %v14019_v5, -inf }
0x14a0   : > { %5854 = vrot.lane.b32.xlu1 %v13619_v49, %s14707_s2  ;;  %v13999_v49 = vadd.f32 %v8272_v54, %v5441_v27 }
0x14a1   : > { %5852 = vrot.lane.b32.xlu0 %v13621_v34, %s14707_s2  ;;  %v5443_v34 = vmul.f32 0.35355338, %v13919_v39  ;;  %v8277_v39 = vld [vmem:[%s14699_s6 + $0x1a8] sm:$0xff] }
0x14a2   : > { %v5466_v24 = vsel %vm1305_vm3, %v13999_v49, -inf  ;;  %v14023_v50 = vadd.f32 %v8277_v39, %v5446_v26 }
0x14a4   : > { %5858 = vrot.lane.b32.xlu1 %v13631_v58, %s14707_s2  ;;  %v8274_v58 = vld [vmem:[%s14699_s6 + $0x190] sm:$0xff]  ;;  %v5481_v22 = vsel %vm1305_vm3, %v14023_v50, -inf }
0x14a5   : > { %5856 = vrot.lane.b32.xlu0 %v13633_v10, %s14707_s2  ;;  %v14005_v10 = vadd.f32 %v8273_v61, %v5442_v21  ;;  %v14011_v53 = vadd.f32 %v8274_v58, %v5443_v34 }
0x14a7   : > { %v5469_v3 = vsel %vm1305_vm3, %v14005_v10, -inf  ;;  %v5472_v47 = vsel %vm1305_vm3, %v14011_v53, -inf }
0x14c4   : > { %5467 = vmax.xlane.f32.xlu0 %v5466_v24 }
0x14c8   : > { %5473 = vmax.xlane.f32.xlu0 %v5472_v47  ;;  %5470 = vmax.xlane.f32.xlu1 %v5469_v3 }
0x14cc   : > { %5476 = vmax.xlane.f32.xlu0 %v5475_v63  ;;  %5482 = vmax.xlane.f32.xlu1 %v5481_v22 }
0x14d0   : > { %5479 = vmax.xlane.f32.xlu0 %v5478_v19  ;;  %5488 = vmax.xlane.f32.xlu1 %v5487_v25 }
0x14d4   : > { %5485 = vmax.xlane.f32.xlu0 %v5484_v14 }
0x14e1   : > { %10877 = vrot.lane.b32.xlu1 %v13617_v4, %s14708_s4 }
0x14ea   : > { %10872 = vrot.lane.b32.xlu0 %v13607_v6, %s14708_s4 }
0x14f7   : > { %v4826_v42 = vpop.xlane.xlu1 %4825 }
0x14f8   : > { %v4823_v44 = vpop.xlane.xlu0 %4822 }
0x14f9   : > { %11151 = vrcp.f32 %v4823_v44 }
0x14fa   : > { %11153 = vrcp.f32 %v4826_v42 }
0x14fc   : > { %v4832_v56 = vpop.xlane.xlu1 %4831 }
0x1500   : > { %v4838_v27 = vpop.xlane.xlu1 %4837  ;;  %v4829_v54 = vpop.xlane.xlu0 %4828 }
0x1501   : > { %11155 = vrcp.f32 %v4829_v54 }
0x1502   : > { %11157 = vrcp.f32 %v4832_v56 }
0x1503   : > { %v11152_v21 = vpop.eup %11151 }
0x1504   : > { %v4844_v61 = vpop.xlane.xlu1 %4843  ;;  %v4835_v34 = vpop.xlane.xlu0 %4834  ;;  %v4846_v58 = vmul.f32 %v11152_v21, %v13933_v35 }
0x1505   : > { %11159 = vrcp.f32 %v4835_v34  ;;  %v11154_v0 = vpop.eup %11153 }
0x1506   : > { %9380 = vmatprep.mubr.msk.f32.mxu1 %vm1305_vm3, %v4846_v58  ;;  %11161 = vrcp.f32 %v4838_v27  ;;  %v4848_v42 = vmul.f32 %v11154_v0, %v13931_v33 }
0x1508   : > { %v4841_v57 = vpop.xlane.xlu1 %4840  ;;  %v10843_v11 = vpop.permute.xlu0 %10842 }
0x1509   : > { %v10845_v26 = vunpack.i.h.bf16 %v10843_v11  ;;  %v10844_v24 = vunpack.i.l.bf16 %v10843_v11  ;;  %11163 = vrcp.f32 %v4841_v57 }
0x150a   : > { %11165 = vrcp.f32 %v4844_v61 }
0x150b   : > { %v10067_v39 = vpack.c.bf16 %v10845_v26, %v10844_v24  ;;  %v11156_v19 = vpop.eup %11155 }
0x150c   : > { %v10848_v3 = vpop.permute.xlu1 %10847  ;;  %v10853_v52 = vpop.permute.xlu0 %10852  ;;  %v4850_v54 = vmul.f32 %v11156_v19, %v13945_v8 }
0x150d   : > { %v10850_v18 = vunpack.i.h.bf16 %v10848_v3  ;;  %v10849_v47 = vunpack.i.l.bf16 %v10848_v3  ;;  %v10855_v31 = vunpack.i.h.bf16 %v10853_v52  ;;  %v10854_v62 = vunpack.i.l.bf16 %v10853_v52  ;;  %10068 = vmatprep.subr.bf16.mxu1 %v10067_v39  ;;  %v11158_v56 = vpop.eup %11157 }
0x150e   : > { %10070 = vmatpush3.bf16.msra.mxu1 %v10067_v39  ;;  %v4852_v61 = vmul.f32 %v11158_v56, %v13939_v32 }
0x150f   : > { %v10071_v35 = vpack.c.bf16 %v10850_v18, %v10849_v47  ;;  %v10115_v63 = vpack.c.bf16 %v10855_v31, %v10854_v62  ;;  %v11160_v21 = vpop.eup %11159 }
0x1510   : > { %v10858_v22 = vpop.permute.xlu1 %10857  ;;  %v10863_v12 = vpop.permute.xlu0 %10862  ;;  %v4854_v57 = vmul.f32 %v11160_v21, %v13953_v36 }
0x1511   : > { %v10860_v25 = vunpack.i.h.bf16 %v10858_v22  ;;  %v10859_v14 = vunpack.i.l.bf16 %v10858_v22  ;;  %10072 = vmatprep.subr.bf16.mxu1 %v10071_v35  ;;  %10117 = vmatprep.subr.msk.bf16.mxu0 %vm12620_vm2, %v10115_v63  ;;  %v10865_v34 = vunpack.i.h.bf16 %v10863_v12  ;;  %v10864_v58 = vunpack.i.l.bf16 %v10863_v12  ;;  %v11162_v33 = vpop.eup %11161 }
0x1512   : > { %10074 = vmatpush3.bf16.msra.mxu1 %v10071_v35  ;;  %10120 = vmatpush3.bf16.xpose.msk.msra.mxu0 %vm12620_vm2, %v10115_v63  ;;  %v4856_v24 = vmul.f32 %v11162_v33, %v13943_v37 }
0x1513   : > { %v10121_v44 = vpack.c.bf16 %v10860_v25, %v10859_v14  ;;  %v11164_v11 = vpop.eup %11163  ;;  %v10127_v26 = vpack.c.bf16 %v10865_v34, %v10864_v58 }
0x1514   : > { %v5845_v27 = vpop.permute.xlu0 %5844  ;;  %v10868_v8 = vpop.permute.xlu1 %10867  ;;  %v4858_v32 = vmul.f32 %v11164_v11, %v13959_v51 }
0x1515   : > { %9381 = vmatmul.mubr.msk.f32.vlgmr.msra.gmra.mrb[64].mxu1 %vm1305_vm3, %v4848_v42  ;;  %10123 = vmatprep.subr.msk.bf16.mxu0 %vm12620_vm2, %v10121_v44  ;;  %v11166_v39 = vpop.eup %11165  ;;  %v10870_v3 = vunpack.i.h.bf16 %v10868_v8  ;;  %v10869_v36 = vunpack.i.l.bf16 %v10868_v8 }
0x1516   : > { %9506 = vmatprep.mubr.msk.f32.mxu0 %vm1143_vm1, %v5845_v27  ;;  %9383 = vmatprep.mubr.msk.f32.mxu1 %vm1305_vm3, %v4850_v54  ;;  %v4860_v52 = vmul.f32 %v11166_v39, %v13951_v13  ;;  %v4576_v39 = vld [vmem:[#allocation11 + $0x28] sm:$0xff] }
0x1517   : > { %v10133_v18 = vpack.c.bf16 %v10870_v3, %v10869_v36  ;;  %9392 = vmatprep.subr.mxu1 %v4576_v39  ;;  %v4575_v3 = vld [vmem:[#allocation11 + $0x20] sm:$0xff] }
0x1518   : > { %v5847_v37 = vpop.permute.xlu1 %5846  ;;  %v5849_v51 = vpop.permute.xlu0 %5848  ;;  %9393 = vmatpush3.msra.mxu1 %v4576_v39 }
0x1519   : > { %9384 = vmatmul.mubr.msk.f32.gmra.mrb[66].mxu1 %vm1305_vm3, %v4852_v61  ;;  %9406 = vmatprep.subr.mxu1 %v4575_v3 }
0x151a   : > { %9386 = vmatprep.mubr.msk.f32.mxu1 %vm1305_vm3, %v4854_v57  ;;  %10126 = vmatpush3.bf16.xpose.msk.msra.mxu0 %vm12620_vm2, %v10121_v44 }
0x151b   : > { %10129 = vmatprep.subr.msk.bf16.mxu0 %vm12620_vm2, %v10127_v26 }
0x151c   : > { %v5851_v47 = vpop.permute.xlu1 %5850  ;;  %v5853_v13 = vpop.permute.xlu0 %5852 }
0x151d   : > { %9387 = vmatmul.mubr.msk.f32.gmra.mrb[68].mxu1 %vm1305_vm3, %v4856_v24 }
0x151e   : > { %9389 = vmatprep.mubr.msk.f32.mxu1 %vm1305_vm3, %v4858_v32 }
0x1520   : > { %v5855_v31 = vpop.permute.xlu1 %5854  ;;  %v5857_v62 = vpop.permute.xlu0 %5856 }
0x1521   : > { %9390 = vmatmul.mubr.msk.f32.gmra.mrb[70].mxu1 %vm1305_vm3, %v4860_v52 }
0x1522   : > { %10132 = vmatpush3.bf16.xpose.msk.msra.mxu0 %vm12620_vm2, %v10127_v26 }
0x1523   : > { %10135 = vmatprep.subr.msk.bf16.mxu0 %vm12620_vm2, %v10133_v18 }
0x1524   : > { %v5859_v35 = vpop.permute.xlu1 %5858 }
0x152a   : > { %10138 = vmatpush3.bf16.xpose.msk.msra.mxu0 %vm12620_vm2, %v10133_v18 }
0x1531   : > { %9507 = vmatmul.mubr.msk.f32.vlgmr.msra.gmra.mrb[72].mxu0 %vm1143_vm1, %v5847_v37 }
0x1532   : > { %9509 = vmatprep.mubr.msk.f32.mxu0 %vm1143_vm1, %v5849_v51 }
0x1535   : > { %9510 = vmatmul.mubr.msk.f32.gmra.mrb[74].mxu0 %vm1143_vm1, %v5851_v47 }
0x1536   : > { %9512 = vmatprep.mubr.msk.f32.mxu0 %vm1143_vm1, %v5853_v13 }
0x1539   : > { %9513 = vmatmul.mubr.msk.f32.gmra.mrb[76].mxu0 %vm1143_vm1, %v5855_v31 }
0x153a   : > { %9515 = vmatprep.mubr.msk.f32.mxu0 %vm1143_vm1, %v5857_v62 }
0x153d   : > { %9516 = vmatmul.mubr.msk.f32.gmra.mrb[78].mxu0 %vm1143_vm1, %v5859_v35 }
0x1551   : > { %v5468_v16 = vpop.xlane.xlu0 %5467 }
0x1552   : > { %v5490_v63 = vsub.f32 %v13999_v49, %v5468_v16 }
0x1554   : > { %v5498_v0 = vmul.f32 1.442695, %v5490_v63 }
0x1555   : > { %v5471_v22 = vpop.xlane.xlu1 %5470  ;;  %v5474_v12 = vpop.xlane.xlu0 %5473 }
0x1556   : > { %11167 = vpow2.f32 %v5498_v0  ;;  %v5491_v19 = vsub.f32 %v14005_v10, %v5471_v22  ;;  %v5492_v25 = vsub.f32 %v14011_v53, %v5474_v12 }
0x1558   : > { %v5500_v14 = vmul.f32 1.442695, %v5491_v19  ;;  %v5502_v42 = vmul.f32 1.442695, %v5492_v25 }
0x1559   : > { %v5483_v44 = vpop.xlane.xlu1 %5482  ;;  %v5477_v56 = vpop.xlane.xlu0 %5476 }
0x155a   : > { %11169 = vpow2.f32 %v5500_v14  ;;  %v5495_v27 = vsub.f32 %v14023_v50, %v5483_v44  ;;  %v5493_v54 = vsub.f32 %v14019_v5, %v5477_v56 }
0x155b   : > { %11171 = vpow2.f32 %v5502_v42 }
0x155c   : > { %v5504_v21 = vmul.f32 1.442695, %v5493_v54  ;;  %v5508_v49 = vmul.f32 1.442695, %v5495_v27 }
0x155d   : > { %v5489_v34 = vpop.xlane.xlu1 %5488  ;;  %v5480_v58 = vpop.xlane.xlu0 %5479 }
0x155e   : > { %v5497_v61 = vsub.f32 %v14039_v1, %v5489_v34  ;;  %v5494_v10 = vsub.f32 %v14037_v41, %v5480_v58  ;;  %11173 = vpow2.f32 %v5504_v21 }
0x155f   : > { %11175 = vpow2.f32 %v5508_v49 }
0x1560   : > { %v14106_v53 = vpop.eup %11167  ;;  %v5506_v33 = vmul.f32 1.442695, %v5494_v10  ;;  %v5512_v57 = vmul.f32 1.442695, %v5497_v61 }
0x1561   : > { %v5486_v11 = vpop.xlane.xlu0 %5485  ;;  %v5514_v50 = vsel %vm1305_vm3, %v14106_v53, 0.0  ;;  %v10878_v25 = vpop.permute.xlu1 %10877 }
0x1562   : > { %v5496_v5 = vsub.f32 %v14047_v59, %v5486_v11  ;;  %5515 = vadd.xlane.f32.xlu0 %v5514_v50  ;;  %11177 = vpow2.f32 %v5506_v33  ;;  %v10880_v21 = vunpack.i.h.bf16 %v10878_v25  ;;  %v10879_v49 = vunpack.i.l.bf16 %v10878_v25  ;;  %v8317_v25 = vld [vmem:[%s14699_s6 + $0x1e8] sm:$0xff] }
0x1563   : > { %11179 = vpow2.f32 %v5512_v57 }
0x1564   : > { %v14111_v26 = vpop.eup %11169  ;;  %v5510_v41 = vmul.f32 1.442695, %v5496_v5  ;;  %v10103_v61 = vpack.c.bf16 %v10880_v21, %v10879_v49 }
0x1565   : > { %v14113_v8 = vpop.eup %11171  ;;  %v5517_v1 = vsel %vm1305_vm3, %v14111_v26, 0.0  ;;  %v10873_v62 = vpop.permute.xlu0 %10872 }
0x1566   : > { %5518 = vadd.xlane.f32.xlu1 %v5517_v1  ;;  %v5520_v24 = vsel %vm1305_vm3, %v14113_v8, 0.0  ;;  %11181 = vpow2.f32 %v5510_v41  ;;  %v10875_v35 = vunpack.i.h.bf16 %v10873_v62  ;;  %v10874_v16 = vunpack.i.l.bf16 %v10873_v62  ;;  %v8313_v41 = vld [vmem:[%s14699_s6 + $0x1c8] sm:$0xff]  ;;  %v8314_v62 = vld [vmem:[%s14699_s6 + $0x1d0] sm:$0xff] }
0x1567   : > { %5521 = vadd.xlane.f32.xlu0 %v5520_v24  ;;  %v8312_v24 = vld [vmem:[%s14699_s6 + $0x1c0] sm:$0xff] }
0x1568   : > { %v14119_v32 = vpop.eup %11173  ;;  %v10099_v22 = vpack.c.bf16 %v10875_v35, %v10874_v16 }
0x1569   : > { %v5523_v59 = vsel %vm1305_vm3, %v14119_v32, 0.0  ;;  %v14123_v36 = vpop.eup %11175 }
0x156a   : > { %5524 = vadd.xlane.f32.xlu1 %v5523_v59  ;;  %v5529_v18 = vsel %vm1305_vm3, %v14123_v36, 0.0 }
0x156c   : > { %v14125_v52 = vpop.eup %11177 }
0x156d   : > { %v5526_v37 = vsel %vm1305_vm3, %v14125_v52, 0.0  ;;  %v14131_v51 = vpop.eup %11179 }
0x156e   : > { %5530 = vadd.xlane.f32.xlu1 %v5529_v18  ;;  %5527 = vadd.xlane.f32.xlu0 %v5526_v37  ;;  %v5535_v47 = vsel %vm1305_vm3, %v14131_v51, 0.0 }
0x1570   : > { %v14135_v13 = vpop.eup %11181 }
0x1571   : > { %v5532_v31 = vsel %vm1305_vm3, %v14135_v13, 0.0 }
0x1572   : > { %5536 = vadd.xlane.f32.xlu1 %v5535_v47 }
0x1576   : > { %5533 = vadd.xlane.f32.xlu1 %v5532_v31 }
0x1584   : > { %10882 = vrot.lane.b32.xlu0 %v13627_v29, %s14708_s4 }
0x1587   : > { %10887 = vrot.lane.b32.xlu1 %v13637_v15, %s14708_s4  ;;  %s7721_s4 = scalar_lea.sflag [#allocation4], %s12408_s18 }
0x15e8   : > { %v9382_v63 = vpop.f32.mrb[64].mxu1 }
0x15e9   : > { %v4975_v0 = vpop.f32.mrb[65].mxu1 }
0x15ea   : > { %9394 = vmatprep.mubr.msk.f32.mxu1 %vm1143_vm1, %v4975_v0  ;;  %v8315_v0 = vld [vmem:[%s14699_s6 + $0x1d8] sm:$0xff] }
0x15eb   : > { %9395 = vmatmul.mubr.msk.f32.vlgmr.msra.gmra.mrb[72].mxu1 %vm1143_vm1, %v9382_v63 }
0x15ec   : > { %9407 = vmatpush3.msra.mxu1 %v4575_v3  ;;  %v9385_v12 = vpop.f32.mrb[66].mxu1 }
0x15ed   : > { %10100 = vmatprep.subr.bf16.mxu1 %v10099_v22  ;;  %v4985_v19 = vpop.f32.mrb[67].mxu1 }
0x15ee   : > { %9397 = vmatprep.mubr.msk.f32.mxu1 %vm1143_vm1, %v4985_v19 }
0x15ef   : > { %9398 = vmatmul.mubr.msk.f32.gmra.mrb[74].mxu1 %vm1143_vm1, %v9385_v12  ;;  %v5516_v44 = vpop.xlane.xlu0 %5515 }
0x15f0   : > { %v9388_v14 = vpop.f32.mrb[68].mxu1  ;;  %11183 = vrcp.f32 %v5516_v44 }
0x15f1   : > { %v4995_v42 = vpop.f32.mrb[69].mxu1 }
0x15f2   : > { %9400 = vmatprep.mubr.msk.f32.mxu1 %vm1143_vm1, %v4995_v42 }
0x15f3   : > { %v5519_v56 = vpop.xlane.xlu1 %5518  ;;  %9401 = vmatmul.mubr.msk.f32.gmra.mrb[76].mxu1 %vm1143_vm1, %v9388_v14 }
0x15f4   : > { %v9391_v27 = vpop.f32.mrb[70].mxu1  ;;  %v5522_v34 = vpop.xlane.xlu0 %5521  ;;  %11185 = vrcp.f32 %v5519_v56 }
0x15f5   : > { %v5005_v54 = vpop.f32.mrb[71].mxu1  ;;  %11187 = vrcp.f32 %v5522_v34  ;;  %v8316_v34 = vld [vmem:[%s14699_s6 + $0x1e0] sm:$0xff] }
0x15f6   : > { %9403 = vmatprep.mubr.msk.f32.mxu1 %vm1143_vm1, %v5005_v54 }
0x15f7   : > { %9404 = vmatmul.mubr.msk.f32.gmra.mrb[78].mxu1 %vm1143_vm1, %v9391_v27  ;;  %v5525_v58 = vpop.xlane.xlu1 %5524 }
0x15f8   : > { %9408 = vmatprep.mubr.msk.f32.mxu1 %vm1143_vm1, %v13865_v17  ;;  %11189 = vrcp.f32 %v5525_v58 }
0x15fb   : > { %9409 = vmatmul.mubr.msk.f32.vlgmr.msra.gmra.mrb[72].mxu1 %vm1143_vm1, %v13863_v40  ;;  %v5531_v10 = vpop.xlane.xlu1 %5530  ;;  %v5528_v33 = vpop.xlane.xlu0 %5527 }
0x15fc   : > { %10102 = vmatpush3.bf16.msra.mxu1 %v10099_v22  ;;  %9411 = vmatprep.mubr.msk.f32.mxu1 %vm1143_vm1, %v13869_v7  ;;  %v11184_v40 = vpop.eup %11183  ;;  %11191 = vrcp.f32 %v5528_v33 }
0x15fd   : > { %10104 = vmatprep.subr.bf16.mxu1 %v10103_v61  ;;  %11193 = vrcp.f32 %v5531_v10  ;;  %v8319_v10 = vld [vmem:[%s14699_s6 + $0x1f8] sm:$0xff] }
0x15fe   : > { %v11186_v22 = vpop.eup %11185 }
0x15ff   : > { %9412 = vmatmul.mubr.msk.f32.gmra.mrb[74].mxu1 %vm1143_vm1, %v13867_v9  ;;  %v5537_v57 = vpop.xlane.xlu1 %5536  ;;  %v10883_v11 = vpop.permute.xlu0 %10882  ;;  %v5541_v21 = vmul.f32 %v11186_v22, %v14111_v26 }
0x1600   : > { %10106 = vmatpush3.bf16.msra.mxu1 %v10103_v61  ;;  %9414 = vmatprep.mubr.msk.f32.mxu1 %vm1143_vm1, %v13873_v23  ;;  %v10885_v17 = vunpack.i.h.bf16 %v10883_v11  ;;  %v10884_v50 = vunpack.i.l.bf16 %v10883_v11  ;;  %v11188_v14 = vpop.eup %11187 }
0x1601   : > { %v5543_v33 = vmul.f32 %v11188_v14, %v14113_v8  ;;  %v8318_v8 = vld [vmem:[%s14699_s6 + $0x1f0] sm:$0xff] }
0x1602   : > { %v10107_v5 = vpack.c.bf16 %v10885_v17, %v10884_v50  ;;  %v11190_v58 = vpop.eup %11189 }
0x1603   : > { %9415 = vmatmul.mubr.msk.f32.gmra.mrb[76].mxu1 %vm1143_vm1, %v13871_v2  ;;  %v5534_v7 = vpop.xlane.xlu1 %5533  ;;  %v5539_v2 = vmul.f32 %v11184_v40, %v14106_v53 }
0x1604   : > { %9417 = vmatprep.mubr.msk.f32.mxu1 %vm1143_vm1, %v13877_v20  ;;  %v9508_v9 = vpop.f32.mrb[72].mxu0  ;;  %10108 = vmatprep.subr.bf16.mxu1 %v10107_v5  ;;  %11195 = vrcp.f32 %v5534_v7 }
0x1605   : > { %v6014_v23 = vmul.f32 0.35355338, %v9508_v9  ;;  %v5974_v1 = vpop.f32.mrb[73].mxu0  ;;  %10110 = vmatpush3.bf16.msra.mxu1 %v10107_v5  ;;  %11197 = vrcp.f32 %v5537_v57  ;;  %v5545_v9 = vmul.f32 %v11190_v58, %v14119_v32 }
0x1606   : > { %v6013_v39 = vmul.f32 0.35355338, %v5974_v1  ;;  %v11192_v57 = vpop.eup %11191 }
0x1607   : > { %v14172_v59 = vadd.f32 %v8313_v41, %v6014_v23  ;;  %9418 = vmatmul.mubr.msk.f32.gmra.mrb[78].mxu1 %vm1143_vm1, %v13875_v45  ;;  %v10888_v3 = vpop.permute.xlu1 %10887  ;;  %v11194_v41 = vpop.eup %11193  ;;  %v5547_v23 = vmul.f32 %v11192_v57, %v14125_v52 }
0x1608   : > { %v14176_v20 = vadd.f32 %v8312_v24, %v6013_v39  ;;  %9464 = vmatprep.mubr.msk.f32.mxu1 %vm1305_vm3, %v5539_v2  ;;  %v9511_v18 = vpop.f32.mrb[74].mxu0  ;;  %v10890_v37 = vunpack.i.h.bf16 %v10888_v3  ;;  %v10889_v47 = vunpack.i.l.bf16 %v10888_v3  ;;  %v5549_v3 = vmul.f32 %v11194_v41, %v14123_v36 }
0x1609   : > { %v5984_v31 = vpop.f32.mrb[75].mxu0  ;;  %v6041_v53 = vsel %vm1305_vm3, %v14172_v59, -inf  ;;  %v6016_v35 = vmul.f32 0.35355338, %v9511_v18 }
0x160a   : > { %v6015_v16 = vmul.f32 0.35355338, %v5984_v31  ;;  %6042 = vmax.xlane.f32.xlu1 %v6041_v53  ;;  %v6038_v45 = vsel %vm1305_vm3, %v14176_v20, -inf  ;;  %v10111_v63 = vpack.c.bf16 %v10890_v37, %v10889_v47  ;;  %v4577_v47 = vld [vmem:[#allocation11 + $0x30] sm:$0xff] }
0x160b   : > { %6039 = vmax.xlane.f32.xlu0 %v6038_v45  ;;  %v14194_v56 = vadd.f32 %v8315_v0, %v6016_v35 }
0x160c   : > { %v14189_v12 = vadd.f32 %v8314_v62, %v6015_v16  ;;  %v9514_v19 = vpop.f32.mrb[76].mxu0  ;;  %10112 = vmatprep.subr.bf16.mxu1 %v10111_v63 }
0x160d   : > { %v6018_v42 = vmul.f32 0.35355338, %v9514_v19  ;;  %v5994_v44 = vpop.f32.mrb[77].mxu0  ;;  %10114 = vmatpush3.bf16.msra.mxu1 %v10111_v63  ;;  %v6047_v5 = vsel %vm1305_vm3, %v14194_v56, -inf }
0x160e   : > { %v6017_v27 = vmul.f32 0.35355338, %v5994_v44  ;;  %v6044_v54 = vsel %vm1305_vm3, %v14189_v12, -inf  ;;  %v11196_v1 = vpop.eup %11195  ;;  %9476 = vmatprep.subr.mxu1 %v4577_v47 }
0x160f   : > { %v6035_v49 = vadd.f32 %v8317_v25, %v6018_v42  ;;  %6045 = vmax.xlane.f32.xlu0 %v6044_v54  ;;  %v11198_v18 = vpop.eup %11197  ;;  %v5551_v32 = vmul.f32 %v11196_v1, %v14135_v13 }
0x1610   : > { %v9517_v61 = vpop.f32.mrb[78].mxu0  ;;  %9465 = vmatmul.mubr.msk.f32.vlgmr.msra.gmra.mrb[80].mxu1 %vm1305_vm3, %v5541_v21  ;;  %v6034_v50 = vadd.f32 %v8316_v34, %v6017_v27  ;;  %v5553_v37 = vmul.f32 %v11198_v18, %v14131_v51 }
0x1611   : > { %v6020_v11 = vmul.f32 0.35355338, %v9517_v61  ;;  %v6004_v17 = vpop.f32.mrb[79].mxu0  ;;  %v6053_v26 = vsel %vm1305_vm3, %v6035_v49, -inf  ;;  %9467 = vmatprep.mubr.msk.f32.mxu1 %vm1305_vm3, %v5543_v33  ;;  %9477 = vmatpush3.msra.mxu1 %v4577_v47 }
0x1612   : > { %v6019_v40 = vmul.f32 0.35355338, %v6004_v17  ;;  %6054 = vmax.xlane.f32.xlu1 %v6053_v26  ;;  %v6050_v2 = vsel %vm1305_vm3, %v6034_v50, -inf }
0x1613   : > { %v6037_v7 = vadd.f32 %v8319_v10, %v6020_v11  ;;  %6048 = vmax.xlane.f32.xlu0 %v6047_v5 }
0x1614   : > { %9468 = vmatmul.mubr.msk.f32.gmra.mrb[82].mxu1 %vm1305_vm3, %v5545_v9  ;;  %v6036_v39 = vadd.f32 %v8318_v8, %v6019_v40 }
0x1615   : > { %v6059_v24 = vsel %vm1305_vm3, %v6037_v7, -inf  ;;  %9470 = vmatprep.mubr.msk.f32.mxu1 %vm1305_vm3, %v5547_v23 }
0x1616   : > { %6060 = vmax.xlane.f32.xlu1 %v6059_v24  ;;  %v6056_v52 = vsel %vm1305_vm3, %v6036_v39, -inf }
0x1617   : > { %6051 = vmax.xlane.f32.xlu0 %v6050_v2 }
0x1618   : > { %9471 = vmatmul.mubr.msk.f32.gmra.mrb[84].mxu1 %vm1305_vm3, %v5549_v3 }
0x1619   : > { %9473 = vmatprep.mubr.msk.f32.mxu1 %vm1305_vm3, %v5551_v32 }
0x161b   : > { %6057 = vmax.xlane.f32.xlu0 %v6056_v52 }
0x161c   : > { %9474 = vmatmul.mubr.msk.f32.gmra.mrb[86].mxu1 %vm1305_vm3, %v5553_v37 }
0x1627   : > { %10897 = vrot.lane.b32.xlu1 %v13617_v4, %s14709_s30 }
0x1631   : > { %10892 = vrot.lane.b32.xlu0 %v13607_v6, %s14709_s30 }
0x1697   : > { %v6043_v36 = vpop.xlane.xlu1 %6042 }
0x1698   : > { %v6063_v13 = vsub.f32 %v14172_v59, %v6043_v36  ;;  %v6040_v31 = vpop.xlane.xlu0 %6039 }
0x1699   : > { %v6062_v62 = vsub.f32 %v14176_v20, %v6040_v31 }
0x169a   : > { %v6072_v53 = vmul.f32 1.442695, %v6063_v13 }
0x169b   : > { %v6070_v35 = vmul.f32 1.442695, %v6062_v62 }
0x169c   : > { %11199 = vpow2.f32 %v6072_v53  ;;  %v6046_v51 = vpop.xlane.xlu0 %6045 }
0x169d   : > { %11201 = vpow2.f32 %v6070_v35  ;;  %v6064_v16 = vsub.f32 %v14189_v12, %v6046_v51 }
0x169f   : > { %v6074_v4 = vmul.f32 1.442695, %v6064_v16  ;;  %v6055_v45 = vpop.xlane.xlu1 %6054 }
0x16a0   : > { %v6067_v63 = vsub.f32 %v6035_v49, %v6055_v45  ;;  %v6049_v0 = vpop.xlane.xlu0 %6048 }
0x16a1   : > { %11203 = vpow2.f32 %v6074_v4  ;;  %v6065_v6 = vsub.f32 %v14194_v56, %v6049_v0 }
0x16a2   : > { %v6080_v22 = vmul.f32 1.442695, %v6067_v63 }
0x16a3   : > { %v6076_v19 = vmul.f32 1.442695, %v6065_v6  ;;  %v6061_v59 = vpop.xlane.xlu1 %6060 }
0x16a4   : > { %v6069_v25 = vsub.f32 %v6037_v7, %v6061_v59  ;;  %v6052_v14 = vpop.xlane.xlu0 %6051 }
0x16a5   : > { %11205 = vpow2.f32 %v6076_v19  ;;  %v6066_v20 = vsub.f32 %v6034_v50, %v6052_v14 }
0x16a6   : > { %v14235_v42 = vpop.eup %11199  ;;  %11207 = vpow2.f32 %v6080_v22  ;;  %v6084_v12 = vmul.f32 1.442695, %v6069_v25 }
0x16a7   : > { %v14237_v44 = vpop.eup %11201  ;;  %v6078_v27 = vmul.f32 1.442695, %v6066_v20  ;;  %v6089_v54 = vsel %vm1305_vm3, %v14235_v42, 0.0  ;;  %v10898_v1 = vpop.permute.xlu1 %10897 }
0x16a8   : > { %6090 = vadd.xlane.f32.xlu1 %v6089_v54  ;;  %v6058_v21 = vpop.xlane.xlu0 %6057  ;;  %v6086_v56 = vsel %vm1305_vm3, %v14237_v44, 0.0  ;;  %v10900_v24 = vunpack.i.h.bf16 %v10898_v1 }
0x16a9   : > { %11209 = vpow2.f32 %v6078_v27  ;;  %v6068_v49 = vsub.f32 %v6036_v39, %v6058_v21  ;;  %6087 = vadd.xlane.f32.xlu0 %v6086_v56  ;;  %v10899_v39 = vunpack.i.l.bf16 %v10898_v1 }
0x16aa   : > { %11211 = vpow2.f32 %v6084_v12 }
0x16ab   : > { %v14243_v34 = vpop.eup %11203  ;;  %v6082_v58 = vmul.f32 1.442695, %v6068_v49  ;;  %v10143_v18 = vpack.c.bf16 %v10900_v24, %v10899_v39 }
0x16ac   : > { %v10893_v61 = vpop.permute.xlu0 %10892  ;;  %v6092_v10 = vsel %vm1305_vm3, %v14243_v34, 0.0 }
0x16ad   : > { %v10895_v33 = vunpack.i.h.bf16 %v10893_v61  ;;  %v10894_v57 = vunpack.i.l.bf16 %v10893_v61  ;;  %6093 = vadd.xlane.f32.xlu0 %v6092_v10  ;;  %11213 = vpow2.f32 %v6082_v58 }
0x16af   : > { %v14247_v11 = vpop.eup %11205  ;;  %v10139_v17 = vpack.c.bf16 %v10895_v33, %v10894_v57 }
0x16b0   : > { %v6095_v26 = vsel %vm1305_vm3, %v14247_v11, 0.0  ;;  %v14251_v50 = vpop.eup %11207 }
0x16b1   : > { %6096 = vadd.xlane.f32.xlu1 %v6095_v26  ;;  %10140 = vmatprep.subr.bf16.mxu1 %v10139_v17  ;;  %v6101_v5 = vsel %vm1305_vm3, %v14251_v50, 0.0 }
0x16b3   : > { %v14253_v40 = vpop.eup %11209 }
0x16b4   : > { %v6098_v7 = vsel %vm1305_vm3, %v14253_v40, 0.0  ;;  %v14259_v8 = vpop.eup %11211 }
0x16b5   : > { %6102 = vadd.xlane.f32.xlu1 %v6101_v5  ;;  %6099 = vadd.xlane.f32.xlu0 %v6098_v7  ;;  %v6107_v9 = vsel %vm1305_vm3, %v14259_v8, 0.0 }
0x16b7   : > { %v14263_v41 = vpop.eup %11213 }
0x16b8   : > { %v6104_v23 = vsel %vm1305_vm3, %v14263_v41, 0.0 }
0x16b9   : > { %6108 = vadd.xlane.f32.xlu1 %v6107_v9 }
0x16bd   : > { %6105 = vadd.xlane.f32.xlu1 %v6104_v23 }
0x16cb   : > { %10902 = vrot.lane.b32.xlu0 %v13627_v29, %s14709_s30 }
0x16ce   : > { %10907 = vrot.lane.b32.xlu1 %v13637_v15, %s14709_s30 }
0x16e3   : > { %v9466_v2 = vpop.f32.mrb[80].mxu1 }
0x16e4   : > { %v5668_v3 = vpop.f32.mrb[81].mxu1 }
0x16e5   : > { %9478 = vmatprep.mubr.msk.f32.mxu1 %vm1143_vm1, %v5668_v3 }
0x16e6   : > { %9479 = vmatmul.mubr.msk.f32.vlgmr.msra.gmra.mrb[72].mxu1 %vm1143_vm1, %v9466_v2 }
0x16e7   : > { %10142 = vmatpush3.bf16.msra.mxu1 %v10139_v17  ;;  %v9469_v32 = vpop.f32.mrb[82].mxu1 }
0x16e8   : > { %10144 = vmatprep.subr.bf16.mxu1 %v10143_v18  ;;  %v5678_v52 = vpop.f32.mrb[83].mxu1 }
0x16e9   : > { %9481 = vmatprep.mubr.msk.f32.mxu1 %vm1143_vm1, %v5678_v52 }
0x16ea   : > { %9482 = vmatmul.mubr.msk.f32.gmra.mrb[74].mxu1 %vm1143_vm1, %v9469_v32 }
0x16eb   : > { %10146 = vmatpush3.bf16.msra.mxu1 %v10143_v18  ;;  %v9472_v29 = vpop.f32.mrb[84].mxu1 }
0x16ec   : > { %v5688_v15 = vpop.f32.mrb[85].mxu1 }
0x16ed   : > { %9484 = vmatprep.mubr.msk.f32.mxu1 %vm1143_vm1, %v5688_v15 }
0x16ee   : > { %9485 = vmatmul.mubr.msk.f32.gmra.mrb[76].mxu1 %vm1143_vm1, %v9472_v29 }
0x16ef   : > { %v9475_v37 = vpop.f32.mrb[86].mxu1 }
0x16f0   : > { %v5698_v47 = vpop.f32.mrb[87].mxu1 }
0x16f1   : > { %9487 = vmatprep.mubr.msk.f32.mxu1 %vm1143_vm1, %v5698_v47 }
0x16f2   : > { %9488 = vmatmul.mubr.msk.f32.gmra.mrb[78].mxu1 %vm1143_vm1, %v9475_v37 }
0x1735   : > { %v6091_v13 = vpop.xlane.xlu1 %6090 }
0x1736   : > { %v6088_v36 = vpop.xlane.xlu0 %6087 }
0x1737   : > { %11215 = vrcp.f32 %v6088_v36 }
0x1738   : > { %11217 = vrcp.f32 %v6091_v13 }
0x173a   : > { %v6094_v31 = vpop.xlane.xlu0 %6093 }
0x173b   : > { %11219 = vrcp.f32 %v6094_v31 }
0x173e   : > { %v6097_v62 = vpop.xlane.xlu1 %6096 }
0x173f   : > { %11221 = vrcp.f32 %v6097_v62 }
0x1741   : > { %v11216_v53 = vpop.eup %11215 }
0x1742   : > { %v6103_v35 = vpop.xlane.xlu1 %6102  ;;  %v6100_v51 = vpop.xlane.xlu0 %6099  ;;  %v6111_v16 = vmul.f32 %v11216_v53, %v14237_v44  ;;  %v4578_v44 = vld [vmem:[#allocation11 + $0x38] sm:$0xff] }
0x1743   : > { %11223 = vrcp.f32 %v6100_v51  ;;  %v11218_v20 = vpop.eup %11217 }
0x1744   : > { %9534 = vmatprep.mubr.msk.f32.mxu1 %vm1305_vm3, %v6111_v16  ;;  %11225 = vrcp.f32 %v6103_v35  ;;  %v6113_v27 = vmul.f32 %v11218_v20, %v14235_v42 }
0x1745   : > { %v11220_v12 = vpop.eup %11219 }
0x1746   : > { %v6109_v4 = vpop.xlane.xlu1 %6108  ;;  %v10903_v45 = vpop.permute.xlu0 %10902  ;;  %v6115_v21 = vmul.f32 %v11220_v12, %v14243_v34 }
0x1747   : > { %v10905_v63 = vunpack.i.h.bf16 %v10903_v45  ;;  %v10904_v0 = vunpack.i.l.bf16 %v10903_v45 }
0x1749   : > { %v10147_v6 = vpack.c.bf16 %v10905_v63, %v10904_v0  ;;  %v11222_v54 = vpop.eup %11221 }
0x174a   : > { %v6106_v22 = vpop.xlane.xlu1 %6105  ;;  %v6117_v49 = vmul.f32 %v11222_v54, %v14247_v11 }
0x174b   : > { %10148 = vmatprep.subr.bf16.mxu1 %v10147_v6  ;;  %11227 = vrcp.f32 %v6106_v22 }
0x174c   : > { %10150 = vmatpush3.bf16.msra.mxu1 %v10147_v6  ;;  %11229 = vrcp.f32 %v6109_v4 }
0x174d   : > { %v11224_v56 = vpop.eup %11223 }
0x174e   : > { %v10908_v19 = vpop.permute.xlu1 %10907  ;;  %v11226_v58 = vpop.eup %11225  ;;  %v6119_v61 = vmul.f32 %v11224_v56, %v14253_v40 }
0x174f   : > { %v10910_v59 = vunpack.i.h.bf16 %v10908_v19  ;;  %v10909_v25 = vunpack.i.l.bf16 %v10908_v19  ;;  %v6121_v42 = vmul.f32 %v11226_v58, %v14251_v50 }
0x1751   : > { %v10151_v14 = vpack.c.bf16 %v10910_v59, %v10909_v25 }
0x1753   : > { %10152 = vmatprep.subr.bf16.mxu1 %v10151_v14 }
0x1754   : > { %10154 = vmatpush3.bf16.msra.mxu1 %v10151_v14 }
0x1755   : > { %9546 = vmatprep.subr.mxu1 %v4578_v44  ;;  %v11228_v10 = vpop.eup %11227 }
0x1756   : > { %v11230_v33 = vpop.eup %11229  ;;  %v6123_v34 = vmul.f32 %v11228_v10, %v14263_v41  ;;  %v8336_v41 = vld [vmem:[#allocation13 + $0x1] ss:$0 sm:$0xff] }
0x1757   : > { %9535 = vmatmul.mubr.msk.f32.vlgmr.msra.gmra.mrb[88].mxu1 %vm1305_vm3, %v6113_v27  ;;  %v6125_v57 = vmul.f32 %v11230_v33, %v14259_v8 }
0x1758   : > { %9537 = vmatprep.mubr.msk.f32.mxu1 %vm1305_vm3, %v6115_v21  ;;  %9547 = vmatpush3.msra.mxu1 %v4578_v44 }
0x175b   : > { %9538 = vmatmul.mubr.msk.f32.gmra.mrb[90].mxu1 %vm1305_vm3, %v6117_v49 }
0x175c   : > { %9540 = vmatprep.mubr.msk.f32.mxu1 %vm1305_vm3, %v6119_v61 }
0x175f   : > { %9541 = vmatmul.mubr.msk.f32.gmra.mrb[92].mxu1 %vm1305_vm3, %v6121_v42 }
0x1760   : > { %9543 = vmatprep.mubr.msk.f32.mxu1 %vm1305_vm3, %v6123_v34 }
0x1763   : > { %9544 = vmatmul.mubr.msk.f32.gmra.mrb[94].mxu1 %vm1305_vm3, %v6125_v57 }
0x182a   : > { %v9536_v11 = vpop.f32.mrb[88].mxu1 }
0x182b   : > { %v6240_v17 = vpop.f32.mrb[89].mxu1 }
0x182c   : > { %9548 = vmatprep.mubr.msk.f32.mxu1 %vm1143_vm1, %v6240_v17 }
0x182d   : > { %9549 = vmatmul.mubr.msk.f32.vlgmr.msra.gmra.mrb[72].mxu1 %vm1143_vm1, %v9536_v11 }
0x182e   : > { %v9539_v26 = vpop.f32.mrb[90].mxu1 }
0x182f   : > { %v6250_v40 = vpop.f32.mrb[91].mxu1 }
0x1830   : > { %9551 = vmatprep.mubr.msk.f32.mxu1 %vm1143_vm1, %v6250_v40 }
0x1831   : > { %9552 = vmatmul.mubr.msk.f32.gmra.mrb[74].mxu1 %vm1143_vm1, %v9539_v26 }
0x1832   : > { %v9542_v50 = vpop.f32.mrb[92].mxu1 }
0x1833   : > { %v6260_v5 = vpop.f32.mrb[93].mxu1 }
0x1834   : > { %9554 = vmatprep.mubr.msk.f32.mxu1 %vm1143_vm1, %v6260_v5 }
0x1835   : > { %9555 = vmatmul.mubr.msk.f32.gmra.mrb[76].mxu1 %vm1143_vm1, %v9542_v50 }
0x1836   : > { %v9545_v7 = vpop.f32.mrb[94].mxu1 }
0x1837   : > { %v6270_v8 = vpop.f32.mrb[95].mxu1 }
0x1838   : > { %9557 = vmatprep.mubr.msk.f32.mxu1 %vm1143_vm1, %v6270_v8 }
0x1839   : > { %9558 = vmatmul.mubr.msk.f32.gmra.mrb[78].mxu1 %vm1143_vm1, %v9545_v7 }
0x1900   : > { %v9550_v9 = vpop.f32.mrb[72].mxu1 }
0x1901   : > { %v6417_v23 = vadd.f32 %v9550_v9, %v13497_v48  ;;  %v6369_v1 = vpop.f32.mrb[73].mxu1 }
0x1902   : > { %v6416_v24 = vadd.f32 %v6369_v1, %v13499_v28 }
0x1903   : > { %v14305_v39 = vadd.f32 %v8336_v41, %v6417_v23 }
0x1904   : > { %v14307_v2 = vadd.f32 %v8336_v41, %v6416_v24  ;;  %v9553_v3 = vpop.f32.mrb[74].mxu1 }
0x1905   : > { %v6419_v18 = vadd.f32 %v9553_v3, %v13507_v30  ;;  %v6379_v32 = vpop.f32.mrb[75].mxu1  ;;  %v6447_v52 = vsel %vm845_vm0, %v14305_v39, 0.0 }
0x1906   : > { %v6418_v29 = vadd.f32 %v6379_v32, %v13509_v46  ;;  %6448 = vadd.xlane.f32.xlu1 %v6447_v52  ;;  %v6444_v48 = vsel %vm845_vm0, %v14307_v2, 0.0 }
0x1907   : > { %v14315_v15 = vadd.f32 %v8336_v41, %v6419_v18  ;;  %6445 = vadd.xlane.f32.xlu0 %v6444_v48  ;;  %v6578_v48 = vld [vmem:[#allocation17 + $0x28] sm:$0xff] }
0x1908   : > { %v9556_v28 = vpop.f32.mrb[76].mxu1  ;;  %v14320_v36 = vadd.f32 %v8336_v41, %v6418_v29  ;;  %v6577_v29 = vld [vmem:[#allocation17 + $0x20] sm:$0xff] }
0x1909   : > { %v6421_v37 = vadd.f32 %v9556_v28, %v13517_v60  ;;  %v6389_v47 = vpop.f32.mrb[77].mxu1  ;;  %v6453_v30 = vsel %vm845_vm0, %v14315_v15, 0.0  ;;  %v10155_v28 = vpack.c.bf16 %v6578_v48, %v6577_v29 }
0x190a   : > { %v6420_v13 = vadd.f32 %v6389_v47, %v13519_v43  ;;  %v6450_v16 = vsel %vm845_vm0, %v14320_v36, 0.0  ;;  %v6580_v47 = vld [vmem:[#allocation17 + $0x38] sm:$0xff] }
0x190b   : > { %v14323_v31 = vadd.f32 %v8336_v41, %v6421_v37  ;;  %6454 = vadd.xlane.f32.xlu0 %v6453_v30  ;;  %10156 = vmatprep.subr.bf16.mxu0 %v10155_v28  ;;  %v6579_v37 = vld [vmem:[#allocation17 + $0x30] sm:$0xff] }
0x190c   : > { %v9559_v46 = vpop.f32.mrb[78].mxu1  ;;  %v14328_v51 = vadd.f32 %v8336_v41, %v6420_v13  ;;  %10158 = vmatpush3.bf16.msra.mxu0 %v10155_v28  ;;  %v10159_v30 = vpack.c.bf16 %v6580_v47, %v6579_v37  ;;  %v8348_v13 = vld [vmem:[%s14700_s1 + $0x80] sm:$0xff] }
0x190d   : > { %v6423_v62 = vadd.f32 %v9559_v46, %v13527_v38  ;;  %v6399_v53 = vpop.f32.mrb[79].mxu1  ;;  %v6459_v35 = vsel %vm845_vm0, %v14323_v31, 0.0  ;;  %v8349_v46 = vld [vmem:[%s14700_s1 + $0x88] sm:$0xff] }
0x190e   : > { %v6422_v60 = vadd.f32 %v6399_v53, %v13529_v55  ;;  %6460 = vadd.xlane.f32.xlu1 %v6459_v35  ;;  %v6456_v38 = vsel %vm845_vm0, %v14328_v51, 0.0  ;;  %10160 = vmatprep.subr.bf16.mxu0 %v10159_v30 }
0x190f   : > { %v14333_v4 = vadd.f32 %v8336_v41, %v6423_v62  ;;  %6451 = vadd.xlane.f32.xlu0 %v6450_v16  ;;  %v10163_v62 = vpack.c.bf16 %v8349_v46, %v8348_v13 }
0x1910   : > { %v14337_v45 = vadd.f32 %v8336_v41, %v6422_v60  ;;  %10162 = vmatpush3.bf16.msra.mxu0 %v10159_v30 }
0x1911   : > { %v6465_v43 = vsel %vm845_vm0, %v14333_v4, 0.0  ;;  %10164 = vmatprep.subr.bf16.mxu0 %v10163_v62 }
0x1912   : > { %6466 = vadd.xlane.f32.xlu1 %v6465_v43  ;;  %v6462_v55 = vsel %vm845_vm0, %v14337_v45, 0.0 }
0x1913   : > { %6457 = vadd.xlane.f32.xlu0 %v6456_v38 }
0x1917   : > { %6463 = vadd.xlane.f32.xlu0 %v6462_v55 }
0x1993   : > { %v6449_v63 = vpop.xlane.xlu1 %6448 }
0x1994   : > { %v6469_v0 = vmul.f32 0.03125, %v6449_v63  ;;  %v6446_v6 = vpop.xlane.xlu0 %6445 }
0x1995   : > { %v6468_v22 = vmul.f32 0.03125, %v6446_v6 }
0x1996   : > { %v14344_v19 = vsub.f32 %v14305_v39, %v6469_v0 }
0x1997   : > { %v14347_v59 = vsub.f32 %v14307_v2, %v6468_v22 }
0x1998   : > { %v6455_v25 = vpop.xlane.xlu0 %6454  ;;  %v6485_v14 = vmul.f32 %v14344_v19, %v14344_v19 }
0x1999   : > { %v6471_v20 = vmul.f32 0.03125, %v6455_v25  ;;  %v6484_v44 = vmul.f32 %v14347_v59, %v14347_v59 }
0x199a   : > { %v6495_v12 = vsel %vm845_vm0, %v6485_v14, 0.0 }
0x199b   : > { %v14355_v27 = vsub.f32 %v14315_v15, %v6471_v20  ;;  %v6461_v54 = vpop.xlane.xlu1 %6460  ;;  %6496 = vadd.xlane.f32.xlu1 %v6495_v12  ;;  %v6492_v21 = vsel %vm845_vm0, %v6484_v44, 0.0 }
0x199c   : > { %v6473_v56 = vmul.f32 0.03125, %v6461_v54  ;;  %v6452_v49 = vpop.xlane.xlu0 %6451  ;;  %6493 = vadd.xlane.f32.xlu0 %v6492_v21 }
0x199d   : > { %v6470_v58 = vmul.f32 0.03125, %v6452_v49  ;;  %v6487_v61 = vmul.f32 %v14355_v27, %v14355_v27 }
0x199e   : > { %v14361_v10 = vsub.f32 %v14323_v31, %v6473_v56 }
0x199f   : > { %v14364_v42 = vsub.f32 %v14320_v36, %v6470_v58  ;;  %v6467_v33 = vpop.xlane.xlu1 %6466  ;;  %v6501_v34 = vsel %vm845_vm0, %v6487_v61, 0.0  ;;  %v8337_v58 = vld [vmem:[#allocation14 + $0x1] ss:$0 sm:$0xff] }
0x19a0   : > { %v6475_v57 = vmul.f32 0.03125, %v6467_v33  ;;  %v6458_v11 = vpop.xlane.xlu0 %6457  ;;  %6502 = vadd.xlane.f32.xlu1 %v6501_v34  ;;  %v6489_v17 = vmul.f32 %v14361_v10, %v14361_v10 }
0x19a1   : > { %v6472_v26 = vmul.f32 0.03125, %v6458_v11  ;;  %v6486_v40 = vmul.f32 %v14364_v42, %v14364_v42 }
0x19a2   : > { %v14372_v50 = vsub.f32 %v14333_v4, %v6475_v57  ;;  %v6507_v5 = vsel %vm845_vm0, %v6489_v17, 0.0 }
0x19a3   : > { %v14376_v7 = vsub.f32 %v14328_v51, %v6472_v26  ;;  %v6498_v8 = vsel %vm845_vm0, %v6486_v40, 0.0  ;;  %v8338_v26 = vld [vmem:[#allocation16 + $0x1] ss:$0 sm:$0xff] }
0x19a4   : > { %6508 = vadd.xlane.f32.xlu1 %v6507_v5  ;;  %6499 = vadd.xlane.f32.xlu0 %v6498_v8  ;;  %v6464_v9 = vpop.xlane.xlu0 %6463  ;;  %v6491_v41 = vmul.f32 %v14372_v50, %v14372_v50 }
0x19a5   : > { %v6474_v23 = vmul.f32 0.03125, %v6464_v9  ;;  %v6488_v1 = vmul.f32 %v14376_v7, %v14376_v7  ;;  %v8350_v9 = vld [vmem:[%s14700_s1 + $0x90] sm:$0xff] }
0x19a6   : > { %v6513_v24 = vsel %vm845_vm0, %v6491_v41, 0.0  ;;  %v8351_v41 = vld [vmem:[%s14700_s1 + $0x98] sm:$0xff] }
0x19a7   : > { %v14385_v3 = vsub.f32 %v14337_v45, %v6474_v23  ;;  %v6504_v18 = vsel %vm845_vm0, %v6488_v1, 0.0 }
0x19a8   : > { %6514 = vadd.xlane.f32.xlu1 %v6513_v24  ;;  %6505 = vadd.xlane.f32.xlu0 %v6504_v18 }
0x19a9   : > { %v6490_v32 = vmul.f32 %v14385_v3, %v14385_v3 }
0x19ab   : > { %v6510_v52 = vsel %vm845_vm0, %v6490_v32, 0.0  ;;  %v8352_v32 = vld [vmem:[%s14700_s1 + $0xa0] sm:$0xff] }
0x19ac   : > { %6511 = vadd.xlane.f32.xlu0 %v6510_v52  ;;  %v8353_v52 = vld [vmem:[%s14700_s1 + $0xa8] sm:$0xff] }
0x19ad   : > { %v10171_v37 = vpack.c.bf16 %v8353_v52, %v8352_v32 }
0x1a28   : > { %v6497_v53 = vpop.xlane.xlu1 %6496 }
0x1a29   : > { %v6517_v35 = vmul.f32 0.03125, %v6497_v53  ;;  %v6494_v60 = vpop.xlane.xlu0 %6493 }
0x1a2a   : > { %v6516_v16 = vmul.f32 0.03125, %v6494_v60 }
0x1a2b   : > { %v6525_v43 = vadd.f32 1e-05, %v6517_v35 }
0x1a2c   : > { %v6524_v38 = vadd.f32 1e-05, %v6516_v16 }
0x1a2d   : > { %11231 = vrsqrt.f32 %v6525_v43  ;;  %v6503_v55 = vpop.xlane.xlu1 %6502 }
0x1a2e   : > { %11233 = vrsqrt.f32 %v6524_v38  ;;  %v6519_v63 = vmul.f32 0.03125, %v6503_v55 }
0x1a30   : > { %v6527_v0 = vadd.f32 1e-05, %v6519_v63 }
0x1a31   : > { %v6509_v6 = vpop.xlane.xlu1 %6508  ;;  %v6500_v22 = vpop.xlane.xlu0 %6499 }
0x1a32   : > { %11235 = vrsqrt.f32 %v6527_v0  ;;  %v6521_v25 = vmul.f32 0.03125, %v6509_v6  ;;  %v6518_v14 = vmul.f32 0.03125, %v6500_v22  ;;  %v8354_v6 = vld [vmem:[%s14700_s1 + $0xb0] sm:$0xff] }
0x1a34   : > { %v6529_v20 = vadd.f32 1e-05, %v6521_v25  ;;  %v6526_v44 = vadd.f32 1e-05, %v6518_v14  ;;  %v8356_v25 = vld [vmem:[%s14700_s1 + $0xc0] sm:$0xff]  ;;  %v8357_v14 = vld [vmem:[%s14700_s1 + $0xc8] sm:$0xff] }
0x1a35   : > { %v6515_v12 = vpop.xlane.xlu1 %6514  ;;  %v6506_v54 = vpop.xlane.xlu0 %6505 }
0x1a36   : > { %11237 = vrsqrt.f32 %v6529_v20  ;;  %v6523_v21 = vmul.f32 0.03125, %v6515_v12  ;;  %v6520_v56 = vmul.f32 0.03125, %v6506_v54  ;;  %v10179_v20 = vpack.c.bf16 %v8357_v14, %v8356_v25  ;;  %v8359_v12 = vld [vmem:[%s14700_s1 + $0xd8] sm:$0xff] }
0x1a37   : > { %v11232_v49 = vpop.eup %11231  ;;  %11239 = vrsqrt.f32 %v6526_v44  ;;  %v8358_v44 = vld [vmem:[%s14700_s1 + $0xd0] sm:$0xff] }
0x1a38   : > { %v11234_v61 = vpop.eup %11233  ;;  %v6541_v33 = vmul.f32 %v11232_v49, %v14344_v19  ;;  %v6531_v34 = vadd.f32 1e-05, %v6523_v21  ;;  %v6528_v57 = vadd.f32 1e-05, %v6520_v56  ;;  %v10183_v54 = vpack.c.bf16 %v8359_v12, %v8358_v44  ;;  %v8360_v21 = vld [vmem:[%s14700_s1 + $0xe0] sm:$0xff]  ;;  %v8361_v56 = vld [vmem:[%s14700_s1 + $0xe8] sm:$0xff] }
0x1a39   : > { %v6512_v11 = vpop.xlane.xlu0 %6511  ;;  %v6540_v17 = vmul.f32 %v11234_v61, %v14347_v59  ;;  %v10167_v59 = vpack.c.bf16 %v8351_v41, %v8350_v9  ;;  %v10187_v49 = vpack.c.bf16 %v8361_v56, %v8360_v21  ;;  %v8363_v61 = vld [vmem:[%s14700_s1 + $0xf8] sm:$0xff] }
0x1a3a   : > { %v6555_v40 = vmul.f32 %v8337_v58, %v6541_v33  ;;  %11241 = vrsqrt.f32 %v6531_v34  ;;  %v6522_v5 = vmul.f32 0.03125, %v6512_v11  ;;  %v8339_v34 = vld [vmem:[#allocation19 + $0x1] ss:$0 sm:$0xff] }
0x1a3b   : > { %11243 = vrsqrt.f32 %v6528_v57  ;;  %v6554_v8 = vmul.f32 %v8337_v58, %v6540_v17 }
0x1a3c   : > { %v11236_v19 = vpop.eup %11235  ;;  %v6530_v23 = vadd.f32 1e-05, %v6522_v5  ;;  %v6569_v24 = vadd.f32 %v8338_v26, %v6555_v40 }
0x1a3d   : > { %v6568_v1 = vadd.f32 %v8338_v26, %v6554_v8  ;;  %v6543_v18 = vmul.f32 %v11236_v19, %v14355_v27 }
0x1a3e   : > { %11245 = vrsqrt.f32 %v6530_v23 }
0x1a3f   : > { %9568 = vmatprep.mubr.msk.f32.mxu0 %vm845_vm0, %v6568_v1  ;;  %v6557_v47 = vmul.f32 %v8337_v58, %v6543_v18 }
0x1a40   : > { %v11238_v29 = vpop.eup %11237  ;;  %9569 = vmatmul.mubr.msk.f32.vlgmr.msra.gmra.mrb[80].mxu0 %vm845_vm0, %v6569_v24 }
0x1a41   : > { %v11240_v48 = vpop.eup %11239  ;;  %10166 = vmatpush3.bf16.msra.mxu0 %v10163_v62  ;;  %v6545_v27 = vmul.f32 %v11238_v29, %v14361_v10  ;;  %v6571_v60 = vadd.f32 %v8338_v26, %v6557_v47 }
0x1a42   : > { %v6542_v28 = vmul.f32 %v11240_v48, %v14364_v42  ;;  %10168 = vmatprep.subr.bf16.mxu0 %v10167_v59 }
0x1a43   : > { %v6559_v16 = vmul.f32 %v8337_v58, %v6545_v27 }
0x1a44   : > { %v11242_v30 = vpop.eup %11241  ;;  %v6556_v13 = vmul.f32 %v8337_v58, %v6542_v28 }
0x1a45   : > { %v11244_v46 = vpop.eup %11243  ;;  %10170 = vmatpush3.bf16.msra.mxu0 %v10167_v59  ;;  %v6547_v43 = vmul.f32 %v11242_v30, %v14372_v50  ;;  %v6573_v55 = vadd.f32 %v8338_v26, %v6559_v16 }
0x1a46   : > { %v6570_v53 = vadd.f32 %v8338_v26, %v6556_v13  ;;  %v6544_v35 = vmul.f32 %v11244_v46, %v14376_v7  ;;  %10172 = vmatprep.subr.bf16.mxu0 %v10171_v37 }
0x1a47   : > { %v6561_v0 = vmul.f32 %v8337_v58, %v6547_v43 }
0x1a48   : > { %v11246_v62 = vpop.eup %11245  ;;  %9571 = vmatprep.mubr.msk.f32.mxu0 %vm845_vm0, %v6570_v53  ;;  %v6558_v42 = vmul.f32 %v8337_v58, %v6544_v35 }
0x1a49   : > { %9572 = vmatmul.mubr.msk.f32.gmra.mrb[82].mxu0 %vm845_vm0, %v6571_v60  ;;  %v6546_v10 = vmul.f32 %v11246_v62, %v14385_v3  ;;  %v6575_v50 = vadd.f32 %v8338_v26, %v6561_v0  ;;  %v8355_v3 = vld [vmem:[%s14700_s1 + $0xb8] sm:$0xff] }
0x1a4a   : > { %v6572_v38 = vadd.f32 %v8338_v26, %v6558_v42  ;;  %10174 = vmatpush3.bf16.msra.mxu0 %v10171_v37  ;;  %v10175_v22 = vpack.c.bf16 %v8355_v3, %v8354_v6 }
0x1a4b   : > { %v6560_v63 = vmul.f32 %v8337_v58, %v6546_v10  ;;  %v8362_v58 = vld [vmem:[%s14700_s1 + $0xf0] sm:$0xff]  ;;  %s7988_s1 = sshll.u32 %s12408_s18, 4 }
0x1a4c   : > { %9574 = vmatprep.mubr.msk.f32.mxu0 %vm845_vm0, %v6572_v38  ;;  %10176 = vmatprep.subr.bf16.mxu0 %v10175_v22  ;;  %v10191_v33 = vpack.c.bf16 %v8363_v61, %v8362_v58  ;;  %s834_s2 = scalar_lea.vmem [#allocation28], %s7988_s1  ;;  %s11729_s1 = sshll.u32 %s11856_s8, 4  ;;  %s11730_s1 = int_to_ptr.vmem [resolvable:$false] %s11729_s1 }
0x1a4d   : > { %9575 = vmatmul.mubr.msk.f32.gmra.mrb[84].mxu0 %vm845_vm0, %v6573_v55  ;;  %v6574_v7 = vadd.f32 %v8338_v26, %v6560_v63  ;;  %s7734_s0 = sshll.u32 %s834_s2, 4  ;;  %s11731_s5 = scalar_lea.vmem %s11730_s1, 512  ;;  %s14529_s0 = int_to_ptr.vmem [resolvable:$true] %s7734_s0 }
0x1a4e   : > { %10178 = vmatpush3.bf16.msra.mxu0 %v10175_v22  ;;  %s11725_s12 = scalar_lea.vmem %s14529_s0, 256  ;;  %p11732_p2 = scmp.lt.s32.totalorder %s14529_s0, %s11730_s1 }
0x1a4f   : > { %9577 = vmatprep.mubr.msk.f32.mxu0 %vm845_vm0, %v6574_v7  ;;  %10180 = vmatprep.subr.bf16.mxu0 %v10179_v20  ;;  %p11726_p4 = scmp.ne.s32.totalorder %s14529_s0, %s11725_s12  ;;  %p11733_p7 = scmp.lt.s32.totalorder %s11731_s5, %s11725_s12 }
0x1a51   : > { %9578 = vmatmul.mubr.msk.f32.gmra.mrb[86].mxu0 %vm845_vm0, %v6575_v50  ;;  %p11727_p0 = pnand %p11726_p4, %p14712_p3  ;;  %p11734_p10 = por %p11733_p7, %p11732_p2 }
0x1a52   : > { %10182 = vmatpush3.bf16.msra.mxu0 %v10179_v20 }
0x1a53   : > { %10184 = vmatprep.subr.bf16.mxu0 %v10183_v54  ;;  %p11728_p5 = pneg %p11727_p0 }
0x1a55   : > { %p11735_p1 = pnand %p11734_p10, %p11728_p5 }
0x1a56   : > { %10186 = vmatpush3.bf16.msra.mxu0 %v10183_v54 }
0x1a57   : > { %10188 = vmatprep.subr.bf16.mxu0 %v10187_v49 }
0x1a5a   : > { %10190 = vmatpush3.bf16.msra.mxu0 %v10187_v49 }
0x1a5b   : > { %10192 = vmatprep.subr.bf16.mxu0 %v10191_v33 }
0x1a5e   : > { %10194 = vmatpush3.bf16.msra.mxu0 %v10191_v33 }
0x1b13   : > { %v9570_v57 = vpop.f32.mrb[80].mxu0 }
0x1b14   : > { %v6685_v11 = vadd.f32 %v9570_v57, %v8339_v34  ;;  %v6679_v17 = vpop.f32.mrb[81].mxu0  ;;  %v6904_v57 = vld [vmem:[#allocation22] sm:$0xff] }
0x1b15   : > { %v6680_v26 = vadd.f32 %v8339_v34, %v6679_v17  ;;  %9640 = vmatprep.mubr.msk.f32.mxu1 %vm1305_vm3, %v6904_v57  ;;  %v8364_v17 = vld [vmem:[#allocation20 + $0x1] ss:$0 sm:$0xff] }
0x1b16   : > { %v6727_v40 = vmul.f32 0.70710677, %v6685_v11  ;;  %v6719_v13 = vmul.f32 0.5, %v6685_v11 }
0x1b17   : > { %v6726_v5 = vmul.f32 0.70710677, %v6680_v26  ;;  %v6718_v37 = vmul.f32 0.5, %v6680_v26 }
0x1b18   : > { %11247 = verf.f32 %v6727_v40 }
0x1b19   : > { %11249 = verf.f32 %v6726_v5 }
0x1b1c   : > { %v9573_v8 = vpop.f32.mrb[82].mxu0 }
0x1b1d   : > { %v6695_v9 = vadd.f32 %v9573_v8, %v8339_v34  ;;  %v6689_v41 = vpop.f32.mrb[83].mxu0 }
0x1b1e   : > { %v6690_v19 = vadd.f32 %v8339_v34, %v6689_v41 }
0x1b1f   : > { %v6729_v23 = vmul.f32 0.70710677, %v6695_v9  ;;  %v6721_v0 = vmul.f32 0.5, %v6695_v9 }
0x1b20   : > { %v6728_v1 = vmul.f32 0.70710677, %v6690_v19  ;;  %v9576_v24 = vpop.f32.mrb[84].mxu0  ;;  %v6720_v55 = vmul.f32 0.5, %v6690_v19 }
0x1b21   : > { %11251 = verf.f32 %v6729_v23  ;;  %v6705_v59 = vadd.f32 %v9576_v24, %v8339_v34  ;;  %v6699_v18 = vpop.f32.mrb[85].mxu0 }
0x1b22   : > { %v11248_v32 = vpop.eup %11247  ;;  %11253 = verf.f32 %v6728_v1  ;;  %v6700_v52 = vadd.f32 %v8339_v34, %v6699_v18 }
0x1b23   : > { %v11250_v29 = vpop.eup %11249  ;;  %v6743_v48 = vadd.f32 1.0, %v11248_v32  ;;  %v6731_v28 = vmul.f32 0.70710677, %v6705_v59  ;;  %v6723_v20 = vmul.f32 0.5, %v6705_v59 }
0x1b24   : > { %v6742_v47 = vadd.f32 1.0, %v11250_v29  ;;  %v6730_v27 = vmul.f32 0.70710677, %v6700_v52  ;;  %v9579_v30 = vpop.f32.mrb[86].mxu0  ;;  %v6722_v25 = vmul.f32 0.5, %v6700_v52 }
0x1b25   : > { %11255 = verf.f32 %v6731_v28  ;;  %v6715_v46 = vadd.f32 %v9579_v30, %v8339_v34  ;;  %v6709_v53 = vpop.f32.mrb[87].mxu0  ;;  %v6751_v16 = vmul.f32 %v6743_v48, %v6719_v13 }
0x1b26   : > { %11257 = verf.f32 %v6730_v27  ;;  %v6710_v35 = vadd.f32 %v8339_v34, %v6709_v53  ;;  %v6750_v60 = vmul.f32 %v6742_v47, %v6718_v37  ;;  %v7244_v53 = vld [vmem:[#allocation22 + $0x28] sm:$0xff] }
0x1b27   : > { %v6733_v43 = vmul.f32 0.70710677, %v6715_v46  ;;  %v6725_v61 = vmul.f32 0.5, %v6715_v46  ;;  %v6905_v46 = vld [vmem:[#allocation22 + $0x8] sm:$0xff] }
0x1b28   : > { %v6732_v62 = vmul.f32 0.70710677, %v6710_v35  ;;  %9612 = vmatprep.mubr.f32.mxu0 %v6750_v60  ;;  %v6724_v49 = vmul.f32 0.5, %v6710_v35  ;;  %v7415_v35 = vld [vmem:[#allocation22 + $0x30] sm:$0xff]  ;;  %v7416_v60 = vld [vmem:[#allocation22 + $0x38] sm:$0xff] }
0x1b29   : > { %11259 = verf.f32 %v6733_v43  ;;  %9613 = vmatmul.mubr.f32.vlgmr.msra.gmra.mrb[88].mxu0 %v6751_v16  ;;  %v7076_v16 = vld [vmem:[#allocation23 + $0x20] sm:$0xff]  ;;  %v7077_v43 = vld [vmem:[#allocation23 + $0x28] sm:$0xff] }
0x1b2a   : > { %11261 = verf.f32 %v6732_v62  ;;  %v7078_v62 = vld [vmem:[#allocation23 + $0x30] sm:$0xff] }
0x1b2b   : > { %v11252_v42 = vpop.eup %11251 }
0x1b2c   : > { %v11254_v10 = vpop.eup %11253  ;;  %v6745_v38 = vadd.f32 1.0, %v11252_v42  ;;  %v10227_v42 = vpack.c.bf16 %v7077_v43, %v7076_v16  ;;  %v7642_v16 = vld [vmem:[%s14710_s29 + $0x78] sm:$0xff] }
0x1b2d   : > { %v6744_v63 = vadd.f32 1.0, %v11254_v10  ;;  %v7079_v10 = vld [vmem:[#allocation23 + $0x38] sm:$0xff] }
0x1b2e   : > { %v6753_v22 = vmul.f32 %v6745_v38, %v6721_v0  ;;  %v10231_v38 = vpack.c.bf16 %v7079_v10, %v7078_v62  ;;  %10228 = vmatprep.subr.bf16.mxu0 %v10227_v42 }
0x1b2f   : > { %v11256_v7 = vpop.eup %11255  ;;  %v6752_v50 = vmul.f32 %v6744_v63, %v6720_v55  ;;  %10230 = vmatpush3.bf16.msra.mxu0 %v10227_v42  ;;  %v6987_v55 = vld [vmem:[#allocation23] sm:$0xff]  ;;  %v6988_v63 = vld [vmem:[#allocation23 + $0x8] sm:$0xff] }
0x1b30   : > { %v11258_v6 = vpop.eup %11257  ;;  %v6747_v3 = vadd.f32 1.0, %v11256_v7  ;;  %10232 = vmatprep.subr.bf16.mxu0 %v10231_v38  ;;  %v10235_v0 = vpack.c.bf16 %v6988_v63, %v6987_v55 }
0x1b31   : > { %v6746_v14 = vadd.f32 1.0, %v11258_v6  ;;  %9615 = vmatprep.mubr.f32.mxu0 %v6752_v50  ;;  %v6989_v6 = vld [vmem:[#allocation23 + $0x10] sm:$0xff] }
0x1b32   : > { %9616 = vmatmul.mubr.f32.gmra.mrb[90].mxu0 %v6753_v22  ;;  %v6755_v56 = vmul.f32 %v6747_v3, %v6723_v20  ;;  %v6990_v3 = vld [vmem:[#allocation23 + $0x18] sm:$0xff]  ;;  %v7327_v20 = vld [vmem:[#allocation23 + $0x40] sm:$0xff] }
0x1b33   : > { %v11260_v44 = vpop.eup %11259  ;;  %v6754_v12 = vmul.f32 %v6746_v14, %v6722_v25  ;;  %10234 = vmatpush3.bf16.msra.mxu0 %v10231_v38  ;;  %v10239_v14 = vpack.c.bf16 %v6990_v3, %v6989_v6 }
0x1b34   : > { %v11262_v54 = vpop.eup %11261  ;;  %v6749_v21 = vadd.f32 1.0, %v11260_v44  ;;  %10236 = vmatprep.subr.bf16.mxu0 %v10235_v0  ;;  %v7328_v44 = vld [vmem:[#allocation23 + $0x48] sm:$0xff] }
0x1b35   : > { %v6748_v58 = vadd.f32 1.0, %v11262_v54  ;;  %9618 = vmatprep.mubr.f32.mxu0 %v6754_v12  ;;  %v10259_v12 = vpack.c.bf16 %v7328_v44, %v7327_v20  ;;  %v7329_v54 = vld [vmem:[#allocation23 + $0x50] sm:$0xff] }
0x1b36   : > { %9619 = vmatmul.mubr.f32.gmra.mrb[92].mxu0 %v6755_v56  ;;  %v6757_v34 = vmul.f32 %v6749_v21, %v6725_v61  ;;  %v7330_v21 = vld [vmem:[#allocation23 + $0x58] sm:$0xff] }
0x1b37   : > { %v6756_v33 = vmul.f32 %v6748_v58, %v6724_v49  ;;  %v10263_v56 = vpack.c.bf16 %v7330_v21, %v7329_v54  ;;  %v7499_v49 = vld [vmem:[#allocation23 + $0x60] sm:$0xff]  ;;  %v7500_v58 = vld [vmem:[#allocation23 + $0x68] sm:$0xff] }
0x1b38   : > { %v10283_v61 = vpack.c.bf16 %v7500_v58, %v7499_v49 }
0x1b39   : > { %9621 = vmatprep.mubr.f32.mxu0 %v6756_v33  ;;  %v7501_v33 = vld [vmem:[#allocation23 + $0x70] sm:$0xff] }
0x1b3a   : > { %9622 = vmatmul.mubr.f32.gmra.mrb[94].mxu0 %v6757_v34  ;;  %v7502_v34 = vld [vmem:[#allocation23 + $0x78] sm:$0xff] }
0x1bfc   : > { %v9614_v11 = vpop.f32.mrb[88].mxu0 }
0x1bfd   : > { %v6881_v26 = vadd.f32 %v9614_v11, %v14305_v39  ;;  %v6841_v40 = vpop.f32.mrb[89].mxu0 }
0x1bfe   : > { %v6880_v5 = vadd.f32 %v6841_v40, %v14307_v2 }
0x1bff   : > { %v6897_v8 = vadd.f32 %v8364_v17, %v6881_v26 }
0x1c00   : > { %v6896_v9 = vadd.f32 %v8364_v17, %v6880_v5 }
0x1c02   : > { %v10195_v41 = vpack.c.bf16 %v6897_v8, %v6896_v9  ;;  %v7627_v9 = vld [vmem:[%s14710_s29] sm:$0xff] }
0x1c04   : > { %10196 = vmatprep.subr.bf16.mxu1 %v10195_v41 }
0x1c05   : > { %v9617_v19 = vpop.f32.mrb[90].mxu0  ;;  %10198 = vmatpush3.bf16.msra.mxu1 %v10195_v41 }
0x1c06   : > { %v6883_v23 = vadd.f32 %v9617_v19, %v14315_v15  ;;  %v6851_v1 = vpop.f32.mrb[91].mxu0  ;;  %v7629_v19 = vld [vmem:[%s14710_s29 + $0x10] sm:$0xff] }
0x1c07   : > { %v6882_v24 = vadd.f32 %v6851_v1, %v14320_v36  ;;  %v7630_v1 = vld [vmem:[%s14710_s29 + $0x18] sm:$0xff] }
0x1c08   : > { %v6899_v59 = vadd.f32 %v8364_v17, %v6883_v23 }
0x1c09   : > { %v6898_v18 = vadd.f32 %v8364_v17, %v6882_v24  ;;  %v9620_v32 = vpop.f32.mrb[92].mxu0  ;;  %v10295_v24 = vpack.c.bf16 %v7630_v1, %v7629_v19 }
0x1c0a   : > { %v6885_v52 = vadd.f32 %v9620_v32, %v14323_v31  ;;  %v6861_v39 = vpop.f32.mrb[93].mxu0 }
0x1c0b   : > { %v10199_v29 = vpack.c.bf16 %v6899_v59, %v6898_v18  ;;  %v6884_v2 = vadd.f32 %v6861_v39, %v14328_v51  ;;  %v6992_v51 = vld [vmem:[#allocation22 + $0x10] sm:$0xff]  ;;  %v7632_v18 = vld [vmem:[%s14710_s29 + $0x28] sm:$0xff] }
0x1c0c   : > { %v6901_v48 = vadd.f32 %v8364_v17, %v6885_v52  ;;  %v7631_v59 = vld [vmem:[%s14710_s29 + $0x20] sm:$0xff] }
0x1c0d   : > { %v6900_v28 = vadd.f32 %v8364_v17, %v6884_v2  ;;  %v9623_v37 = vpop.f32.mrb[94].mxu0  ;;  %10200 = vmatprep.subr.bf16.mxu1 %v10199_v29  ;;  %v10299_v32 = vpack.c.bf16 %v7632_v18, %v7631_v59 }
0x1c0e   : > { %v6887_v47 = vadd.f32 %v9623_v37, %v14333_v4  ;;  %v6871_v27 = vpop.f32.mrb[95].mxu0  ;;  %10202 = vmatpush3.bf16.msra.mxu1 %v10199_v29  ;;  %v6993_v4 = vld [vmem:[#allocation22 + $0x18] sm:$0xff] }
0x1c0f   : > { %v10203_v15 = vpack.c.bf16 %v6901_v48, %v6900_v28  ;;  %v6886_v36 = vadd.f32 %v6871_v27, %v14337_v45  ;;  %v7243_v45 = vld [vmem:[#allocation22 + $0x20] sm:$0xff] }
0x1c10   : > { %v6903_v30 = vadd.f32 %v8364_v17, %v6887_v47  ;;  %v7633_v27 = vld [vmem:[%s14710_s29 + $0x30] sm:$0xff] }
0x1c11   : > { %v6902_v13 = vadd.f32 %v8364_v17, %v6886_v36  ;;  %10204 = vmatprep.subr.bf16.mxu1 %v10203_v15  ;;  %v10287_v17 = vpack.c.bf16 %v7502_v34, %v7501_v33 }
0x1c12   : > { %10206 = vmatpush3.bf16.msra.mxu1 %v10203_v15 }
0x1c13   : > { %v10207_v31 = vpack.c.bf16 %v6903_v30, %v6902_v13  ;;  %v7635_v30 = vld [vmem:[%s14710_s29 + $0x40] sm:$0xff]  ;;  %v7636_v13 = vld [vmem:[%s14710_s29 + $0x48] sm:$0xff] }
0x1c15   : > { %10208 = vmatprep.subr.bf16.mxu1 %v10207_v31 }
0x1c16   : > { %10210 = vmatpush3.bf16.msra.mxu1 %v10207_v31 }
0x1c17   : > { %10212 = vmatprep.subr.bf16.mxu1 %v10195_v41 }
0x1c19   : > { %9641 = vmatmul.mubr.msk.f32.vlgmr.msra.gmra.mrb[96].mxu1 %vm1305_vm3, %v6905_v46  ;;  %v10307_v46 = vpack.c.bf16 %v7636_v13, %v7635_v30 }
0x1c1a   : > { %10214 = vmatpush3.bf16.msra.mxu1 %v10195_v41  ;;  %9659 = vmatprep.mubr.msk.f32.mxu1 %vm1305_vm3, %v6992_v51  ;;  %v7638_v51 = vld [vmem:[%s14710_s29 + $0x58] sm:$0xff] }
0x1c1b   : > { %10216 = vmatprep.subr.bf16.mxu1 %v10199_v29 }
0x1c1e   : > { %10218 = vmatpush3.bf16.msra.mxu1 %v10199_v29 }
0x1c1f   : > { %10220 = vmatprep.subr.bf16.mxu1 %v10203_v15 }
0x1c22   : > { %10222 = vmatpush3.bf16.msra.mxu1 %v10203_v15 }
0x1c23   : > { %10224 = vmatprep.subr.bf16.mxu1 %v10207_v31 }
0x1c26   : > { %10226 = vmatpush3.bf16.msra.mxu1 %v10207_v31 }
0x1c27   : > { %10244 = vmatprep.subr.bf16.mxu1 %v10195_v41 }
0x1c29   : > { %9660 = vmatmul.mubr.msk.f32.vlgmr.msra.gmra.mrb[98].mxu1 %vm1305_vm3, %v6993_v4 }
0x1c2a   : > { %10246 = vmatpush3.bf16.msra.mxu1 %v10195_v41  ;;  %9700 = vmatprep.mubr.msk.f32.mxu1 %vm1305_vm3, %v7243_v45  ;;  %v7639_v45 = vld [vmem:[%s14710_s29 + $0x60] sm:$0xff] }
0x1c2b   : > { %10248 = vmatprep.subr.bf16.mxu1 %v10199_v29 }
0x1c2e   : > { %10250 = vmatpush3.bf16.msra.mxu1 %v10199_v29 }
0x1c2f   : > { %10252 = vmatprep.subr.bf16.mxu1 %v10203_v15 }
0x1c32   : > { %10254 = vmatpush3.bf16.msra.mxu1 %v10203_v15 }
0x1c33   : > { %10256 = vmatprep.subr.bf16.mxu1 %v10207_v31 }
0x1c36   : > { %10258 = vmatpush3.bf16.msra.mxu1 %v10207_v31 }
0x1c37   : > { %10268 = vmatprep.subr.bf16.mxu1 %v10195_v41 }
0x1c39   : > { %9701 = vmatmul.mubr.msk.f32.vlgmr.msra.gmra.mrb[100].mxu1 %vm1305_vm3, %v7244_v53  ;;  %v7640_v53 = vld [vmem:[%s14710_s29 + $0x68] sm:$0xff] }
0x1c3a   : > { %10270 = vmatpush3.bf16.msra.mxu1 %v10195_v41  ;;  %9730 = vmatprep.mubr.msk.f32.mxu1 %vm1305_vm3, %v7415_v35  ;;  %v7628_v41 = vld [vmem:[%s14710_s29 + $0x8] sm:$0xff]  ;;  %v10315_v35 = vpack.c.bf16 %v7640_v53, %v7639_v45 }
0x1c3b   : > { %10272 = vmatprep.subr.bf16.mxu1 %v10199_v29  ;;  %v10291_v23 = vpack.c.bf16 %v7628_v41, %v7627_v9 }
0x1c3e   : > { %10274 = vmatpush3.bf16.msra.mxu1 %v10199_v29 }
0x1c3f   : > { %10276 = vmatprep.subr.bf16.mxu1 %v10203_v15 }
0x1c42   : > { %10278 = vmatpush3.bf16.msra.mxu1 %v10203_v15  ;;  %v7634_v15 = vld [vmem:[%s14710_s29 + $0x38] sm:$0xff] }
0x1c43   : > { %10280 = vmatprep.subr.bf16.mxu1 %v10207_v31  ;;  %v10303_v36 = vpack.c.bf16 %v7634_v15, %v7633_v27 }
0x1c46   : > { %10282 = vmatpush3.bf16.msra.mxu1 %v10207_v31  ;;  %v7637_v31 = vld [vmem:[%s14710_s29 + $0x50] sm:$0xff] }
0x1c47   : > { %v10311_v4 = vpack.c.bf16 %v7638_v51, %v7637_v31 }
0x1c49   : > { %9731 = vmatmul.mubr.msk.f32.vlgmr.msra.gmra.mrb[102].mxu1 %vm1305_vm3, %v7416_v60  ;;  %v7641_v60 = vld [vmem:[%s14710_s29 + $0x70] sm:$0xff] }
0x1c4a   : > { %v10319_v43 = vpack.c.bf16 %v7642_v16, %v7641_v60 }
0x1cec   : > { %v9642_v7 = vpop.f32.mrb[96].mxu1 }
0x1ced   : > { %v6978_v50 = vpop.f32.mrb[97].mxu1 }
0x1cfc   : > { %v9661_v22 = vpop.f32.mrb[98].mxu1 }
0x1cfd   : > { %v7066_v25 = vpop.f32.mrb[99].mxu1 }
0x1cfe   : > { %9670 = vmatprep.mubr.msk.f32.mxu0 %vm845_vm0, %v7066_v25 }
0x1cff   : > { %9671 = vmatmul.mubr.msk.f32.vlgmr.msra.gmra.mrb[96].mxu0 %vm845_vm0, %v9661_v22  ;;  %v8382_v22 = vld [vmem:[#allocation26] ss:$0 sm:$0xff] }
0x1d00   : > { %10238 = vmatpush3.bf16.msra.mxu0 %v10235_v0  ;;  %9681 = vmatprep.mubr.msk.f32.mxu0 %vm845_vm0, %v6978_v50 }
0x1d01   : > { %10240 = vmatprep.subr.bf16.mxu0 %v10239_v14 }
0x1d04   : > { %10242 = vmatpush3.bf16.msra.mxu0 %v10239_v14 }
0x1d05   : > { %10260 = vmatprep.subr.bf16.mxu0 %v10259_v12 }
0x1d07   : > { %9682 = vmatmul.mubr.msk.f32.vlgmr.msra.gmra.mrb[96].mxu0 %vm845_vm0, %v9642_v7  ;;  %v8381_v7 = vld [vmem:[#allocation25] ss:$0 sm:$0xff] }
0x1d08   : > { %10262 = vmatpush3.bf16.msra.mxu0 %v10259_v12 }
0x1d09   : > { %10264 = vmatprep.subr.bf16.mxu0 %v10263_v56 }
0x1d0c   : > { %v9702_v57 = vpop.f32.mrb[100].mxu1  ;;  %10266 = vmatpush3.bf16.msra.mxu0 %v10263_v56 }
0x1d0d   : > { %v7317_v11 = vpop.f32.mrb[101].mxu1  ;;  %10284 = vmatprep.subr.bf16.mxu0 %v10283_v61 }
0x1d0e   : > { %9711 = vmatprep.mubr.msk.f32.mxu0 %vm845_vm0, %v7317_v11 }
0x1d0f   : > { %9712 = vmatmul.mubr.msk.f32.vlgmr.msra.gmra.mrb[96].mxu0 %vm845_vm0, %v9702_v57 }
0x1d10   : > { %10286 = vmatpush3.bf16.msra.mxu0 %v10283_v61 }
0x1d11   : > { %10288 = vmatprep.subr.bf16.mxu0 %v10287_v17 }
0x1d14   : > { %10290 = vmatpush3.bf16.msra.mxu0 %v10287_v17 }
0x1d15   : > { %10292 = vmatprep.subr.bf16.mxu0 %v10291_v23 }
0x1d1c   : > { %v9732_v26 = vpop.f32.mrb[102].mxu1 }
0x1d1d   : > { %v7489_v40 = vpop.f32.mrb[103].mxu1 }
0x1d1e   : > { %9741 = vmatprep.mubr.msk.f32.mxu0 %vm845_vm0, %v7489_v40 }
0x1d1f   : > { %9742 = vmatmul.mubr.msk.f32.vlgmr.msra.gmra.mrb[96].mxu0 %vm845_vm0, %v9732_v26 }
0x1d20   : > { %10294 = vmatpush3.bf16.msra.mxu0 %v10291_v23 }
0x1d21   : > { %10296 = vmatprep.subr.bf16.mxu0 %v10295_v24 }
0x1d24   : > { %10298 = vmatpush3.bf16.msra.mxu0 %v10295_v24 }
0x1d25   : > { %10300 = vmatprep.subr.bf16.mxu0 %v10299_v32 }
0x1d28   : > { %10302 = vmatpush3.bf16.msra.mxu0 %v10299_v32 }
0x1d29   : > { %10304 = vmatprep.subr.bf16.mxu0 %v10303_v36 }
0x1d2c   : > { %10306 = vmatpush3.bf16.msra.mxu0 %v10303_v36 }
0x1d2d   : > { %10308 = vmatprep.subr.bf16.mxu0 %v10307_v46 }
0x1d30   : > { %10310 = vmatpush3.bf16.msra.mxu0 %v10307_v46 }
0x1d31   : > { %10312 = vmatprep.subr.bf16.mxu0 %v10311_v4 }
0x1d34   : > { %10314 = vmatpush3.bf16.msra.mxu0 %v10311_v4 }
0x1d35   : > { %10316 = vmatprep.subr.bf16.mxu0 %v10315_v35 }
0x1d38   : > { %10318 = vmatpush3.bf16.msra.mxu0 %v10315_v35 }
0x1d39   : > { %10320 = vmatprep.subr.bf16.mxu0 %v10319_v43 }
0x1d3c   : > { %10322 = vmatpush3.bf16.msra.mxu0 %v10319_v43 }
0x1df2   : > { %v9743_v5 = vpop.f32.mrb[96].mxu0 }
0x1df3   : > { %7590 = vadd.xlane.f32.xlu1 %v9743_v5  ;;  %v7575_v8 = vpop.f32.mrb[97].mxu0 }
0x1df4   : > { %7588 = vadd.xlane.f32.xlu0 %v7575_v8 }
0x1e80   : > { %v7591_v52 = vpop.xlane.xlu1 %7590 }
0x1e81   : > { %v7594_v39 = vmul.f32 0.0078125, %v7591_v52  ;;  %v7589_v29 = vpop.xlane.xlu0 %7588 }
0x1e82   : > { %v7593_v2 = vmul.f32 0.0078125, %v7589_v29 }
0x1e83   : > { %v7596_v48 = vsub.f32 %v9743_v5, %v7594_v39 }
0x1e84   : > { %v7595_v28 = vsub.f32 %v7575_v8, %v7593_v2 }
0x1e85   : > { %v7598_v37 = vmul.f32 %v7596_v48, %v7596_v48 }
0x1e86   : > { %v7597_v47 = vmul.f32 %v7595_v28, %v7595_v28 }
0x1e87   : > { %7601 = vadd.xlane.f32.xlu1 %v7598_v37 }
0x1e88   : > { %7599 = vadd.xlane.f32.xlu0 %v7597_v47 }
0x1f14   : > { %v7602_v62 = vpop.xlane.xlu1 %7601 }
0x1f15   : > { %v7604_v42 = vmul.f32 0.0078125, %v7602_v62  ;;  %v7600_v10 = vpop.xlane.xlu0 %7599 }
0x1f16   : > { %v7603_v38 = vmul.f32 0.0078125, %v7600_v10 }
0x1f17   : > { %v7606_v55 = vadd.f32 1e-05, %v7604_v42 }
0x1f18   : > { %v7605_v63 = vadd.f32 1e-05, %v7603_v38 }
0x1f19   : > { %11263 = vrsqrt.f32 %v7606_v55 }
0x1f1a   : > { %11265 = vrsqrt.f32 %v7605_v63 }
0x1f23   : > { %v11264_v0 = vpop.eup %11263 }
0x1f24   : > { %v11266_v50 = vpop.eup %11265  ;;  %v7610_v6 = vmul.f32 %v11264_v0, %v7596_v48 }
0x1f25   : > { %v7609_v3 = vmul.f32 %v11266_v50, %v7595_v28 }
0x1f26   : > { %v7618_v25 = vmul.f32 %v8381_v7, %v7610_v6 }
0x1f27   : > { %v7617_v14 = vmul.f32 %v8381_v7, %v7609_v3 }
0x1f28   : > { %v7626_v44 = vadd.f32 %v8382_v22, %v7618_v25 }
0x1f29   : > { %v7625_v20 = vadd.f32 %v8382_v22, %v7617_v14 }
0x1f2b   : > { %9776 = vmatprep.mubr.f32.mxu0 %v7625_v20 }
0x1f2c   : > { %9777 = vmatmul.mubr.f32.vlgmr.msra.gmra.mrb[98].mxu0 %v7626_v44 }
0x1fff   : > { %v9778_v12 = vpop.f32.mrb[98].mxu0 }
0x2000   : > { %7719 = vst.msk [vmem:[%s834_s2 + $0x8] sm:$0xff] %vm1305_vm3, %v9778_v12  ;;  %v7709_v54 = vpop.f32.mrb[99].mxu0 }
0x2001   : > { %7718 = vst.msk [vmem:[%s834_s2] sm:$0xff] %vm1305_vm3, %v7709_v54 }
0x2002   : > { %11738 = shalt.err (!%p11735_p1)
}
0x2003   : > { %s11739_s2 = scalar_lea.hbm %s14534_s27, 256  ;;  %s11743_s30 = scalar_lea.hbm %s14711_s24, 512 }
0x2004   : > { %p11740_p11 = scmp.ne.s32.totalorder %s14534_s27, %s11739_s2  ;;  %p11744_p8 = scmp.lt.u32.totalorder %s14534_s27, %s14711_s24 }
0x2005   : > { %p11745_p6 = scmp.lt.u32.totalorder %s11743_s30, %s11739_s2  ;;  %p11747_p4 = scmp.lt.u32.totalorder %s11739_s2, %s14534_s27 }
0x2006   : > { %p11741_p12 = pnand %p11740_p11, %p14712_p3 }
0x2007   : > { %p11746_p9 = por %p11745_p6, %p11744_p8 }
0x2008   : > { %p11742_p13 = pneg %p11741_p12 }
0x2009   : > { %p11748_p0 = por %p11747_p4, %p11746_p9 }
0x200b   : > { %p11749_p5 = pnand %p11748_p0, %p11742_p13 }
0x200d   : > { %11752 = shalt.err (!%p11749_p5)
}
0x200e   : > { %s11857_s5 = smov 128   ;;  %s11858_s12 = smov 8  }
0x200f   : > { %10439 = dma.vmem_to_hbm [thread:$0]  (%p14712_p3), %s14529_s0, 256, %s14534_s27, %s7721_s4, %s11857_s5, %s11857_s5, %s11858_s12  }
0x2010 PF: > { %s14713_s26 = sld [smem:[#allocation39_spill]]  ;;  %p14714_p2 = scmp.ne.s32.totalorder %s14674_s23, 0 }
0x2011   : > { %p14715_p7 = scmp.ge.s32.totalorder %s11823_s21, 2 }
0x2013   : > { %p10492_p10 = pnand %p14715_p7, %p14714_p2 }
0x2016   : > { %s7749_s28 = sand.u32 1, %s14713_s26  }
0x2017   : > { %s7750_s2 = scalar_lea.sflag [#allocation4], %s7749_s28 }
0x2018   : > { %11806 = dma.done.wait (!%p10492_p10), %s7750_s2, 256  }
0x2019   : > { %11808 = vsyncadd (!%p10492_p10), %s7750_s2, 4294967040  ;;  %s14716_s0 = sld [smem:[#allocation40_spill]]  ;;  %s14717_s30 = sld [smem:[#allocation41_spill]] }
0x201a   : > { %p40_p1 = scmp.ge.s32.totalorder %s12332_s3, 4   ;;  %s14718_s21 = smov %s12332_s3 }
0x201c   :  { %42 = sbr.rel (!%p40_p1) target bundleno = 25 (0x19), region = 226 }
0x2023   :  { %7755 = vsyncpa [#allocation3], 1 }
0x2024   :  { %7757 = vsyncpa [#allocation3 + $0x1], 1 }
0x2025   :  { %7758 = vsyncpa [#allocation6], 1 }
0x2026   :  { %7759 = vsyncpa [#allocation9], 1 }
0x2027   :  { %7760 = vsyncpa [#allocation12], 1 }
0x2028   :  { %7761 = vsyncpa [#allocation15], 1 }
0x2029   :  { %7762 = vsyncpa [#allocation18], 1 }
0x202a   :  { %7763 = vsyncpa [#allocation21], 1 }
0x202b   :  { %7764 = vsyncpa [#allocation24], 1 }
0x202c   :  { %7765 = vsyncpa [#allocation27], 1 }
0x202d   :  { %7766 = vsyncpa [#allocation4], 1 }
0x202e   :  { %7768 = vsyncpa [#allocation4 + $0x1], 1 }

</bundles_post_ra>
